<compile_context>
chip_gen: v6e
topology: v6e:2x2x1
jax: 0.10.0
libtpu: 0.0.40
codegen_flags: <defaults>
</compile_context>

<pallas_src>
import functools
import inspect

import jax
import jax.numpy as jnp
from jax.experimental import pallas as pl
from jax.experimental.pallas import tpu as pltpu

BN_EPS = 1e-5
C_HIDDEN = 1280          # Classify's fixed intermediate width (10 * 128)


# --------------------------------------------------------------------------
# Helpers
# --------------------------------------------------------------------------
def _single_buffered_kwargs():
    """pipeline_mode=pl.Buffered(1) for grid-invariant operands (constant
    index_map -> no need for double buffers).  Feature-detected so the code
    still runs (just double-buffers) on older jax."""
    try:
        if hasattr(pl, "Buffered") and \
                "pipeline_mode" in inspect.signature(pl.BlockSpec).parameters:
            return {"pipeline_mode": pl.Buffered(1)}
    except Exception:
        pass
    return {}


def _default_vmem_limit_bytes():
    mib = 1024 * 1024
    try:
        cap = getattr(pltpu.get_tpu_info(), "vmem_capacity_bytes", 64 * mib)
    except Exception:
        cap = 64 * mib
    # v5e / v6e: 128 MiB physical -> generous budget; v7x: 64 MiB -> ~48 MiB.
    return 96 * mib if cap >= 128 * mib else 48 * mib


def _spatial_tile_cap(vmem_limit, c1, c_, x_itemsize):
    """Largest spatial tile (rows of H*W) that fits the VMEM budget."""
    resident = c_ * c1 * 4 + c_ * 4                  # folded weight (f32 worst case) + bias
    headroom = 4 * 1024 * 1024                       # acc/output/misc + compiler slack
    per_row = 2 * c1 * x_itemsize + 3 * c_ * 4       # double-buffered x tile + f32 act temps
    cap = (vmem_limit - resident - headroom) // per_row
    return int(max(128, min(cap, 4096)))


def _choose_spatial_tile(hw, cap):
    """Pick tm (lane dim of the x block).  Returns (tm, needs_mask)."""
    if hw <= cap:
        return hw, False                              # full-extent block: always legal
    t = (cap // 128) * 128
    while t >= 128:
        if hw % t == 0:
            return t, False                           # lane-aligned divisor, no masking
        t -= 128
    # No lane-aligned divisor under the cap: use a padded last tile + in-kernel mask
    return (cap // 128) * 128, True


# --------------------------------------------------------------------------
# Fused kernel: 1x1 conv (BN folded) + bias + SiLU + global-avg-pool partial sums
# --------------------------------------------------------------------------
def _conv_silu_pool_kernel(x_ref, w1t_ref, b1_ref, o_ref, acc_ref, *,
                           hw, tm, tiles_per_split, needs_mask, mxu_dtype):
    si = pl.program_id(2)

    @pl.when(si == 0)
    def _():
        acc_ref[...] = jnp.zeros_like(acc_ref)

    # x block: (1, c1, tm) in its native dtype; cast to the MXU dtype here
    # (no extra HBM pass on the host side).
    x = x_ref[0].astype(mxu_dtype)                             # (c1, tm)
    # 1x1 conv (BN scale folded into w1t): (c_, c1) @ (c1, tm) -> (c_, tm).
    # LHS has 1280 rows, so the MXU stays full even for small spatial tiles.
    y = jnp.dot(w1t_ref[...], x, preferred_element_type=jnp.float32)
    y = y + b1_ref[...]                                        # BN bias (c_, 1)
    y = y * jax.nn.sigmoid(y)                                  # SiLU (EUP)
    if needs_mask:
        # Last (padded) tile: zero out columns past H*W before pooling.
        start = (pl.program_id(1) * tiles_per_split + si) * tm
        lane = jax.lax.broadcasted_iota(jnp.int32, (1, tm), 1)
        y = jnp.where(start + lane < hw, y, 0.0)
    # Partial global-average-pool: accumulate the spatial sum (lane reduce, XLU).
    acc_ref[...] += jnp.sum(y, axis=1, keepdims=True)          # (c_, 1)

    @pl.when(si == pl.num_programs(2) - 1)
    def _():
        o_ref[0, 0] = acc_ref[...].astype(o_ref.dtype)         # pooled SUM (c_, 1)


# --------------------------------------------------------------------------
# Forward wrapper
# --------------------------------------------------------------------------
def classify_forward(params, x, *, compute_dtype=jnp.bfloat16, tm=None,
                     vmem_limit_bytes=None, spatial_splits=None):
    """Classify forward.

    x: NCHW (N, c1, H, W) array, or a list of such arrays (concatenated along
    channels, matching the PyTorch branch).  x is consumed in its native
    layout and dtype — no host-side transpose / cast pass over the activation.
    `compute_dtype` is the MXU operand dtype (bf16 default; accumulation and
    epilogue stay f32)."""
    if isinstance(x, (list, tuple)):
        x = jnp.concatenate(x, axis=1)
    n, c1, h, w = x.shape
    hw = h * w
    x3 = x.reshape(n, c1, hw)                         # contiguous reshape: free

    w1t = params["w1t"].astype(compute_dtype)         # (c_, c1), BN scale folded
    b1 = params["b1"].astype(jnp.float32)             # (c_, 1)  BN bias
    c_ = w1t.shape[0]

    if vmem_limit_bytes is None:
        vmem_limit_bytes = _default_vmem_limit_bytes()
    if tm is None:
        cap = _spatial_tile_cap(vmem_limit_bytes, c1, c_, x3.dtype.itemsize)
        tm, needs_mask = _choose_spatial_tile(hw, cap)
    else:
        assert tm == hw or tm % 128 == 0, "tm must be a multiple of 128 or == H*W"
        needs_mask = (hw % tm != 0)

    n_tiles = pl.cdiv(hw, tm)
    # Spatial split keeps both v7x TensorCores busy for batch-1 inference
    # (v5e/v6e have 1 TC; the extra size-1/2 "parallel" axis is harmless).
    if spatial_splits is None:
        spatial_splits = 2 if (n == 1 and n_tiles % 2 == 0 and n_tiles >= 2) else 1
    if spatial_splits < 1 or n_tiles % spatial_splits != 0:
        spatial_splits = 1
    tiles_per_split = n_tiles // spatial_splits

    kernel = functools.partial(
        _conv_silu_pool_kernel, hw=hw, tm=tm, tiles_per_split=tiles_per_split,
        needs_mask=needs_mask, mxu_dtype=compute_dtype)

    inv = _single_buffered_kwargs()                   # single-buffer invariant operands

    pooled_parts = pl.pallas_call(
        kernel,
        out_shape=jax.ShapeDtypeStruct((n, spatial_splits, c_, 1), jnp.float32),
        grid_spec=pltpu.PrefetchScalarGridSpec(
            num_scalar_prefetch=0,
            grid=(n, spatial_splits, tiles_per_split),
            in_specs=[
                pl.BlockSpec((1, c1, tm),
                             lambda b, so, si: (b, 0, so * tiles_per_split + si)),
                pl.BlockSpec((c_, c1), lambda b, so, si: (0, 0), **inv),
                pl.BlockSpec((c_, 1), lambda b, so, si: (0, 0), **inv),
            ],
            out_specs=pl.BlockSpec((1, 1, c_, 1),
                                   lambda b, so, si: (b, so, 0, 0)),
            scratch_shapes=[pltpu.VMEM((c_, 1), jnp.float32)],
        ),
        compiler_params=pltpu.CompilerParams(
            dimension_semantics=("parallel", "parallel", "arbitrary"),
            vmem_limit_bytes=int(vmem_limit_bytes),
        ),
    )(x3, w1t, b1)

    # Combine spatial-split partial sums, convert sum -> mean.
    pooled = pooled_parts[..., 0].sum(axis=1) * (1.0 / float(hw))   # (n, c_) f32
    # Dropout(p=0.0) == identity.  Final Linear as a tiny batched XLA matmul
    # (keeps w2/b2 out of VMEM and fills MXU rows across the batch).
    return pooled @ params["w2"] + params["b2"]


# --------------------------------------------------------------------------
# Parameter construction (deterministic, synthetic) with BN folding
# --------------------------------------------------------------------------
def make_classify_params(key, c1, c2, c_=C_HIDDEN):
    kw, kg, kb, km, kv, kl, klb = jax.random.split(key, 7)
    w_conv = 0.1 * jax.random.normal(kw, (c1, c_), jnp.float32)     # 1x1 conv
    gamma = 1.0 + 0.1 * jax.random.normal(kg, (c_,), jnp.float32)
    beta = 0.1 * jax.random.normal(kb, (c_,), jnp.float32)
    mean = 0.1 * jax.random.normal(km, (c_,), jnp.float32)
    var = 1.0 + 0.2 * jax.random.uniform(kv, (c_,), jnp.float32)
    scale = gamma / jnp.sqrt(var + BN_EPS)
    bias = beta - mean * scale
    # Fold BN: bn(conv(x)) = (x @ w)*scale + bias = x @ (w*scale) + bias
    w1 = w_conv * scale[None, :]
    w_lin = 0.05 * jax.random.normal(kl, (c_, c2), jnp.float32)
    b_lin = 0.05 * jax.random.normal(klb, (c2,), jnp.float32)
    return {
        "w1t": jnp.asarray(w1.T),          # (c_, c1) — kernel layout (LHS of MXU)
        "b1": bias[:, None],               # (c_, 1)
        "w2": w_lin, "b2": b_lin[None, :],
        # un-folded pieces kept only for the pure-JAX reference
        "w_conv": w_conv, "bn_scale": scale, "bn_bias": bias,
    }


# --------------------------------------------------------------------------
# Pure-JAX reference (validates the Pallas implementation)
# --------------------------------------------------------------------------
def classify_reference(params, x):
    if isinstance(x, (list, tuple)):
        x = jnp.concatenate(x, axis=1)
    x_nhwc = jnp.transpose(x, (0, 2, 3, 1))
    y = jnp.einsum("nhwc,cd->nhwd", x_nhwc, params["w_conv"])
    y = y * params["bn_scale"] + params["bn_bias"]
    y = y * jax.nn.sigmoid(y)                       # SiLU
    pooled = jnp.mean(y, axis=(1, 2))               # AdaptiveAvgPool2d(1)+flatten
    return pooled @ params["w2"] + params["b2"]     # Dropout(p=0)=id, Linear


# --------------------------------------------------------------------------
# TODO(synk): general k>1 / stride>1 / grouped conv not implemented
#             (Classify defaults to k=1, s=1, g=1, which is what is used).
# --------------------------------------------------------------------------
if __name__ == "__main__":
    B, C1, H, W = 2, 16, 16, 16
    C2 = 32                                          # num classes

    key = jax.random.PRNGKey(0)
    kx, kp = jax.random.split(key)
    x = jax.random.normal(kx, (B, C1, H, W), jnp.float32)   # NCHW like PyTorch
    params = make_classify_params(kp, C1, C2)

    ref = jax.block_until_ready(classify_reference(params, x))

    # 1) Default bf16 MXU path.
    out_bf16 = jax.block_until_ready(jax.jit(classify_forward)(params, x))
    assert out_bf16.shape == (B, C2), out_bf16.shape
    err_bf16 = float(jnp.max(jnp.abs(out_bf16 - ref)))
    assert jnp.allclose(out_bf16, ref, atol=4e-2, rtol=4e-2), err_bf16

    # 2) f32 MXU path (tight tolerance).
    f32_fwd = jax.jit(functools.partial(classify_forward, compute_dtype=jnp.float32))
    out_f32 = jax.block_until_ready(f32_fwd(params, x))
    err_f32 = float(jnp.max(jnp.abs(out_f32 - ref)))
    assert jnp.allclose(out_f32, ref, atol=5e-3, rtol=5e-3), err_f32

    # 3) Batch-1 with a forced 128-row tile -> exercises the 2-way spatial
    #    split (both v7x TensorCores) and the partial-sum combination path.
    split_fwd = jax.jit(functools.partial(classify_forward, tm=128))
    out_1 = jax.block_until_ready(split_fwd(params, x[:1]))
    ref_1 = classify_reference(params, x[:1])
    err_1 = float(jnp.max(jnp.abs(out_1 - ref_1)))
    assert jnp.allclose(out_1, ref_1, atol=4e-2, rtol=4e-2), err_1

    print("KERNEL_OK")
</pallas_src>

<mosaic_0001>
module attributes {stable_mosaic.version = 11 : i64} {
  func.func @_conv_silu_pool_kernel(%arg0: i32, %arg1: i32, %arg2: i32, %arg3: memref<1x16x256xf32, #tpu.memory_space<vmem>>, %arg4: memref<1280x16xbf16, #tpu.memory_space<vmem>>, %arg5: memref<1280x1xf32, #tpu.memory_space<vmem>>, %arg6: memref<1x1x1280x1xf32, #tpu.memory_space<vmem>>, %arg7: memref<1280x1xf32, #tpu.memory_space<vmem>>) attributes {dimension_semantics = [#tpu.dimension_semantics<parallel>, #tpu.dimension_semantics<parallel>, #tpu.dimension_semantics<arbitrary>], iteration_bounds = array<i64: 2, 1, 1>, scalar_prefetch = 0 : i64, scratch_operands = 1 : i64, tpu.core_type = #tpu.core_type<tc>, window_params = [{transform_indices = @transform_0, window_bounds = array<i64: 1, 16, 256>}, {pipeline_mode = #tpu.pipeline_mode<synchronous>, transform_indices = @transform_1, window_bounds = array<i64: 1280, 16>}, {pipeline_mode = #tpu.pipeline_mode<synchronous>, transform_indices = @transform_2, window_bounds = array<i64: 1280, 1>}, {transform_indices = @transform_3, window_bounds = array<i64: 1, 1, 1280, 1>}]} {
    %c0_i32 = arith.constant 0 : i32
    %0 = arith.cmpi eq, %arg2, %c0_i32 : i32
    %1 = arith.extui %0 : i1 to i32
    %c0_i32_0 = arith.constant 0 : i32
    %2 = arith.cmpi ne, %1, %c0_i32_0 : i32
    scf.if %2 {
      %cst_15 = arith.constant 0.000000e+00 : f32
      %25 = vector.broadcast %cst_15 : f32 to vector<1280x1xf32>
      %c0_16 = arith.constant 0 : index
      %c0_17 = arith.constant 0 : index
      %26 = vector.load %arg7[%c0_16, %c0_17] : memref<1280x1xf32, #tpu.memory_space<vmem>>, vector<1280x1xf32>
      tpu.vector_store %arg7[%c0_16, %c0_17], %25 {strides = array<i32>} : memref<1280x1xf32, #tpu.memory_space<vmem>>, vector<1280x1xf32>,
    } else {
    }
    %c0 = arith.constant 0 : index
    %c0_1 = arith.constant 0 : index
    %c0_2 = arith.constant 0 : index
    %3 = vector.load %arg3[%c0, %c0_1, %c0_2] : memref<1x16x256xf32, #tpu.memory_space<vmem>>, vector<1x16x256xf32>
    %4 = vector.shape_cast %3 : vector<1x16x256xf32> to vector<16x256xf32>
    %5 = arith.truncf %4 : vector<16x256xf32> to vector<16x256xbf16>
    %c0_3 = arith.constant 0 : index
    %c0_4 = arith.constant 0 : index
    %6 = vector.load %arg4[%c0_3, %c0_4] : memref<1280x16xbf16, #tpu.memory_space<vmem>>, vector<1280x16xbf16>
    %cst = arith.constant dense<0.000000e+00> : vector<1280x256xf32>
    %7 = tpu.matmul %6, %5, %cst {dimension_numbers = #tpu.dot_dimension_numbers<[1], [0], [0], [1], [0, 0, 1, 1], [], []>} : vector<1280x16xbf16>, vector<16x256xbf16>, vector<1280x256xf32> -> vector<1280x256xf32>
    %c0_5 = arith.constant 0 : index
    %c0_6 = arith.constant 0 : index
    %8 = vector.load %arg5[%c0_5, %c0_6] : memref<1280x1xf32, #tpu.memory_space<vmem>>, vector<1280x1xf32>
    %9 = vector.broadcast %8 : vector<1280x1xf32> to vector<1280x256xf32>
    %10 = arith.addf %7, %9 : vector<1280x256xf32>
    %11 = arith.negf %10 : vector<1280x256xf32>
    %12 = math.exp %11 : vector<1280x256xf32>
    %cst_7 = arith.constant 1.000000e+00 : f32
    %13 = vector.broadcast %cst_7 : f32 to vector<1280x256xf32>
    %14 = arith.addf %13, %12 : vector<1280x256xf32>
    %15 = arith.divf %13, %14 : vector<1280x256xf32>
    %16 = arith.mulf %10, %15 : vector<1280x256xf32>
    %c0_8 = arith.constant 0 : index
    %c0_9 = arith.constant 0 : index
    %17 = vector.load %arg7[%c0_8, %c0_9] : memref<1280x1xf32, #tpu.memory_space<vmem>>, vector<1280x1xf32>
    %cst_10 = arith.constant dense<0.000000e+00> : vector<1280xf32>
    %18 = vector.multi_reduction <add>, %16, %cst_10 [1] : vector<1280x256xf32> to vector<1280xf32>
    %19 = vector.shape_cast %18 : vector<1280xf32> to vector<1280x1xf32>
    %20 = arith.addf %17, %19 : vector<1280x1xf32>
    %c0_11 = arith.constant 0 : index
    %c0_12 = arith.constant 0 : index
    %21 = vector.load %arg7[%c0_11, %c0_12] : memref<1280x1xf32, #tpu.memory_space<vmem>>, vector<1280x1xf32>
    tpu.vector_store %arg7[%c0_11, %c0_12], %20 {strides = array<i32>} : memref<1280x1xf32, #tpu.memory_space<vmem>>, vector<1280x1xf32>,
    %c0_i32_13 = arith.constant 0 : i32
    %22 = arith.cmpi eq, %arg2, %c0_i32_13 : i32
    %23 = arith.extui %22 : i1 to i32
    %c0_i32_14 = arith.constant 0 : i32
    %24 = arith.cmpi ne, %23, %c0_i32_14 : i32
    scf.if %24 {
      %c0_15 = arith.constant 0 : index
      %c0_16 = arith.constant 0 : index
      %25 = vector.load %arg7[%c0_15, %c0_16] : memref<1280x1xf32, #tpu.memory_space<vmem>>, vector<1280x1xf32>
      %c0_17 = arith.constant 0 : index
      %c0_18 = arith.constant 0 : index
      %c0_19 = arith.constant 0 : index
      %c0_20 = arith.constant 0 : index
      %26 = vector.load %arg6[%c0_17, %c0_18, %c0_19, %c0_20] : memref<1x1x1280x1xf32, #tpu.memory_space<vmem>>, vector<1x1x1280x1xf32>
      %27 = vector.shape_cast %26 : vector<1x1x1280x1xf32> to vector<1280x1xf32>
      %28 = vector.shape_cast %25 : vector<1280x1xf32> to vector<1x1x1280x1xf32>
      tpu.vector_store %arg6[%c0_17, %c0_18, %c0_19, %c0_20], %28 {strides = array<i32>} : memref<1x1x1280x1xf32, #tpu.memory_space<vmem>>, vector<1x1x1280x1xf32>,
    } else {
    }
    return
  }
  func.func @transform_0(%arg0: i32, %arg1: i32, %arg2: i32) -> (i32, i32, i32) {
    %c1_i32 = arith.constant 1 : i32
    %0 = arith.muli %arg1, %c1_i32 : i32
    %1 = arith.addi %0, %arg2 : i32
    %c0_i32 = arith.constant 0 : i32
    %c0_i32_0 = arith.constant 0 : i32
    return %arg0, %c0_i32, %1 : i32, i32, i32
  }
  func.func @transform_1(%arg0: i32, %arg1: i32, %arg2: i32) -> (i32, i32) {
    %c0_i32 = arith.constant 0 : i32
    %c0_i32_0 = arith.constant 0 : i32
    %c0_i32_1 = arith.constant 0 : i32
    return %c0_i32, %c0_i32_0 : i32, i32
  }
  func.func @transform_2(%arg0: i32, %arg1: i32, %arg2: i32) -> (i32, i32) {
    %c0_i32 = arith.constant 0 : i32
    %c0_i32_0 = arith.constant 0 : i32
    %c0_i32_1 = arith.constant 0 : i32
    return %c0_i32, %c0_i32_0 : i32, i32
  }
  func.func @transform_3(%arg0: i32, %arg1: i32, %arg2: i32) -> (i32, i32, i32, i32) {
    %c0_i32 = arith.constant 0 : i32
    %c0_i32_0 = arith.constant 0 : i32
    %c0_i32_1 = arith.constant 0 : i32
    return %arg0, %arg1, %c0_i32, %c0_i32_0 : i32, i32, i32, i32
  }
}

</mosaic_0001>

<bundles_post_ra>
// kernel: classify_forward.1
= control target key start
LH: loop header
LB: loop body
LE: loop exit
PB: predicated region body
PF: predicated region fallthrough
CT: control target
= control target key end

     0   :  { %s8533_s12 = smov 0   ;;  %s8535_s13 = smov 0   ;;  %s13403_s0 = inlined_call_operand.vmem [shape: f32[2,16,256], index: 0, kind: input, shape index: {}]   ;;  %s13404_s1 = inlined_call_operand.vmem [shape: bf16[1280,16], index: 1, kind: input, shape index: {}]   ;;  %s13405_s2 = inlined_call_operand.vmem [shape: f32[1280,1], index: 2, kind: input, shape index: {}]   ;;  %s13406_s3 = inlined_call_operand.vmem [shape: f32[2,1,1280,1], index: 3, kind: output, shape index: {}]  }
   0x1   :  { %s8537_s14 = smov 0  }
   0x2 LB: > { %s32_s15 = sadd.s32 1, %s8505_s13  ;;  %p6609_p0 = scmp.ge.s32.totalorder %s8509_s14, 1  ;;  %s8509_s14 = sphi %s8537_s14, %s13_s14   ;;  %s8505_s13 = sphi %s8535_s13, %s14354_s13   ;;  %s8501_s12 = sphi %s8533_s12, %s14353_s12  }
   0x3   : > { %p34_p1 = scmp.ge.s32.totalorder %s32_s15, 2  ;;  %p169_p2 = scmp.lt.s32.totalorder %s8509_s14, 3 }
   0x5   : > { %s14356_s15 = smov (%p34_p1, %s32_s15), 0  ;;  %p170_p3 = pnand %p6609_p0, %p169_p2 }
   0x7   : > { %173 = sbr.rel (%p170_p3) target bundleno = 1216 (0x4c0), region = 32 }
   0xc   : > { %v557_v0 = vld [vmem:[%s13405_s2 + $0x10] sm:$0xff]  ;;  %v555_v1 = vld [vmem:[%s13405_s2] sm:$0xff]  ;;  %p204_p4 = scmp.lt.s32.totalorder %s8501_s12, 1  ;;  %v13407_v2 = vmov 0   ;;  %v558_v3 = vld [vmem:[%s13405_s2 + $0x18] sm:$0xff]  ;;  %vm1915_vm0 = vcmask 130048  }
   0xd   : > { %7126 = vset.pattern.permute.xlu1 %v13407_v2  ;;  %7125 = vset.pattern.permute.xlu0 %v13407_v2  ;;  %v556_v4 = vld [vmem:[%s13405_s2 + $0x8] sm:$0xff]  ;;  %v559_v10 = vld [vmem:[%s13405_s2 + $0x20] sm:$0xff]  ;;  %v562_v15 = vld [vmem:[%s13405_s2 + $0x38] sm:$0xff]  ;;  %vm228_vm1 = vcmask 7168  }
   0xe   : > { %727 = vperm.xlu1 %7126, %v557_v0   ;;  %717 = vperm.xlu0 %7125, %v555_v1   ;;  %s14358_s12 = smov (!%p204_p4, %s8501_s12), 1  ;;  %v560_v5 = vld [vmem:[%s13405_s2 + $0x28] sm:$0xff]  ;;  %v7127_v13 = vld [vmem:[%s13404_s1] sm:$0xff]   ;;  %v561_v16 = vld [vmem:[%s13405_s2 + $0x30] sm:$0xff] }
   0xf   : > { %2188 = vmatprep.mubr.bf16.mxu0 %v13407_v2  ;;  %2588 = vmatprep.mubr.bf16.mxu1 %v13407_v2  ;;  %s7095_s24 = sshll.u32 %s14358_s12, 5  ;;  %v7128_v14 = vld [vmem:[%s13404_s1 + $0x140] sm:$0xff]   ;;  %v564_v17 = vld [vmem:[%s13405_s2 + $0x48] sm:$0xff]  ;;  %v566_v21 = vld [vmem:[%s13405_s2 + $0x58] sm:$0xff]  ;;  %s7098_s17 = smul.u32 1280, %s14358_s12 }
  0x10   : > { %s211_s27 = scalar_lea.vmem %s13403_s0, %s7095_s24  ;;  %v563_v18 = vld [vmem:[%s13405_s2 + $0x40] sm:$0xff]  ;;  %v7129_v19 = vld [vmem:[%s13404_s1 + $0x8] sm:$0xff]   ;;  %v565_v22 = vld [vmem:[%s13405_s2 + $0x50] sm:$0xff] }
  0x11   : > { %v390_v6 = vld [vmem:[%s211_s27 + $0x8] sm:$0xff]  ;;  %v392_v7 = vld [vmem:[%s211_s27 + $0x18] sm:$0xff]  ;;  %v389_v8 = vld [vmem:[%s211_s27] sm:$0xff]  ;;  %s11904_s19 = scalar_lea.vmem %s13406_s3, %s7098_s17 }
  0x12   : > { %732 = vperm.xlu1 %7126, %v558_v3   ;;  %722 = vperm.xlu0 %7125, %v556_v4   ;;  %v394_v9 = vpack.c.bf16 %v392_v7, %v390_v6  ;;  %v391_v11 = vld [vmem:[%s211_s27 + $0x10] sm:$0xff]  ;;  %v7130_v20 = vld [vmem:[%s13404_s1 + $0x148] sm:$0xff]   ;;  %v567_v24 = vld [vmem:[%s13405_s2 + $0x60] sm:$0xff] }
  0x13   : > { %v393_v12 = vpack.c.bf16 %v391_v11, %v389_v8  ;;  %v568_v23 = vld [vmem:[%s13405_s2 + $0x68] sm:$0xff]  ;;  %v7131_v25 = vld [vmem:[%s13404_s1 + $0x10] sm:$0xff]   ;;  %v570_v27 = vld [vmem:[%s13405_s2 + $0x78] sm:$0xff] }
  0x14   : > { %2170 = vmatprep.subr.bf16.mxu0 %v394_v9  ;;  %7096 = vmatprep.subr.bf16.mxu1 %v394_v9  ;;  %v7132_v26 = vld [vmem:[%s13404_s1 + $0x150] sm:$0xff]   ;;  %v572_v29 = vld [vmem:[%s13405_s2 + $0x88] sm:$0xff]  ;;  %v571_v30 = vld [vmem:[%s13405_s2 + $0x80] sm:$0xff] }
  0x15   : > { %2171 = vmatpush1.bf16.msra.mxu0 %v393_v12  ;;  %7097 = vmatpush1.bf16.msra.mxu1 %v393_v12  ;;  %v569_v28 = vld [vmem:[%s13405_s2 + $0x70] sm:$0xff]  ;;  %v7133_v31 = vld [vmem:[%s13404_s1 + $0x18] sm:$0xff]   ;;  %v576_v35 = vld [vmem:[%s13405_s2 + $0xa8] sm:$0xff] }
  0x16   : > { %742 = vperm.xlu1 %7126, %v560_v5   ;;  %737 = vperm.xlu0 %7125, %v559_v10   ;;  %v7134_v32 = vld [vmem:[%s13404_s1 + $0x158] sm:$0xff]   ;;  %v573_v34 = vld [vmem:[%s13405_s2 + $0x90] sm:$0xff]  ;;  %v575_v36 = vld [vmem:[%s13405_s2 + $0xa0] sm:$0xff] }
  0x17   : > { %v574_v33 = vld [vmem:[%s13405_s2 + $0x98] sm:$0xff]  ;;  %v7135_v37 = vld [vmem:[%s13404_s1 + $0x20] sm:$0xff]   ;;  %v577_v40 = vld [vmem:[%s13405_s2 + $0xb0] sm:$0xff] }
  0x18   : > { %6693 = vmatmul.mubr.msk.bf16.vlgmr.msra.gmra.mxu0 %vm1915_vm0, %v7127_v13  ;;  %6733 = vmatmul.mubr.msk.bf16.vlgmr.msra.gmra.mxu1 %vm1915_vm0, %v7128_v14  ;;  %v7136_v38 = vld [vmem:[%s13404_s1 + $0x160] sm:$0xff]   ;;  %v578_v39 = vld [vmem:[%s13405_s2 + $0xb8] sm:$0xff]  ;;  %v580_v41 = vld [vmem:[%s13405_s2 + $0xc8] sm:$0xff] }
  0x19   : > { %2198 = vmatprep.mubr.bf16.mxu0 %v13407_v2  ;;  %2598 = vmatprep.mubr.bf16.mxu1 %v13407_v2  ;;  %v579_v42 = vld [vmem:[%s13405_s2 + $0xc0] sm:$0xff]  ;;  %v7137_v43 = vld [vmem:[%s13404_s1 + $0x28] sm:$0xff]   ;;  %v582_v45 = vld [vmem:[%s13405_s2 + $0xd8] sm:$0xff] }
  0x1a   : > { %752 = vperm.xlu1 %7126, %v562_v15   ;;  %747 = vperm.xlu0 %7125, %v561_v16   ;;  %v7138_v44 = vld [vmem:[%s13404_s1 + $0x168] sm:$0xff]   ;;  %v581_v46 = vld [vmem:[%s13405_s2 + $0xd0] sm:$0xff]  ;;  %v583_v48 = vld [vmem:[%s13405_s2 + $0xe0] sm:$0xff] }
  0x1b   : > { %v584_v47 = vld [vmem:[%s13405_s2 + $0xe8] sm:$0xff]  ;;  %v7139_v49 = vld [vmem:[%s13404_s1 + $0x30] sm:$0xff]   ;;  %v586_v51 = vld [vmem:[%s13405_s2 + $0xf8] sm:$0xff] }
  0x1c   : > { %v7140_v50 = vld [vmem:[%s13404_s1 + $0x170] sm:$0xff]   ;;  %v588_v53 = vld [vmem:[%s13405_s2 + $0x108] sm:$0xff]  ;;  %v587_v54 = vld [vmem:[%s13405_s2 + $0x100] sm:$0xff] }
  0x1d   : > { %v585_v52 = vld [vmem:[%s13405_s2 + $0xf0] sm:$0xff]  ;;  %v7141_v55 = vld [vmem:[%s13404_s1 + $0x38] sm:$0xff]   ;;  %v592_v59 = vld [vmem:[%s13405_s2 + $0x128] sm:$0xff] }
  0x1e   : > { %762 = vperm.xlu1 %7126, %v564_v17   ;;  %757 = vperm.xlu0 %7125, %v563_v18   ;;  %v7142_v56 = vld [vmem:[%s13404_s1 + $0x178] sm:$0xff]   ;;  %v589_v58 = vld [vmem:[%s13405_s2 + $0x110] sm:$0xff]  ;;  %v591_v60 = vld [vmem:[%s13405_s2 + $0x120] sm:$0xff] }
  0x1f   : > { %v590_v57 = vld [vmem:[%s13405_s2 + $0x118] sm:$0xff]  ;;  %v7143_v61 = vld [vmem:[%s13404_s1 + $0x40] sm:$0xff]   ;;  %v593_v0 = vld [vmem:[%s13405_s2 + $0x130] sm:$0xff] }
  0x20   : > { %6694 = vmatmul.mubr.msk.bf16.gmra.mxu0 %vm1915_vm0, %v7129_v19  ;;  %6734 = vmatmul.mubr.msk.bf16.gmra.mxu1 %vm1915_vm0, %v7130_v20  ;;  %v7144_v62 = vld [vmem:[%s13404_s1 + $0x180] sm:$0xff]   ;;  %v594_v63 = vld [vmem:[%s13405_s2 + $0x138] sm:$0xff]  ;;  %v596_v1 = vld [vmem:[%s13405_s2 + $0x148] sm:$0xff] }
  0x21   : > { %2208 = vmatprep.mubr.bf16.mxu0 %v13407_v2  ;;  %2608 = vmatprep.mubr.bf16.mxu1 %v13407_v2  ;;  %v595_v3 = vld [vmem:[%s13405_s2 + $0x140] sm:$0xff]  ;;  %v7145_v4 = vld [vmem:[%s13404_s1 + $0x48] sm:$0xff]   ;;  %v598_v6 = vld [vmem:[%s13405_s2 + $0x158] sm:$0xff] }
  0x22   : > { %772 = vperm.xlu1 %7126, %v566_v21   ;;  %767 = vperm.xlu0 %7125, %v565_v22   ;;  %v7146_v5 = vld [vmem:[%s13404_s1 + $0x188] sm:$0xff]   ;;  %v597_v7 = vld [vmem:[%s13405_s2 + $0x150] sm:$0xff]  ;;  %v599_v9 = vld [vmem:[%s13405_s2 + $0x160] sm:$0xff] }
  0x23   : > { %v600_v8 = vld [vmem:[%s13405_s2 + $0x168] sm:$0xff]  ;;  %v7147_v10 = vld [vmem:[%s13404_s1 + $0x50] sm:$0xff]   ;;  %v602_v12 = vld [vmem:[%s13405_s2 + $0x178] sm:$0xff] }
  0x24   : > { %v7148_v11 = vld [vmem:[%s13404_s1 + $0x190] sm:$0xff]   ;;  %v604_v14 = vld [vmem:[%s13405_s2 + $0x188] sm:$0xff]  ;;  %v603_v15 = vld [vmem:[%s13405_s2 + $0x180] sm:$0xff] }
  0x25   : > { %v601_v13 = vld [vmem:[%s13405_s2 + $0x170] sm:$0xff]  ;;  %v7149_v16 = vld [vmem:[%s13404_s1 + $0x58] sm:$0xff]   ;;  %v608_v20 = vld [vmem:[%s13405_s2 + $0x1a8] sm:$0xff] }
  0x26   : > { %782 = vperm.xlu1 %7126, %v568_v23   ;;  %777 = vperm.xlu0 %7125, %v567_v24   ;;  %v7150_v17 = vld [vmem:[%s13404_s1 + $0x198] sm:$0xff]   ;;  %v605_v19 = vld [vmem:[%s13405_s2 + $0x190] sm:$0xff]  ;;  %v607_v21 = vld [vmem:[%s13405_s2 + $0x1a0] sm:$0xff] }
  0x27   : > { %v606_v18 = vld [vmem:[%s13405_s2 + $0x198] sm:$0xff]  ;;  %v7151_v22 = vld [vmem:[%s13404_s1 + $0x60] sm:$0xff]  }
  0x28   : > { %6695 = vmatmul.mubr.msk.bf16.gmra.mxu0 %vm1915_vm0, %v7131_v25  ;;  %6735 = vmatmul.mubr.msk.bf16.gmra.mxu1 %vm1915_vm0, %v7132_v26  ;;  %v7152_v23 = vld [vmem:[%s13404_s1 + $0x1a0] sm:$0xff]   ;;  %v610_v24 = vld [vmem:[%s13405_s2 + $0x1b8] sm:$0xff]  ;;  %v609_v25 = vld [vmem:[%s13405_s2 + $0x1b0] sm:$0xff] }
  0x29   : > { %2218 = vmatprep.mubr.bf16.mxu0 %v13407_v2  ;;  %2618 = vmatprep.mubr.bf16.mxu1 %v13407_v2  ;;  %v612_v26 = vld [vmem:[%s13405_s2 + $0x1c8] sm:$0xff] }
  0x2a   : > { %792 = vperm.xlu1 %7126, %v570_v27   ;;  %787 = vperm.xlu0 %7125, %v569_v28   ;;  %v611_v27 = vld [vmem:[%s13405_s2 + $0x1c0] sm:$0xff]  ;;  %v7153_v28 = vld [vmem:[%s13404_s1 + $0x68] sm:$0xff]  }
  0x2e   : > { %802 = vperm.xlu1 %7126, %v572_v29   ;;  %797 = vperm.xlu0 %7125, %v571_v30   ;;  %v7154_v29 = vld [vmem:[%s13404_s1 + $0x1a8] sm:$0xff]   ;;  %v614_v30 = vld [vmem:[%s13405_s2 + $0x1d8] sm:$0xff] }
  0x30   : > { %6696 = vmatmul.mubr.msk.bf16.gmra.mxu0 %vm1915_vm0, %v7133_v31  ;;  %6736 = vmatmul.mubr.msk.bf16.gmra.mxu1 %vm1915_vm0, %v7134_v32  ;;  %v613_v31 = vld [vmem:[%s13405_s2 + $0x1d0] sm:$0xff]  ;;  %v616_v32 = vld [vmem:[%s13405_s2 + $0x1e8] sm:$0xff] }
  0x31   : > { %2228 = vmatprep.mubr.bf16.mxu0 %v13407_v2  ;;  %2628 = vmatprep.mubr.bf16.mxu1 %v13407_v2 }
  0x32   : > { %812 = vperm.xlu1 %7126, %v574_v33   ;;  %807 = vperm.xlu0 %7125, %v573_v34   ;;  %v615_v33 = vld [vmem:[%s13405_s2 + $0x1e0] sm:$0xff]  ;;  %v7155_v34 = vld [vmem:[%s13404_s1 + $0x70] sm:$0xff]  }
  0x36   : > { %822 = vperm.xlu1 %7126, %v576_v35   ;;  %817 = vperm.xlu0 %7125, %v575_v36   ;;  %v7156_v35 = vld [vmem:[%s13404_s1 + $0x1b0] sm:$0xff]   ;;  %v618_v36 = vld [vmem:[%s13405_s2 + $0x1f8] sm:$0xff] }
  0x38   : > { %6697 = vmatmul.mubr.msk.bf16.gmra.mxu0 %vm1915_vm0, %v7135_v37  ;;  %6737 = vmatmul.mubr.msk.bf16.gmra.mxu1 %vm1915_vm0, %v7136_v38  ;;  %v617_v37 = vld [vmem:[%s13405_s2 + $0x1f0] sm:$0xff] }
  0x39   : > { %2238 = vmatprep.mubr.bf16.mxu0 %v13407_v2  ;;  %2638 = vmatprep.mubr.bf16.mxu1 %v13407_v2 }
  0x3a   : > { %832 = vperm.xlu1 %7126, %v578_v39   ;;  %827 = vperm.xlu0 %7125, %v577_v40   ;;  %v620_v40 = vld [vmem:[%s13405_s2 + $0x208] sm:$0xff] }
  0x3e   : > { %842 = vperm.xlu1 %7126, %v580_v41   ;;  %837 = vperm.xlu0 %7125, %v579_v42   ;;  %v619_v41 = vld [vmem:[%s13405_s2 + $0x200] sm:$0xff] }
  0x40   : > { %6698 = vmatmul.mubr.msk.bf16.gmra.mxu0 %vm1915_vm0, %v7137_v43  ;;  %6738 = vmatmul.mubr.msk.bf16.gmra.mxu1 %vm1915_vm0, %v7138_v44  ;;  %v7157_v44 = vld [vmem:[%s13404_s1 + $0x78] sm:$0xff]  }
  0x41   : > { %2248 = vmatprep.mubr.bf16.mxu0 %v13407_v2  ;;  %2648 = vmatprep.mubr.bf16.mxu1 %v13407_v2 }
  0x42   : > { %852 = vperm.xlu1 %7126, %v582_v45   ;;  %847 = vperm.xlu0 %7125, %v581_v46   ;;  %v7158_v45 = vld [vmem:[%s13404_s1 + $0x1b8] sm:$0xff]  }
  0x43   : > { %v622_v46 = vld [vmem:[%s13405_s2 + $0x218] sm:$0xff] }
  0x46   : > { %862 = vperm.xlu1 %7126, %v584_v47   ;;  %857 = vperm.xlu0 %7125, %v583_v48   ;;  %v621_v47 = vld [vmem:[%s13405_s2 + $0x210] sm:$0xff] }
  0x48   : > { %6699 = vmatmul.mubr.msk.bf16.gmra.mxu0 %vm1915_vm0, %v7139_v49  ;;  %6739 = vmatmul.mubr.msk.bf16.gmra.mxu1 %vm1915_vm0, %v7140_v50  ;;  %v624_v50 = vld [vmem:[%s13405_s2 + $0x228] sm:$0xff] }
  0x49   : > { %2258 = vmatprep.mubr.bf16.mxu0 %v13407_v2  ;;  %2658 = vmatprep.mubr.bf16.mxu1 %v13407_v2 }
  0x4a   : > { %872 = vperm.xlu1 %7126, %v586_v51   ;;  %867 = vperm.xlu0 %7125, %v585_v52   ;;  %v623_v51 = vld [vmem:[%s13405_s2 + $0x220] sm:$0xff] }
  0x4e   : > { %882 = vperm.xlu1 %7126, %v588_v53   ;;  %877 = vperm.xlu0 %7125, %v587_v54   ;;  %v7159_v54 = vld [vmem:[%s13404_s1 + $0x80] sm:$0xff]  }
  0x50   : > { %6700 = vmatmul.mubr.msk.bf16.gmra.mxu0 %vm1915_vm0, %v7141_v55  ;;  %6740 = vmatmul.mubr.msk.bf16.gmra.mxu1 %vm1915_vm0, %v7142_v56  ;;  %v7160_v55 = vld [vmem:[%s13404_s1 + $0x1c0] sm:$0xff]   ;;  %v626_v56 = vld [vmem:[%s13405_s2 + $0x238] sm:$0xff] }
  0x51   : > { %2268 = vmatprep.mubr.bf16.mxu0 %v13407_v2  ;;  %2668 = vmatprep.mubr.bf16.mxu1 %v13407_v2 }
  0x52   : > { %892 = vperm.xlu1 %7126, %v590_v57   ;;  %887 = vperm.xlu0 %7125, %v589_v58   ;;  %v625_v57 = vld [vmem:[%s13405_s2 + $0x230] sm:$0xff] }
  0x56   : > { %902 = vperm.xlu1 %7126, %v592_v59   ;;  %897 = vperm.xlu0 %7125, %v591_v60   ;;  %v628_v60 = vld [vmem:[%s13405_s2 + $0x248] sm:$0xff] }
  0x58   : > { %6701 = vmatmul.mubr.msk.bf16.gmra.mxu0 %vm1915_vm0, %v7143_v61  ;;  %6741 = vmatmul.mubr.msk.bf16.gmra.mxu1 %vm1915_vm0, %v7144_v62  ;;  %v627_v61 = vld [vmem:[%s13405_s2 + $0x240] sm:$0xff] }
  0x59   : > { %2278 = vmatprep.mubr.bf16.mxu0 %v13407_v2  ;;  %2678 = vmatprep.mubr.bf16.mxu1 %v13407_v2 }
  0x5a   : > { %912 = vperm.xlu1 %7126, %v594_v63   ;;  %907 = vperm.xlu0 %7125, %v593_v0   ;;  %v7161_v0 = vld [vmem:[%s13404_s1 + $0x88] sm:$0xff]  }
  0x5e   : > { %922 = vperm.xlu1 %7126, %v596_v1   ;;  %917 = vperm.xlu0 %7125, %v595_v3   ;;  %v7162_v1 = vld [vmem:[%s13404_s1 + $0x1c8] sm:$0xff]   ;;  %v630_v3 = vld [vmem:[%s13405_s2 + $0x258] sm:$0xff] }
  0x60   : > { %6702 = vmatmul.mubr.msk.bf16.gmra.mxu0 %vm1915_vm0, %v7145_v4  ;;  %6742 = vmatmul.mubr.msk.bf16.gmra.mxu1 %vm1915_vm0, %v7146_v5  ;;  %v629_v4 = vld [vmem:[%s13405_s2 + $0x250] sm:$0xff] }
  0x61   : > { %2288 = vmatprep.mubr.bf16.mxu0 %v13407_v2  ;;  %2688 = vmatprep.mubr.bf16.mxu1 %v13407_v2 }
  0x62   : > { %932 = vperm.xlu1 %7126, %v598_v6   ;;  %927 = vperm.xlu0 %7125, %v597_v7   ;;  %v632_v7 = vld [vmem:[%s13405_s2 + $0x268] sm:$0xff] }
  0x66   : > { %942 = vperm.xlu1 %7126, %v600_v8   ;;  %937 = vperm.xlu0 %7125, %v599_v9   ;;  %v631_v8 = vld [vmem:[%s13405_s2 + $0x260] sm:$0xff] }
  0x68   : > { %6703 = vmatmul.mubr.msk.bf16.gmra.mxu0 %vm1915_vm0, %v7147_v10  ;;  %6743 = vmatmul.mubr.msk.bf16.gmra.mxu1 %vm1915_vm0, %v7148_v11  ;;  %v7163_v11 = vld [vmem:[%s13404_s1 + $0x90] sm:$0xff]  }
  0x69   : > { %2298 = vmatprep.mubr.bf16.mxu0 %v13407_v2  ;;  %2698 = vmatprep.mubr.bf16.mxu1 %v13407_v2 }
  0x6a   : > { %952 = vperm.xlu1 %7126, %v602_v12   ;;  %947 = vperm.xlu0 %7125, %v601_v13   ;;  %v7164_v12 = vld [vmem:[%s13404_s1 + $0x1d0] sm:$0xff]   ;;  %v634_v13 = vld [vmem:[%s13405_s2 + $0x278] sm:$0xff] }
  0x6e   : > { %962 = vperm.xlu1 %7126, %v604_v14   ;;  %957 = vperm.xlu0 %7125, %v603_v15   ;;  %v633_v14 = vld [vmem:[%s13405_s2 + $0x270] sm:$0xff] }
  0x70   : > { %6704 = vmatmul.mubr.msk.bf16.gmra.mxu0 %vm1915_vm0, %v7149_v16  ;;  %6744 = vmatmul.mubr.msk.bf16.gmra.mxu1 %vm1915_vm0, %v7150_v17  ;;  %v636_v17 = vld [vmem:[%s13405_s2 + $0x288] sm:$0xff] }
  0x71   : > { %2308 = vmatprep.mubr.bf16.mxu0 %v13407_v2  ;;  %2708 = vmatprep.mubr.bf16.mxu1 %v13407_v2 }
  0x72   : > { %972 = vperm.xlu1 %7126, %v606_v18   ;;  %967 = vperm.xlu0 %7125, %v605_v19   ;;  %v635_v18 = vld [vmem:[%s13405_s2 + $0x280] sm:$0xff] }
  0x76   : > { %982 = vperm.xlu1 %7126, %v608_v20   ;;  %977 = vperm.xlu0 %7125, %v607_v21   ;;  %v7165_v21 = vld [vmem:[%s13404_s1 + $0x98] sm:$0xff]  }
  0x78   : > { %6705 = vmatmul.mubr.msk.bf16.gmra.mxu0 %vm1915_vm0, %v7151_v22  ;;  %6745 = vmatmul.mubr.msk.bf16.gmra.mxu1 %vm1915_vm0, %v7152_v23  ;;  %v7166_v22 = vld [vmem:[%s13404_s1 + $0x1d8] sm:$0xff]  }
  0x79   : > { %2318 = vmatprep.mubr.bf16.mxu0 %v13407_v2  ;;  %2718 = vmatprep.mubr.bf16.mxu1 %v13407_v2  ;;  %v638_v23 = vld [vmem:[%s13405_s2 + $0x298] sm:$0xff] }
  0x7a   : > { %992 = vperm.xlu1 %7126, %v610_v24   ;;  %987 = vperm.xlu0 %7125, %v609_v25   ;;  %v637_v24 = vld [vmem:[%s13405_s2 + $0x290] sm:$0xff] }
  0x7e   : > { %1002 = vperm.xlu1 %7126, %v612_v26   ;;  %997 = vperm.xlu0 %7125, %v611_v27   ;;  %v640_v27 = vld [vmem:[%s13405_s2 + $0x2a8] sm:$0xff] }
  0x80   : > { %6706 = vmatmul.mubr.msk.bf16.gmra.mxu0 %vm1915_vm0, %v7153_v28  ;;  %6746 = vmatmul.mubr.msk.bf16.gmra.mxu1 %vm1915_vm0, %v7154_v29  ;;  %v639_v28 = vld [vmem:[%s13405_s2 + $0x2a0] sm:$0xff] }
  0x81   : > { %2328 = vmatprep.mubr.bf16.mxu0 %v13407_v2  ;;  %2728 = vmatprep.mubr.bf16.mxu1 %v13407_v2 }
  0x82   : > { %1012 = vperm.xlu1 %7126, %v614_v30   ;;  %1007 = vperm.xlu0 %7125, %v613_v31   ;;  %v7167_v31 = vld [vmem:[%s13404_s1 + $0xa0] sm:$0xff]  }
  0x86   : > { %1022 = vperm.xlu1 %7126, %v616_v32   ;;  %1017 = vperm.xlu0 %7125, %v615_v33   ;;  %v7168_v32 = vld [vmem:[%s13404_s1 + $0x1e0] sm:$0xff]   ;;  %v642_v33 = vld [vmem:[%s13405_s2 + $0x2b8] sm:$0xff] }
  0x88   : > { %6707 = vmatmul.mubr.msk.bf16.gmra.mxu0 %vm1915_vm0, %v7155_v34  ;;  %6747 = vmatmul.mubr.msk.bf16.gmra.mxu1 %vm1915_vm0, %v7156_v35  ;;  %v641_v34 = vld [vmem:[%s13405_s2 + $0x2b0] sm:$0xff] }
  0x89   : > { %v8899_v38 = vpop.permute.xlu1 %727  ;;  %v8901_v39 = vpop.permute.xlu0 %717  ;;  %2338 = vmatprep.mubr.bf16.mxu0 %v13407_v2  ;;  %2738 = vmatprep.mubr.bf16.mxu1 %v13407_v2 }
  0x8a   : > { %1032 = vperm.xlu1 %7126, %v618_v36   ;;  %1027 = vperm.xlu0 %7125, %v617_v37   ;;  %v644_v37 = vld [vmem:[%s13405_s2 + $0x2c8] sm:$0xff] }
  0x8d   : > { %v8913_v42 = vpop.permute.xlu1 %732  ;;  %v8915_v43 = vpop.permute.xlu0 %722 }
  0x8e   : > { %1042 = vperm.xlu1 %7126, %v620_v40   ;;  %1037 = vperm.xlu0 %7125, %v619_v41   ;;  %v643_v40 = vld [vmem:[%s13405_s2 + $0x2c0] sm:$0xff] }
  0x90   : > { %6708 = vmatmul.mubr.msk.bf16.gmra.mxu0 %vm1915_vm0, %v7157_v44  ;;  %6748 = vmatmul.mubr.msk.bf16.gmra.mxu1 %vm1915_vm0, %v7158_v45  ;;  %v7169_v45 = vld [vmem:[%s13404_s1 + $0xa8] sm:$0xff]  }
  0x91   : > { %v8929_v48 = vpop.permute.xlu1 %742  ;;  %v8931_v49 = vpop.permute.xlu0 %737  ;;  %2348 = vmatprep.mubr.bf16.mxu0 %v13407_v2  ;;  %2748 = vmatprep.mubr.bf16.mxu1 %v13407_v2 }
  0x92   : > { %1052 = vperm.xlu1 %7126, %v622_v46   ;;  %1047 = vperm.xlu0 %7125, %v621_v47   ;;  %v7170_v46 = vld [vmem:[%s13404_s1 + $0x1e8] sm:$0xff]   ;;  %v646_v47 = vld [vmem:[%s13405_s2 + $0x2d8] sm:$0xff] }
  0x95   : > { %v8943_v52 = vpop.permute.xlu1 %752  ;;  %v8945_v53 = vpop.permute.xlu0 %747 }
  0x96   : > { %1062 = vperm.xlu1 %7126, %v624_v50   ;;  %1057 = vperm.xlu0 %7125, %v623_v51   ;;  %v645_v50 = vld [vmem:[%s13405_s2 + $0x2d0] sm:$0xff] }
  0x98   : > { %6709 = vmatmul.mubr.msk.bf16.gmra.mxu0 %vm1915_vm0, %v7159_v54  ;;  %6749 = vmatmul.mubr.msk.bf16.gmra.mxu1 %vm1915_vm0, %v7160_v55  ;;  %v648_v55 = vld [vmem:[%s13405_s2 + $0x2e8] sm:$0xff] }
  0x99   : > { %v8959_v58 = vpop.permute.xlu1 %762  ;;  %v8961_v59 = vpop.permute.xlu0 %757  ;;  %2358 = vmatprep.mubr.bf16.mxu0 %v13407_v2  ;;  %2758 = vmatprep.mubr.bf16.mxu1 %v13407_v2 }
  0x9a   : > { %1072 = vperm.xlu1 %7126, %v626_v56   ;;  %1067 = vperm.xlu0 %7125, %v625_v57   ;;  %v647_v56 = vld [vmem:[%s13405_s2 + $0x2e0] sm:$0xff] }
  0x9d   : > { %v8973_v62 = vpop.permute.xlu1 %772  ;;  %v8975_v63 = vpop.permute.xlu0 %767 }
  0x9e   : > { %1082 = vperm.xlu1 %7126, %v628_v60   ;;  %1077 = vperm.xlu0 %7125, %v627_v61   ;;  %v7171_v61 = vld [vmem:[%s13404_s1 + $0xb0] sm:$0xff]  }
  0xa0   : > { %6710 = vmatmul.mubr.msk.bf16.gmra.mxu0 %vm1915_vm0, %v7161_v0  ;;  %6750 = vmatmul.mubr.msk.bf16.gmra.mxu1 %vm1915_vm0, %v7162_v1  ;;  %v7172_v0 = vld [vmem:[%s13404_s1 + $0x1f0] sm:$0xff]   ;;  %v650_v1 = vld [vmem:[%s13405_s2 + $0x2f8] sm:$0xff] }
  0xa1   : > { %v8989_v5 = vpop.permute.xlu1 %782  ;;  %v8991_v6 = vpop.permute.xlu0 %777  ;;  %2368 = vmatprep.mubr.bf16.mxu0 %v13407_v2  ;;  %2768 = vmatprep.mubr.bf16.mxu1 %v13407_v2 }
  0xa2   : > { %1092 = vperm.xlu1 %7126, %v630_v3   ;;  %1087 = vperm.xlu0 %7125, %v629_v4   ;;  %v649_v3 = vld [vmem:[%s13405_s2 + $0x2f0] sm:$0xff] }
  0xa5   : > { %v9003_v9 = vpop.permute.xlu1 %792  ;;  %v9005_v10 = vpop.permute.xlu0 %787 }
  0xa6   : > { %1102 = vperm.xlu1 %7126, %v632_v7   ;;  %1097 = vperm.xlu0 %7125, %v631_v8   ;;  %v652_v8 = vld [vmem:[%s13405_s2 + $0x308] sm:$0xff] }
  0xa8   : > { %6711 = vmatmul.mubr.msk.bf16.gmra.mxu0 %vm1915_vm0, %v7163_v11  ;;  %6751 = vmatmul.mubr.msk.bf16.gmra.mxu1 %vm1915_vm0, %v7164_v12  ;;  %v651_v11 = vld [vmem:[%s13405_s2 + $0x300] sm:$0xff] }
  0xa9   : > { %v9019_v15 = vpop.permute.xlu1 %802  ;;  %v9021_v16 = vpop.permute.xlu0 %797  ;;  %2378 = vmatprep.mubr.bf16.mxu0 %v13407_v2  ;;  %2778 = vmatprep.mubr.bf16.mxu1 %v13407_v2 }
  0xaa   : > { %1112 = vperm.xlu1 %7126, %v634_v13   ;;  %1107 = vperm.xlu0 %7125, %v633_v14   ;;  %v7173_v14 = vld [vmem:[%s13404_s1 + $0xb8] sm:$0xff]  }
  0xad   : > { %v9033_v19 = vpop.permute.xlu1 %812  ;;  %v9035_v20 = vpop.permute.xlu0 %807 }
  0xae   : > { %1122 = vperm.xlu1 %7126, %v636_v17   ;;  %1117 = vperm.xlu0 %7125, %v635_v18   ;;  %v7174_v17 = vld [vmem:[%s13404_s1 + $0x1f8] sm:$0xff]  }
  0xaf   : > { %v654_v18 = vld [vmem:[%s13405_s2 + $0x318] sm:$0xff] }
  0xb0   : > { %6712 = vmatmul.mubr.msk.bf16.gmra.mxu0 %vm1915_vm0, %v7165_v21  ;;  %6752 = vmatmul.mubr.msk.bf16.gmra.mxu1 %vm1915_vm0, %v7166_v22  ;;  %v653_v21 = vld [vmem:[%s13405_s2 + $0x310] sm:$0xff] }
  0xb1   : > { %v9049_v25 = vpop.permute.xlu1 %822  ;;  %v9051_v26 = vpop.permute.xlu0 %817  ;;  %2388 = vmatprep.mubr.bf16.mxu0 %v13407_v2  ;;  %2788 = vmatprep.mubr.bf16.mxu1 %v13407_v2 }
  0xb2   : > { %1132 = vperm.xlu1 %7126, %v638_v23   ;;  %1127 = vperm.xlu0 %7125, %v637_v24   ;;  %v656_v24 = vld [vmem:[%s13405_s2 + $0x328] sm:$0xff] }
  0xb5   : > { %v9063_v29 = vpop.permute.xlu1 %832  ;;  %v9065_v30 = vpop.permute.xlu0 %827 }
  0xb6   : > { %1142 = vperm.xlu1 %7126, %v640_v27   ;;  %1137 = vperm.xlu0 %7125, %v639_v28   ;;  %v655_v27 = vld [vmem:[%s13405_s2 + $0x320] sm:$0xff] }
  0xb8   : > { %6713 = vmatmul.mubr.msk.bf16.gmra.mxu0 %vm1915_vm0, %v7167_v31  ;;  %6753 = vmatmul.mubr.msk.bf16.gmra.mxu1 %vm1915_vm0, %v7168_v32  ;;  %v7175_v31 = vld [vmem:[%s13404_s1 + $0xc0] sm:$0xff]  }
  0xb9   : > { %v9079_v35 = vpop.permute.xlu1 %842  ;;  %v9081_v36 = vpop.permute.xlu0 %837  ;;  %2398 = vmatprep.mubr.bf16.mxu0 %v13407_v2  ;;  %2798 = vmatprep.mubr.bf16.mxu1 %v13407_v2  ;;  %v7176_v32 = vld [vmem:[%s13404_s1 + $0x200] sm:$0xff]  }
  0xba   : > { %13640 = vst [vmem:[#allocation3_spill] sm:$0xff] %v9079_v35  ;;  %13641 = vst [vmem:[#allocation4_spill] sm:$0xff] %v9081_v36  ;;  %1152 = vperm.xlu1 %7126, %v642_v33   ;;  %1147 = vperm.xlu0 %7125, %v641_v34   ;;  %v658_v33 = vld [vmem:[%s13405_s2 + $0x338] sm:$0xff]  ;;  %v657_v34 = vld [vmem:[%s13405_s2 + $0x330] sm:$0xff] }
  0xbd   : > { %v9093_v41 = vpop.permute.xlu1 %852  ;;  %v9095_v44 = vpop.permute.xlu0 %847 }
  0xbe   : > { %13642 = vst [vmem:[#allocation5_spill] sm:$0xff] %v9093_v41  ;;  %13643 = vst [vmem:[#allocation6_spill] sm:$0xff] %v9095_v44  ;;  %1162 = vperm.xlu1 %7126, %v644_v37   ;;  %1157 = vperm.xlu0 %7125, %v643_v40   ;;  %v685_v41 = vld [vmem:[%s13405_s2 + $0x410] sm:$0xff] }
  0xc0   : > { %6714 = vmatmul.mubr.msk.bf16.gmra.mxu0 %vm1915_vm0, %v7169_v45  ;;  %6754 = vmatmul.mubr.msk.bf16.gmra.mxu1 %vm1915_vm0, %v7170_v46 }
  0xc1   : > { %v9109_v51 = vpop.permute.xlu1 %862  ;;  %v9111_v54 = vpop.permute.xlu0 %857  ;;  %2408 = vmatprep.mubr.bf16.mxu0 %v13407_v2  ;;  %2808 = vmatprep.mubr.bf16.mxu1 %v13407_v2 }
  0xc2   : > { %13644 = vst [vmem:[#allocation7_spill] sm:$0xff] %v9109_v51  ;;  %13645 = vst [vmem:[#allocation8_spill] sm:$0xff] %v9111_v54  ;;  %1172 = vperm.xlu1 %7126, %v646_v47   ;;  %1167 = vperm.xlu0 %7125, %v645_v50   ;;  %v660_v47 = vld [vmem:[%s13405_s2 + $0x348] sm:$0xff]  ;;  %v659_v50 = vld [vmem:[%s13405_s2 + $0x340] sm:$0xff] }
  0xc5   : > { %v9123_v57 = vpop.permute.xlu1 %872  ;;  %v9125_v60 = vpop.permute.xlu0 %867 }
  0xc6   : > { %13646 = vst [vmem:[#allocation9_spill] sm:$0xff] %v9123_v57  ;;  %13647 = vst [vmem:[#allocation10_spill] sm:$0xff] %v9125_v60  ;;  %1182 = vperm.xlu1 %7126, %v648_v55   ;;  %1177 = vperm.xlu0 %7125, %v647_v56  }
  0xc8   : > { %6715 = vmatmul.mubr.msk.bf16.gmra.mxu0 %vm1915_vm0, %v7171_v61  ;;  %6755 = vmatmul.mubr.msk.bf16.gmra.mxu1 %vm1915_vm0, %v7172_v0 }
  0xc9   : > { %v9139_v4 = vpop.permute.xlu1 %882  ;;  %v9141_v7 = vpop.permute.xlu0 %877  ;;  %2418 = vmatprep.mubr.bf16.mxu0 %v13407_v2  ;;  %2818 = vmatprep.mubr.bf16.mxu1 %v13407_v2 }
  0xca   : > { %13648 = vst [vmem:[#allocation11_spill] sm:$0xff] %v9139_v4  ;;  %13649 = vst [vmem:[#allocation12_spill] sm:$0xff] %v9141_v7  ;;  %1192 = vperm.xlu1 %7126, %v650_v1   ;;  %1187 = vperm.xlu0 %7125, %v649_v3   ;;  %v7177_v3 = vld [vmem:[%s13404_s1 + $0xc8] sm:$0xff]  }
  0xcd   : > { %v9153_v12 = vpop.permute.xlu1 %892  ;;  %v9155_v13 = vpop.permute.xlu0 %887 }
  0xce   : > { %13650 = vst [vmem:[#allocation13_spill] sm:$0xff] %v9153_v12  ;;  %13651 = vst [vmem:[#allocation14_spill] sm:$0xff] %v9155_v13  ;;  %1202 = vperm.xlu1 %7126, %v652_v8   ;;  %1197 = vperm.xlu0 %7125, %v651_v11   ;;  %v7178_v8 = vld [vmem:[%s13404_s1 + $0x208] sm:$0xff]   ;;  %v677_v13 = vld [vmem:[%s13405_s2 + $0x3d0] sm:$0xff] }
  0xd0   : > { %6716 = vmatmul.mubr.msk.bf16.gmra.mxu0 %vm1915_vm0, %v7173_v14  ;;  %6756 = vmatmul.mubr.msk.bf16.gmra.mxu1 %vm1915_vm0, %v7174_v17 }
  0xd1   : > { %v9169_v22 = vpop.permute.xlu1 %902  ;;  %v9173_v23 = vpop.permute.xlu0 %897  ;;  %2428 = vmatprep.mubr.bf16.mxu0 %v13407_v2  ;;  %2828 = vmatprep.mubr.bf16.mxu1 %v13407_v2 }
  0xd2   : > { %13652 = vst [vmem:[#allocation15_spill] sm:$0xff] %v9169_v22  ;;  %1212 = vperm.xlu1 %7126, %v654_v18   ;;  %1207 = vperm.xlu0 %7125, %v653_v21   ;;  %13653 = vst [vmem:[#allocation16_spill] sm:$0xff] %v9173_v23  ;;  %v662_v18 = vld [vmem:[%s13405_s2 + $0x358] sm:$0xff]  ;;  %v661_v21 = vld [vmem:[%s13405_s2 + $0x350] sm:$0xff] }
  0xd5   : > { %v9183_v28 = vpop.permute.xlu1 %912  ;;  %v9197_v37 = vpop.permute.xlu0 %907 }
  0xd6   : > { %13654 = vst [vmem:[#allocation17_spill] sm:$0xff] %v9183_v28  ;;  %1222 = vperm.xlu1 %7126, %v656_v24   ;;  %1217 = vperm.xlu0 %7125, %v655_v27   ;;  %13655 = vst [vmem:[#allocation18_spill] sm:$0xff] %v9197_v37 }
  0xd8   : > { %6717 = vmatmul.mubr.msk.bf16.gmra.mxu0 %vm1915_vm0, %v7175_v31  ;;  %6757 = vmatmul.mubr.msk.bf16.gmra.mxu1 %vm1915_vm0, %v7176_v32  ;;  %v2190_v45 = vpop.f32.mrf.mxu0  ;;  %v9203_v46 = vpop.f32.mrf.mxu1 }
  0xd9   : > { %v9199_v40 = vpop.permute.xlu1 %922  ;;  %13657 = vst [vmem:[#allocation20_spill] sm:$0xff] %v9203_v46  ;;  %2438 = vmatprep.mubr.bf16.mxu0 %v13407_v2  ;;  %2838 = vmatprep.mubr.bf16.mxu1 %v13407_v2  ;;  %v9214_v55 = vadd.f32 %v2190_v45, %v8901_v39  ;;  %v9231_v17 = vpop.permute.xlu0 %917  ;;  %v664_v45 = vld [vmem:[%s13405_s2 + $0x368] sm:$0xff]  ;;  %v7181_v46 = vld [vmem:[%s13404_s1 + $0xd8] sm:$0xff]  }
  0xda   : > { %13656 = vst [vmem:[#allocation19_spill] sm:$0xff] %v9199_v40  ;;  %1232 = vperm.xlu1 %7126, %v658_v33   ;;  %1227 = vperm.xlu0 %7125, %v657_v34   ;;  %v2192_v56 = vpop.f32.mrf.mxu0  ;;  %v9216_v61 = vpop.f32.mrf.mxu1  ;;  %13661 = vst [vmem:[#allocation24_spill] sm:$0xff] %v9231_v17 }
  0xdb   : > { %13658 = vst [vmem:[#allocation21_spill] sm:$0xff] %v9216_v61  ;;  %v9219_v0 = vadd.f32 %v2192_v56, %v8901_v39  ;;  %v6773_v24 = vmul.f32 -1.442695, %v9214_v55 }
  0xdc   : > { %v2194_v11 = vpop.f32.mrf.mxu0  ;;  %v9229_v14 = vpop.f32.mrf.mxu1 }
  0xdd   : > { %v9221_v1 = vpop.permute.xlu1 %932  ;;  %13660 = vst [vmem:[#allocation23_spill] sm:$0xff] %v9229_v14  ;;  %v6774_v39 = vmul.f32 -1.442695, %v9219_v0 }
  0xde   : > { %13659 = vst [vmem:[#allocation22_spill] sm:$0xff] %v9221_v1  ;;  %1242 = vperm.xlu1 %7126, %v660_v47   ;;  %1237 = vperm.xlu0 %7125, %v659_v50   ;;  %v2196_v27 = vpop.f32.mrf.mxu0  ;;  %v9241_v31 = vpop.f32.mrf.mxu1  ;;  %v663_v47 = vld [vmem:[%s13405_s2 + $0x360] sm:$0xff] }
  0xdf   : > { %13662 = vst [vmem:[#allocation25_spill] sm:$0xff] %v9241_v31  ;;  %7207 = vpow2.f32 %v6774_v39  ;;  %v7180_v39 = vld [vmem:[%s13404_s1 + $0x210] sm:$0xff]   ;;  %v9283_v31 = vadd.f32 %v2194_v11, %v8915_v43  ;;  %v668_v11 = vld [vmem:[%s13405_s2 + $0x388] sm:$0xff] }
  0xe0   : > { %6718 = vmatmul.mubr.msk.bf16.gmra.mxu0 %vm1915_vm0, %v7177_v3  ;;  %6758 = vmatmul.mubr.msk.bf16.gmra.mxu1 %vm1915_vm0, %v7178_v8  ;;  %v2200_v33 = vpop.f32.mrf.mxu0  ;;  %v9247_v34 = vpop.f32.mrf.mxu1  ;;  %7209 = vpow2.f32 %v6773_v24  ;;  %v7179_v8 = vld [vmem:[%s13404_s1 + $0xd0] sm:$0xff]  }
  0xe1   : > { %v9243_v32 = vpop.permute.xlu1 %942  ;;  %13664 = vst [vmem:[#allocation27_spill] sm:$0xff] %v9247_v34  ;;  %2448 = vmatprep.mubr.bf16.mxu0 %v13407_v2  ;;  %2848 = vmatprep.mubr.bf16.mxu1 %v13407_v2  ;;  %v9259_v3 = vpop.permute.xlu0 %927  ;;  %v665_v34 = vld [vmem:[%s13405_s2 + $0x370] sm:$0xff] }
  0xe2   : > { %13663 = vst [vmem:[#allocation26_spill] sm:$0xff] %v9243_v32  ;;  %1252 = vperm.xlu1 %7126, %v662_v18   ;;  %1247 = vperm.xlu0 %7125, %v661_v21   ;;  %v2202_v50 = vpop.f32.mrf.mxu0  ;;  %v9257_v56 = vpop.f32.mrf.mxu1  ;;  %13666 = vst [vmem:[#allocation29_spill] sm:$0xff] %v9259_v3  ;;  %v9268_v18 = vadd.f32 %v2196_v27, %v8915_v43 }
  0xe3   : > { %13665 = vst [vmem:[#allocation28_spill] sm:$0xff] %v9257_v56  ;;  %v666_v56 = vld [vmem:[%s13405_s2 + $0x378] sm:$0xff] }
  0xe4   : > { %v9270_v21 = vpop.f32.mrf.mxu0  ;;  %v9272_v2 = vpop.f32.mrf.mxu1 }
  0xe5   : > { %13667 = vst [vmem:[#allocation30_spill] sm:$0xff] %v9272_v2  ;;  %v9274_v24 = vpop.permute.xlu1 %952  ;;  %v9297_v43 = vpop.permute.xlu0 %937 }
  0xe6   : > { %1262 = vperm.xlu1 %7126, %v664_v45   ;;  %1257 = vperm.xlu0 %7125, %v663_v47   ;;  %13668 = vst [vmem:[#allocation31_spill] sm:$0xff] %v9274_v24  ;;  %v2206_v27 = vpop.f32.mrf.mxu0  ;;  %v9285_v61 = vpop.f32.mrf.mxu1  ;;  %v6776_v45 = vmul.f32 -1.442695, %v9268_v18  ;;  %v9291_v47 = vadd.f32 %v2202_v50, %v8899_v38  ;;  %13671 = vst [vmem:[#allocation34_spill] sm:$0xff] %v9297_v43  ;;  %v6775_v50 = vmul.f32 -1.442695, %v9283_v31 }
  0xe7   : > { %13669 = vst [vmem:[#allocation32_spill] sm:$0xff] %v9285_v61  ;;  %v7182_v24 = vld [vmem:[%s13404_s1 + $0x218] sm:$0xff]  }
  0xe8   : > { %6719 = vmatmul.mubr.msk.bf16.gmra.mxu0 %vm1915_vm0, %v7179_v8  ;;  %6759 = vmatmul.mubr.msk.bf16.gmra.mxu1 %vm1915_vm0, %v7180_v39  ;;  %v9293_v2 = vpop.f32.mrf.mxu0  ;;  %v9295_v14 = vpop.f32.mrf.mxu1  ;;  %v667_v8 = vld [vmem:[%s13405_s2 + $0x380] sm:$0xff]  ;;  %v13672_v39 = vmov 0   ;;  %7211 = vpow2.f32 %v6776_v45  ;;  %v6778_v32 = vmul.f32 -1.442695, %v9291_v47 }
  0xe9   : > { %13670 = vst [vmem:[#allocation33_spill] sm:$0xff] %v9295_v14  ;;  %2458 = vmatprep.mubr.bf16.mxu0 %v13672_v39  ;;  %2858 = vmatprep.mubr.bf16.mxu1 %v13672_v39  ;;  %v9309_v14 = vadd.f32 %v2200_v33, %v8899_v38  ;;  %v9315_v61 = vpop.permute.xlu1 %962  ;;  %7213 = vpow2.f32 %v6775_v50 }
  0xea   : > { %1272 = vperm.xlu1 %7126, %v666_v56   ;;  %1267 = vperm.xlu0 %7125, %v665_v34   ;;  %v9311_v34 = vpop.f32.mrf.mxu0  ;;  %v9313_v56 = vpop.f32.mrf.mxu1  ;;  %13674 = vst [vmem:[#allocation36_spill] sm:$0xff] %v9315_v61  ;;  %v669_v61 = vld [vmem:[%s13405_s2 + $0x390] sm:$0xff]  ;;  %7215 = vpow2.f32 %v6778_v32 }
  0xeb   : > { %13673 = vst [vmem:[#allocation35_spill] sm:$0xff] %v9313_v56  ;;  %v670_v56 = vld [vmem:[%s13405_s2 + $0x398] sm:$0xff]  ;;  %v6777_v45 = vmul.f32 -1.442695, %v9309_v14 }
  0xec   : > { %v9324_v43 = vpop.f32.mrf.mxu0  ;;  %v9326_v38 = vpop.f32.mrf.mxu1 }
  0xed   : > { %13675 = vst [vmem:[#allocation37_spill] sm:$0xff] %v9326_v38  ;;  %v7208_v33 = vpop.eup %7207  ;;  %v9339_v38 = vpop.permute.xlu0 %947  ;;  %7217 = vpow2.f32 %v6777_v45 }
  0xee   : > { %1282 = vperm.xlu1 %7126, %v668_v11   ;;  %1277 = vperm.xlu0 %7125, %v667_v8   ;;  %v9335_v1 = vpop.f32.mrf.mxu0  ;;  %v9337_v3 = vpop.f32.mrf.mxu1  ;;  %13677 = vst [vmem:[#allocation39_spill] sm:$0xff] %v9339_v38  ;;  %v3950_v11 = vadd.f32 1.0, %v7208_v33  ;;  %v7184_v33 = vld [vmem:[%s13404_s1 + $0x220] sm:$0xff]   ;;  %v673_v38 = vld [vmem:[%s13405_s2 + $0x3b0] sm:$0xff] }
  0xef   : > { %13676 = vst [vmem:[#allocation38_spill] sm:$0xff] %v9337_v3  ;;  %v7210_v40 = vpop.eup %7209  ;;  %v9347_v50 = vpop.permute.xlu1 %972  ;;  %v672_v3 = vld [vmem:[%s13405_s2 + $0x3a8] sm:$0xff] }
  0xf0   : > { %6720 = vmatmul.mubr.msk.bf16.gmra.mxu0 %vm1915_vm0, %v7181_v46  ;;  %6760 = vmatmul.mubr.msk.bf16.gmra.mxu1 %vm1915_vm0, %v7182_v24  ;;  %v9343_v8 = vpop.f32.mrf.mxu0  ;;  %v9345_v17 = vpop.f32.mrf.mxu1  ;;  %13679 = vst [vmem:[#allocation41_spill] sm:$0xff] %v9347_v50  ;;  %v671_v46 = vld [vmem:[%s13405_s2 + $0x3a0] sm:$0xff]  ;;  %v3949_v32 = vadd.f32 1.0, %v7210_v40  ;;  %7219 = vrcp.f32 %v3950_v11 }
  0xf1   : > { %13678 = vst [vmem:[#allocation40_spill] sm:$0xff] %v9345_v17  ;;  %2468 = vmatprep.mubr.bf16.mxu0 %v13672_v39  ;;  %2868 = vmatprep.mubr.bf16.mxu1 %v13672_v39  ;;  %v9368_v17 = vadd.f32 %v2206_v27, %v8913_v42  ;;  %v9374_v45 = vpop.permute.xlu0 %957  ;;  %v9384_v27 = vadd.f32 %v9270_v21, %v8913_v42  ;;  %v676_v21 = vld [vmem:[%s13405_s2 + $0x3c8] sm:$0xff] }
  0xf2   : > { %1292 = vperm.xlu1 %7126, %v670_v56   ;;  %1287 = vperm.xlu0 %7125, %v669_v61   ;;  %v9357_v24 = vpop.f32.mrf.mxu0  ;;  %v9359_v56 = vpop.f32.mrf.mxu1  ;;  %v7183_v61 = vld [vmem:[%s13404_s1 + $0xe0] sm:$0xff]   ;;  %13682 = vst [vmem:[#allocation44_spill] sm:$0xff] %v9374_v45  ;;  %7221 = vrcp.f32 %v3949_v32 }
  0xf3   : > { %13680 = vst [vmem:[#allocation42_spill] sm:$0xff] %v9359_v56  ;;  %v674_v56 = vld [vmem:[%s13405_s2 + $0x3b8] sm:$0xff]  ;;  %v675_v32 = vld [vmem:[%s13405_s2 + $0x3c0] sm:$0xff] }
  0xf4   : > { %v9370_v50 = vpop.f32.mrf.mxu0  ;;  %v9372_v40 = vpop.f32.mrf.mxu1 }
  0xf5   : > { %13681 = vst [vmem:[#allocation43_spill] sm:$0xff] %v9372_v40  ;;  %v7212_v42 = vpop.eup %7211 }
  0xf6   : > { %1302 = vperm.xlu1 %7126, %v672_v3   ;;  %1297 = vperm.xlu0 %7125, %v671_v46   ;;  %v9386_v11 = vpop.f32.mrf.mxu0  ;;  %v9388_v40 = vpop.f32.mrf.mxu1  ;;  %v6780_v46 = vmul.f32 -1.442695, %v9368_v17  ;;  %v3952_v37 = vadd.f32 1.0, %v7212_v42 }
  0xf7   : > { %13683 = vst [vmem:[#allocation45_spill] sm:$0xff] %v9388_v40  ;;  %v9390_v3 = vpop.permute.xlu1 %982  ;;  %v7185_v40 = vld [vmem:[%s13404_s1 + $0xe8] sm:$0xff]  }
  0xf8   : > { %13684 = vst [vmem:[#allocation46_spill] sm:$0xff] %v9390_v3  ;;  %6721 = vmatmul.mubr.msk.bf16.gmra.mxu0 %vm1915_vm0, %v7183_v61  ;;  %6761 = vmatmul.mubr.msk.bf16.gmra.mxu1 %vm1915_vm0, %v7184_v33  ;;  %v9395_v45 = vpop.f32.mrf.mxu0  ;;  %v9397_v28 = vpop.f32.mrf.mxu1  ;;  %v6779_v61 = vmul.f32 -1.442695, %v9384_v27  ;;  %v7186_v3 = vld [vmem:[%s13404_s1 + $0x228] sm:$0xff]   ;;  %7223 = vpow2.f32 %v6780_v46 }
  0xf9   : > { %13685 = vst [vmem:[#allocation47_spill] sm:$0xff] %v9397_v28  ;;  %2478 = vmatprep.mubr.bf16.mxu0 %v13672_v39  ;;  %2878 = vmatprep.mubr.bf16.mxu1 %v13672_v39 }
  0xfa   : > { %1312 = vperm.xlu1 %7126, %v674_v56   ;;  %1307 = vperm.xlu0 %7125, %v673_v38   ;;  %v9408_v33 = vpop.f32.mrf.mxu0  ;;  %v9410_v28 = vpop.f32.mrf.mxu1  ;;  %7225 = vpow2.f32 %v6779_v61  ;;  %v680_v61 = vld [vmem:[%s13405_s2 + $0x3e8] sm:$0xff] }
  0xfb   : > { %13686 = vst [vmem:[#allocation48_spill] sm:$0xff] %v9410_v28  ;;  %v7214_v38 = vpop.eup %7213  ;;  %v9412_v56 = vpop.permute.xlu0 %967  ;;  %7227 = vrcp.f32 %v3952_v37 }
  0xfc   : > { %13687 = vst [vmem:[#allocation49_spill] sm:$0xff] %v9412_v56  ;;  %v9420_v22 = vpop.f32.mrf.mxu0  ;;  %v9422_v23 = vpop.f32.mrf.mxu1  ;;  %v678_v56 = vld [vmem:[%s13405_s2 + $0x3d8] sm:$0xff]  ;;  %v3951_v4 = vadd.f32 1.0, %v7214_v38 }
  0xfd   : > { %13688 = vst [vmem:[#allocation50_spill] sm:$0xff] %v9422_v23  ;;  %v7216_v28 = vpop.eup %7215  ;;  %v9424_v12 = vpop.permute.xlu1 %992 }
  0xfe   : > { %1322 = vperm.xlu1 %7126, %v676_v21   ;;  %1317 = vperm.xlu0 %7125, %v675_v32   ;;  %13689 = vst [vmem:[#allocation51_spill] sm:$0xff] %v9424_v12  ;;  %v9432_v46 = vpop.f32.mrf.mxu0  ;;  %v9434_v42 = vpop.f32.mrf.mxu1  ;;  %v3954_v21 = vadd.f32 1.0, %v7216_v28  ;;  %7229 = vrcp.f32 %v3951_v4 }
  0xff   : > { %13690 = vst [vmem:[#allocation52_spill] sm:$0xff] %v9434_v42  ;;  %v7218_v23 = vpop.eup %7217  ;;  %v9442_v38 = vpop.permute.xlu0 %977  ;;  %v7188_v42 = vld [vmem:[%s13404_s1 + $0x230] sm:$0xff]  }
 0x100   : > { %6722 = vmatmul.mubr.msk.bf16.gmra.mxu0 %vm1915_vm0, %v7185_v40  ;;  %6762 = vmatmul.mubr.msk.bf16.gmra.mxu1 %vm1915_vm0, %v7186_v3  ;;  %v9438_v32 = vpop.f32.mrf.mxu0  ;;  %v9440_v12 = vpop.f32.mrf.mxu1  ;;  %13692 = vst [vmem:[#allocation54_spill] sm:$0xff] %v9442_v38  ;;  %v679_v40 = vld [vmem:[%s13405_s2 + $0x3e0] sm:$0xff]  ;;  %v3953_v28 = vadd.f32 1.0, %v7218_v23  ;;  %7231 = vrcp.f32 %v3954_v21 }
 0x101   : > { %13691 = vst [vmem:[#allocation53_spill] sm:$0xff] %v9440_v12  ;;  %v7220_v7 = vpop.eup %7219  ;;  %2488 = vmatprep.mubr.bf16.mxu0 %v13672_v39  ;;  %2888 = vmatprep.mubr.bf16.mxu1 %v13672_v39  ;;  %v7187_v12 = vld [vmem:[%s13404_s1 + $0xf0] sm:$0xff]  }
 0x102   : > { %1332 = vperm.xlu1 %7126, %v678_v56   ;;  %1327 = vperm.xlu0 %7125, %v677_v13   ;;  %v9452_v37 = vpop.f32.mrf.mxu0  ;;  %v9454_v13 = vpop.f32.mrf.mxu1  ;;  %v4910_v38 = vmul.f32 %v7220_v7, %v9219_v0  ;;  %7233 = vrcp.f32 %v3953_v28 }
 0x103   : > { %13693 = vst [vmem:[#allocation55_spill] sm:$0xff] %v9454_v13  ;;  %v7222_v3 = vpop.eup %7221  ;;  %v9456_v56 = vpop.permute.xlu1 %1002  ;;  %v682_v13 = vld [vmem:[%s13405_s2 + $0x3f8] sm:$0xff] }
 0x104   : > { %13694 = vst [vmem:[#allocation56_spill] sm:$0xff] %v9456_v56  ;;  %v9465_v4 = vpop.f32.mrf.mxu0  ;;  %v9467_v23 = vpop.f32.mrf.mxu1  ;;  %v681_v56 = vld [vmem:[%s13405_s2 + $0x3f0] sm:$0xff]  ;;  %v4909_v57 = vmul.f32 %v7222_v3, %v9214_v55  ;;  %v684_v3 = vld [vmem:[%s13405_s2 + $0x408] sm:$0xff] }
 0x105   : > { %13695 = vst [vmem:[#allocation57_spill] sm:$0xff] %v9467_v23  ;;  %v9480_v0 = vpop.permute.xlu0 %987  ;;  %v7224_v55 = vpop.eup %7223 }
 0x106   : > { %1342 = vperm.xlu1 %7126, %v680_v61   ;;  %1337 = vperm.xlu0 %7125, %v679_v40   ;;  %v9476_v60 = vpop.f32.mrf.mxu0  ;;  %v9478_v7 = vpop.f32.mrf.mxu1  ;;  %13697 = vst [vmem:[#allocation59_spill] sm:$0xff] %v9480_v0  ;;  %v9488_v40 = vadd.f32 %v4910_v38, %v4909_v57  ;;  %v7189_v38 = vld [vmem:[%s13404_s1 + $0xf8] sm:$0xff]  }
 0x107   : > { %13696 = vst [vmem:[#allocation58_spill] sm:$0xff] %v9478_v7  ;;  %v9490_v28 = vpop.permute.xlu1 %1012  ;;  %v7226_v57 = vpop.eup %7225 }
 0x108   : > { %6723 = vmatmul.mubr.msk.bf16.gmra.mxu0 %vm1915_vm0, %v7187_v12  ;;  %6763 = vmatmul.mubr.msk.bf16.gmra.mxu1 %vm1915_vm0, %v7188_v42  ;;  %v9484_v21 = vpop.f32.mrf.mxu0  ;;  %v9486_v61 = vpop.f32.mrf.mxu1  ;;  %13699 = vst [vmem:[#allocation61_spill] sm:$0xff] %v9490_v28  ;;  %v683_v12 = vld [vmem:[%s13405_s2 + $0x400] sm:$0xff]  ;;  %v3955_v44 = vadd.f32 1.0, %v7226_v57 }
 0x109   : > { %13698 = vst [vmem:[#allocation60_spill] sm:$0xff] %v9486_v61  ;;  %2498 = vmatprep.mubr.bf16.mxu0 %v13672_v39  ;;  %2898 = vmatprep.mubr.bf16.mxu1 %v13672_v39  ;;  %v3956_v61 = vadd.f32 1.0, %v7224_v55  ;;  %v7228_v51 = vpop.eup %7227  ;;  %v9514_v54 = vpop.permute.xlu0 %997 }
 0x10a   : > { %1352 = vperm.xlu1 %7126, %v682_v13   ;;  %1347 = vperm.xlu0 %7125, %v681_v56   ;;  %v9500_v42 = vpop.f32.mrf.mxu0  ;;  %v9502_v13 = vpop.f32.mrf.mxu1  ;;  %v7190_v56 = vld [vmem:[%s13404_s1 + $0x238] sm:$0xff]   ;;  %13702 = vst [vmem:[#allocation64_spill] sm:$0xff] %v9514_v54 }
 0x10b   : > { %13700 = vst [vmem:[#allocation62_spill] sm:$0xff] %v9502_v13  ;;  %v686_v13 = vld [vmem:[%s13405_s2 + $0x418] sm:$0xff]  ;;  %v7230_v7 = vpop.eup %7229  ;;  %7235 = vrcp.f32 %v3956_v61 }
 0x10c   : > { %v9510_v28 = vpop.f32.mrf.mxu0  ;;  %v9512_v0 = vpop.f32.mrf.mxu1  ;;  %7237 = vrcp.f32 %v3955_v44 }
 0x10d   : > { %13701 = vst [vmem:[#allocation63_spill] sm:$0xff] %v9512_v0  ;;  %v9526_v0 = vpop.permute.xlu1 %1022  ;;  %v7232_v57 = vpop.eup %7231 }
 0x10e   : > { %1362 = vperm.xlu1 %7126, %v684_v3   ;;  %1357 = vperm.xlu0 %7125, %v683_v12   ;;  %v9522_v35 = vpop.f32.mrf.mxu0  ;;  %v9524_v55 = vpop.f32.mrf.mxu1  ;;  %13704 = vst [vmem:[#allocation66_spill] sm:$0xff] %v9526_v0  ;;  %v4912_v3 = vmul.f32 %v7228_v51, %v9268_v18  ;;  %v4911_v51 = vmul.f32 %v7230_v7, %v9283_v31 }
 0x10f   : > { %13703 = vst [vmem:[#allocation65_spill] sm:$0xff] %v9524_v55  ;;  %v688_v55 = vld [vmem:[%s13405_s2 + $0x428] sm:$0xff]  ;;  %v4914_v0 = vmul.f32 %v7232_v57, %v9291_v47 }
 0x110   : > { %6724 = vmatmul.mubr.msk.bf16.gmra.mxu0 %vm1915_vm0, %v7189_v38  ;;  %6764 = vmatmul.mubr.msk.bf16.gmra.mxu1 %vm1915_vm0, %v7190_v56  ;;  %v9531_v12 = vpop.f32.mrf.mxu0  ;;  %v9533_v54 = vpop.f32.mrf.mxu1  ;;  %v687_v38 = vld [vmem:[%s13405_s2 + $0x420] sm:$0xff]  ;;  %v9561_v31 = vadd.f32 %v4912_v3, %v4911_v51 }
 0x111   : > { %13705 = vst [vmem:[#allocation67_spill] sm:$0xff] %v9533_v54  ;;  %2508 = vmatprep.mubr.bf16.mxu0 %v13672_v39  ;;  %2908 = vmatprep.mubr.bf16.mxu1 %v13672_v39  ;;  %v7191_v56 = vld [vmem:[%s13404_s1 + $0x100] sm:$0xff]   ;;  %v9563_v7 = vpop.permute.xlu1 %1032 }
 0x112   : > { %1372 = vperm.xlu1 %7126, %v686_v13   ;;  %1367 = vperm.xlu0 %7125, %v685_v41   ;;  %v9544_v18 = vpop.f32.mrf.mxu0  ;;  %v9546_v61 = vpop.f32.mrf.mxu1  ;;  %v7192_v54 = vld [vmem:[%s13404_s1 + $0x240] sm:$0xff]   ;;  %13709 = vst [vmem:[#allocation71_spill] sm:$0xff] %v9561_v31  ;;  %13710 = vst [vmem:[#allocation72_spill] sm:$0xff] %v9563_v7  ;;  %v9612_v7 = vadd.f32 %v9311_v34, %v8931_v49 }
 0x113   : > { %13706 = vst [vmem:[#allocation68_spill] sm:$0xff] %v9546_v61  ;;  %v7234_v41 = vpop.eup %7233  ;;  %v9548_v13 = vpop.permute.xlu0 %1007  ;;  %v690_v61 = vld [vmem:[%s13405_s2 + $0x438] sm:$0xff] }
 0x114   : > { %13707 = vst [vmem:[#allocation69_spill] sm:$0xff] %v9548_v13  ;;  %v9557_v23 = vpop.f32.mrf.mxu0  ;;  %v9559_v44 = vpop.f32.mrf.mxu1  ;;  %v689_v13 = vld [vmem:[%s13405_s2 + $0x430] sm:$0xff]  ;;  %v4913_v47 = vmul.f32 %v7234_v41, %v9309_v14  ;;  %v692_v14 = vld [vmem:[%s13405_s2 + $0x448] sm:$0xff]  ;;  %v691_v41 = vld [vmem:[%s13405_s2 + $0x440] sm:$0xff] }
 0x115   : > { %13708 = vst [vmem:[#allocation70_spill] sm:$0xff] %v9559_v44  ;;  %v6782_v44 = vmul.f32 -1.442695, %v9612_v7 }
 0x116   : > { %1382 = vperm.xlu1 %7126, %v688_v55   ;;  %1377 = vperm.xlu0 %7125, %v687_v38   ;;  %v9572_v57 = vpop.f32.mrf.mxu0  ;;  %v9574_v36 = vpop.f32.mrf.mxu1  ;;  %v9582_v38 = vadd.f32 %v4914_v0, %v4913_v47  ;;  %v7194_v47 = vld [vmem:[%s13404_s1 + $0x248] sm:$0xff]  }
 0x117   : > { %13711 = vst [vmem:[#allocation73_spill] sm:$0xff] %v9574_v36  ;;  %v9584_v51 = vpop.permute.xlu0 %1017 }
 0x118   : > { %6725 = vmatmul.mubr.msk.bf16.gmra.mxu0 %vm1915_vm0, %v7191_v56  ;;  %6765 = vmatmul.mubr.msk.bf16.gmra.mxu1 %vm1915_vm0, %v7192_v54  ;;  %v9578_v55 = vpop.f32.mrf.mxu0  ;;  %v9580_v3 = vpop.f32.mrf.mxu1  ;;  %13713 = vst [vmem:[#allocation75_spill] sm:$0xff] %v9584_v51  ;;  %v9596_v54 = vadd.f32 %v9293_v2, %v8931_v49  ;;  %v7193_v56 = vld [vmem:[%s13404_s1 + $0x108] sm:$0xff]   ;;  %v693_v49 = vld [vmem:[%s13405_s2 + $0x450] sm:$0xff] }
 0x119   : > { %13712 = vst [vmem:[#allocation74_spill] sm:$0xff] %v9580_v3  ;;  %2518 = vmatprep.mubr.bf16.mxu0 %v13672_v39  ;;  %2918 = vmatprep.mubr.bf16.mxu1 %v13672_v39  ;;  %v694_v3 = vld [vmem:[%s13405_s2 + $0x458] sm:$0xff] }
 0x11a   : > { %1392 = vperm.xlu1 %7126, %v690_v61   ;;  %1387 = vperm.xlu0 %7125, %v689_v13   ;;  %13714 = vst [vmem:[#allocation76_spill] sm:$0xff] %v9596_v54  ;;  %v9598_v0 = vpop.f32.mrf.mxu0  ;;  %v9600_v61 = vpop.f32.mrf.mxu1  ;;  %v6781_v34 = vmul.f32 -1.442695, %v9596_v54 }
 0x11b   : > { %13715 = vst [vmem:[#allocation77_spill] sm:$0xff] %v9600_v61  ;;  %v9602_v13 = vpop.permute.xlu1 %1042  ;;  %v7236_v61 = vpop.eup %7235 }
 0x11c   : > { %13716 = vst [vmem:[#allocation78_spill] sm:$0xff] %v9602_v13  ;;  %v9614_v2 = vpop.f32.mrf.mxu0  ;;  %v9616_v51 = vpop.f32.mrf.mxu1  ;;  %v9620_v13 = vadd.f32 %v9324_v43, %v8929_v48  ;;  %v4916_v43 = vmul.f32 %v7236_v61, %v9368_v17  ;;  %v695_v17 = vld [vmem:[%s13405_s2 + $0x460] sm:$0xff]  ;;  %7239 = vpow2.f32 %v6781_v34  ;;  %v698_v34 = vld [vmem:[%s13405_s2 + $0x478] sm:$0xff] }
 0x11d   : > { %13717 = vst [vmem:[#allocation79_spill] sm:$0xff] %v9616_v51  ;;  %v7238_v36 = vpop.eup %7237  ;;  %v9641_v31 = vpop.permute.xlu0 %1027  ;;  %7241 = vpow2.f32 %v6782_v44 }
 0x11e   : > { %1402 = vperm.xlu1 %7126, %v692_v14   ;;  %1397 = vperm.xlu0 %7125, %v691_v41   ;;  %v9631_v14 = vadd.f32 %v9335_v1, %v8929_v48  ;;  %v9633_v41 = vpop.f32.mrf.mxu0  ;;  %v9635_v51 = vpop.f32.mrf.mxu1  ;;  %13718 = vst [vmem:[#allocation80_spill] sm:$0xff] %v9641_v31  ;;  %v6783_v54 = vmul.f32 -1.442695, %v9620_v13  ;;  %v9646_v48 = vadd.f32 %v9343_v8, %v8945_v53  ;;  %v696_v1 = vld [vmem:[%s13405_s2 + $0x468] sm:$0xff]  ;;  %v7195_v31 = vld [vmem:[%s13404_s1 + $0x110] sm:$0xff]  }
 0x11f   : > { %v9657_v61 = vpop.permute.xlu1 %1052 }
 0x120   : > { %6726 = vmatmul.mubr.msk.bf16.gmra.mxu0 %vm1915_vm0, %v7193_v56  ;;  %6766 = vmatmul.mubr.msk.bf16.gmra.mxu1 %vm1915_vm0, %v7194_v47  ;;  %13719 = vst [vmem:[#allocation81_spill] sm:$0xff] %v9657_v61  ;;  %v6784_v8 = vmul.f32 -1.442695, %v9631_v14  ;;  %v9662_v56 = vadd.f32 %v9357_v24, %v8945_v53  ;;  %v9664_v47 = vpop.f32.mrf.mxu0  ;;  %7243 = vpow2.f32 %v6783_v54  ;;  %v6785_v53 = vmul.f32 -1.442695, %v9646_v48  ;;  %v697_v61 = vld [vmem:[%s13405_s2 + $0x470] sm:$0xff] }
 0x121   : > { %2528 = vmatprep.mubr.bf16.mxu0 %v13672_v39  ;;  %2928 = vmatprep.mubr.bf16.mxu1 %v13672_v39  ;;  %v9679_v24 = vadd.f32 %v9370_v50, %v8943_v52  ;;  %v9687_v44 = vpop.permute.xlu0 %1037  ;;  %v9692_v54 = vadd.f32 %v9386_v11, %v8943_v52  ;;  %v700_v52 = vld [vmem:[%s13405_s2 + $0x488] sm:$0xff]  ;;  %v699_v11 = vld [vmem:[%s13405_s2 + $0x480] sm:$0xff] }
 0x122   : > { %1412 = vperm.xlu1 %7126, %v694_v3   ;;  %1407 = vperm.xlu0 %7125, %v693_v49   ;;  %v4915_v3 = vmul.f32 %v7238_v36, %v9384_v27  ;;  %13720 = vst [vmem:[#allocation82_spill] sm:$0xff] %v9662_v56  ;;  %v9666_v49 = vpop.f32.mrf.mxu1  ;;  %v7196_v36 = vld [vmem:[%s13404_s1 + $0x250] sm:$0xff]   ;;  %13722 = vst [vmem:[#allocation84_spill] sm:$0xff] %v9687_v44  ;;  %7245 = vpow2.f32 %v6784_v8  ;;  %v9705_v8 = vadd.f32 %v9395_v45, %v8961_v59 }
 0x123   : > { %13721 = vst [vmem:[#allocation83_spill] sm:$0xff] %v9679_v24  ;;  %13723 = vst [vmem:[#allocation85_spill] sm:$0xff] %v9692_v54  ;;  %7247 = vpow2.f32 %v6785_v53  ;;  %v7197_v53 = vld [vmem:[%s13404_s1 + $0x118] sm:$0xff]   ;;  %v701_v44 = vld [vmem:[%s13405_s2 + $0x490] sm:$0xff] }
 0x124   : > { %v9674_v27 = vadd.f32 %v4916_v43, %v4915_v3  ;;  %v6786_v43 = vmul.f32 -1.442695, %v9662_v56  ;;  %v9696_v50 = vpop.f32.mrf.mxu1  ;;  %v6787_v3 = vmul.f32 -1.442695, %v9679_v24  ;;  %13726 = vst [vmem:[#allocation88_spill] sm:$0xff] %v9705_v8  ;;  %v705_v24 = vld [vmem:[%s13405_s2 + $0x4b0] sm:$0xff] }
 0x125   : > { %13724 = vst [vmem:[#allocation86_spill] sm:$0xff] %v9696_v50 }
 0x126   : > { %1422 = vperm.xlu1 %7126, %v696_v1   ;;  %1417 = vperm.xlu0 %7125, %v695_v17   ;;  %v9694_v1 = vpop.f32.mrf.mxu0  ;;  %v9700_v17 = vpop.permute.xlu1 %1062  ;;  %7249 = vpow2.f32 %v6786_v43  ;;  %v702_v43 = vld [vmem:[%s13405_s2 + $0x498] sm:$0xff] }
 0x127   : > { %13725 = vst [vmem:[#allocation87_spill] sm:$0xff] %v9700_v17  ;;  %v9730_v17 = vpop.permute.xlu0 %1047  ;;  %7251 = vpow2.f32 %v6787_v3 }
 0x128   : > { %6727 = vmatmul.mubr.msk.bf16.gmra.mxu0 %vm1915_vm0, %v7195_v31  ;;  %6767 = vmatmul.mubr.msk.bf16.gmra.mxu1 %vm1915_vm0, %v7196_v36  ;;  %v6788_v31 = vmul.f32 -1.442695, %v9692_v54  ;;  %v9720_v45 = vpop.f32.mrf.mxu0  ;;  %v9722_v36 = vpop.f32.mrf.mxu1  ;;  %13728 = vst [vmem:[#allocation90_spill] sm:$0xff] %v9730_v17 }
 0x129   : > { %2538 = vmatprep.mubr.bf16.mxu0 %v13672_v39  ;;  %2938 = vmatprep.mubr.bf16.mxu1 %v13672_v39  ;;  %v7240_v17 = vpop.eup %7239 }
 0x12a   : > { %1432 = vperm.xlu1 %7126, %v698_v34   ;;  %1427 = vperm.xlu0 %7125, %v697_v61   ;;  %v9718_v61 = vadd.f32 %v9408_v33, %v8961_v59  ;;  %v7198_v34 = vld [vmem:[%s13404_s1 + $0x258] sm:$0xff]   ;;  %v6789_v59 = vmul.f32 -1.442695, %v9705_v8  ;;  %v9735_v33 = vadd.f32 %v9420_v22, %v8959_v58  ;;  %v9743_v50 = vpop.permute.xlu1 %1072  ;;  %7253 = vpow2.f32 %v6788_v31  ;;  %v9750_v22 = vpop.f32.mrf.mxu0 }
 0x12b   : > { %13730 = vst [vmem:[#allocation92_spill] sm:$0xff] %v9743_v50  ;;  %v7242_v8 = vpop.eup %7241  ;;  %v704_v50 = vld [vmem:[%s13405_s2 + $0x4a8] sm:$0xff] }
 0x12c   : > { %13727 = vst [vmem:[#allocation89_spill] sm:$0xff] %v9718_v61  ;;  %13729 = vst [vmem:[#allocation91_spill] sm:$0xff] %v9735_v33  ;;  %v6790_v3 = vmul.f32 -1.442695, %v9718_v61  ;;  %7255 = vpow2.f32 %v6789_v59  ;;  %v6791_v31 = vmul.f32 -1.442695, %v9735_v33 }
 0x12d   : > { %v7199_v61 = vld [vmem:[%s13404_s1 + $0x120] sm:$0xff]  }
 0x12e   : > { %1442 = vperm.xlu1 %7126, %v700_v52   ;;  %1437 = vperm.xlu0 %7125, %v699_v11   ;;  %v9748_v52 = vadd.f32 %v9432_v46, %v8959_v58  ;;  %v9752_v11 = vpop.f32.mrf.mxu1  ;;  %v703_v58 = vld [vmem:[%s13405_s2 + $0x4a0] sm:$0xff]  ;;  %v7244_v46 = vpop.eup %7243  ;;  %7257 = vpow2.f32 %v6790_v3 }
 0x12f   : > { %v7246_v54 = vpop.eup %7245  ;;  %v9786_v3 = vpop.permute.xlu1 %1082  ;;  %7259 = vpow2.f32 %v6791_v31 }
 0x130   : > { %13731 = vst [vmem:[#allocation93_spill] sm:$0xff] %v9748_v52  ;;  %6728 = vmatmul.mubr.msk.bf16.gmra.mxu0 %vm1915_vm0, %v7197_v53  ;;  %6768 = vmatmul.mubr.msk.bf16.gmra.mxu1 %vm1915_vm0, %v7198_v34  ;;  %v3957_v53 = vadd.f32 1.0, %v7240_v17  ;;  %v9769_v34 = vpop.permute.xlu0 %1057  ;;  %v6792_v59 = vmul.f32 -1.442695, %v9748_v52  ;;  %v9774_v33 = vpop.f32.mrf.mxu1  ;;  %v7200_v17 = vld [vmem:[%s13404_s1 + $0x260] sm:$0xff]   ;;  %13734 = vst [vmem:[#allocation96_spill] sm:$0xff] %v9786_v3 }
 0x131   : > { %2548 = vmatprep.mubr.bf16.mxu0 %v13672_v39  ;;  %2948 = vmatprep.mubr.bf16.mxu1 %v13672_v39  ;;  %13732 = vst [vmem:[#allocation94_spill] sm:$0xff] %v9769_v34  ;;  %13733 = vst [vmem:[#allocation95_spill] sm:$0xff] %v9774_v33  ;;  %v9784_v34 = vadd.f32 %v9452_v37, %v8975_v63  ;;  %v3959_v52 = vadd.f32 1.0, %v7244_v46  ;;  %v706_v33 = vld [vmem:[%s13405_s2 + $0x4b8] sm:$0xff]  ;;  %v7248_v56 = vpop.eup %7247  ;;  %v3960_v37 = vadd.f32 1.0, %v7246_v54 }
 0x132   : > { %1452 = vperm.xlu1 %7126, %v702_v43   ;;  %1447 = vperm.xlu0 %7125, %v701_v44   ;;  %v9767_v44 = vadd.f32 %v9438_v32, %v8975_v63  ;;  %v9772_v43 = vpop.f32.mrf.mxu0  ;;  %v3958_v32 = vadd.f32 1.0, %v7242_v8  ;;  %7261 = vrcp.f32 %v3957_v53  ;;  %v9797_v63 = vadd.f32 %v9465_v4, %v8973_v62  ;;  %v9801_v31 = vpop.f32.mrf.mxu1 }
 0x133   : > { %7263 = vpow2.f32 %v6792_v59  ;;  %13735 = vst [vmem:[#allocation97_spill] sm:$0xff] %v9801_v31  ;;  %v6794_v46 = vmul.f32 -1.442695, %v9784_v34  ;;  %v9808_v53 = vadd.f32 %v9476_v60, %v8973_v62  ;;  %v3961_v54 = vadd.f32 1.0, %v7248_v56  ;;  %v707_v59 = vld [vmem:[%s13405_s2 + $0x4c0] sm:$0xff]  ;;  %v9825_v56 = vpop.permute.xlu1 %1092 }
 0x134   : > { %v6793_v8 = vmul.f32 -1.442695, %v9767_v44  ;;  %7265 = vrcp.f32 %v3958_v32  ;;  %v9810_v4 = vpop.permute.xlu0 %1067  ;;  %v6795_v60 = vmul.f32 -1.442695, %v9797_v63  ;;  %13738 = vst [vmem:[#allocation100_spill] sm:$0xff] %v9825_v56  ;;  %v7201_v32 = vld [vmem:[%s13404_s1 + $0x128] sm:$0xff]  }
 0x135   : > { %13736 = vst [vmem:[#allocation98_spill] sm:$0xff] %v9810_v4  ;;  %7267 = vrcp.f32 %v3959_v52  ;;  %v710_v56 = vld [vmem:[%s13405_s2 + $0x4d8] sm:$0xff]  ;;  %v709_v4 = vld [vmem:[%s13405_s2 + $0x4d0] sm:$0xff] }
 0x136   : > { %1462 = vperm.xlu1 %7126, %v704_v50   ;;  %1457 = vperm.xlu0 %7125, %v703_v58   ;;  %v9799_v50 = vpop.f32.mrf.mxu0  ;;  %v7250_v58 = vpop.eup %7249  ;;  %7269 = vpow2.f32 %v6793_v8  ;;  %v7202_v8 = vld [vmem:[%s13404_s1 + $0x268] sm:$0xff]  }
 0x137   : > { %v7252_v62 = vpop.eup %7251  ;;  %7271 = vrcp.f32 %v3960_v37  ;;  %v9840_v37 = vadd.f32 %v9500_v42, %v8991_v6 }
 0x138   : > { %6729 = vmatmul.mubr.msk.bf16.gmra.mxu0 %vm1915_vm0, %v7199_v61  ;;  %6769 = vmatmul.mubr.msk.bf16.gmra.mxu1 %vm1915_vm0, %v7200_v17  ;;  %v708_v61 = vld [vmem:[%s13405_s2 + $0x4c8] sm:$0xff]  ;;  %v9827_v52 = vpop.f32.mrf.mxu0  ;;  %v9829_v17 = vpop.f32.mrf.mxu1  ;;  %7273 = vpow2.f32 %v6794_v46 }
 0x139   : > { %2558 = vmatprep.mubr.bf16.mxu0 %v13672_v39  ;;  %2958 = vmatprep.mubr.bf16.mxu1 %v13672_v39  ;;  %v7254_v3 = vpop.eup %7253  ;;  %7275 = vrcp.f32 %v3961_v54  ;;  %v9853_v42 = vpop.permute.xlu0 %1077 }
 0x13a   : > { %1472 = vperm.xlu1 %7126, %v706_v33   ;;  %1467 = vperm.xlu0 %7125, %v705_v24   ;;  %v9823_v24 = vadd.f32 %v9484_v21, %v8991_v6  ;;  %v3962_v33 = vadd.f32 1.0, %v7250_v58  ;;  %v6796_v21 = vmul.f32 -1.442695, %v9808_v53  ;;  %v3963_v58 = vadd.f32 1.0, %v7252_v62  ;;  %v7256_v31 = vpop.eup %7255  ;;  %13740 = vst [vmem:[#allocation102_spill] sm:$0xff] %v9853_v42 }
 0x13b   : > { %7277 = vpow2.f32 %v6795_v60  ;;  %v9851_v6 = vadd.f32 %v9510_v28, %v8989_v5  ;;  %v3964_v54 = vadd.f32 1.0, %v7254_v3  ;;  %v7258_v62 = vpop.eup %7257  ;;  %v6798_v60 = vmul.f32 -1.442695, %v9840_v37 }
 0x13c   : > { %13737 = vst [vmem:[#allocation99_spill] sm:$0xff] %v9823_v24  ;;  %v6797_v46 = vmul.f32 -1.442695, %v9823_v24  ;;  %7279 = vrcp.f32 %v3962_v33  ;;  %v9864_v28 = vadd.f32 %v9522_v35, %v8989_v5  ;;  %v9866_v24 = vpop.permute.xlu1 %1102  ;;  %v3965_v3 = vadd.f32 1.0, %v7256_v31  ;;  %v712_v33 = vld [vmem:[%s13405_s2 + $0x4e8] sm:$0xff]  ;;  %v7260_v5 = vpop.eup %7259 }
 0x13d   : > { %13739 = vst [vmem:[#allocation101_spill] sm:$0xff] %v9851_v6  ;;  %7281 = vpow2.f32 %v6796_v21  ;;  %13742 = vst [vmem:[#allocation104_spill] sm:$0xff] %v9866_v24  ;;  %v6799_v35 = vmul.f32 -1.442695, %v9851_v6  ;;  %v9904_v6 = vadd.f32 %v9557_v23, %v9003_v9  ;;  %v9919_v23 = vadd.f32 %v9572_v57, %v9003_v9 }
 0x13e   : > { %1482 = vperm.xlu1 %7126, %v708_v61   ;;  %1477 = vperm.xlu0 %7125, %v707_v59   ;;  %v9855_v61 = vpop.f32.mrf.mxu0  ;;  %v9857_v59 = vpop.f32.mrf.mxu1  ;;  %13741 = vst [vmem:[#allocation103_spill] sm:$0xff] %v9864_v28  ;;  %7283 = vrcp.f32 %v3963_v58  ;;  %v7203_v58 = vld [vmem:[%s13404_s1 + $0x130] sm:$0xff]   ;;  %v9933_v57 = vadd.f32 %v9578_v55, %v9021_v16 }
 0x13f   : > { %7285 = vpow2.f32 %v6797_v46  ;;  %v9881_v31 = vpop.eup %7261  ;;  %v7204_v46 = vld [vmem:[%s13404_s1 + $0x270] sm:$0xff]   ;;  %13746 = vst [vmem:[#allocation108_spill] sm:$0xff] %v9904_v6  ;;  %13748 = vst [vmem:[#allocation110_spill] sm:$0xff] %v9919_v23  ;;  %v6803_v9 = vmul.f32 -1.442695, %v9904_v6 }
 0x140   : > { %6730 = vmatmul.mubr.msk.bf16.gmra.mxu0 %vm1915_vm0, %v7201_v32  ;;  %6770 = vmatmul.mubr.msk.bf16.gmra.mxu1 %vm1915_vm0, %v7202_v8  ;;  %v711_v32 = vld [vmem:[%s13405_s2 + $0x4e0] sm:$0xff]  ;;  %7287 = vrcp.f32 %v3964_v54  ;;  %v9883_v8 = vpop.f32.mrf.mxu0  ;;  %v9885_v21 = vpop.f32.mrf.mxu1  ;;  %v9896_v54 = vadd.f32 %v9544_v18, %v9005_v10 }
 0x141   : > { %2568 = vmatprep.mubr.bf16.mxu0 %v13672_v39  ;;  %2968 = vmatprep.mubr.bf16.mxu1 %v13672_v39  ;;  %13743 = vst [vmem:[#allocation105_spill] sm:$0xff] %v9885_v21  ;;  %v7264_v24 = vpop.eup %7263  ;;  %7289 = vpow2.f32 %v6798_v60  ;;  %v3967_v21 = vadd.f32 1.0, %v7260_v5  ;;  %v714_v60 = vld [vmem:[%s13405_s2 + $0x4f8] sm:$0xff] }
 0x142   : > { %1492 = vperm.xlu1 %7126, %v710_v56   ;;  %1487 = vperm.xlu0 %7125, %v709_v4   ;;  %v9879_v4 = vadd.f32 %v9531_v12, %v9005_v10  ;;  %v3966_v56 = vadd.f32 1.0, %v7258_v62  ;;  %v6800_v12 = vmul.f32 -1.442695, %v9864_v28  ;;  %13744 = vst [vmem:[#allocation106_spill] sm:$0xff] %v9896_v54  ;;  %v9898_v62 = vpop.permute.xlu0 %1087  ;;  %v9900_v42 = vpop.eup %7265  ;;  %7291 = vrcp.f32 %v3965_v3  ;;  %v713_v10 = vld [vmem:[%s13405_s2 + $0x4f0] sm:$0xff] }
 0x143   : > { %13745 = vst [vmem:[#allocation107_spill] sm:$0xff] %v9898_v62  ;;  %v9912_v18 = vpop.eup %7267  ;;  %7293 = vpow2.f32 %v6799_v35  ;;  %v3968_v5 = vadd.f32 1.0, %v7264_v24  ;;  %v9921_v62 = vpop.f32.mrf.mxu0 }
 0x144   : > { %v7270_v3 = vpop.eup %7269  ;;  %7295 = vrcp.f32 %v3966_v56  ;;  %v9923_v28 = vpop.f32.mrf.mxu1 }
 0x145   : > { %13749 = vst [vmem:[#allocation111_spill] sm:$0xff] %v9923_v28  ;;  %v9927_v35 = vpop.eup %7271  ;;  %7297 = vpow2.f32 %v6800_v12  ;;  %v9946_v55 = vpop.f32.mrf.mxu0  ;;  %v9963_v28 = vadd.f32 %v9614_v2, %v9019_v15 }
 0x146   : > { %1502 = vperm.xlu1 %7126, %v712_v33   ;;  %1497 = vperm.xlu0 %7125, %v711_v32   ;;  %v6801_v33 = vmul.f32 -1.442695, %v9879_v4  ;;  %v9915_v32 = vpop.permute.xlu1 %1112  ;;  %v7274_v24 = vpop.eup %7273  ;;  %7299 = vrcp.f32 %v3967_v21  ;;  %v6804_v21 = vmul.f32 -1.442695, %v9919_v23 }
 0x147   : > { %13747 = vst [vmem:[#allocation109_spill] sm:$0xff] %v9915_v32  ;;  %v6802_v32 = vmul.f32 -1.442695, %v9896_v54  ;;  %v9937_v56 = vpop.eup %7275  ;;  %13754 = vst [vmem:[#allocation116_spill] sm:$0xff] %v9963_v28 }
 0x148   : > { %6731 = vmatmul.mubr.msk.bf16.gmra.mxu0 %vm1915_vm0, %v7203_v58  ;;  %6771 = vmatmul.mubr.msk.bf16.gmra.mxu1 %vm1915_vm0, %v7204_v46  ;;  %v3969_v58 = vadd.f32 1.0, %v7270_v3  ;;  %7301 = vpow2.f32 %v6801_v33  ;;  %v9939_v46 = vpop.permute.xlu0 %1097  ;;  %v7278_v12 = vpop.eup %7277  ;;  %v7206_v33 = vld [vmem:[%s13404_s1 + $0x278] sm:$0xff]  }
 0x149   : > { %2578 = vmatprep.mubr.bf16.mxu0 %v13672_v39  ;;  %2978 = vmatprep.mubr.bf16.mxu1 %v13672_v39  ;;  %13750 = vst [vmem:[#allocation112_spill] sm:$0xff] %v9939_v46  ;;  %7303 = vrcp.f32 %v3968_v5  ;;  %v7205_v39 = vld [vmem:[%s13404_s1 + $0x138] sm:$0xff]   ;;  %v9956_v3 = vpop.eup %7279  ;;  %v3970_v5 = vadd.f32 1.0, %v7274_v24  ;;  %v3971_v23 = vadd.f32 1.0, %v7278_v12  ;;  %v9972_v24 = vpop.f32.mrf.mxu0 }
 0x14a   : > { %1512 = vperm.xlu1 %7126, %v714_v60   ;;  %1507 = vperm.xlu0 %7125, %v713_v10   ;;  %v9944_v60 = vadd.f32 %v9598_v0, %v9021_v16  ;;  %v9948_v10 = vpop.f32.mrf.mxu1  ;;  %7305 = vpow2.f32 %v6802_v32  ;;  %v9958_v46 = vpop.permute.xlu1 %1122  ;;  %v6805_v0 = vmul.f32 -1.442695, %v9933_v57  ;;  %v9970_v32 = vadd.f32 %v9633_v41, %v9019_v15 }
 0x14b   : > { %13752 = vst [vmem:[#allocation114_spill] sm:$0xff] %v9948_v10  ;;  %13753 = vst [vmem:[#allocation115_spill] sm:$0xff] %v9958_v46  ;;  %v7282_v16 = vpop.eup %7281  ;;  %7307 = vpow2.f32 %v6803_v9  ;;  %v9983_v15 = vadd.f32 %v9664_v47, %v9035_v20 }
 0x14c   : > { %13751 = vst [vmem:[#allocation113_spill] sm:$0xff] %v9944_v60  ;;  %v9965_v10 = vpop.eup %7283  ;;  %7309 = vrcp.f32 %v3969_v58  ;;  %v6806_v54 = vmul.f32 -1.442695, %v9944_v60  ;;  %13755 = vst [vmem:[#allocation117_spill] sm:$0xff] %v9970_v32  ;;  %v9974_v9 = vpop.f32.mrf.mxu1  ;;  %v3972_v58 = vadd.f32 1.0, %v7282_v16  ;;  %v9994_v16 = vadd.f32 %v9694_v1, %v9035_v20  ;;  %v13798_v60 = vld [vmem:[#allocation6_spill] sm:$0xff] }
 0x14d   : > { %v7286_v6 = vpop.eup %7285  ;;  %7311 = vpow2.f32 %v6804_v21  ;;  %13756 = vst [vmem:[#allocation118_spill] sm:$0xff] %v9974_v9  ;;  %v6807_v21 = vmul.f32 -1.442695, %v9963_v28  ;;  %13757 = vst [vmem:[#allocation119_spill] sm:$0xff] %v9983_v15  ;;  %v9985_v41 = vpop.permute.xlu0 %1107  ;;  %v10008_v1 = vadd.f32 %v9750_v22, %v9033_v19 }
 0x14e   : > { %v9978_v2 = vpop.eup %7287  ;;  %7313 = vrcp.f32 %v3970_v5  ;;  %13758 = vst [vmem:[#allocation120_spill] sm:$0xff] %v9985_v41  ;;  %v9989_v9 = vpop.permute.xlu1 %1132  ;;  %v6808_v5 = vmul.f32 -1.442695, %v9970_v32  ;;  %13760 = vst [vmem:[#allocation122_spill] sm:$0xff] %v9994_v16  ;;  %v6809_v41 = vmul.f32 -1.442695, %v9983_v15 }
 0x14f   : > { %v7290_v12 = vpop.eup %7289  ;;  %7315 = vpow2.f32 %v6805_v0  ;;  %13759 = vst [vmem:[#allocation121_spill] sm:$0xff] %v9989_v9  ;;  %v6810_v20 = vmul.f32 -1.442695, %v9994_v16  ;;  %13762 = vst [vmem:[#allocation124_spill] sm:$0xff] %v10008_v1  ;;  %v10019_v16 = vadd.f32 %v9772_v43, %v9051_v26  ;;  %v6812_v22 = vmul.f32 -1.442695, %v10008_v1 }
 0x150   : > { %6732 = vmatmul.mubr.msk.bf16.gmra.mxu0 %vm1915_vm0, %v7205_v39  ;;  %6772 = vmatmul.mubr.msk.bf16.gmra.mxu1 %vm1915_vm0, %v7206_v33  ;;  %v9987_v46 = vpop.eup %7291  ;;  %7317 = vrcp.f32 %v3971_v23  ;;  %v3973_v39 = vadd.f32 1.0, %v7286_v6  ;;  %v3974_v47 = vadd.f32 1.0, %v7290_v12  ;;  %v10001_v6 = vadd.f32 %v9720_v45, %v9033_v19 }
 0x151   : > { %v7294_v33 = vpop.eup %7293  ;;  %7319 = vpow2.f32 %v6806_v54  ;;  %13765 = vst [vmem:[#allocation127_spill] sm:$0xff] %v10019_v16 }
 0x152   : > { %v9996_v0 = vpop.eup %7295  ;;  %7321 = vrcp.f32 %v3972_v58  ;;  %13761 = vst [vmem:[#allocation123_spill] sm:$0xff] %v10001_v6  ;;  %v3975_v54 = vadd.f32 1.0, %v7294_v33  ;;  %v10010_v58 = vpop.permute.xlu0 %1117 }
 0x153   : > { %v7298_v28 = vpop.eup %7297  ;;  %7323 = vpow2.f32 %v6807_v21  ;;  %13763 = vst [vmem:[#allocation125_spill] sm:$0xff] %v10010_v58  ;;  %v10014_v45 = vpop.permute.xlu1 %1142  ;;  %v6813_v58 = vmul.f32 -1.442695, %v10019_v16 }
 0x154   : > { %v10003_v23 = vpop.eup %7299  ;;  %7325 = vrcp.f32 %v3973_v39  ;;  %v3976_v21 = vadd.f32 1.0, %v7298_v28  ;;  %13764 = vst [vmem:[#allocation126_spill] sm:$0xff] %v10014_v45  ;;  %v6811_v39 = vmul.f32 -1.442695, %v10001_v6 }
 0x155   : > { %v7302_v9 = vpop.eup %7301  ;;  %7327 = vpow2.f32 %v6808_v5 }
 0x156   : > { %v10012_v12 = vpop.eup %7303  ;;  %7329 = vrcp.f32 %v3974_v47  ;;  %v3977_v5 = vadd.f32 1.0, %v7302_v9  ;;  %v10030_v9 = vpop.permute.xlu0 %1127 }
 0x157   : > { %v7306_v15 = vpop.eup %7305  ;;  %7331 = vpow2.f32 %v6809_v41  ;;  %v10026_v41 = vadd.f32 %v9799_v50, %v9051_v26  ;;  %13767 = vst [vmem:[#allocation129_spill] sm:$0xff] %v10030_v9 }
 0x158   : > { %v7308_v33 = vpop.eup %7307  ;;  %7333 = vrcp.f32 %v3975_v54  ;;  %v3978_v28 = vadd.f32 1.0, %v7306_v15 }
 0x159   : > { %v10021_v19 = vpop.eup %7309  ;;  %7335 = vpow2.f32 %v6810_v20  ;;  %13766 = vst [vmem:[#allocation128_spill] sm:$0xff] %v10026_v41  ;;  %v3979_v54 = vadd.f32 1.0, %v7308_v33  ;;  %v10035_v20 = vadd.f32 %v9827_v52, %v9049_v25  ;;  %v10044_v33 = vadd.f32 %v9855_v61, %v9049_v25 }
 0x15a   : > { %v7312_v47 = vpop.eup %7311  ;;  %7337 = vrcp.f32 %v3976_v21  ;;  %v10037_v21 = vpop.permute.xlu1 %1152 }
 0x15b   : > { %v10028_v45 = vpop.eup %7313  ;;  %7339 = vpow2.f32 %v6811_v39  ;;  %13768 = vst [vmem:[#allocation130_spill] sm:$0xff] %v10035_v20  ;;  %13769 = vst [vmem:[#allocation131_spill] sm:$0xff] %v10037_v21  ;;  %v3980_v26 = vadd.f32 1.0, %v7312_v47  ;;  %v6814_v39 = vmul.f32 -1.442695, %v10026_v41  ;;  %v10051_v47 = vadd.f32 %v9883_v8, %v9065_v30  ;;  %v10055_v41 = vpop.permute.xlu0 %1137 }
 0x15c   : > { %v7316_v43 = vpop.eup %7315  ;;  %7341 = vrcp.f32 %v3977_v5  ;;  %13770 = vst [vmem:[#allocation132_spill] sm:$0xff] %v10044_v33  ;;  %v6815_v21 = vmul.f32 -1.442695, %v10035_v20  ;;  %13772 = vst [vmem:[#allocation134_spill] sm:$0xff] %v10055_v41  ;;  %v6816_v61 = vmul.f32 -1.442695, %v10044_v33 }
 0x15d   : > { %v10039_v15 = vpop.eup %7317  ;;  %7343 = vpow2.f32 %v6812_v22  ;;  %v3981_v9 = vadd.f32 1.0, %v7316_v43  ;;  %13771 = vst [vmem:[#allocation133_spill] sm:$0xff] %v10051_v47  ;;  %v2310_v43 = vpop.f32.mrf.mxu0  ;;  %v13782_v33 = vld [vmem:[#allocation57_spill] sm:$0xff] }
 0x15e   : > { %v7320_v50 = vpop.eup %7319  ;;  %7345 = vrcp.f32 %v3978_v28 }
 0x15f   : > { %v10046_v5 = vpop.eup %7321  ;;  %7347 = vrcp.f32 %v3979_v54  ;;  %v3982_v28 = vadd.f32 1.0, %v7320_v50  ;;  %v10060_v54 = vadd.f32 %v9921_v62, %v9065_v30  ;;  %v10069_v50 = vadd.f32 %v9946_v55, %v9063_v29  ;;  %v10081_v41 = vpop.permute.xlu0 %1147 }
 0x160   : > { %v7324_v52 = vpop.eup %7323  ;;  %7349 = vpow2.f32 %v6813_v58  ;;  %v10062_v58 = vpop.permute.xlu1 %1162  ;;  %13777 = vst [vmem:[#allocation139_spill] sm:$0xff] %v10081_v41  ;;  %v13781_v41 = vld [vmem:[#allocation71_spill] sm:$0xff] }
 0x161   : > { %v10053_v22 = vpop.eup %7325  ;;  %7351 = vrcp.f32 %v3980_v26  ;;  %13773 = vst [vmem:[#allocation135_spill] sm:$0xff] %v10060_v54  ;;  %13774 = vst [vmem:[#allocation136_spill] sm:$0xff] %v10062_v58  ;;  %v3983_v8 = vadd.f32 1.0, %v7324_v52  ;;  %v6817_v26 = vmul.f32 -1.442695, %v10051_v47 }
 0x162   : > { %v7328_v25 = vpop.eup %7327  ;;  %7353 = vpow2.f32 %v6814_v39  ;;  %13775 = vst [vmem:[#allocation137_spill] sm:$0xff] %v10069_v50  ;;  %v6818_v58 = vmul.f32 -1.442695, %v10060_v54 }
 0x163   : > { %v10064_v20 = vpop.eup %7329  ;;  %7355 = vrcp.f32 %v3981_v9  ;;  %v3984_v30 = vadd.f32 1.0, %v7328_v25  ;;  %v10077_v9 = vadd.f32 %v9972_v24, %v9063_v29 }
 0x164   : > { %v7332_v16 = vpop.eup %7331  ;;  %7357 = vpow2.f32 %v6815_v21  ;;  %v2312_v21 = vpop.f32.mrf.mxu0 }
 0x165   : > { %v10071_v39 = vpop.eup %7333  ;;  %7359 = vrcp.f32 %v3982_v28  ;;  %13776 = vst [vmem:[#allocation138_spill] sm:$0xff] %v10077_v9  ;;  %v3985_v55 = vadd.f32 1.0, %v7332_v16  ;;  %v6819_v28 = vmul.f32 -1.442695, %v10069_v50  ;;  %v6820_v16 = vmul.f32 -1.442695, %v10077_v9 }
 0x166   : > { %v7336_v62 = vpop.eup %7335  ;;  %7361 = vpow2.f32 %v6816_v61  ;;  %v1173_v61 = vpop.permute.xlu1 %1172 }
 0x167   : > { %v10079_v52 = vpop.eup %7337  ;;  %7363 = vrcp.f32 %v3983_v8  ;;  %v3986_v29 = vadd.f32 1.0, %v7336_v62  ;;  %v10098_v1 = vadd.f32 %v13782_v33, %v1173_v61 }
 0x168   : > { %v7340_v47 = vpop.eup %7339  ;;  %7365 = vpow2.f32 %v6817_v26  ;;  %v2314_v26 = vpop.f32.mrf.mxu0 }
 0x169   : > { %5390 = vadd.xlane.f32.xlu0 %v9488_v40  ;;  %v13778_v40 = vld [vmem:[#allocation4_spill] sm:$0xff]  ;;  %v10087_v54 = vpop.eup %7341  ;;  %7367 = vrcp.f32 %v3984_v30  ;;  %13783 = vst [vmem:[#allocation71_spill] sm:$0xff] %v10098_v1 }
 0x16a   : > { %v10085_v25 = vadd.f32 %v2310_v43, %v13778_v40  ;;  %v7344_v24 = vpop.eup %7343  ;;  %7369 = vpow2.f32 %v6818_v58  ;;  %v10092_v8 = vadd.f32 %v2312_v21, %v13778_v40  ;;  %v3987_v43 = vadd.f32 1.0, %v7340_v47  ;;  %v10103_v21 = vpop.permute.xlu0 %1157  ;;  %v13785_v40 = vld [vmem:[#allocation58_spill] sm:$0xff] }
 0x16b   : > { %v10095_v50 = vpop.eup %7345  ;;  %7371 = vrcp.f32 %v3985_v55  ;;  %v3988_v62 = vadd.f32 1.0, %v7344_v24  ;;  %13784 = vst [vmem:[#allocation57_spill] sm:$0xff] %v10103_v21  ;;  %v10106_v9 = vadd.f32 %v13785_v40, %v1173_v61  ;;  %v2316_v47 = vpop.f32.mrf.mxu0 }
 0x16c   : > { %13779 = vst [vmem:[#allocation4_spill] sm:$0xff] %v10085_v25  ;;  %13780 = vst [vmem:[#allocation140_spill] sm:$0xff] %v10092_v8  ;;  %v10100_v30 = vpop.eup %7347  ;;  %7373 = vpow2.f32 %v6819_v28  ;;  %v6822_v33 = vmul.f32 -1.442695, %v10092_v8  ;;  %v6955_v28 = vmul.f32 -1.442695, %v10098_v1  ;;  %v1183_v61 = vpop.permute.xlu1 %1182 }
 0x16d   : > { %5396 = vadd.xlane.f32.xlu0 %v9582_v38  ;;  %v6821_v38 = vmul.f32 -1.442695, %v10085_v25  ;;  %v7350_v58 = vpop.eup %7349  ;;  %7375 = vrcp.f32 %v3986_v29  ;;  %13786 = vst [vmem:[#allocation58_spill] sm:$0xff] %v10106_v9  ;;  %v13787_v25 = vld [vmem:[#allocation3_spill] sm:$0xff]  ;;  %v2320_v1 = vpop.f32.mrf.mxu0 }
 0x16e   : > { %5393 = vadd.xlane.f32.xlu1 %v13781_v41  ;;  %v10109_v41 = vpop.eup %7351  ;;  %7377 = vpow2.f32 %v6820_v16  ;;  %v10114_v29 = vadd.f32 %v2314_v26, %v13787_v25  ;;  %v3989_v21 = vadd.f32 1.0, %v7350_v58  ;;  %v10120_v16 = vadd.f32 %v2316_v47, %v13787_v25  ;;  %v10124_v26 = vpop.permute.xlu0 %1167 }
 0x16f   : > { %v7354_v55 = vpop.eup %7353  ;;  %7379 = vrcp.f32 %v3987_v43  ;;  %13791 = vst [vmem:[#allocation143_spill] sm:$0xff] %v10124_v26  ;;  %v2322_v26 = vpop.f32.mrf.mxu0 }
 0x170   : > { %13788 = vst [vmem:[#allocation3_spill] sm:$0xff] %v10114_v29  ;;  %v10116_v24 = vpop.eup %7355  ;;  %7381 = vpow2.f32 %v6821_v38  ;;  %13789 = vst [vmem:[#allocation141_spill] sm:$0xff] %v10120_v16  ;;  %v3990_v43 = vadd.f32 1.0, %v7354_v55  ;;  %v6823_v58 = vmul.f32 -1.442695, %v10114_v29  ;;  %v13792_v38 = vld [vmem:[#allocation63_spill] sm:$0xff] }
 0x171   : > { %5399 = vadd.xlane.f32.xlu0 %v9674_v27  ;;  %v7358_v40 = vpop.eup %7357  ;;  %7383 = vrcp.f32 %v3988_v62  ;;  %v6956_v27 = vmul.f32 -1.442695, %v10106_v9  ;;  %v10128_v32 = vadd.f32 %v13792_v38, %v1183_v61  ;;  %v6824_v47 = vmul.f32 -1.442695, %v10120_v16  ;;  %v13795_v55 = vld [vmem:[#allocation65_spill] sm:$0xff] }
 0x172   : > { %v10122_v8 = vpop.eup %7359  ;;  %7385 = vpow2.f32 %v6822_v33  ;;  %v3991_v9 = vadd.f32 1.0, %v7358_v40  ;;  %v10134_v33 = vadd.f32 %v13795_v55, %v1183_v61  ;;  %v10145_v55 = vpop.permute.xlu0 %1177 }
 0x173   : > { %13790 = vst [vmem:[#allocation142_spill] sm:$0xff] %v10122_v8  ;;  %v7362_v6 = vpop.eup %7361  ;;  %7387 = vpow2.f32 %v6955_v28  ;;  %13793 = vst [vmem:[#allocation63_spill] sm:$0xff] %v10128_v32  ;;  %v6959_v38 = vmul.f32 -1.442695, %v10128_v32 }
 0x174   : > { %v10130_v62 = vpop.eup %7363  ;;  %7389 = vrcp.f32 %v3989_v21  ;;  %13796 = vst [vmem:[#allocation65_spill] sm:$0xff] %v10134_v33  ;;  %v3992_v28 = vadd.f32 1.0, %v7362_v6  ;;  %v6960_v61 = vmul.f32 -1.442695, %v10134_v33  ;;  %13801 = vst [vmem:[#allocation147_spill] sm:$0xff] %v10145_v55  ;;  %v10148_v6 = vadd.f32 %v2322_v26, %v13798_v60  ;;  %v13807_v26 = vld [vmem:[#allocation73_spill] sm:$0xff] }
 0x175   : > { %13794 = vst [vmem:[#allocation144_spill] sm:$0xff] %v10130_v62  ;;  %v7366_v25 = vpop.eup %7365  ;;  %7391 = vpow2.f32 %v6956_v27  ;;  %v10140_v62 = vadd.f32 %v2320_v1, %v13798_v60  ;;  %v1193_v27 = vpop.permute.xlu1 %1192 }
 0x176   : > { %v10136_v8 = vpop.eup %7367  ;;  %7393 = vrcp.f32 %v3990_v43  ;;  %v3993_v40 = vadd.f32 1.0, %v7366_v25  ;;  %13802 = vst [vmem:[#allocation148_spill] sm:$0xff] %v10148_v6  ;;  %v6826_v60 = vmul.f32 -1.442695, %v10148_v6 }
 0x177   : > { %13797 = vst [vmem:[#allocation145_spill] sm:$0xff] %v10136_v8  ;;  %v7370_v29 = vpop.eup %7369  ;;  %7395 = vpow2.f32 %v6823_v58  ;;  %13799 = vst [vmem:[#allocation6_spill] sm:$0xff] %v10140_v62  ;;  %v6825_v32 = vmul.f32 -1.442695, %v10140_v62  ;;  %v10165_v62 = vpop.permute.xlu0 %1187 }
 0x178   : > { %v10142_v21 = vpop.eup %7371  ;;  %7397 = vrcp.f32 %v3991_v9  ;;  %v3994_v58 = vadd.f32 1.0, %v7370_v29  ;;  %v13804_v9 = vld [vmem:[#allocation70_spill] sm:$0xff]  ;;  %13809 = vst [vmem:[#allocation151_spill] sm:$0xff] %v10165_v62 }
 0x179   : > { %13800 = vst [vmem:[#allocation146_spill] sm:$0xff] %v10142_v21  ;;  %v7374_v16 = vpop.eup %7373  ;;  %7399 = vpow2.f32 %v6824_v47  ;;  %v10154_v25 = vadd.f32 %v13804_v9, %v1193_v27  ;;  %v2324_v21 = vpop.f32.mrf.mxu0 }
 0x17a   : > { %v10150_v43 = vpop.eup %7375  ;;  %7401 = vrcp.f32 %v3992_v28  ;;  %v3995_v33 = vadd.f32 1.0, %v7374_v16 }
 0x17b   : > { %13803 = vst [vmem:[#allocation149_spill] sm:$0xff] %v10150_v43  ;;  %v7378_v1 = vpop.eup %7377  ;;  %7403 = vpow2.f32 %v6959_v38  ;;  %13805 = vst [vmem:[#allocation70_spill] sm:$0xff] %v10154_v25  ;;  %v10160_v43 = vadd.f32 %v13807_v26, %v1193_v27  ;;  %v6963_v9 = vmul.f32 -1.442695, %v10154_v25 }
 0x17c   : > { %v10156_v47 = vpop.eup %7379  ;;  %7405 = vrcp.f32 %v3993_v40  ;;  %v3996_v28 = vadd.f32 1.0, %v7378_v1 }
 0x17d   : > { %13806 = vst [vmem:[#allocation150_spill] sm:$0xff] %v10156_v47  ;;  %v7382_v55 = vpop.eup %7381  ;;  %7407 = vpow2.f32 %v6960_v61  ;;  %13808 = vst [vmem:[#allocation73_spill] sm:$0xff] %v10160_v43  ;;  %v2326_v47 = vpop.f32.mrf.mxu0  ;;  %v13810_v61 = vld [vmem:[#allocation5_spill] sm:$0xff]  ;;  %v6964_v27 = vmul.f32 -1.442695, %v10160_v43 }
 0x17e   : > { %v10162_v29 = vpop.eup %7383  ;;  %7409 = vrcp.f32 %v3994_v58  ;;  %v3997_v16 = vadd.f32 1.0, %v7382_v55  ;;  %v10168_v8 = vadd.f32 %v2324_v21, %v13810_v61  ;;  %v1203_v58 = vpop.permute.xlu1 %1202  ;;  %v10174_v26 = vadd.f32 %v2326_v47, %v13810_v61  ;;  %v13815_v55 = vld [vmem:[#allocation79_spill] sm:$0xff] }
 0x17f   : > { %v7386_v38 = vpop.eup %7385  ;;  %7411 = vpow2.f32 %v6825_v32  ;;  %v10184_v43 = vpop.f32.mrf.mxu1 }
 0x180   : > { %v7388_v40 = vpop.eup %7387  ;;  %7413 = vrcp.f32 %v3995_v33  ;;  %13811 = vst [vmem:[#allocation5_spill] sm:$0xff] %v10168_v8  ;;  %v3998_v32 = vadd.f32 1.0, %v7386_v38  ;;  %13813 = vst [vmem:[#allocation153_spill] sm:$0xff] %v10174_v26  ;;  %v6827_v21 = vmul.f32 -1.442695, %v10168_v8  ;;  %v1198_v38 = vpop.permute.xlu0 %1197 }
 0x181   : > { %v10170_v6 = vpop.eup %7389  ;;  %7415 = vpow2.f32 %v6826_v60  ;;  %v4131_v25 = vadd.f32 1.0, %v7388_v40  ;;  %13818 = vst [vmem:[#allocation156_spill] sm:$0xff] %v10184_v43  ;;  %v6828_v61 = vmul.f32 -1.442695, %v10174_v26  ;;  %v13821_v43 = vld [vmem:[#allocation74_spill] sm:$0xff] }
 0x182   : > { %13812 = vst [vmem:[#allocation152_spill] sm:$0xff] %v10170_v6  ;;  %v7392_v1 = vpop.eup %7391  ;;  %7417 = vrcp.f32 %v3996_v28  ;;  %v10180_v6 = vadd.f32 %v13815_v55, %v1203_v58  ;;  %v2330_v55 = vpop.f32.mrf.mxu0 }
 0x183   : > { %v10176_v62 = vpop.eup %7393  ;;  %7419 = vpow2.f32 %v6963_v9  ;;  %v4132_v28 = vadd.f32 1.0, %v7392_v1  ;;  %v10188_v9 = vadd.f32 %v9635_v51, %v1203_v58  ;;  %v10194_v1 = vadd.f32 %v13821_v43, %v1198_v38 }
 0x184   : > { %13814 = vst [vmem:[#allocation154_spill] sm:$0xff] %v10176_v62  ;;  %v7396_v33 = vpop.eup %7395  ;;  %7421 = vrcp.f32 %v3997_v16  ;;  %13816 = vst [vmem:[#allocation79_spill] sm:$0xff] %v10180_v6  ;;  %v13827_v62 = vld [vmem:[#allocation8_spill] sm:$0xff] }
 0x185   : > { %v10182_v60 = vpop.eup %7397  ;;  %7423 = vpow2.f32 %v6964_v27  ;;  %13819 = vst [vmem:[#allocation157_spill] sm:$0xff] %v10188_v9  ;;  %v3999_v16 = vadd.f32 1.0, %v7396_v33  ;;  %13822 = vst [vmem:[#allocation74_spill] sm:$0xff] %v10194_v1  ;;  %v6968_v58 = vmul.f32 -1.442695, %v10188_v9  ;;  %v13831_v9 = vld [vmem:[#allocation76_spill] sm:$0xff] }
 0x186   : > { %13817 = vst [vmem:[#allocation155_spill] sm:$0xff] %v10182_v60  ;;  %v7400_v47 = vpop.eup %7399  ;;  %7425 = vrcp.f32 %v3998_v32  ;;  %v6967_v60 = vmul.f32 -1.442695, %v10180_v6  ;;  %v10198_v32 = vpop.f32.mrf.mxu1 }
 0x187   : > { %v10190_v40 = vpop.eup %7401  ;;  %7427 = vrcp.f32 %v4131_v25  ;;  %13824 = vst [vmem:[#allocation160_spill] sm:$0xff] %v10198_v32  ;;  %v4000_v26 = vadd.f32 1.0, %v7400_v47  ;;  %v13825_v25 = vld [vmem:[#allocation77_spill] sm:$0xff]  ;;  %v2332_v6 = vpop.f32.mrf.mxu0  ;;  %v10208_v32 = vadd.f32 %v2330_v55, %v13827_v62 }
 0x188   : > { %13820 = vst [vmem:[#allocation158_spill] sm:$0xff] %v10190_v40  ;;  %v7404_v8 = vpop.eup %7403  ;;  %7429 = vpow2.f32 %v6827_v21  ;;  %v10202_v33 = vadd.f32 %v13825_v25, %v1198_v38  ;;  %v10212_v47 = vpop.f32.mrf.mxu1 }
 0x189   : > { %v10196_v27 = vpop.eup %7405  ;;  %7431 = vrcp.f32 %v4132_v28  ;;  %v4135_v21 = vadd.f32 1.0, %v7404_v8  ;;  %13828 = vst [vmem:[#allocation8_spill] sm:$0xff] %v10208_v32  ;;  %13830 = vst [vmem:[#allocation162_spill] sm:$0xff] %v10212_v47  ;;  %v1213_v38 = vpop.permute.xlu1 %1212  ;;  %v10216_v8 = vadd.f32 %v2332_v6, %v13827_v62  ;;  %v4918_v62 = vmul.f32 %v9900_v42, %v9612_v7 }
 0x18a   : > { %13823 = vst [vmem:[#allocation159_spill] sm:$0xff] %v10196_v27  ;;  %v7408_v51 = vpop.eup %7407  ;;  %7433 = vpow2.f32 %v6828_v61  ;;  %13826 = vst [vmem:[#allocation77_spill] sm:$0xff] %v10202_v33  ;;  %v6965_v27 = vmul.f32 -1.442695, %v10194_v1  ;;  %v10232_v6 = vmul.f32 %v9912_v18, %v9620_v13  ;;  %v4921_v13 = vmul.f32 %v9937_v56, %v9646_v48 }
 0x18b   : > { %v10204_v40 = vpop.eup %7409  ;;  %7435 = vrcp.f32 %v3999_v16  ;;  %v4136_v61 = vadd.f32 1.0, %v7408_v51  ;;  %v6966_v16 = vmul.f32 -1.442695, %v10202_v33  ;;  %v10224_v51 = vadd.f32 %v9722_v36, %v1213_v38  ;;  %v2334_v33 = vpop.f32.mrf.mxu0 }
 0x18c   : > { %v7412_v43 = vpop.eup %7411  ;;  %7437 = vpow2.f32 %v6967_v60  ;;  %v6830_v36 = vmul.f32 -1.442695, %v10216_v8 }
 0x18d   : > { %v10210_v28 = vpop.eup %7413  ;;  %7439 = vrcp.f32 %v4000_v26  ;;  %v4001_v1 = vadd.f32 1.0, %v7412_v43  ;;  %v6829_v26 = vmul.f32 -1.442695, %v10208_v32  ;;  %13832 = vst [vmem:[#allocation76_spill] sm:$0xff] %v10224_v51  ;;  %v10240_v43 = vadd.f32 %v9752_v11, %v1213_v38  ;;  %v13838_v32 = vld [vmem:[#allocation85_spill] sm:$0xff] }
 0x18e   : > { %13829 = vst [vmem:[#allocation161_spill] sm:$0xff] %v10210_v28  ;;  %v7416_v25 = vpop.eup %7415  ;;  %7441 = vpow2.f32 %v6968_v58  ;;  %v4917_v28 = vmul.f32 %v9881_v31, %v13831_v9  ;;  %v1208_v58 = vpop.permute.xlu0 %1207  ;;  %v6971_v38 = vmul.f32 -1.442695, %v10224_v51  ;;  %v10260_v48 = vmul.f32 %v9978_v2, %v13838_v32  ;;  %v13843_v32 = vld [vmem:[#allocation89_spill] sm:$0xff] }
 0x18f   : > { %v10218_v60 = vpop.eup %7417  ;;  %7443 = vrcp.f32 %v4135_v21  ;;  %v10234_v21 = vpop.f32.mrf.mxu1  ;;  %v4002_v31 = vadd.f32 1.0, %v7416_v25  ;;  %13833 = vst [vmem:[#allocation163_spill] sm:$0xff] %v10240_v43  ;;  %v10247_v18 = vadd.f32 %v9666_v49, %v1208_v58  ;;  %v13837_v25 = vld [vmem:[#allocation83_spill] sm:$0xff] }
 0x190   : > { %v7420_v55 = vpop.eup %7419  ;;  %7445 = vpow2.f32 %v6965_v27  ;;  %v4920_v27 = vmul.f32 %v9927_v35, %v9631_v14  ;;  %v13836_v14 = vld [vmem:[#allocation82_spill] sm:$0xff]  ;;  %v10255_v11 = vmul.f32 %v9965_v10, %v13837_v25  ;;  %v2336_v25 = vpop.f32.mrf.mxu0  ;;  %v5401_v51 = vadd.f32 %v4918_v62, %v4917_v28 }
 0x191   : > { %v10226_v47 = vpop.eup %7421  ;;  %7447 = vrcp.f32 %v4136_v61  ;;  %v4139_v42 = vadd.f32 1.0, %v7420_v55  ;;  %13834 = vst [vmem:[#allocation164_spill] sm:$0xff] %v10247_v18  ;;  %v4922_v35 = vmul.f32 %v9956_v3, %v13836_v14  ;;  %v10262_v56 = vpop.f32.mrf.mxu1  ;;  %v13842_v14 = vld [vmem:[#allocation88_spill] sm:$0xff] }
 0x192   : > { %v7424_v9 = vpop.eup %7423  ;;  %7449 = vpow2.f32 %v6966_v16  ;;  %v10271_v10 = vmul.f32 %v9987_v46, %v13842_v14  ;;  %v13845_v46 = vld [vmem:[#allocation91_spill] sm:$0xff]  ;;  %v13846_v14 = vld [vmem:[#allocation93_spill] sm:$0xff]  ;;  %5402 = vadd.xlane.f32.xlu1 %v5401_v51  ;;  %v10310_v51 = vmul.f32 %v10039_v15, %v9797_v63  ;;  %v5404_v15 = vadd.f32 %v4920_v27, %v10232_v6  ;;  %v1218_v27 = vpop.permute.xlu0 %1217 }
 0x193   : > { %v10242_v7 = vpop.eup %7425  ;;  %7451 = vrcp.f32 %v4001_v1  ;;  %v4140_v49 = vadd.f32 1.0, %v7424_v9  ;;  %v13839_v1 = vld [vmem:[#allocation86_spill] sm:$0xff]  ;;  %v10290_v28 = vmul.f32 %v10012_v12, %v13846_v14  ;;  %v10306_v12 = vmul.f32 %v10028_v45, %v9784_v34  ;;  %v13849_v34 = vld [vmem:[#allocation99_spill] sm:$0xff] }
 0x194   : > { %v10249_v61 = vpop.eup %7427  ;;  %7453 = vpow2.f32 %v6829_v26  ;;  %v10265_v55 = vadd.f32 %v13839_v1, %v1208_v58  ;;  %v6972_v26 = vmul.f32 -1.442695, %v10240_v43  ;;  %v6969_v58 = vmul.f32 -1.442695, %v10247_v18  ;;  %5405 = vadd.xlane.f32.xlu0 %v5404_v15  ;;  %v13857_v15 = vld [vmem:[#allocation95_spill] sm:$0xff] }
 0x195   : > { %13835 = vst [vmem:[#allocation165_spill] sm:$0xff] %v10249_v61  ;;  %v7430_v16 = vpop.eup %7429  ;;  %7455 = vrcp.f32 %v4002_v31  ;;  %v10276_v61 = vmul.f32 %v9996_v0, %v13843_v32  ;;  %v13844_v31 = vld [vmem:[#allocation7_spill] sm:$0xff]  ;;  %v1223_v0 = vpop.permute.xlu1 %1222  ;;  %v10294_v32 = vmul.f32 %v10021_v19, %v9767_v44  ;;  %v10324_v45 = vmul.f32 %v10053_v22, %v13849_v34 }
 0x196   : > { %13840 = vst [vmem:[#allocation82_spill] sm:$0xff] %v10265_v55  ;;  %v10267_v3 = vpop.eup %7431  ;;  %7457 = vpow2.f32 %v6830_v36  ;;  %v10280_v9 = vadd.f32 %v2334_v33, %v13844_v31  ;;  %v10286_v36 = vmul.f32 %v10003_v23, %v13845_v46  ;;  %v4003_v62 = vadd.f32 1.0, %v7430_v16  ;;  %v10296_v33 = vpop.f32.mrf.mxu1 }
 0x197   : > { %13841 = vst [vmem:[#allocation83_spill] sm:$0xff] %v10267_v3  ;;  %v7434_v2 = vpop.eup %7433  ;;  %7459 = vrcp.f32 %v4139_v42  ;;  %v6970_v18 = vmul.f32 -1.442695, %v10265_v55  ;;  %v10300_v23 = vadd.f32 %v2336_v25, %v13844_v31  ;;  %v10337_v22 = vmul.f32 %v10064_v20, %v9840_v37  ;;  %v13852_v31 = vld [vmem:[#allocation101_spill] sm:$0xff]  ;;  %v2340_v20 = vpop.f32.mrf.mxu0 }
 0x198   : > { %v10282_v1 = vpop.eup %7435  ;;  %7461 = vpow2.f32 %v6971_v38  ;;  %v4004_v44 = vadd.f32 1.0, %v7434_v2  ;;  %v10314_v38 = vmul.f32 %v10046_v5, %v9808_v53  ;;  %v6831_v16 = vmul.f32 -1.442695, %v10280_v9  ;;  %v10327_v2 = vpop.f32.mrf.mxu1  ;;  %v13873_v55 = vld [vmem:[#allocation149_spill] sm:$0xff] }
 0x199   : > { %v7438_v42 = vpop.eup %7437  ;;  %7463 = vrcp.f32 %v4140_v49  ;;  %v10318_v49 = vadd.f32 %v9829_v17, %v1223_v0  ;;  %v6832_v53 = vmul.f32 -1.442695, %v10300_v23  ;;  %v10331_v5 = vadd.f32 %v9857_v59, %v1223_v0 }
 0x19a   : > { %v10302_v46 = vpop.eup %7439  ;;  %7465 = vpow2.f32 %v6972_v26  ;;  %v4143_v63 = vadd.f32 1.0, %v7438_v42  ;;  %v5407_v17 = vadd.f32 %v4922_v35, %v4921_v13  ;;  %v10341_v14 = vmul.f32 %v10071_v39, %v13852_v31  ;;  %v13854_v35 = vld [vmem:[#allocation106_spill] sm:$0xff]  ;;  %v13855_v42 = vld [vmem:[#allocation108_spill] sm:$0xff] }
 0x19b   : > { %v7442_v19 = vpop.eup %7441  ;;  %7467 = vpow2.f32 %v6969_v58  ;;  %13847 = vst [vmem:[#allocation85_spill] sm:$0xff] %v10318_v49  ;;  %13850 = vst [vmem:[#allocation88_spill] sm:$0xff] %v10331_v5  ;;  %v10349_v13 = vmul.f32 %v10087_v54, %v9879_v4  ;;  %v6975_v37 = vmul.f32 -1.442695, %v10318_v49  ;;  %v10356_v0 = vmul.f32 %v10095_v50, %v13854_v35  ;;  %v13856_v4 = vld [vmem:[#allocation110_spill] sm:$0xff] }
 0x19c   : > { %v10320_v25 = vpop.eup %7443  ;;  %7469 = vrcp.f32 %v4003_v62  ;;  %v4144_v6 = vadd.f32 1.0, %v7442_v19  ;;  %v13853_v62 = vld [vmem:[#allocation103_spill] sm:$0xff]  ;;  %5408 = vadd.xlane.f32.xlu1 %v5407_v17  ;;  %v10364_v54 = vmul.f32 %v10109_v41, %v13856_v4  ;;  %v6976_v34 = vmul.f32 -1.442695, %v10331_v5  ;;  %v13872_v49 = vld [vmem:[#allocation122_spill] sm:$0xff] }
 0x19d   : > { %13848 = vst [vmem:[#allocation86_spill] sm:$0xff] %v10320_v25  ;;  %v7446_v26 = vpop.eup %7445  ;;  %7471 = vpow2.f32 %v6970_v18  ;;  %v10345_v59 = vmul.f32 %v10079_v52, %v13853_v62  ;;  %v10370_v17 = vadd.f32 %v13857_v15, %v1218_v27  ;;  %v10380_v31 = vmul.f32 %v10116_v24, %v9933_v57  ;;  %v13859_v62 = vld [vmem:[#allocation97_spill] sm:$0xff]  ;;  %v13865_v24 = vld [vmem:[#allocation116_spill] sm:$0xff] }
 0x19e   : > { %v10333_v58 = vpop.eup %7447  ;;  %7473 = vrcp.f32 %v4004_v44  ;;  %v10360_v44 = vmul.f32 %v10100_v30, %v13855_v42  ;;  %v4141_v52 = vadd.f32 1.0, %v7446_v26  ;;  %v5413_v26 = vadd.f32 %v10276_v61, %v10271_v10  ;;  %v2342_v42 = vpop.f32.mrf.mxu0  ;;  %v13864_v61 = vld [vmem:[#allocation10_spill] sm:$0xff]  ;;  %v13866_v10 = vld [vmem:[#allocation144_spill] sm:$0xff] }
 0x19f   : > { %13851 = vst [vmem:[#allocation89_spill] sm:$0xff] %v10333_v58  ;;  %v7450_v18 = vpop.eup %7449  ;;  %7475 = vpow2.f32 %v6831_v16  ;;  %v10366_v16 = vpop.f32.mrf.mxu1  ;;  %13858 = vst [vmem:[#allocation7_spill] sm:$0xff] %v10370_v17  ;;  %v10383_v35 = vadd.f32 %v13859_v62, %v1218_v27  ;;  %v13867_v27 = vld [vmem:[#allocation117_spill] sm:$0xff] }
 0x1a0   : > { %v10352_v39 = vpop.eup %7451  ;;  %7477 = vrcp.f32 %v4143_v63  ;;  %v4142_v30 = vadd.f32 1.0, %v7450_v18  ;;  %v5410_v63 = vadd.f32 %v10260_v48, %v10255_v11  ;;  %v13863_v18 = vld [vmem:[#allocation142_spill] sm:$0xff]  ;;  %v10392_v48 = vadd.f32 %v2340_v20, %v13864_v61  ;;  %5414 = vadd.xlane.f32.xlu1 %v5413_v26  ;;  %v13870_v20 = vld [vmem:[#allocation119_spill] sm:$0xff] }
 0x1a1   : > { %v7454_v19 = vpop.eup %7453  ;;  %7479 = vpow2.f32 %v6832_v53  ;;  %13860 = vst [vmem:[#allocation91_spill] sm:$0xff] %v10383_v35  ;;  %v10402_v5 = vpop.f32.mrf.mxu1 }
 0x1a2   : > { %v10372_v50 = vpop.eup %7455  ;;  %7481 = vrcp.f32 %v4144_v6  ;;  %v4005_v53 = vadd.f32 1.0, %v7454_v19  ;;  %v13862_v6 = vld [vmem:[#allocation113_spill] sm:$0xff]  ;;  %5411 = vadd.xlane.f32.xlu0 %v5410_v63  ;;  %v13871_v63 = vld [vmem:[#allocation146_spill] sm:$0xff] }
 0x1a3   : > { %v7458_v41 = vpop.eup %7457  ;;  %7483 = vpow2.f32 %v6975_v37  ;;  %v10389_v15 = vmul.f32 %v13863_v18, %v13862_v6  ;;  %v10396_v37 = vmul.f32 %v13866_v10, %v13865_v24  ;;  %v13868_v19 = vld [vmem:[#allocation145_spill] sm:$0xff]  ;;  %v10409_v26 = vmul.f32 %v13871_v63, %v13870_v20  ;;  %v13876_v63 = vld [vmem:[#allocation150_spill] sm:$0xff] }
 0x1a4   : > { %v10385_v4 = vpop.eup %7459  ;;  %7485 = vrcp.f32 %v4141_v52  ;;  %v4006_v11 = vadd.f32 1.0, %v7458_v41  ;;  %v10400_v62 = vmul.f32 %v13868_v19, %v13867_v27  ;;  %v6973_v52 = vmul.f32 -1.442695, %v10370_v17  ;;  %v1233_v41 = vpop.permute.xlu1 %1232 }
 0x1a5   : > { %13861 = vst [vmem:[#allocation93_spill] sm:$0xff] %v10385_v4  ;;  %v7462_v57 = vpop.eup %7461  ;;  %7487 = vpow2.f32 %v6976_v34  ;;  %v10412_v24 = vadd.f32 %v2342_v42, %v13864_v61  ;;  %v6974_v27 = vmul.f32 -1.442695, %v10383_v35  ;;  %v5416_v34 = vadd.f32 %v10290_v28, %v10286_v36  ;;  %v13874_v42 = vld [vmem:[#allocation114_spill] sm:$0xff]  ;;  %v13877_v36 = vld [vmem:[#allocation124_spill] sm:$0xff] }
 0x1a6   : > { %v10405_v6 = vpop.eup %7463  ;;  %7489 = vrcp.f32 %v4142_v30  ;;  %v4147_v18 = vadd.f32 1.0, %v7462_v57  ;;  %v5419_v19 = vadd.f32 %v10306_v12, %v10294_v32  ;;  %v10421_v20 = vmul.f32 %v13873_v55, %v13872_v49  ;;  %v13875_v57 = vld [vmem:[#allocation123_spill] sm:$0xff]  ;;  %v10437_v32 = vpop.f32.mrf.mxu1  ;;  %v13883_v4 = vld [vmem:[#allocation154_spill] sm:$0xff] }
 0x1a7   : > { %13869 = vst [vmem:[#allocation99_spill] sm:$0xff] %v10405_v6  ;;  %v7466_v10 = vpop.eup %7465  ;;  %7491 = vrcp.f32 %v4005_v53  ;;  %v6833_v30 = vmul.f32 -1.442695, %v10392_v48  ;;  %v10425_v61 = vadd.f32 %v13874_v42, %v1233_v41  ;;  %v10431_v35 = vmul.f32 %v13876_v63, %v13875_v57  ;;  %5417 = vadd.xlane.f32.xlu0 %v5416_v34  ;;  %v13878_v49 = vld [vmem:[#allocation127_spill] sm:$0xff]  ;;  %v13880_v57 = vld [vmem:[#allocation118_spill] sm:$0xff]  ;;  %v1228_v6 = vpop.permute.xlu0 %1227 }
 0x1a8   : > { %v7468_v17 = vpop.eup %7467  ;;  %7493 = vrcp.f32 %v4006_v11  ;;  %v10435_v28 = vmul.f32 %v10162_v29, %v13877_v36  ;;  %v4148_v55 = vadd.f32 1.0, %v7466_v10  ;;  %5420 = vadd.xlane.f32.xlu1 %v5419_v19  ;;  %v13879_v11 = vld [vmem:[#allocation152_spill] sm:$0xff]  ;;  %v6834_v43 = vmul.f32 -1.442695, %v10412_v24  ;;  %v13885_v34 = vld [vmem:[#allocation155_spill] sm:$0xff] }
 0x1a9   : > { %v10427_v53 = vpop.eup %7469  ;;  %7495 = vpow2.f32 %v6973_v52  ;;  %v10441_v42 = vmul.f32 %v13879_v11, %v13878_v49  ;;  %v10445_v63 = vadd.f32 %v13880_v57, %v1233_v41  ;;  %v13882_v36 = vld [vmem:[#allocation128_spill] sm:$0xff]  ;;  %v13884_v52 = vld [vmem:[#allocation130_spill] sm:$0xff]  ;;  %v4145_v58 = vadd.f32 1.0, %v7468_v17  ;;  %v2344_v49 = vpop.f32.mrf.mxu0 }
 0x1aa   : > { %v7472_v12 = vpop.eup %7471  ;;  %7497 = vrcp.f32 %v4147_v18  ;;  %v10451_v10 = vmul.f32 %v13883_v4, %v13882_v36  ;;  %v10455_v19 = vmul.f32 %v13885_v34, %v13884_v52  ;;  %v6979_v11 = vmul.f32 -1.442695, %v10425_v61  ;;  %v13886_v4 = vld [vmem:[#allocation132_spill] sm:$0xff]  ;;  %v13887_v36 = vld [vmem:[#allocation158_spill] sm:$0xff]  ;;  %v13888_v52 = vld [vmem:[#allocation105_spill] sm:$0xff] }
 0x1ab   : > { %13881 = vst [vmem:[#allocation101_spill] sm:$0xff] %v10445_v63  ;;  %v10447_v29 = vpop.eup %7473  ;;  %7499 = vpow2.f32 %v6974_v27  ;;  %v5422_v41 = vadd.f32 %v10314_v38, %v10310_v51  ;;  %v5425_v57 = vadd.f32 %v10337_v22, %v10324_v45  ;;  %v10466_v3 = vmul.f32 %v13887_v36, %v13886_v4  ;;  %v10468_v27 = vpop.f32.mrf.mxu1  ;;  %v13892_v36 = vld [vmem:[#allocation9_spill] sm:$0xff] }
 0x1ac   : > { %v7476_v18 = vpop.eup %7475  ;;  %7501 = vpow2.f32 %v6833_v30  ;;  %v4146_v17 = vadd.f32 1.0, %v7472_v12  ;;  %v10471_v30 = vadd.f32 %v13888_v52, %v1228_v6  ;;  %v6980_v51 = vmul.f32 -1.442695, %v10445_v63  ;;  %v13890_v12 = vld [vmem:[#allocation111_spill] sm:$0xff] }
 0x1ad   : > { %v10462_v25 = vpop.eup %7477  ;;  %7503 = vrcp.f32 %v4148_v55  ;;  %5423 = vadd.xlane.f32.xlu0 %v5422_v41  ;;  %5426 = vadd.xlane.f32.xlu1 %v5425_v57  ;;  %v5428_v38 = vadd.f32 %v10345_v59, %v10341_v14  ;;  %v5431_v45 = vadd.f32 %v10356_v0, %v10349_v13  ;;  %v4007_v55 = vadd.f32 1.0, %v7476_v18  ;;  %v1243_v57 = vpop.permute.xlu1 %1242  ;;  %v13894_v0 = vld [vmem:[#allocation159_spill] sm:$0xff] }
 0x1ae   : > { %13889 = vst [vmem:[#allocation103_spill] sm:$0xff] %v10471_v30  ;;  %v7480_v34 = vpop.eup %7479  ;;  %7505 = vpow2.f32 %v6834_v43  ;;  %v10481_v4 = vadd.f32 %v13890_v12, %v1228_v6  ;;  %v10484_v52 = vadd.f32 %v2344_v49, %v13892_v36  ;;  %v2346_v43 = vpop.f32.mrf.mxu0  ;;  %v5434_v14 = vadd.f32 %v10364_v54, %v10360_v44 }
 0x1af   : > { %v10478_v22 = vpop.eup %7481  ;;  %7507 = vrcp.f32 %v4145_v58  ;;  %v4008_v41 = vadd.f32 1.0, %v7480_v34  ;;  %v5437_v59 = vadd.f32 %v10389_v15, %v10380_v31  ;;  %v13893_v58 = vld [vmem:[#allocation133_spill] sm:$0xff]  ;;  %v10494_v18 = vpop.f32.mrf.mxu1  ;;  %v6977_v12 = vmul.f32 -1.442695, %v10471_v30  ;;  %v13895_v15 = vld [vmem:[#allocation135_spill] sm:$0xff] }
 0x1b0   : > { %13891 = vst [vmem:[#allocation106_spill] sm:$0xff] %v10481_v4  ;;  %v7484_v63 = vpop.eup %7483  ;;  %7509 = vpow2.f32 %v6979_v11  ;;  %v4953_v6 = vmul.f32 %v13894_v0, %v13893_v58  ;;  %v10498_v11 = vadd.f32 %v2346_v43, %v13892_v36  ;;  %v5440_v44 = vadd.f32 %v10400_v62, %v10396_v37 }
 0x1b1   : > { %v10490_v13 = vpop.eup %7485  ;;  %7511 = vrcp.f32 %v4146_v17  ;;  %v4151_v49 = vadd.f32 1.0, %v7484_v63  ;;  %5429 = vadd.xlane.f32.xlu0 %v5428_v38  ;;  %5432 = vadd.xlane.f32.xlu1 %v5431_v45  ;;  %v5443_v54 = vadd.f32 %v10421_v20, %v10409_v26  ;;  %v4954_v63 = vmul.f32 %v10204_v40, %v13895_v15  ;;  %v13898_v38 = vld [vmem:[#allocation138_spill] sm:$0xff]  ;;  %v10522_v20 = vpop.f32.mrf.mxu1 }
 0x1b2   : > { %v7488_v34 = vpop.eup %7487  ;;  %7513 = vpow2.f32 %v6980_v51  ;;  %v6978_v17 = vmul.f32 -1.442695, %v10481_v4  ;;  %v13896_v51 = vld [vmem:[#allocation162_spill] sm:$0xff]  ;;  %v4956_v45 = vmul.f32 %v10218_v60, %v13898_v38  ;;  %v6835_v37 = vmul.f32 -1.442695, %v10484_v52  ;;  %v13900_v60 = vld [vmem:[#allocation137_spill] sm:$0xff] }
 0x1b3   : > { %v10504_v31 = vpop.eup %7489  ;;  %7515 = vrcp.f32 %v4007_v55  ;;  %v10510_v58 = vadd.f32 %v13896_v51, %v1243_v57  ;;  %v10518_v62 = vadd.f32 %v10234_v21, %v1243_v57  ;;  %v4152_v40 = vadd.f32 1.0, %v7488_v34  ;;  %v1238_v57 = vpop.permute.xlu0 %1237  ;;  %v13912_v4 = vld [vmem:[#allocation148_spill] sm:$0xff] }
 0x1b4   : > { %v10512_v36 = vpop.eup %7491  ;;  %7517 = vrcp.f32 %v4008_v41  ;;  %v5446_v55 = vadd.f32 %v10435_v28, %v10431_v35  ;;  %v5449_v43 = vadd.f32 %v10451_v10, %v10441_v42  ;;  %v13901_v41 = vld [vmem:[#allocation161_spill] sm:$0xff]  ;;  %v6836_v21 = vmul.f32 -1.442695, %v10498_v11  ;;  %v2350_v51 = vpop.f32.mrf.mxu0 }
 0x1b5   : > { %13897 = vst [vmem:[#allocation108_spill] sm:$0xff] %v10510_v58  ;;  %13899 = vst [vmem:[#allocation110_spill] sm:$0xff] %v10518_v62  ;;  %v10520_v26 = vpop.eup %7493  ;;  %7519 = vrcp.f32 %v4151_v49  ;;  %v4955_v15 = vmul.f32 %v13901_v41, %v13900_v60  ;;  %5435 = vadd.xlane.f32.xlu0 %v5434_v14  ;;  %5438 = vadd.xlane.f32.xlu1 %v5437_v59  ;;  %v6983_v34 = vmul.f32 -1.442695, %v10510_v58  ;;  %v10538_v38 = vpop.f32.mrf.mxu1  ;;  %v6984_v14 = vmul.f32 -1.442695, %v10518_v62 }
 0x1b6   : > { %v7496_v0 = vpop.eup %7495  ;;  %7521 = vpow2.f32 %v6977_v12  ;;  %v5452_v35 = vadd.f32 %v10466_v3, %v10455_v19  ;;  %v5455_v28 = vadd.f32 %v4954_v63, %v4953_v6  ;;  %v13902_v59 = vld [vmem:[#allocation156_spill] sm:$0xff]  ;;  %v2352_v58 = vpop.f32.mrf.mxu0  ;;  %v4962_v30 = vmul.f32 %v10372_v50, %v13912_v4  ;;  %v13916_v50 = vld [vmem:[#allocation6_spill] sm:$0xff] }
 0x1b7   : > { %v10531_v49 = vpop.eup %7497  ;;  %7523 = vpow2.f32 %v6978_v17  ;;  %v10536_v10 = vadd.f32 %v4956_v45, %v4955_v15  ;;  %v10542_v60 = vadd.f32 %v13902_v59, %v1238_v57  ;;  %v4149_v19 = vadd.f32 1.0, %v7496_v0  ;;  %v13904_v6 = vld [vmem:[#allocation12_spill] sm:$0xff]  ;;  %v1253_v62 = vpop.permute.xlu1 %1252 }
 0x1b8   : > { %v7500_v42 = vpop.eup %7499  ;;  %7525 = vpow2.f32 %v6835_v37  ;;  %v10547_v63 = vadd.f32 %v2350_v51, %v13904_v6  ;;  %v13905_v15 = vld [vmem:[#allocation160_spill] sm:$0xff]  ;;  %v4961_v4 = vmul.f32 %v10352_v39, %v13916_v50 }
 0x1b9   : > { %v7502_v12 = vpop.eup %7501  ;;  %7527 = vrcp.f32 %v4152_v40  ;;  %13903 = vst [vmem:[#allocation95_spill] sm:$0xff] %v10542_v60  ;;  %5441 = vadd.xlane.f32.xlu0 %v5440_v44  ;;  %5444 = vadd.xlane.f32.xlu1 %v5443_v54  ;;  %v4150_v37 = vadd.f32 1.0, %v7500_v42  ;;  %v10552_v59 = vadd.f32 %v13905_v15, %v1238_v57  ;;  %v6981_v44 = vmul.f32 -1.442695, %v10542_v60  ;;  %v13910_v15 = vld [vmem:[#allocation4_spill] sm:$0xff] }
 0x1ba   : > { %v10544_v17 = vpop.eup %7503  ;;  %v4009_v41 = vadd.f32 1.0, %v7502_v12  ;;  %7529 = vpow2.f32 %v6836_v21  ;;  %v10554_v21 = vpop.f32.mrf.mxu1  ;;  %v10558_v54 = vadd.f32 %v2352_v58, %v13904_v6  ;;  %v6837_v57 = vmul.f32 -1.442695, %v10547_v63 }
 0x1bb   : > { %v7506_v3 = vpop.eup %7505  ;;  %7531 = vpow2.f32 %v6983_v34  ;;  %13906 = vst [vmem:[#allocation97_spill] sm:$0xff] %v10552_v59  ;;  %v10564_v42 = vadd.f32 %v10327_v2, %v1253_v62  ;;  %v6982_v58 = vmul.f32 -1.442695, %v10552_v59  ;;  %v1248_v6 = vpop.permute.xlu0 %1247  ;;  %v13911_v59 = vld [vmem:[#allocation141_spill] sm:$0xff] }
 0x1bc   : > { %v10549_v45 = vpop.eup %7507  ;;  %7533 = vrcp.f32 %v4009_v41  ;;  %v4010_v40 = vadd.f32 1.0, %v7506_v3  ;;  %v4960_v60 = vmul.f32 %v10302_v46, %v13911_v59  ;;  %v1263_v50 = vpop.permute.xlu1 %1262 }
 0x1bd   : > { %v7510_v12 = vpop.eup %7509  ;;  %7535 = vpow2.f32 %v6984_v14  ;;  %5447 = vadd.xlane.f32.xlu0 %v5446_v55  ;;  %5450 = vadd.xlane.f32.xlu1 %v5449_v43  ;;  %13907 = vst [vmem:[#allocation113_spill] sm:$0xff] %v10564_v42  ;;  %v13908_v14 = vld [vmem:[#allocation140_spill] sm:$0xff]  ;;  %v10573_v55 = vpop.f32.mrf.mxu1  ;;  %v6838_v43 = vmul.f32 -1.442695, %v10558_v54 }
 0x1be   : > { %v10560_v0 = vpop.eup %7511  ;;  %7537 = vrcp.f32 %v4010_v40  ;;  %v4155_v51 = vadd.f32 1.0, %v7510_v12  ;;  %v4958_v3 = vmul.f32 %v10242_v7, %v13908_v14  ;;  %v4957_v12 = vmul.f32 %v10226_v47, %v13910_v15 }
 0x1bf   : > { %v7514_v34 = vpop.eup %7513  ;;  %7539 = vrcp.f32 %v4149_v19  ;;  %v10577_v19 = vadd.f32 %v10366_v16, %v1253_v62  ;;  %v10587_v16 = vadd.f32 %v10262_v56, %v1248_v6  ;;  %v10592_v47 = vadd.f32 %v10296_v33, %v1248_v6  ;;  %v10596_v46 = vpop.f32.mrf.mxu1  ;;  %v13915_v56 = vld [vmem:[#allocation11_spill] sm:$0xff]  ;;  %v13917_v33 = vld [vmem:[#allocation153_spill] sm:$0xff] }
 0x1c0   : > { %v10566_v41 = vpop.eup %7515  ;;  %7541 = vrcp.f32 %v4150_v37  ;;  %v4156_v7 = vadd.f32 1.0, %v7514_v34  ;;  %v2354_v37 = vpop.f32.mrf.mxu0  ;;  %v4966_v6 = vmul.f32 %v10520_v26, %v10216_v8 }
 0x1c1   : > { %v10571_v40 = vpop.eup %7517  ;;  %7543 = vpow2.f32 %v6981_v44  ;;  %13909 = vst [vmem:[#allocation142_spill] sm:$0xff] %v10577_v19  ;;  %5453 = vadd.xlane.f32.xlu0 %v5452_v35  ;;  %5456 = vadd.xlane.f32.xlu1 %v5455_v28  ;;  %v6987_v44 = vmul.f32 -1.442695, %v10564_v42  ;;  %13913 = vst [vmem:[#allocation10_spill] sm:$0xff] %v10592_v47  ;;  %v5461_v35 = vadd.f32 %v4958_v3, %v4957_v12  ;;  %v6988_v59 = vmul.f32 -1.442695, %v10577_v19 }
 0x1c2   : > { %v10579_v2 = vpop.eup %7519  ;;  %7545 = vrcp.f32 %v4155_v51  ;;  %v13914_v51 = vld [vmem:[#allocation3_spill] sm:$0xff]  ;;  %v4964_v3 = vmul.f32 %v10447_v29, %v13917_v33  ;;  %v2356_v12 = vpop.f32.mrf.mxu0  ;;  %v5467_v42 = vadd.f32 %v4962_v30, %v4961_v4  ;;  %v6985_v8 = vmul.f32 -1.442695, %v10587_v16 }
 0x1c3   : > { %v7522_v14 = vpop.eup %7521  ;;  %7547 = vpow2.f32 %v6837_v57  ;;  %v4959_v34 = vmul.f32 %v10282_v1, %v13914_v51  ;;  %v10600_v57 = vadd.f32 %v2354_v37, %v13915_v56 }
 0x1c4   : > { %v7524_v62 = vpop.eup %7523  ;;  %7549 = vpow2.f32 %v6982_v58 }
 0x1c5   : > { %v7526_v28 = vpop.eup %7525  ;;  %7551 = vpow2.f32 %v6838_v43  ;;  %5459 = vadd.xlane.f32.xlu0 %v10536_v10  ;;  %5462 = vadd.xlane.f32.xlu1 %v5461_v35  ;;  %v4153_v43 = vadd.f32 1.0, %v7522_v14  ;;  %v5464_v37 = vadd.f32 %v4960_v60, %v4959_v34  ;;  %v4154_v19 = vadd.f32 1.0, %v7524_v62  ;;  %v10613_v35 = vpop.f32.mrf.mxu1  ;;  %v13919_v14 = vld [vmem:[#allocation8_spill] sm:$0xff] }
 0x1c6   : > { %v10602_v15 = vpop.eup %7527  ;;  %7553 = vrcp.f32 %v4156_v7  ;;  %v4011_v58 = vadd.f32 1.0, %v7526_v28  ;;  %v13918_v7 = vld [vmem:[#allocation5_spill] sm:$0xff]  ;;  %v4965_v60 = vmul.f32 %v10512_v36, %v13919_v14  ;;  %v10620_v62 = vadd.f32 %v2356_v12, %v13915_v56 }
 0x1c7   : > { %v7530_v1 = vpop.eup %7529  ;;  %7555 = vpow2.f32 %v6987_v44  ;;  %v4963_v28 = vmul.f32 %v10427_v53, %v13918_v7  ;;  %v6986_v44 = vmul.f32 -1.442695, %v10592_v47  ;;  %v6839_v53 = vmul.f32 -1.442695, %v10600_v57 }
 0x1c8   : > { %v7532_v51 = vpop.eup %7531  ;;  %7557 = vrcp.f32 %v4011_v58  ;;  %v4012_v39 = vadd.f32 1.0, %v7530_v1  ;;  %v10624_v34 = vadd.f32 %v10468_v27, %v1263_v50  ;;  %v4968_v36 = vmul.f32 %v10571_v40, %v10300_v23  ;;  %v10633_v1 = vpop.f32.mrf.mxu1 }
 0x1c9   : > { %v7534_v29 = vpop.eup %7533  ;;  %v4159_v10 = vadd.f32 1.0, %v7532_v51  ;;  %7559 = vpow2.f32 %v6988_v59  ;;  %5465 = vadd.xlane.f32.xlu0 %v5464_v37  ;;  %5468 = vadd.xlane.f32.xlu1 %v5467_v42  ;;  %v5470_v59 = vadd.f32 %v4964_v3, %v4963_v28  ;;  %v5473_v56 = vadd.f32 %v4966_v6, %v4965_v60 }
 0x1ca   : > { %v7536_v26 = vpop.eup %7535  ;;  %7561 = vrcp.f32 %v4012_v39  ;;  %13920 = vst [vmem:[#allocation116_spill] sm:$0xff] %v10624_v34  ;;  %v4967_v3 = vmul.f32 %v10566_v41, %v10280_v9  ;;  %v4969_v12 = vmul.f32 %v7534_v29, %v10392_v48  ;;  %v6840_v23 = vmul.f32 -1.442695, %v10620_v62  ;;  %v10645_v48 = vpop.f32.mrf.mxu1 }
 0x1cb   : > { %v7538_v30 = vpop.eup %7537  ;;  %7563 = vrcp.f32 %v4153_v43  ;;  %v4160_v42 = vadd.f32 1.0, %v7536_v26  ;;  %v10636_v43 = vadd.f32 %v10494_v18, %v1263_v50  ;;  %v6991_v18 = vmul.f32 -1.442695, %v10624_v34  ;;  %v13923_v26 = vld [vmem:[#allocation14_spill] sm:$0xff]  ;;  %v13956_v34 = vld [vmem:[#allocation83_spill] sm:$0xff] }
 0x1cc   : > { %v10626_v4 = vpop.eup %7539  ;;  %v4970_v33 = vmul.f32 %v7538_v30, %v10412_v24  ;;  %7565 = vrcp.f32 %v4154_v19  ;;  %v2360_v24 = vpop.f32.mrf.mxu0  ;;  %v5476_v37 = vadd.f32 %v4968_v36, %v4967_v3 }
 0x1cd   : > { %v10631_v58 = vpop.eup %7541  ;;  %7567 = vrcp.f32 %v4159_v10  ;;  %13921 = vst [vmem:[#allocation144_spill] sm:$0xff] %v10636_v43  ;;  %5471 = vadd.xlane.f32.xlu0 %v5470_v59  ;;  %5474 = vadd.xlane.f32.xlu1 %v5473_v56  ;;  %v1258_v19 = vpop.permute.xlu0 %1257  ;;  %v6992_v50 = vmul.f32 -1.442695, %v10636_v43  ;;  %v10654_v14 = vadd.f32 %v2360_v24, %v13923_v26 }
 0x1ce   : > { %v7544_v27 = vpop.eup %7543  ;;  %7569 = vpow2.f32 %v6985_v8  ;;  %v5479_v51 = vadd.f32 %v4970_v33, %v4969_v12  ;;  %v10649_v29 = vadd.f32 %v10402_v5, %v1258_v19  ;;  %v2362_v7 = vpop.f32.mrf.mxu0  ;;  %v10657_v30 = vadd.f32 %v10437_v32, %v1258_v19 }
 0x1cf   : > { %v10642_v40 = vpop.eup %7545  ;;  %7571 = vpow2.f32 %v6986_v44  ;;  %v4157_v10 = vadd.f32 1.0, %v7544_v27  ;;  %v10659_v36 = vpop.f32.mrf.mxu1  ;;  %v10662_v33 = vadd.f32 %v2362_v7, %v13923_v26  ;;  %v6841_v3 = vmul.f32 -1.442695, %v10654_v14 }
 0x1d0   : > { %v7548_v6 = vpop.eup %7547  ;;  %7573 = vpow2.f32 %v6839_v53  ;;  %13922 = vst [vmem:[#allocation117_spill] sm:$0xff] %v10649_v29  ;;  %13924 = vst [vmem:[#allocation145_spill] sm:$0xff] %v10657_v30  ;;  %v1273_v53 = vpop.permute.xlu1 %1272  ;;  %v6990_v19 = vmul.f32 -1.442695, %v10657_v30 }
 0x1d1   : > { %v7550_v39 = vpop.eup %7549  ;;  %7575 = vrcp.f32 %v4160_v42  ;;  %v4013_v9 = vadd.f32 1.0, %v7548_v6  ;;  %5477 = vadd.xlane.f32.xlu0 %v5476_v37  ;;  %5480 = vadd.xlane.f32.xlu1 %v5479_v51  ;;  %v6989_v42 = vmul.f32 -1.442695, %v10649_v29  ;;  %v10667_v32 = vadd.f32 %v10554_v21, %v1273_v53  ;;  %v10677_v37 = vpop.f32.mrf.mxu1 }
 0x1d2   : > { %v7552_v41 = vpop.eup %7551  ;;  %7577 = vpow2.f32 %v6840_v23  ;;  %v4158_v44 = vadd.f32 1.0, %v7550_v39  ;;  %v10680_v51 = vadd.f32 %v10573_v55, %v1273_v53 }
 0x1d3   : > { %v10651_v28 = vpop.eup %7553  ;;  %7579 = vrcp.f32 %v4013_v9  ;;  %v4014_v8 = vadd.f32 1.0, %v7552_v41  ;;  %13925 = vst [vmem:[#allocation119_spill] sm:$0xff] %v10667_v32  ;;  %v2364_v9 = vpop.f32.mrf.mxu0 }
 0x1d4   : > { %v7556_v60 = vpop.eup %7555  ;;  %7581 = vpow2.f32 %v6991_v18  ;;  %v6842_v18 = vmul.f32 -1.442695, %v10662_v33  ;;  %13926 = vst [vmem:[#allocation146_spill] sm:$0xff] %v10680_v51  ;;  %v10689_v26 = vpop.f32.mrf.mxu1 }
 0x1d5   : > { %v7558_v5 = vpop.eup %7557  ;;  %7583 = vrcp.f32 %v4014_v8  ;;  %v4163_v59 = vadd.f32 1.0, %v7556_v60  ;;  %v6996_v8 = vmul.f32 -1.442695, %v10680_v51  ;;  %v2366_v53 = vpop.f32.mrf.mxu0 }
 0x1d6   : > { %v7560_v56 = vpop.eup %7559  ;;  %7585 = vpow2.f32 %v6992_v50  ;;  %v4971_v23 = vmul.f32 %v7558_v5, %v10484_v52  ;;  %v1268_v52 = vpop.permute.xlu0 %1267  ;;  %v6995_v50 = vmul.f32 -1.442695, %v10667_v32 }
 0x1d7   : > { %v7562_v27 = vpop.eup %7561  ;;  %7587 = vrcp.f32 %v4157_v10  ;;  %v4164_v39 = vadd.f32 1.0, %v7560_v56  ;;  %v10687_v55 = vadd.f32 %v10522_v20, %v1268_v52  ;;  %v13928_v56 = vld [vmem:[#allocation13_spill] sm:$0xff]  ;;  %v10697_v20 = vadd.f32 %v10538_v38, %v1268_v52  ;;  %v2370_v52 = vpop.f32.mrf.mxu0 }
 0x1d8   : > { %v10669_v12 = vpop.eup %7563  ;;  %v4972_v24 = vmul.f32 %v7562_v27, %v10498_v11  ;;  %7589 = vrcp.f32 %v4158_v44 }
 0x1d9   : > { %v10674_v6 = vpop.eup %7565  ;;  %7591 = vrcp.f32 %v4163_v59  ;;  %13927 = vst [vmem:[#allocation122_spill] sm:$0xff] %v10687_v55  ;;  %13929 = vst [vmem:[#allocation149_spill] sm:$0xff] %v10697_v20 }
 0x1da   : > { %v10682_v21 = vpop.eup %7567  ;;  %7593 = vpow2.f32 %v6989_v42  ;;  %v5482_v11 = vadd.f32 %v4972_v24, %v4971_v23  ;;  %v10694_v42 = vadd.f32 %v2364_v9, %v13928_v56 }
 0x1db   : > { %v7570_v41 = vpop.eup %7569  ;;  %7595 = vpow2.f32 %v6841_v3 }
 0x1dc   : > { %v7572_v7 = vpop.eup %7571  ;;  %7597 = vpow2.f32 %v6990_v19  ;;  %5483 = vadd.xlane.f32.xlu0 %v5482_v11  ;;  %v4161_v59 = vadd.f32 1.0, %v7570_v41  ;;  %v6993_v19 = vmul.f32 -1.442695, %v10687_v55  ;;  %v1283_v11 = vpop.permute.xlu1 %1282  ;;  %v6843_v38 = vmul.f32 -1.442695, %v10694_v42 }
 0x1dd   : > { %v7574_v10 = vpop.eup %7573  ;;  %7599 = vpow2.f32 %v6842_v18  ;;  %v4162_v3 = vadd.f32 1.0, %v7572_v7  ;;  %v10701_v18 = vadd.f32 %v2366_v53, %v13928_v56  ;;  %v10712_v53 = vadd.f32 %v10633_v1, %v1283_v11  ;;  %v2372_v1 = vpop.f32.mrf.mxu0 }
 0x1de   : > { %v10691_v60 = vpop.eup %7575  ;;  %7601 = vrcp.f32 %v4164_v39  ;;  %v4015_v44 = vadd.f32 1.0, %v7574_v10  ;;  %v10703_v39 = vpop.f32.mrf.mxu1 }
 0x1df   : > { %v7578_v5 = vpop.eup %7577  ;;  %7603 = vpow2.f32 %v6995_v50  ;;  %13930 = vst [vmem:[#allocation114_spill] sm:$0xff] %v10712_v53  ;;  %v6844_v56 = vmul.f32 -1.442695, %v10701_v18 }
 0x1e0   : > { %v7580_v27 = vpop.eup %7579  ;;  %7605 = vrcp.f32 %v4015_v44  ;;  %v4016_v23 = vadd.f32 1.0, %v7578_v5  ;;  %v6994_v44 = vmul.f32 -1.442695, %v10697_v20 }
 0x1e1   : > { %v7582_v24 = vpop.eup %7581  ;;  %7607 = vpow2.f32 %v6996_v8  ;;  %v4973_v8 = vmul.f32 %v7580_v27, %v10547_v63 }
 0x1e2   : > { %v7584_v41 = vpop.eup %7583  ;;  %7609 = vrcp.f32 %v4016_v23  ;;  %v4167_v9 = vadd.f32 1.0, %v7582_v24  ;;  %v10722_v24 = vadd.f32 %v10645_v48, %v1283_v11 }
 0x1e3   : > { %v7586_v50 = vpop.eup %7585  ;;  %v4974_v7 = vmul.f32 %v7584_v41, %v10558_v54  ;;  %7611 = vrcp.f32 %v4161_v59  ;;  %v10717_v54 = vpop.f32.mrf.mxu1 }
 0x1e4   : > { %v10707_v10 = vpop.eup %7587  ;;  %7613 = vrcp.f32 %v4162_v3  ;;  %v4168_v23 = vadd.f32 1.0, %v7586_v50  ;;  %13931 = vst [vmem:[#allocation123_spill] sm:$0xff] %v10722_v24  ;;  %v1278_v3 = vpop.permute.xlu0 %1277  ;;  %v7000_v48 = vmul.f32 -1.442695, %v10722_v24 }
 0x1e5   : > { %v10714_v5 = vpop.eup %7589  ;;  %7615 = vpow2.f32 %v6993_v19  ;;  %v5485_v63 = vadd.f32 %v4974_v7, %v4973_v8  ;;  %v6999_v19 = vmul.f32 -1.442695, %v10712_v53  ;;  %v10725_v55 = vpop.f32.mrf.mxu1  ;;  %v10729_v11 = vadd.f32 %v10596_v46, %v1278_v3 }
 0x1e6   : > { %v10719_v59 = vpop.eup %7591  ;;  %7617 = vrcp.f32 %v4167_v9  ;;  %v10734_v8 = vadd.f32 %v10613_v35, %v1278_v3 }
 0x1e7   : > { %v7594_v27 = vpop.eup %7593  ;;  %7619 = vpow2.f32 %v6843_v38  ;;  %5486 = vadd.xlane.f32.xlu1 %v5485_v63  ;;  %13932 = vst [vmem:[#allocation150_spill] sm:$0xff] %v10729_v11  ;;  %v10739_v32 = vpop.f32.mrf.mxu1 }
 0x1e8   : > { %v7596_v41 = vpop.eup %7595  ;;  %7621 = vpow2.f32 %v6994_v44  ;;  %v4165_v7 = vadd.f32 1.0, %v7594_v27  ;;  %13933 = vst [vmem:[#allocation124_spill] sm:$0xff] %v10734_v8  ;;  %v2374_v44 = vpop.f32.mrf.mxu0 }
 0x1e9   : > { %v7598_v51 = vpop.eup %7597  ;;  %v4017_v20 = vadd.f32 1.0, %v7596_v41  ;;  %7623 = vpow2.f32 %v6844_v56  ;;  %v13934_v41 = vld [vmem:[#allocation16_spill] sm:$0xff] }
 0x1ea   : > { %v7600_v50 = vpop.eup %7599  ;;  %7625 = vrcp.f32 %v4168_v23  ;;  %v4166_v56 = vadd.f32 1.0, %v7598_v51  ;;  %v10737_v53 = vadd.f32 %v2370_v52, %v13934_v41  ;;  %v1293_v23 = vpop.permute.xlu1 %1292  ;;  %v10743_v35 = vadd.f32 %v2372_v1, %v13934_v41 }
 0x1eb   : > { %v10731_v9 = vpop.eup %7601  ;;  %7627 = vrcp.f32 %v4017_v20  ;;  %v4018_v38 = vadd.f32 1.0, %v7600_v50  ;;  %v6997_v20 = vmul.f32 -1.442695, %v10729_v11  ;;  %v6998_v51 = vmul.f32 -1.442695, %v10734_v8  ;;  %v2376_v3 = vpop.f32.mrf.mxu0 }
 0x1ec   : > { %v7604_v63 = vpop.eup %7603  ;;  %7629 = vpow2.f32 %v6999_v19  ;;  %v10747_v52 = vadd.f32 %v10689_v26, %v1293_v23  ;;  %v6846_v26 = vmul.f32 -1.442695, %v10743_v35  ;;  %v10758_v8 = vadd.f32 %v10703_v39, %v1293_v23  ;;  %v1288_v11 = vpop.permute.xlu0 %1287 }
 0x1ed   : > { %v7606_v24 = vpop.eup %7605  ;;  %7631 = vrcp.f32 %v4018_v38  ;;  %v4171_v46 = vadd.f32 1.0, %v7604_v63 }
 0x1ee   : > { %v7608_v30 = vpop.eup %7607  ;;  %7633 = vpow2.f32 %v7000_v48  ;;  %13935 = vst [vmem:[#allocation127_spill] sm:$0xff] %v10747_v52  ;;  %v4975_v50 = vmul.f32 %v7606_v24, %v10600_v57  ;;  %v6845_v48 = vmul.f32 -1.442695, %v10737_v53  ;;  %13938 = vst [vmem:[#allocation128_spill] sm:$0xff] %v10758_v8  ;;  %v1303_v43 = vpop.permute.xlu1 %1302 }
 0x1ef   : > { %v7610_v27 = vpop.eup %7609  ;;  %7635 = vrcp.f32 %v4165_v7  ;;  %v4172_v1 = vadd.f32 1.0, %v7608_v30  ;;  %v2776_v7 = vpop.f32.mrf.mxu1  ;;  %v7003_v30 = vmul.f32 -1.442695, %v10747_v52 }
 0x1f0   : > { %v10749_v19 = vpop.eup %7611  ;;  %v4976_v38 = vmul.f32 %v7610_v27, %v10620_v62  ;;  %7637 = vrcp.f32 %v4166_v56  ;;  %v10762_v62 = vpop.f32.mrf.mxu0  ;;  %v7004_v27 = vmul.f32 -1.442695, %v10758_v8 }
 0x1f1   : > { %13936 = vst [vmem:[#allocation152_spill] sm:$0xff] %v10749_v19  ;;  %v10754_v63 = vpop.eup %7613  ;;  %7639 = vrcp.f32 %v4171_v46  ;;  %v10768_v39 = vpop.f32.mrf.mxu1  ;;  %v13971_v19 = vld [vmem:[#allocation24_spill] sm:$0xff] }
 0x1f2   : > { %13937 = vst [vmem:[#allocation118_spill] sm:$0xff] %v10754_v63  ;;  %v7616_v41 = vpop.eup %7615  ;;  %7641 = vpow2.f32 %v6997_v20  ;;  %v5488_v29 = vadd.f32 %v4976_v38, %v4975_v50  ;;  %v10766_v20 = vadd.f32 %v10659_v36, %v1288_v11  ;;  %v13942_v50 = vld [vmem:[#allocation15_spill] sm:$0xff] }
 0x1f3   : > { %v10760_v57 = vpop.eup %7617  ;;  %7643 = vpow2.f32 %v6998_v51  ;;  %v10772_v51 = vadd.f32 %v10677_v37, %v1288_v11  ;;  %v10775_v38 = vadd.f32 %v2374_v44, %v13942_v50  ;;  %v10783_v37 = vadd.f32 %v2376_v3, %v13942_v50  ;;  %v10785_v11 = vpop.f32.mrf.mxu1 }
 0x1f4   : > { %13939 = vst [vmem:[#allocation154_spill] sm:$0xff] %v10760_v57  ;;  %v7620_v24 = vpop.eup %7619  ;;  %7645 = vpow2.f32 %v6845_v48  ;;  %5489 = vadd.xlane.f32.xlu0 %v5488_v29  ;;  %13940 = vst [vmem:[#allocation130_spill] sm:$0xff] %v10766_v20  ;;  %v4169_v29 = vadd.f32 1.0, %v7616_v41  ;;  %v7001_v8 = vmul.f32 -1.442695, %v10766_v20  ;;  %v13955_v57 = vld [vmem:[#allocation58_spill] sm:$0xff] }
 0x1f5   : > { %v7622_v56 = vpop.eup %7621  ;;  %7647 = vrcp.f32 %v4172_v1  ;;  %v4019_v46 = vadd.f32 1.0, %v7620_v24  ;;  %13941 = vst [vmem:[#allocation155_spill] sm:$0xff] %v10772_v51  ;;  %v10779_v24 = vpop.f32.mrf.mxu0  ;;  %v7002_v41 = vmul.f32 -1.442695, %v10772_v51  ;;  %v6848_v51 = vmul.f32 -1.442695, %v10783_v37 }
 0x1f6   : > { %v7624_v23 = vpop.eup %7623  ;;  %7649 = vpow2.f32 %v6846_v26  ;;  %v4170_v52 = vadd.f32 1.0, %v7622_v56 }
 0x1f7   : > { %v10777_v48 = vpop.eup %7625  ;;  %7651 = vrcp.f32 %v4019_v46  ;;  %v4020_v1 = vadd.f32 1.0, %v7624_v23  ;;  %v6847_v46 = vmul.f32 -1.442695, %v10775_v38  ;;  %v10794_v20 = vpop.f32.mrf.mxu0 }
 0x1f8   : > { %13943 = vst [vmem:[#allocation132_spill] sm:$0xff] %v10777_v48  ;;  %v7628_v36 = vpop.eup %7627  ;;  %7653 = vpow2.f32 %v7003_v30  ;;  %v10801_v48 = vadd.f32 %v2776_v7, %v1303_v43 }
 0x1f9   : > { %v7630_v26 = vpop.eup %7629  ;;  %7655 = vrcp.f32 %v4020_v1  ;;  %v4977_v56 = vmul.f32 %v7628_v36, %v10654_v14  ;;  %v10792_v1 = vadd.f32 %v10739_v32, %v1303_v43  ;;  %v10803_v14 = vpop.f32.mrf.mxu1 }
 0x1fa   : > { %v7632_v44 = vpop.eup %7631  ;;  %7657 = vpow2.f32 %v7004_v27  ;;  %v4175_v50 = vadd.f32 1.0, %v7630_v26  ;;  %13947 = vst [vmem:[#allocation9_spill] sm:$0xff] %v10801_v48  ;;  %v1298_v36 = vpop.permute.xlu0 %1297  ;;  %v7008_v43 = vmul.f32 -1.442695, %v10801_v48 }
 0x1fb   : > { %v7634_v23 = vpop.eup %7633  ;;  %v4978_v30 = vmul.f32 %v7632_v44, %v10662_v33  ;;  %7659 = vrcp.f32 %v4169_v29  ;;  %13944 = vst [vmem:[#allocation158_spill] sm:$0xff] %v10792_v1  ;;  %v10808_v26 = vpop.f32.mrf.mxu0  ;;  %v10812_v7 = vadd.f32 %v10717_v54, %v1298_v36  ;;  %v13952_v54 = vld [vmem:[#allocation18_spill] sm:$0xff] }
 0x1fc   : > { %v10796_v3 = vpop.eup %7635  ;;  %7661 = vrcp.f32 %v4170_v52  ;;  %v4176_v32 = vadd.f32 1.0, %v7634_v23  ;;  %v7007_v52 = vmul.f32 -1.442695, %v10792_v1 }
 0x1fd   : > { %13945 = vst [vmem:[#allocation105_spill] sm:$0xff] %v10796_v3  ;;  %v10798_v27 = vpop.eup %7637  ;;  %7663 = vpow2.f32 %v7001_v8  ;;  %v5491_v33 = vadd.f32 %v4978_v30, %v4977_v56  ;;  %13949 = vst [vmem:[#allocation159_spill] sm:$0xff] %v10812_v7  ;;  %v10814_v56 = vpop.f32.mrf.mxu1 }
 0x1fe   : > { %13946 = vst [vmem:[#allocation111_spill] sm:$0xff] %v10798_v27  ;;  %v10805_v29 = vpop.eup %7639  ;;  %7665 = vpow2.f32 %v7002_v41 }
 0x1ff   : > { %13948 = vst [vmem:[#allocation133_spill] sm:$0xff] %v10805_v29  ;;  %v7642_v44 = vpop.eup %7641  ;;  %7667 = vpow2.f32 %v6847_v46  ;;  %5492 = vadd.xlane.f32.xlu1 %v5491_v33  ;;  %v10819_v33 = vadd.f32 %v10725_v55, %v1298_v36  ;;  %v10825_v29 = vadd.f32 %v10762_v62, %v13952_v54  ;;  %v10830_v55 = vpop.f32.mrf.mxu1  ;;  %v10836_v62 = vadd.f32 %v10779_v24, %v13952_v54 }
 0x200   : > { %v7644_v8 = vpop.eup %7643  ;;  %7669 = vrcp.f32 %v4175_v50  ;;  %v4173_v30 = vadd.f32 1.0, %v7642_v44  ;;  %v10821_v50 = vpop.f32.mrf.mxu0  ;;  %v7005_v44 = vmul.f32 -1.442695, %v10812_v7 }
 0x201   : > { %v7646_v27 = vpop.eup %7645  ;;  %7671 = vpow2.f32 %v6848_v51  ;;  %13951 = vst [vmem:[#allocation162_spill] sm:$0xff] %v10819_v33  ;;  %v4174_v1 = vadd.f32 1.0, %v7644_v8  ;;  %v5092_v8 = vmul.f32 %v13956_v34, %v13955_v57  ;;  %v6849_v34 = vmul.f32 -1.442695, %v10825_v29  ;;  %v1313_v54 = vpop.permute.xlu1 %1312 }
 0x202   : > { %v10816_v41 = vpop.eup %7647  ;;  %7673 = vrcp.f32 %v4176_v32  ;;  %v4021_v46 = vadd.f32 1.0, %v7646_v27  ;;  %v13954_v32 = vld [vmem:[#allocation165_spill] sm:$0xff] }
 0x203   : > { %13950 = vst [vmem:[#allocation135_spill] sm:$0xff] %v10816_v41  ;;  %v7650_v23 = vpop.eup %7649  ;;  %7675 = vpow2.f32 %v7007_v52  ;;  %v13953_v41 = vld [vmem:[#allocation71_spill] sm:$0xff]  ;;  %v1308_v52 = vpop.permute.xlu0 %1307 }
 0x204   : > { %v7652_v51 = vpop.eup %7651  ;;  %7677 = vrcp.f32 %v4021_v46  ;;  %v4022_v48 = vadd.f32 1.0, %v7650_v23  ;;  %v5091_v27 = vmul.f32 %v13954_v32, %v13953_v41  ;;  %v7006_v41 = vmul.f32 -1.442695, %v10819_v33  ;;  %v10841_v32 = vpop.f32.mrf.mxu0 }
 0x205   : > { %v7654_v3 = vpop.eup %7653  ;;  %7679 = vpow2.f32 %v7008_v43  ;;  %v4979_v63 = vmul.f32 %v7652_v51, %v10694_v42  ;;  %v10847_v57 = vadd.f32 %v10768_v39, %v1308_v52  ;;  %v10851_v42 = vpop.f32.mrf.mxu1 }
 0x206   : > { %v7656_v36 = vpop.eup %7655  ;;  %7681 = vrcp.f32 %v4022_v48  ;;  %v4179_v46 = vadd.f32 1.0, %v7654_v3 }
 0x207   : > { %v7658_v23 = vpop.eup %7657  ;;  %v4980_v43 = vmul.f32 %v7656_v36, %v10701_v18  ;;  %7683 = vrcp.f32 %v4173_v30  ;;  %13958 = vst [vmem:[#allocation137_spill] sm:$0xff] %v10847_v57  ;;  %v6850_v30 = vmul.f32 -1.442695, %v10836_v62  ;;  %v10856_v36 = vadd.f32 %v5092_v8, %v5091_v27 }
 0x208   : > { %v10843_v7 = vpop.eup %7659  ;;  %7685 = vrcp.f32 %v4174_v1  ;;  %v4180_v24 = vadd.f32 1.0, %v7658_v23  ;;  %v10854_v1 = vpop.f32.mrf.mxu0  ;;  %v7009_v23 = vmul.f32 -1.442695, %v10847_v57  ;;  %v10871_v8 = vadd.f32 %v10803_v14, %v1313_v54  ;;  %v13968_v14 = vld [vmem:[#allocation65_spill] sm:$0xff] }
 0x209   : > { %13957 = vst [vmem:[#allocation138_spill] sm:$0xff] %v10843_v7  ;;  %v10849_v48 = vpop.eup %7661  ;;  %7687 = vpow2.f32 %v7005_v44  ;;  %v5494_v18 = vadd.f32 %v4980_v43, %v4979_v63  ;;  %13960 = vst [vmem:[#allocation156_spill] sm:$0xff] %v10856_v36  ;;  %v13961_v44 = vld [vmem:[#allocation17_spill] sm:$0xff]  ;;  %v10866_v43 = vadd.f32 %v10785_v11, %v1308_v52 }
 0x20a   : > { %13959 = vst [vmem:[#allocation161_spill] sm:$0xff] %v10849_v48  ;;  %v7664_v3 = vpop.eup %7663  ;;  %7689 = vrcp.f32 %v4179_v46  ;;  %v10861_v33 = vadd.f32 %v10794_v20, %v13961_v44  ;;  %13964 = vst [vmem:[#allocation140_spill] sm:$0xff] %v10871_v8  ;;  %v2396_v57 = vpop.f32.mrf.mxu0  ;;  %v10878_v11 = vadd.f32 %v10808_v26, %v13961_v44  ;;  %v13969_v48 = vld [vmem:[#allocation89_spill] sm:$0xff] }
 0x20b   : > { %v7666_v51 = vpop.eup %7665  ;;  %7691 = vpow2.f32 %v7006_v41  ;;  %5495 = vadd.xlane.f32.xlu0 %v5494_v18  ;;  %13963 = vst [vmem:[#allocation160_spill] sm:$0xff] %v10866_v43  ;;  %v10868_v41 = vpop.f32.mrf.mxu1  ;;  %v4177_v27 = vadd.f32 1.0, %v7664_v3  ;;  %v13966_v3 = vld [vmem:[#allocation63_spill] sm:$0xff]  ;;  %v5096_v7 = vmul.f32 %v13969_v48, %v13968_v14 }
 0x20c   : > { %v7668_v39 = vpop.eup %7667  ;;  %7693 = vpow2.f32 %v6849_v34  ;;  %v4178_v36 = vadd.f32 1.0, %v7666_v51  ;;  %v7010_v51 = vmul.f32 -1.442695, %v10866_v43  ;;  %v1318_v26 = vpop.permute.xlu0 %1317  ;;  %v6852_v14 = vmul.f32 -1.442695, %v10878_v11 }
 0x20d   : > { %v10863_v63 = vpop.eup %7669  ;;  %7695 = vrcp.f32 %v4180_v24  ;;  %v4023_v46 = vadd.f32 1.0, %v7668_v39  ;;  %v6851_v24 = vmul.f32 -1.442695, %v10861_v33  ;;  %v2400_v48 = vpop.f32.mrf.mxu0 }
 0x20e   : > { %13962 = vst [vmem:[#allocation12_spill] sm:$0xff] %v10863_v63  ;;  %v7672_v18 = vpop.eup %7671  ;;  %7697 = vpow2.f32 %v6850_v30  ;;  %v13967_v30 = vld [vmem:[#allocation86_spill] sm:$0xff] }
 0x20f   : > { %v10873_v34 = vpop.eup %7673  ;;  %7699 = vrcp.f32 %v4023_v46  ;;  %v4024_v20 = vadd.f32 1.0, %v7672_v18  ;;  %v5095_v39 = vmul.f32 %v13967_v30, %v13966_v3  ;;  %v2796_v46 = vpop.f32.mrf.mxu1  ;;  %v10891_v3 = vadd.f32 %v10821_v50, %v13971_v19 }
 0x210   : > { %13965 = vst [vmem:[#allocation4_spill] sm:$0xff] %v10873_v34  ;;  %v7676_v63 = vpop.eup %7675  ;;  %7701 = vpow2.f32 %v7009_v23  ;;  %v7011_v23 = vmul.f32 -1.442695, %v10871_v8  ;;  %v10887_v34 = vadd.f32 %v10814_v56, %v1313_v54 }
 0x211   : > { %v7678_v52 = vpop.eup %7677  ;;  %7703 = vrcp.f32 %v4024_v20  ;;  %v4183_v47 = vadd.f32 1.0, %v7676_v63  ;;  %13972 = vst [vmem:[#allocation148_spill] sm:$0xff] %v10891_v3  ;;  %v2800_v63 = vpop.f32.mrf.mxu1  ;;  %v10903_v50 = vadd.f32 %v5096_v7, %v5095_v39  ;;  %v13979_v39 = vld [vmem:[#allocation70_spill] sm:$0xff] }
 0x212   : > { %v7680_v18 = vpop.eup %7679  ;;  %7705 = vrcp.f32 %v4177_v27  ;;  %13970 = vst [vmem:[#allocation141_spill] sm:$0xff] %v10887_v34  ;;  %v4981_v30 = vmul.f32 %v7678_v52, %v10737_v53  ;;  %v7012_v43 = vmul.f32 -1.442695, %v10887_v34  ;;  %v1328_v34 = vpop.permute.xlu0 %1327 }
 0x213   : > { %v7682_v44 = vpop.eup %7681  ;;  %7707 = vrcp.f32 %v4178_v36  ;;  %v4184_v54 = vadd.f32 1.0, %v7680_v18  ;;  %v10901_v36 = vadd.f32 %v10830_v55, %v1318_v26  ;;  %13976 = vst [vmem:[#allocation153_spill] sm:$0xff] %v10903_v50  ;;  %v13980_v18 = vld [vmem:[#allocation93_spill] sm:$0xff] }
 0x214   : > { %v10893_v20 = vpop.eup %7683  ;;  %v4982_v27 = vmul.f32 %v7682_v44, %v10743_v35  ;;  %7709 = vpow2.f32 %v6851_v24  ;;  %v6853_v35 = vmul.f32 -1.442695, %v10891_v3  ;;  %v10911_v24 = vadd.f32 %v10841_v32, %v13971_v19  ;;  %v13983_v19 = vld [vmem:[#allocation73_spill] sm:$0xff]  ;;  %v13984_v32 = vld [vmem:[#allocation99_spill] sm:$0xff] }
 0x215   : > { %13973 = vst [vmem:[#allocation3_spill] sm:$0xff] %v10893_v20  ;;  %v10898_v56 = vpop.eup %7685  ;;  %7711 = vpow2.f32 %v7010_v51  ;;  %13975 = vst [vmem:[#allocation6_spill] sm:$0xff] %v10901_v36  ;;  %v2402_v51 = vpop.f32.mrf.mxu0  ;;  %v7013_v44 = vmul.f32 -1.442695, %v10901_v36  ;;  %v10925_v50 = vmul.f32 %v13984_v32, %v13983_v19  ;;  %v10945_v3 = vadd.f32 %v2800_v63, %v1328_v34 }
 0x216   : > { %13974 = vst [vmem:[#allocation11_spill] sm:$0xff] %v10898_v56  ;;  %v7688_v8 = vpop.eup %7687  ;;  %7713 = vpow2.f32 %v7011_v23  ;;  %v5497_v53 = vadd.f32 %v4982_v27, %v4981_v30  ;;  %13978 = vst [vmem:[#allocation8_spill] sm:$0xff] %v10911_v24  ;;  %v10915_v23 = vmul.f32 %v13980_v18, %v13979_v39  ;;  %v2802_v30 = vpop.f32.mrf.mxu1  ;;  %v13988_v56 = vld [vmem:[#allocation29_spill] sm:$0xff] }
 0x217   : > { %v10906_v52 = vpop.eup %7689  ;;  %7715 = vrcp.f32 %v4183_v47  ;;  %v10919_v47 = vadd.f32 %v10851_v42, %v1318_v26  ;;  %v6854_v42 = vmul.f32 -1.442695, %v10911_v24  ;;  %v2404_v19 = vpop.f32.mrf.mxu0  ;;  %v10942_v20 = vadd.f32 %v2400_v48, %v13988_v56  ;;  %13990 = vst [vmem:[#allocation71_spill] sm:$0xff] %v10945_v3 }
 0x218   : > { %13977 = vst [vmem:[#allocation5_spill] sm:$0xff] %v10906_v52  ;;  %v7692_v55 = vpop.eup %7691  ;;  %7717 = vpow2.f32 %v6852_v14  ;;  %5498 = vadd.xlane.f32.xlu1 %v5497_v53  ;;  %v1323_v53 = vpop.permute.xlu1 %1322  ;;  %v13985_v52 = vld [vmem:[#allocation19_spill] sm:$0xff] }
 0x219   : > { %v7694_v7 = vpop.eup %7693  ;;  %7719 = vrcp.f32 %v4184_v54  ;;  %13981 = vst [vmem:[#allocation14_spill] sm:$0xff] %v10919_v47  ;;  %v10929_v39 = vadd.f32 %v10854_v1, %v13985_v52  ;;  %v10933_v26 = vadd.f32 %v10868_v41, %v1323_v53  ;;  %v10936_v18 = vadd.f32 %v2396_v57, %v13985_v52  ;;  %13989 = vst [vmem:[#allocation18_spill] sm:$0xff] %v10942_v20  ;;  %v2804_v41 = vpop.f32.mrf.mxu1 }
 0x21a   : > { %v10921_v27 = vpop.eup %7695  ;;  %v4025_v14 = vadd.f32 1.0, %v7694_v7  ;;  %7721 = vpow2.f32 %v7012_v43  ;;  %v4181_v7 = vadd.f32 1.0, %v7688_v8  ;;  %v10938_v36 = vadd.f32 %v2796_v46, %v1323_v53  ;;  %v13992_v53 = vld [vmem:[#allocation79_spill] sm:$0xff] }
 0x21b   : > { %13982 = vst [vmem:[#allocation13_spill] sm:$0xff] %v10921_v27  ;;  %v7698_v54 = vpop.eup %7697  ;;  %7723 = vpow2.f32 %v6853_v35  ;;  %13986 = vst [vmem:[#allocation16_spill] sm:$0xff] %v10933_v26  ;;  %v4182_v1 = vadd.f32 1.0, %v7692_v55  ;;  %v7014_v35 = vmul.f32 -1.442695, %v10919_v47  ;;  %v13994_v47 = vld [vmem:[#allocation157_spill] sm:$0xff] }
 0x21c   : > { %v7700_v32 = vpop.eup %7699  ;;  %7725 = vrcp.f32 %v4025_v14  ;;  %v4026_v43 = vadd.f32 1.0, %v7698_v54  ;;  %13987 = vst [vmem:[#allocation15_spill] sm:$0xff] %v10938_v36  ;;  %v6855_v52 = vmul.f32 -1.442695, %v10929_v39  ;;  %v2406_v14 = vpop.f32.mrf.mxu0  ;;  %v10956_v54 = vmul.f32 %v10462_v25, %v13992_v53 }
 0x21d   : > { %v7702_v27 = vpop.eup %7701  ;;  %7727 = vpow2.f32 %v7013_v44  ;;  %v4983_v46 = vmul.f32 %v7700_v32, %v10775_v38  ;;  %v7015_v44 = vmul.f32 -1.442695, %v10933_v26  ;;  %v6856_v63 = vmul.f32 -1.442695, %v10936_v18 }
 0x21e   : > { %v7704_v24 = vpop.eup %7703  ;;  %7729 = vrcp.f32 %v4026_v43  ;;  %v4185_v57 = vadd.f32 1.0, %v7702_v27  ;;  %v7016_v27 = vmul.f32 -1.442695, %v10938_v36  ;;  %v10960_v43 = vpop.permute.xlu0 %1337  ;;  %v10971_v53 = vadd.f32 %v2802_v30, %v1328_v34 }
 0x21f   : > { %v10947_v8 = vpop.eup %7705  ;;  %v4984_v55 = vmul.f32 %v7704_v24, %v10783_v37  ;;  %7731 = vpow2.f32 %v6854_v42  ;;  %v10963_v37 = vmul.f32 -1.442695, %v10942_v20  ;;  %v10966_v24 = vadd.f32 %v2402_v51, %v13988_v56  ;;  %v2806_v42 = vpop.f32.mrf.mxu1  ;;  %v13995_v20 = vld [vmem:[#allocation74_spill] sm:$0xff] }
 0x220   : > { %v10952_v48 = vpop.eup %7707  ;;  %7733 = vrcp.f32 %v4181_v7  ;;  %v10969_v7 = vmul.f32 -1.442695, %v10945_v3  ;;  %13993 = vst [vmem:[#allocation58_spill] sm:$0xff] %v10971_v53  ;;  %v1333_v56 = vpop.permute.xlu1 %1332  ;;  %v13996_v51 = vld [vmem:[#allocation22_spill] sm:$0xff] }
 0x221   : > { %13991 = vst [vmem:[#allocation165_spill] sm:$0xff] %v10952_v48  ;;  %v7710_v38 = vpop.eup %7709  ;;  %7735 = vrcp.f32 %v4182_v1  ;;  %v5500_v32 = vadd.f32 %v4984_v55, %v4983_v46  ;;  %v10975_v1 = vmul.f32 %v10478_v22, %v13994_v47  ;;  %v5101_v48 = vmul.f32 %v10490_v13, %v13995_v20 }
 0x222   : > { %v7712_v26 = vpop.eup %7711  ;;  %7737 = vrcp.f32 %v4185_v57  ;;  %v4027_v25 = vadd.f32 1.0, %v7710_v38  ;;  %v10980_v46 = vadd.f32 %v2404_v19, %v13996_v51  ;;  %v2410_v57 = vpop.f32.mrf.mxu0  ;;  %v10984_v34 = vadd.f32 %v2804_v41, %v1333_v56 }
 0x223   : > { %v7714_v36 = vpop.eup %7713  ;;  %7739 = vpow2.f32 %v6855_v52  ;;  %5501 = vadd.xlane.f32.xlu0 %v5500_v32  ;;  %v10987_v30 = vadd.f32 %v2406_v14, %v13996_v51  ;;  %v10991_v22 = vadd.f32 %v10925_v50, %v10915_v23  ;;  %v4186_v20 = vadd.f32 1.0, %v7712_v26  ;;  %v2810_v52 = vpop.f32.mrf.mxu1  ;;  %v14004_v23 = vld [vmem:[#allocation77_spill] sm:$0xff] }
 0x224   : > { %13997 = vst [vmem:[#allocation83_spill] sm:$0xff] %v10980_v46  ;;  %v10982_v55 = vpop.eup %7715  ;;  %7741 = vpow2.f32 %v7014_v35  ;;  %13999 = vst [vmem:[#allocation63_spill] sm:$0xff] %v10984_v34  ;;  %v6858_v47 = vmul.f32 -1.442695, %v10966_v24  ;;  %v10994_v19 = vadd.f32 %v2806_v42, %v1333_v56  ;;  %v4187_v35 = vadd.f32 1.0, %v7714_v36  ;;  %v11001_v32 = vpop.permute.xlu0 %1347  ;;  %v14005_v42 = vld [vmem:[#allocation34_spill] sm:$0xff] }
 0x225   : > { %13998 = vst [vmem:[#allocation17_spill] sm:$0xff] %v10982_v55  ;;  %14000 = vst [vmem:[#allocation86_spill] sm:$0xff] %v10987_v30  ;;  %v7718_v13 = vpop.eup %7717  ;;  %7743 = vrcp.f32 %v4027_v25  ;;  %v10999_v14 = vmul.f32 -1.442695, %v10971_v53  ;;  %v5102_v26 = vmul.f32 %v10504_v31, %v14004_v23  ;;  %v11006_v25 = vmul.f32 -1.442695, %v10980_v46  ;;  %v2412_v51 = vpop.f32.mrf.mxu0 }
 0x226   : > { %14001 = vst [vmem:[#allocation65_spill] sm:$0xff] %v10991_v22  ;;  %14002 = vst [vmem:[#allocation89_spill] sm:$0xff] %v10994_v19  ;;  %v10996_v38 = vpop.eup %7719  ;;  %v4028_v41 = vadd.f32 1.0, %v7718_v13  ;;  %7745 = vpow2.f32 %v7015_v44  ;;  %v11009_v56 = vadd.f32 %v2410_v57, %v14005_v42  ;;  %v14006_v13 = vld [vmem:[#allocation76_spill] sm:$0xff]  ;;  %v11014_v22 = vmul.f32 -1.442695, %v10984_v34  ;;  %v2812_v46 = vpop.f32.mrf.mxu1 }
 0x227   : > { %14003 = vst [vmem:[#allocation24_spill] sm:$0xff] %v10996_v38  ;;  %v7722_v50 = vpop.eup %7721  ;;  %7747 = vpow2.f32 %v6856_v63  ;;  %v5107_v44 = vmul.f32 %v10531_v49, %v14006_v13  ;;  %v11017_v3 = vmul.f32 -1.442695, %v10987_v30  ;;  %v14007_v63 = vld [vmem:[#allocation163_spill] sm:$0xff]  ;;  %v11022_v57 = vmul.f32 -1.442695, %v10994_v19 }
 0x228   : > { %v7724_v36 = vpop.eup %7723  ;;  %7749 = vrcp.f32 %v4028_v41  ;;  %v5108_v23 = vmul.f32 %v10544_v17, %v14007_v63  ;;  %v14008_v55 = vld [vmem:[#allocation164_spill] sm:$0xff]  ;;  %v14009_v41 = vld [vmem:[#allocation82_spill] sm:$0xff]  ;;  %v11029_v34 = vadd.f32 %v2810_v52, %v10960_v43  ;;  %v11031_v17 = vpop.permute.xlu1 %1342  ;;  %v11039_v19 = vadd.f32 %v5102_v26, %v5101_v48 }
 0x229   : > { %v7726_v31 = vpop.eup %7725  ;;  %7751 = vrcp.f32 %v4186_v20  ;;  %v4029_v53 = vadd.f32 1.0, %v7724_v36  ;;  %v5105_v49 = vmul.f32 %v10549_v45, %v14008_v55  ;;  %v5106_v13 = vmul.f32 %v10560_v0, %v14009_v41  ;;  %v2414_v63 = vpop.f32.mrf.mxu0 }
 0x22a   : > { %v7728_v38 = vpop.eup %7727  ;;  %7753 = vrcp.f32 %v4187_v35  ;;  %v11034_v20 = vmul.f32 -1.442695, %v11009_v56  ;;  %v11037_v36 = vadd.f32 %v2412_v51, %v14005_v42  ;;  %14010 = vst [vmem:[#allocation70_spill] sm:$0xff] %v11039_v19  ;;  %v4985_v0 = vmul.f32 %v7726_v31, %v10825_v29  ;;  %v11044_v52 = vpop.permute.xlu0 %1357  ;;  %v14015_v51 = vld [vmem:[#allocation88_spill] sm:$0xff] }
 0x22b   : > { %v7730_v30 = vpop.eup %7729  ;;  %7755 = vpow2.f32 %v7016_v27  ;;  %14011 = vst [vmem:[#allocation93_spill] sm:$0xff] %v11044_v52  ;;  %v11047_v27 = vadd.f32 %v2812_v46, %v10960_v43  ;;  %v4188_v41 = vadd.f32 1.0, %v7722_v50  ;;  %v11053_v48 = vadd.f32 %v10975_v1, %v10956_v54  ;;  %v14014_v46 = vld [vmem:[#allocation85_spill] sm:$0xff]  ;;  %v2814_v1 = vpop.f32.mrf.mxu1 }
 0x22c   : > { %v7732_v45 = vpop.eup %7731  ;;  %v4986_v55 = vmul.f32 %v7730_v30, %v10836_v62  ;;  %7757 = vpow2.f32 %v10963_v37  ;;  %v4189_v29 = vadd.f32 1.0, %v7728_v38  ;;  %v14013_v62 = vld [vmem:[#allocation26_spill] sm:$0xff]  ;;  %v5111_v50 = vmul.f32 %v10579_v2, %v14014_v46  ;;  %v2416_v31 = vpop.f32.mrf.mxu0 }
 0x22d   : > { %v11049_v35 = vpop.eup %7733  ;;  %7759 = vrcp.f32 %v4029_v53  ;;  %v4030_v42 = vadd.f32 1.0, %v7732_v45  ;;  %14012 = vst [vmem:[#allocation73_spill] sm:$0xff] %v11053_v48  ;;  %v11059_v37 = vadd.f32 %v2414_v63, %v14013_v62  ;;  %v11066_v53 = vmul.f32 -1.442695, %v11029_v34  ;;  %v11081_v52 = vpop.permute.xlu1 %1352 }
 0x22e   : > { %v11055_v26 = vpop.eup %7735  ;;  %7761 = vpow2.f32 %v10969_v7  ;;  %v5503_v30 = vadd.f32 %v4986_v55, %v4985_v0  ;;  %v11069_v54 = vmul.f32 -1.442695, %v11037_v36  ;;  %v5112_v7 = vmul.f32 %v10602_v15, %v14015_v51  ;;  %v14016_v0 = vld [vmem:[#allocation7_spill] sm:$0xff]  ;;  %v14020_v51 = vld [vmem:[#allocation106_spill] sm:$0xff] }
 0x22f   : > { %v11061_v43 = vpop.eup %7737  ;;  %7763 = vrcp.f32 %v4030_v42  ;;  %v11073_v63 = vadd.f32 %v5106_v13, %v5105_v49  ;;  %v11075_v45 = vadd.f32 %v5108_v23, %v5107_v44  ;;  %v5109_v55 = vmul.f32 %v10626_v4, %v14016_v0  ;;  %v14017_v42 = vld [vmem:[#allocation91_spill] sm:$0xff]  ;;  %v14018_v49 = vld [vmem:[#allocation101_spill] sm:$0xff] }
 0x230   : > { %v7740_v38 = vpop.eup %7739  ;;  %7765 = vpow2.f32 %v6858_v47  ;;  %5504 = vadd.xlane.f32.xlu1 %v5503_v30  ;;  %v5110_v46 = vmul.f32 %v10631_v58, %v14017_v42  ;;  %v11084_v15 = vmul.f32 -1.442695, %v11047_v27  ;;  %v11086_v47 = vpop.permute.xlu0 %1367  ;;  %v11089_v44 = vmul.f32 -1.442695, %v11059_v37  ;;  %v14019_v30 = vld [vmem:[#allocation103_spill] sm:$0xff] }
 0x231   : > { %v7742_v2 = vpop.eup %7741  ;;  %7767 = vrcp.f32 %v4188_v41  ;;  %v4031_v48 = vadd.f32 1.0, %v7740_v38  ;;  %v11092_v23 = vadd.f32 %v2814_v1, %v11031_v17  ;;  %v5115_v58 = vmul.f32 %v10642_v40, %v10425_v61  ;;  %v2816_v42 = vpop.f32.mrf.mxu1 }
 0x232   : > { %v7744_v19 = vpop.eup %7743  ;;  %7769 = vrcp.f32 %v4189_v29  ;;  %v5116_v13 = vmul.f32 %v10651_v28, %v14018_v49  ;;  %v11100_v41 = vadd.f32 %v2416_v31, %v14013_v62  ;;  %v5113_v38 = vmul.f32 %v10669_v12, %v14019_v30  ;;  %v14024_v30 = vld [vmem:[#allocation108_spill] sm:$0xff] }
 0x233   : > { %v7746_v4 = vpop.eup %7745  ;;  %7771 = vpow2.f32 %v10999_v14  ;;  %v5114_v1 = vmul.f32 %v10674_v6, %v14020_v51  ;;  %v4190_v0 = vadd.f32 1.0, %v7742_v2  ;;  %v11107_v28 = vadd.f32 %v5110_v46, %v5109_v55 }
 0x234   : > { %v7748_v29 = vpop.eup %7747  ;;  %7773 = vpow2.f32 %v11006_v25  ;;  %v11109_v14 = vadd.f32 %v5112_v7, %v5111_v50  ;;  %v4987_v31 = vmul.f32 %v7744_v19, %v10861_v33  ;;  %v4191_v49 = vadd.f32 1.0, %v7746_v4  ;;  %v11118_v25 = vpop.permute.xlu1 %1362 }
 0x235   : > { %v7750_v61 = vpop.eup %7749  ;;  %7775 = vrcp.f32 %v4031_v48  ;;  %v4032_v40 = vadd.f32 1.0, %v7748_v29  ;;  %v11121_v48 = vmul.f32 -1.442695, %v11092_v23  ;;  %v11124_v50 = vmul.f32 -1.442695, %v11100_v41  ;;  %v2420_v33 = vpop.f32.mrf.mxu0 }
 0x236   : > { %14021 = vst [vmem:[#allocation99_spill] sm:$0xff] %v11109_v14  ;;  %v11111_v62 = vpop.eup %7751  ;;  %v4988_v12 = vmul.f32 %v7750_v61, %v10878_v11  ;;  %7777 = vpow2.f32 %v11014_v22  ;;  %v11127_v7 = vadd.f32 %v2816_v42, %v11031_v17  ;;  %v14022_v11 = vld [vmem:[#allocation95_spill] sm:$0xff]  ;;  %v14023_v22 = vld [vmem:[#allocation97_spill] sm:$0xff]  ;;  %v11134_v46 = vpop.permute.xlu0 %1377  ;;  %v5119_v51 = vmul.f32 %v10682_v21, %v14024_v30  ;;  %v14025_v61 = vld [vmem:[#allocation110_spill] sm:$0xff] }
 0x237   : > { %v11116_v6 = vpop.eup %7753  ;;  %7779 = vrcp.f32 %v4032_v40  ;;  %v5117_v2 = vmul.f32 %v10707_v10, %v14022_v11  ;;  %v5118_v55 = vmul.f32 %v10714_v5, %v14023_v22  ;;  %v5120_v17 = vmul.f32 %v10691_v60, %v14025_v61  ;;  %v14027_v11 = vld [vmem:[#allocation39_spill] sm:$0xff]  ;;  %v14030_v21 = vld [vmem:[#allocation142_spill] sm:$0xff]  ;;  %v14031_v60 = vld [vmem:[#allocation152_spill] sm:$0xff] }
 0x238   : > { %v7756_v19 = vpop.eup %7755  ;;  %7781 = vpow2.f32 %v11017_v3  ;;  %v5506_v4 = vadd.f32 %v4988_v12, %v4987_v31  ;;  %v11140_v42 = vadd.f32 %v5114_v1, %v5113_v38  ;;  %v11143_v5 = vadd.f32 %v2420_v33, %v14027_v11  ;;  %v14029_v12 = vld [vmem:[#allocation113_spill] sm:$0xff]  ;;  %v2820_v1 = vpop.f32.mrf.mxu1  ;;  %v14033_v33 = vld [vmem:[#allocation118_spill] sm:$0xff]  ;;  %v14070_v14 = vld [vmem:[#allocation11_spill] sm:$0xff] }
 0x239   : > { %v7758_v29 = vpop.eup %7757  ;;  %7783 = vrcp.f32 %v4190_v0  ;;  %v11145_v3 = vadd.f32 %v5116_v13, %v5115_v58  ;;  %v5123_v22 = vmul.f32 %v10719_v59, %v14029_v12  ;;  %v5124_v30 = vmul.f32 %v10731_v9, %v14030_v21  ;;  %v14035_v59 = vld [vmem:[#allocation148_spill] sm:$0xff]  ;;  %v11161_v21 = vpop.permute.xlu1 %1372 }
 0x23a   : > { %14026 = vst [vmem:[#allocation19_spill] sm:$0xff] %v11140_v42  ;;  %v7760_v40 = vpop.eup %7759  ;;  %7785 = vrcp.f32 %v4191_v49  ;;  %v4033_v10 = vadd.f32 1.0, %v7758_v29  ;;  %5507 = vadd.xlane.f32.xlu0 %v5506_v4  ;;  %v5121_v38 = vmul.f32 %v14031_v60, %v10587_v16  ;;  %v14032_v49 = vld [vmem:[#allocation10_spill] sm:$0xff]  ;;  %v4192_v4 = vadd.f32 1.0, %v7756_v19  ;;  %v14036_v12 = vld [vmem:[#allocation8_spill] sm:$0xff]  ;;  %v11171_v19 = vpop.permute.xlu0 %1387 }
 0x23b   : > { %14028 = vst [vmem:[#allocation29_spill] sm:$0xff] %v11145_v3  ;;  %v7762_v31 = vpop.eup %7761  ;;  %7787 = vpow2.f32 %v11034_v20  ;;  %v5122_v29 = vmul.f32 %v14033_v33, %v14032_v49  ;;  %v11157_v58 = vadd.f32 %v5118_v55, %v5117_v2  ;;  %v4989_v61 = vmul.f32 %v7760_v40, %v14035_v59  ;;  %14038 = vst [vmem:[#allocation74_spill] sm:$0xff] %v11171_v19  ;;  %v14039_v55 = vld [vmem:[#allocation116_spill] sm:$0xff]  ;;  %v14040_v40 = vld [vmem:[#allocation154_spill] sm:$0xff] }
 0x23c   : > { %v7764_v0 = vpop.eup %7763  ;;  %7789 = vpow2.f32 %v11022_v57  ;;  %v11163_v16 = vadd.f32 %v5120_v17, %v5119_v51  ;;  %v4193_v60 = vadd.f32 1.0, %v7762_v31  ;;  %v11169_v57 = vadd.f32 %v2820_v1, %v11001_v32  ;;  %v14042_v49 = vld [vmem:[#allocation132_spill] sm:$0xff]  ;;  %v2422_v17 = vpop.f32.mrf.mxu0  ;;  %v14045_v1 = vld [vmem:[#allocation145_spill] sm:$0xff] }
 0x23d   : > { %14034 = vst [vmem:[#allocation79_spill] sm:$0xff] %v11157_v58  ;;  %v7766_v13 = vpop.eup %7765  ;;  %v4990_v9 = vmul.f32 %v7764_v0, %v14036_v12  ;;  %7791 = vrcp.f32 %v4033_v10  ;;  %v5127_v10 = vmul.f32 %v14040_v40, %v14039_v55  ;;  %v14041_v0 = vld [vmem:[#allocation144_spill] sm:$0xff]  ;;  %v14046_v12 = vld [vmem:[#allocation111_spill] sm:$0xff]  ;;  %v2822_v58 = vpop.f32.mrf.mxu1  ;;  %v11184_v42 = vadd.f32 %v5122_v29, %v5121_v38 }
 0x23e   : > { %14037 = vst [vmem:[#allocation157_spill] sm:$0xff] %v11163_v16  ;;  %v11165_v20 = vpop.eup %7767  ;;  %v4034_v3 = vadd.f32 1.0, %v7766_v13  ;;  %7793 = vpow2.f32 %v11066_v53  ;;  %v5128_v51 = vmul.f32 %v14042_v49, %v14041_v0  ;;  %v14043_v13 = vld [vmem:[#allocation117_spill] sm:$0xff]  ;;  %v5126_v16 = vmul.f32 %v14046_v12, %v14045_v1  ;;  %v14049_v29 = vld [vmem:[#allocation119_spill] sm:$0xff] }
 0x23f   : > { %v11173_v2 = vpop.eup %7769  ;;  %7795 = vpow2.f32 %v11069_v54  ;;  %v5509_v31 = vadd.f32 %v4990_v9, %v4989_v61  ;;  %v14044_v53 = vld [vmem:[#allocation105_spill] sm:$0xff]  ;;  %14047 = vst [vmem:[#allocation22_spill] sm:$0xff] %v11184_v42  ;;  %v7024_v55 = vmul.f32 -1.442695, %v11127_v7  ;;  %v11188_v40 = vmul.f32 -1.442695, %v11143_v5 }
 0x240   : > { %v7772_v33 = vpop.eup %7771  ;;  %v5125_v59 = vmul.f32 %v14044_v53, %v14043_v13  ;;  %7797 = vrcp.f32 %v4034_v3  ;;  %v11190_v54 = vadd.f32 %v5124_v30, %v5123_v22  ;;  %v11193_v0 = vmul.f32 -1.442695, %v11169_v57  ;;  %v14051_v13 = vld [vmem:[#allocation122_spill] sm:$0xff]  ;;  %v11203_v22 = vpop.permute.xlu1 %1382  ;;  %v14055_v12 = vld [vmem:[#allocation161_spill] sm:$0xff] }
 0x241   : > { %v7774_v19 = vpop.eup %7773  ;;  %7799 = vrcp.f32 %v4192_v4  ;;  %5510 = vadd.xlane.f32.xlu1 %v5509_v31  ;;  %v11196_v3 = vadd.f32 %v2422_v17, %v14027_v11  ;;  %v14050_v4 = vld [vmem:[#allocation133_spill] sm:$0xff]  ;;  %v14052_v53 = vld [vmem:[#allocation138_spill] sm:$0xff]  ;;  %14053 = vst [vmem:[#allocation34_spill] sm:$0xff] %v11203_v22  ;;  %v11206_v30 = vadd.f32 %v2822_v58, %v11001_v32  ;;  %v11211_v17 = vpop.permute.xlu0 %1397  ;;  %v14069_v22 = vld [vmem:[#allocation124_spill] sm:$0xff] }
 0x242   : > { %14048 = vst [vmem:[#allocation77_spill] sm:$0xff] %v11190_v54  ;;  %v7776_v61 = vpop.eup %7775  ;;  %7801 = vrcp.f32 %v4193_v60  ;;  %v4035_v9 = vadd.f32 1.0, %v7774_v19  ;;  %v5131_v49 = vmul.f32 %v14050_v4, %v14049_v29  ;;  %v5129_v1 = vmul.f32 %v14052_v53, %v14051_v13  ;;  %v2424_v60 = vpop.f32.mrf.mxu0  ;;  %v14054_v31 = vld [vmem:[#allocation149_spill] sm:$0xff]  ;;  %14056 = vst [vmem:[#allocation76_spill] sm:$0xff] %v11211_v17  ;;  %v14060_v53 = vld [vmem:[#allocation135_spill] sm:$0xff] }
 0x243   : > { %v7778_v38 = vpop.eup %7777  ;;  %7803 = vpow2.f32 %v11089_v44  ;;  %v5130_v11 = vmul.f32 %v14055_v12, %v14054_v31  ;;  %v11213_v29 = vadd.f32 %v5126_v16, %v5125_v59  ;;  %v11215_v4 = vadd.f32 %v5128_v51, %v5127_v10  ;;  %v14059_v44 = vld [vmem:[#allocation146_spill] sm:$0xff]  ;;  %v14063_v59 = vld [vmem:[#allocation12_spill] sm:$0xff] }
 0x244   : > { %v7780_v19 = vpop.eup %7779  ;;  %7805 = vpow2.f32 %v11084_v15  ;;  %v5132_v54 = vmul.f32 %v14060_v53, %v14059_v44  ;;  %v4991_v32 = vmul.f32 %v7776_v61, %v10929_v39  ;;  %v4194_v31 = vadd.f32 1.0, %v7772_v33  ;;  %v14061_v15 = vld [vmem:[#allocation31_spill] sm:$0xff]  ;;  %v14062_v51 = vld [vmem:[#allocation114_spill] sm:$0xff]  ;;  %v2824_v39 = vpop.f32.mrf.mxu1 }
 0x245   : > { %14057 = vst [vmem:[#allocation163_spill] sm:$0xff] %v11213_v29  ;;  %14058 = vst [vmem:[#allocation164_spill] sm:$0xff] %v11215_v4  ;;  %v7782_v13 = vpop.eup %7781  ;;  %v4992_v58 = vmul.f32 %v7780_v19, %v10936_v18  ;;  %7807 = vrcp.f32 %v4035_v9  ;;  %v11225_v16 = vadd.f32 %v2424_v60, %v14061_v15  ;;  %v5135_v4 = vmul.f32 %v14063_v59, %v14062_v51  ;;  %v14064_v9 = vld [vmem:[#allocation123_spill] sm:$0xff]  ;;  %v14065_v19 = vld [vmem:[#allocation4_spill] sm:$0xff]  ;;  %v2426_v60 = vpop.f32.mrf.mxu0 }
 0x246   : > { %v11221_v42 = vpop.eup %7783  ;;  %v4036_v12 = vadd.f32 1.0, %v7782_v13  ;;  %7809 = vpow2.f32 %v11121_v48  ;;  %v4195_v44 = vadd.f32 1.0, %v7778_v38  ;;  %v5136_v33 = vmul.f32 %v14065_v19, %v14064_v9  ;;  %v14066_v13 = vld [vmem:[#allocation150_spill] sm:$0xff]  ;;  %v14067_v53 = vld [vmem:[#allocation3_spill] sm:$0xff] }
 0x247   : > { %v11227_v10 = vpop.eup %7785  ;;  %7811 = vpow2.f32 %v11124_v50  ;;  %v5512_v18 = vadd.f32 %v4992_v58, %v4991_v32  ;;  %v5133_v48 = vmul.f32 %v14067_v53, %v14066_v13  ;;  %v11236_v29 = vadd.f32 %v5130_v11, %v5129_v1  ;;  %v11240_v50 = vpop.permute.xlu1 %1392  ;;  %v14077_v19 = vld [vmem:[#allocation155_spill] sm:$0xff]  ;;  %v14078_v13 = vld [vmem:[#allocation165_spill] sm:$0xff] }
 0x248   : > { %v7788_v61 = vpop.eup %7787  ;;  %7813 = vrcp.f32 %v4036_v12  ;;  %v5134_v51 = vmul.f32 %v14070_v14, %v14069_v22  ;;  %14071 = vst [vmem:[#allocation26_spill] sm:$0xff] %v11240_v50  ;;  %v11242_v32 = vadd.f32 %v5132_v54, %v5131_v49  ;;  %v6866_v59 = vmul.f32 -1.442695, %v11196_v3  ;;  %v11249_v11 = vpop.permute.xlu0 %1407  ;;  %v14074_v14 = vld [vmem:[#allocation127_spill] sm:$0xff]  ;;  %v14075_v22 = vld [vmem:[#allocation5_spill] sm:$0xff] }
 0x249   : > { %14068 = vst [vmem:[#allocation82_spill] sm:$0xff] %v11236_v29  ;;  %v7790_v17 = vpop.eup %7789  ;;  %v4037_v38 = vadd.f32 1.0, %v7788_v61  ;;  %7815 = vpow2.f32 %v7024_v55  ;;  %5513 = vadd.xlane.f32.xlu0 %v5512_v18  ;;  %v7026_v12 = vmul.f32 -1.442695, %v11206_v30  ;;  %v11247_v1 = vadd.f32 %v2824_v39, %v11081_v52  ;;  %14073 = vst [vmem:[#allocation88_spill] sm:$0xff] %v11249_v11  ;;  %v14082_v11 = vld [vmem:[#allocation13_spill] sm:$0xff] }
 0x24a   : > { %14072 = vst [vmem:[#allocation85_spill] sm:$0xff] %v11242_v32  ;;  %v7792_v58 = vpop.eup %7791  ;;  %7817 = vrcp.f32 %v4194_v31  ;;  %v5139_v55 = vmul.f32 %v14075_v22, %v14074_v14  ;;  %v6867_v18 = vmul.f32 -1.442695, %v11225_v16  ;;  %v11255_v54 = vadd.f32 %v2426_v60, %v14061_v15  ;;  %v14076_v31 = vld [vmem:[#allocation130_spill] sm:$0xff]  ;;  %v2826_v32 = vpop.f32.mrf.mxu1  ;;  %v14081_v60 = vld [vmem:[#allocation128_spill] sm:$0xff] }
 0x24b   : > { %v7794_v9 = vpop.eup %7793  ;;  %7819 = vrcp.f32 %v4195_v44  ;;  %v5137_v61 = vmul.f32 %v10947_v8, %v14076_v31  ;;  %v5138_v39 = vmul.f32 %v14078_v13, %v14077_v19  ;;  %v4196_v53 = vadd.f32 1.0, %v7790_v17  ;;  %v14083_v8 = vld [vmem:[#allocation18_spill] sm:$0xff]  ;;  %v14086_v13 = vld [vmem:[#allocation9_spill] sm:$0xff] }
 0x24c   : > { %v7796_v49 = vpop.eup %7795  ;;  %7821 = vpow2.f32 %v11188_v40  ;;  %v11262_v44 = vadd.f32 %v5134_v51, %v5133_v48  ;;  %v11264_v22 = vadd.f32 %v5136_v33, %v5135_v4  ;;  %v5140_v50 = vmul.f32 %v14082_v11, %v14081_v60  ;;  %v14084_v17 = vld [vmem:[#allocation158_spill] sm:$0xff]  ;;  %v11280_v33 = vpop.permute.xlu1 %1402 }
 0x24d   : > { %v7798_v29 = vpop.eup %7797  ;;  %7823 = vrcp.f32 %v4037_v38  ;;  %v4038_v14 = vadd.f32 1.0, %v7796_v49  ;;  %v4993_v31 = vmul.f32 %v7792_v58, %v14083_v8  ;;  %v14085_v38 = vld [vmem:[#allocation17_spill] sm:$0xff]  ;;  %v4197_v48 = vadd.f32 1.0, %v7794_v9  ;;  %v2430_v51 = vpop.f32.mrf.mxu0  ;;  %v14087_v58 = vld [vmem:[#allocation24_spill] sm:$0xff]  ;;  %v14090_v9 = vld [vmem:[#allocation162_spill] sm:$0xff] }
 0x24e   : > { %14079 = vst [vmem:[#allocation7_spill] sm:$0xff] %v11262_v44  ;;  %14080 = vst [vmem:[#allocation91_spill] sm:$0xff] %v11264_v22  ;;  %v11266_v15 = vpop.eup %7799  ;;  %v4994_v19 = vmul.f32 %v7798_v29, %v10966_v24  ;;  %7825 = vpow2.f32 %v11193_v0  ;;  %v5143_v49 = vmul.f32 %v14085_v38, %v14084_v17  ;;  %v11278_v4 = vadd.f32 %v2826_v32, %v11081_v52  ;;  %v14088_v24 = vld [vmem:[#allocation159_spill] sm:$0xff]  ;;  %v11286_v29 = vpop.permute.xlu0 %1417  ;;  %v14099_v44 = vld [vmem:[#allocation141_spill] sm:$0xff] }
 0x24f   : > { %v11273_v40 = vpop.eup %7801  ;;  %7827 = vrcp.f32 %v4038_v14  ;;  %v5144_v60 = vmul.f32 %v14087_v58, %v14086_v13  ;;  %v5141_v0 = vmul.f32 %v11049_v35, %v14088_v24  ;;  %14089 = vst [vmem:[#allocation101_spill] sm:$0xff] %v11286_v29  ;;  %v5142_v14 = vmul.f32 %v11055_v26, %v14090_v9  ;;  %v11290_v32 = vpop.f32.mrf.mxu1  ;;  %v14093_v26 = vld [vmem:[#allocation44_spill] sm:$0xff] }
 0x250   : > { %v7804_v11 = vpop.eup %7803  ;;  %7829 = vpow2.f32 %v6866_v59  ;;  %v5515_v8 = vadd.f32 %v4994_v19, %v4993_v31  ;;  %v11292_v38 = vadd.f32 %v5138_v39, %v5137_v61  ;;  %v7027_v13 = vmul.f32 -1.442695, %v11247_v1  ;;  %v14094_v61 = vld [vmem:[#allocation137_spill] sm:$0xff]  ;;  %v11308_v9 = vpop.permute.xlu1 %1412 }
 0x251   : > { %v7806_v17 = vpop.eup %7805  ;;  %7831 = vrcp.f32 %v4196_v53  ;;  %v4039_v52 = vadd.f32 1.0, %v7804_v11  ;;  %v11295_v35 = vadd.f32 %v5140_v50, %v5139_v55  ;;  %v6868_v31 = vmul.f32 -1.442695, %v11255_v54  ;;  %v2432_v11 = vpop.f32.mrf.mxu0  ;;  %14096 = vst [vmem:[#allocation95_spill] sm:$0xff] %v11308_v9 }
 0x252   : > { %14091 = vst [vmem:[#allocation103_spill] sm:$0xff] %v11292_v38  ;;  %v7808_v22 = vpop.eup %7807  ;;  %7833 = vpow2.f32 %v7026_v12  ;;  %5516 = vadd.xlane.f32.xlu1 %v5515_v8  ;;  %v7028_v19 = vmul.f32 -1.442695, %v11278_v4  ;;  %v11300_v53 = vadd.f32 %v2430_v51, %v14093_v26  ;;  %v5145_v39 = vmul.f32 %v11061_v43, %v14094_v61  ;;  %v14095_v12 = vld [vmem:[#allocation160_spill] sm:$0xff]  ;;  %v14100_v61 = vld [vmem:[#allocation83_spill] sm:$0xff] }
 0x253   : > { %14092 = vst [vmem:[#allocation106_spill] sm:$0xff] %v11295_v35  ;;  %v7810_v59 = vpop.eup %7809  ;;  %7835 = vrcp.f32 %v4197_v48  ;;  %v5146_v24 = vmul.f32 %v11111_v62, %v14095_v12  ;;  %v4198_v8 = vadd.f32 1.0, %v7806_v17  ;;  %v11306_v48 = vpop.f32.mrf.mxu1  ;;  %v11310_v35 = vadd.f32 %v5142_v14, %v5141_v0  ;;  %v14101_v62 = vld [vmem:[#allocation86_spill] sm:$0xff]  ;;  %v14103_v14 = vld [vmem:[#allocation140_spill] sm:$0xff] }
 0x254   : > { %v7812_v58 = vpop.eup %7811  ;;  %7837 = vpow2.f32 %v6867_v18  ;;  %v11312_v51 = vadd.f32 %v5144_v60, %v5143_v49  ;;  %v5148_v43 = vmul.f32 %v11165_v20, %v14099_v44  ;;  %v4995_v29 = vmul.f32 %v7808_v22, %v14100_v61  ;;  %v11318_v18 = vpop.permute.xlu0 %1427 }
 0x255   : > { %v7814_v50 = vpop.eup %7813  ;;  %7839 = vrcp.f32 %v4039_v52  ;;  %v4040_v55 = vadd.f32 1.0, %v7812_v58  ;;  %14097 = vst [vmem:[#allocation97_spill] sm:$0xff] %v11310_v35  ;;  %14102 = vst [vmem:[#allocation110_spill] sm:$0xff] %v11318_v18  ;;  %v6869_v58 = vmul.f32 -1.442695, %v11300_v53  ;;  %v11322_v0 = vadd.f32 %v2432_v11, %v14093_v26  ;;  %v2434_v49 = vpop.f32.mrf.mxu0 }
 0x256   : > { %14098 = vst [vmem:[#allocation108_spill] sm:$0xff] %v11312_v51  ;;  %v7816_v38 = vpop.eup %7815  ;;  %v4996_v17 = vmul.f32 %v7814_v50, %v14101_v62  ;;  %7841 = vpow2.f32 %v7027_v13  ;;  %v5147_v20 = vmul.f32 %v11116_v6, %v14103_v14  ;;  %v4199_v44 = vadd.f32 1.0, %v7810_v59  ;;  %v2834_v50 = vpop.f32.mrf.mxu1  ;;  %v14105_v62 = vld [vmem:[#allocation14_spill] sm:$0xff] }
 0x257   : > { %v7818_v52 = vpop.eup %7817  ;;  %7843 = vrcp.f32 %v4040_v55  ;;  %v4200_v13 = vadd.f32 1.0, %v7816_v38  ;;  %v11328_v61 = vadd.f32 %v5146_v24, %v5145_v39  ;;  %v5150_v26 = vmul.f32 %v11221_v42, %v14105_v62  ;;  %v2436_v38 = vpop.f32.mrf.mxu0  ;;  %v14109_v24 = vld [vmem:[#allocation6_spill] sm:$0xff] }
 0x258   : > { %v11324_v60 = vpop.eup %7819  ;;  %7845 = vpow2.f32 %v6868_v31  ;;  %v5518_v22 = vadd.f32 %v4996_v17, %v4995_v29  ;;  %v11332_v51 = vadd.f32 %v5148_v43, %v5147_v20  ;;  %v6870_v6 = vmul.f32 -1.442695, %v11322_v0  ;;  %v14107_v29 = vld [vmem:[#allocation36_spill] sm:$0xff]  ;;  %v11338_v31 = vpop.permute.xlu1 %1422  ;;  %v14111_v20 = vld [vmem:[#allocation15_spill] sm:$0xff] }
 0x259   : > { %v7822_v12 = vpop.eup %7821  ;;  %7847 = vrcp.f32 %v4198_v8  ;;  %14104 = vst [vmem:[#allocation39_spill] sm:$0xff] %v11328_v61  ;;  %v11336_v59 = vadd.f32 %v2434_v49, %v14107_v29  ;;  %14108 = vst [vmem:[#allocation142_spill] sm:$0xff] %v11338_v31  ;;  %v5149_v8 = vmul.f32 %v11173_v2, %v14109_v24  ;;  %v11343_v42 = vadd.f32 %v2834_v50, %v11118_v25  ;;  %v2836_v2 = vpop.f32.mrf.mxu1 }
 0x25a   : > { %v7824_v55 = vpop.eup %7823  ;;  %v4041_v11 = vadd.f32 1.0, %v7822_v12  ;;  %7849 = vpow2.f32 %v7028_v19  ;;  %5519 = vadd.xlane.f32.xlu0 %v5518_v22  ;;  %14106 = vst [vmem:[#allocation113_spill] sm:$0xff] %v11332_v51  ;;  %v11345_v19 = vpop.permute.xlu0 %1437  ;;  %v5152_v22 = vmul.f32 %v11266_v15, %v14111_v20  ;;  %v11355_v24 = vadd.f32 %v2436_v38, %v14107_v29  ;;  %v14115_v38 = vld [vmem:[#allocation58_spill] sm:$0xff]  ;;  %v14118_v20 = vld [vmem:[#allocation49_spill] sm:$0xff] }
 0x25b   : > { %v7826_v35 = vpop.eup %7825  ;;  %7851 = vpow2.f32 %v6869_v58  ;;  %14110 = vst [vmem:[#allocation152_spill] sm:$0xff] %v11345_v19  ;;  %v4997_v17 = vmul.f32 %v7824_v55, %v11009_v56  ;;  %v6871_v62 = vmul.f32 -1.442695, %v11336_v59  ;;  %v2440_v56 = vpop.f32.mrf.mxu0 }
 0x25c   : > { %v7828_v39 = vpop.eup %7827  ;;  %7853 = vrcp.f32 %v4199_v44  ;;  %v4201_v49 = vadd.f32 1.0, %v7826_v35  ;;  %v11351_v44 = vadd.f32 %v5150_v26, %v5149_v8  ;;  %v14113_v35 = vld [vmem:[#allocation16_spill] sm:$0xff]  ;;  %v7031_v26 = vmul.f32 -1.442695, %v11343_v42 }
 0x25d   : > { %v7830_v43 = vpop.eup %7829  ;;  %v4998_v58 = vmul.f32 %v7828_v39, %v11037_v36  ;;  %7855 = vrcp.f32 %v4200_v13  ;;  %v5151_v55 = vmul.f32 %v11227_v10, %v14113_v35  ;;  %v11365_v39 = vpop.permute.xlu1 %1432  ;;  %v5154_v8 = vmul.f32 %v7818_v52, %v14115_v38 }
 0x25e   : > { %v7832_v14 = vpop.eup %7831  ;;  %7857 = vrcp.f32 %v4041_v11  ;;  %v4042_v12 = vadd.f32 1.0, %v7830_v43  ;;  %14112 = vst [vmem:[#allocation10_spill] sm:$0xff] %v11351_v44  ;;  %14114 = vst [vmem:[#allocation118_spill] sm:$0xff] %v11365_v39 }
 0x25f   : > { %v7834_v50 = vpop.eup %7833  ;;  %7859 = vpow2.f32 %v6870_v6  ;;  %v5521_v36 = vadd.f32 %v4998_v58, %v4997_v17  ;;  %v11363_v6 = vadd.f32 %v2836_v2, %v11118_v25  ;;  %v11368_v17 = vpop.permute.xlu0 %1447  ;;  %v11370_v10 = vadd.f32 %v5152_v22, %v5151_v55 }
 0x260   : > { %v11357_v13 = vpop.eup %7835  ;;  %7861 = vrcp.f32 %v4042_v12  ;;  %v4202_v15 = vadd.f32 1.0, %v7834_v50  ;;  %14116 = vst [vmem:[#allocation148_spill] sm:$0xff] %v11368_v17  ;;  %v11374_v12 = vadd.f32 %v2440_v56, %v14118_v20  ;;  %v2442_v25 = vpop.f32.mrf.mxu0  ;;  %v14119_v50 = vld [vmem:[#allocation71_spill] sm:$0xff] }
 0x261   : > { %v7838_v11 = vpop.eup %7837  ;;  %7863 = vrcp.f32 %v4201_v49  ;;  %5522 = vadd.xlane.f32.xlu1 %v5521_v36  ;;  %14117 = vst [vmem:[#allocation8_spill] sm:$0xff] %v11370_v10  ;;  %v6872_v49 = vmul.f32 -1.442695, %v11355_v24  ;;  %v5153_v36 = vmul.f32 %v11273_v40, %v14119_v50 }
 0x262   : > { %v7840_v29 = vpop.eup %7839  ;;  %7865 = vrcp.f32 %v4202_v15  ;;  %v4043_v43 = vadd.f32 1.0, %v7838_v11  ;;  %v14120_v11 = vld [vmem:[#allocation89_spill] sm:$0xff]  ;;  %v6873_v40 = vmul.f32 -1.442695, %v11374_v12 }
 0x263   : > { %v7842_v58 = vpop.eup %7841  ;;  %7867 = vpow2.f32 %v6871_v62  ;;  %v4999_v15 = vmul.f32 %v7840_v29, %v11059_v37  ;;  %v7032_v62 = vmul.f32 -1.442695, %v11363_v6  ;;  %v5156_v38 = vmul.f32 %v7832_v14, %v14120_v11  ;;  %v11392_v50 = vpop.permute.xlu0 %1457 }
 0x264   : > { %v7844_v2 = vpop.eup %7843  ;;  %7869 = vrcp.f32 %v4043_v43  ;;  %v4203_v52 = vadd.f32 1.0, %v7842_v58  ;;  %v11382_v10 = vadd.f32 %v5154_v8, %v5153_v36  ;;  %v2444_v43 = vpop.f32.mrf.mxu0  ;;  %v11390_v14 = vadd.f32 %v2442_v25, %v14118_v20  ;;  %14124 = vst [vmem:[#allocation144_spill] sm:$0xff] %v11392_v50 }
 0x265   : > { %v7846_v35 = vpop.eup %7845  ;;  %v5000_v22 = vmul.f32 %v7844_v2, %v11100_v41  ;;  %7871 = vpow2.f32 %v7031_v26  ;;  %v11385_v58 = vpop.permute.xlu1 %1442  ;;  %v14123_v41 = vld [vmem:[#allocation63_spill] sm:$0xff] }
 0x266   : > { %v7848_v55 = vpop.eup %7847  ;;  %7873 = vrcp.f32 %v4203_v52  ;;  %v4044_v56 = vadd.f32 1.0, %v7846_v35  ;;  %14121 = vst [vmem:[#allocation116_spill] sm:$0xff] %v11382_v10  ;;  %14122 = vst [vmem:[#allocation154_spill] sm:$0xff] %v11385_v58  ;;  %v5155_v26 = vmul.f32 %v11324_v60, %v14123_v41  ;;  %v14128_v60 = vld [vmem:[#allocation41_spill] sm:$0xff]  ;;  %v2446_v25 = vpop.f32.mrf.mxu0 }
 0x267   : > { %v7850_v51 = vpop.eup %7849  ;;  %7875 = vpow2.f32 %v6872_v49  ;;  %v5524_v37 = vadd.f32 %v5000_v22, %v4999_v15  ;;  %v14126_v15 = vld [vmem:[#allocation125_spill] sm:$0xff]  ;;  %v14127_v22 = vld [vmem:[#allocation20_spill] sm:$0xff]  ;;  %v11402_v20 = vadd.f32 %v2444_v43, %v14128_v60 }
 0x268   : > { %v7852_v29 = vpop.eup %7851  ;;  %7877 = vrcp.f32 %v4044_v56  ;;  %v4204_v2 = vadd.f32 1.0, %v7850_v51  ;;  %v11394_v52 = vadd.f32 %v5156_v38, %v5155_v26  ;;  %v11398_v11 = vadd.f32 %v14127_v22, %v14126_v15  ;;  %v14131_v22 = vld [vmem:[#allocation23_spill] sm:$0xff] }
 0x269   : > { %v7854_v8 = vpop.eup %7853  ;;  %v4045_v36 = vadd.f32 1.0, %v7852_v29  ;;  %7879 = vpow2.f32 %v7032_v62  ;;  %5525 = vadd.xlane.f32.xlu0 %v5524_v37  ;;  %v5158_v51 = vmul.f32 %v7848_v55, %v11047_v27  ;;  %v6874_v62 = vmul.f32 -1.442695, %v11390_v14  ;;  %v11407_v41 = vpop.permute.xlu1 %1452 }
 0x26a   : > { %v7856_v49 = vpop.eup %7855  ;;  %7881 = vrcp.f32 %v4204_v2  ;;  %14125 = vst [vmem:[#allocation132_spill] sm:$0xff] %v11394_v52  ;;  %v5157_v38 = vmul.f32 %v11357_v13, %v11029_v34  ;;  %14129 = vst [vmem:[#allocation117_spill] sm:$0xff] %v11407_v41  ;;  %v14130_v2 = vld [vmem:[#allocation115_spill] sm:$0xff]  ;;  %v11416_v52 = vpop.permute.xlu0 %1467  ;;  %v6933_v34 = vmul.f32 -1.442695, %v11398_v11 }
 0x26b   : > { %v7858_v35 = vpop.eup %7857  ;;  %7883 = vpow2.f32 %v6873_v40  ;;  %v11411_v27 = vadd.f32 %v14131_v22, %v14130_v2  ;;  %v5160_v55 = vmul.f32 %v7856_v49, %v11127_v7  ;;  %14132 = vst [vmem:[#allocation105_spill] sm:$0xff] %v11416_v52  ;;  %v6875_v13 = vmul.f32 -1.442695, %v11402_v20  ;;  %v14134_v49 = vld [vmem:[#allocation21_spill] sm:$0xff]  ;;  %v14135_v52 = vld [vmem:[#allocation54_spill] sm:$0xff] }
 0x26c   : > { %v7860_v56 = vpop.eup %7859  ;;  %7885 = vrcp.f32 %v4045_v36  ;;  %v5001_v43 = vmul.f32 %v7858_v35, %v11143_v5  ;;  %v2450_v36 = vpop.f32.mrf.mxu0  ;;  %v5159_v22 = vmul.f32 %v7854_v8, %v11092_v23  ;;  %v11424_v7 = vadd.f32 %v2446_v25, %v14128_v60 }
 0x26d   : > { %v7862_v37 = vpop.eup %7861  ;;  %v4046_v29 = vadd.f32 1.0, %v7860_v56  ;;  %v11420_v56 = vadd.f32 %v5158_v51, %v5157_v38  ;;  %v11428_v35 = vadd.f32 %v14134_v49, %v14126_v15  ;;  %v11431_v61 = vadd.f32 %v2450_v36, %v14135_v52  ;;  %v11436_v60 = vpop.permute.xlu1 %1462 }
 0x26e   : > { %v7864_v26 = vpop.eup %7863  ;;  %v5002_v40 = vmul.f32 %v7862_v37, %v11196_v3  ;;  %v11433_v51 = vadd.f32 %v5160_v55, %v5159_v22  ;;  %14137 = vst [vmem:[#allocation119_spill] sm:$0xff] %v11436_v60  ;;  %v11444_v55 = vpop.permute.xlu0 %1477 }
 0x26f   : > { %v7866_v10 = vpop.eup %7865  ;;  %7887 = vrcp.f32 %v4046_v29  ;;  %14133 = vst [vmem:[#allocation145_spill] sm:$0xff] %v11420_v56  ;;  %14139 = vst [vmem:[#allocation133_spill] sm:$0xff] %v11444_v55  ;;  %v14161_v55 = vld [vmem:[#allocation33_spill] sm:$0xff] }
 0x270   : > { %v7868_v44 = vpop.eup %7867  ;;  %7889 = vpow2.f32 %v6874_v62  ;;  %v5527_v5 = vadd.f32 %v5002_v40, %v5001_v43  ;;  %14136 = vst [vmem:[#allocation111_spill] sm:$0xff] %v11433_v51  ;;  %v5162_v23 = vmul.f32 %v7866_v10, %v11206_v30  ;;  %v14138_v62 = vld [vmem:[#allocation25_spill] sm:$0xff]  ;;  %v6876_v43 = vmul.f32 -1.442695, %v11424_v7  ;;  %v2452_v40 = vpop.f32.mrf.mxu0 }
 0x271   : > { %v7870_v3 = vpop.eup %7869  ;;  %v4047_v37 = vadd.f32 1.0, %v7868_v44  ;;  %7891 = vpow2.f32 %v6933_v34  ;;  %v11440_v15 = vadd.f32 %v14138_v62, %v14130_v2  ;;  %v6935_v44 = vmul.f32 -1.442695, %v11411_v27 }
 0x272   : > { %v7872_v29 = vpop.eup %7871  ;;  %5528 = vadd.xlane.f32.xlu1 %v5527_v5  ;;  %7893 = vpow2.f32 %v6875_v13  ;;  %v6934_v34 = vmul.f32 -1.442695, %v11428_v35  ;;  %v5161_v30 = vmul.f32 %v7864_v26, %v11169_v57  ;;  %v5003_v5 = vmul.f32 %v7870_v3, %v11225_v16 }
 0x273   : > { %v7874_v38 = vpop.eup %7873  ;;  %v4207_v8 = vadd.f32 1.0, %v7872_v29  ;;  %7895 = vrcp.f32 %v4047_v37  ;;  %v6877_v13 = vmul.f32 -1.442695, %v11431_v61  ;;  %v11452_v62 = vadd.f32 %v2452_v40, %v14135_v52  ;;  %v2454_v37 = vpop.f32.mrf.mxu0  ;;  %v14145_v40 = vld [vmem:[#allocation121_spill] sm:$0xff] }
 0x274   : > { %v7876_v25 = vpop.eup %7875  ;;  %v11454_v51 = vadd.f32 %v5162_v23, %v5161_v30  ;;  %v5163_v57 = vmul.f32 %v7874_v38, %v11247_v1  ;;  %v11461_v52 = vpop.permute.xlu0 %1487  ;;  %v14146_v30 = vld [vmem:[#allocation30_spill] sm:$0xff] }
 0x275   : > { %v7878_v36 = vpop.eup %7877  ;;  %v4048_v10 = vadd.f32 1.0, %v7876_v25  ;;  %7897 = vrcp.f32 %v4207_v8  ;;  %v11459_v8 = vpop.permute.xlu1 %1472  ;;  %14142 = vst [vmem:[#allocation149_spill] sm:$0xff] %v11461_v52  ;;  %v6878_v1 = vmul.f32 -1.442695, %v11452_v62 }
 0x276   : > { %v7880_v22 = vpop.eup %7879  ;;  %v5004_v2 = vmul.f32 %v7878_v36, %v11255_v54  ;;  %14140 = vst [vmem:[#allocation122_spill] sm:$0xff] %v11454_v51  ;;  %v6936_v54 = vmul.f32 -1.442695, %v11440_v15  ;;  %14141 = vst [vmem:[#allocation138_spill] sm:$0xff] %v11459_v8 }
 0x277   : > { %v7882_v49 = vpop.eup %7881  ;;  %7899 = vrcp.f32 %v4048_v10  ;;  %v4208_v29 = vadd.f32 1.0, %v7880_v22  ;;  %v11471_v10 = vadd.f32 %v14146_v30, %v14145_v40  ;;  %v2456_v22 = vpop.f32.mrf.mxu0 }
 0x278   : > { %v5164_v26 = vmul.f32 %v7882_v49, %v11278_v4  ;;  %7901 = vpow2.f32 %v6876_v43  ;;  %v5530_v16 = vadd.f32 %v5004_v2, %v5003_v5  ;;  %v7884_v3 = vpop.eup %7883  ;;  %v14144_v4 = vld [vmem:[#allocation46_spill] sm:$0xff]  ;;  %v14147_v5 = vld [vmem:[#allocation129_spill] sm:$0xff]  ;;  %v14148_v2 = vld [vmem:[#allocation27_spill] sm:$0xff] }
 0x279   : > { %7903 = vrcp.f32 %v4208_v29  ;;  %v7886_v25 = vpop.eup %7885  ;;  %v4049_v36 = vadd.f32 1.0, %v7884_v3  ;;  %v11467_v38 = vadd.f32 %v2454_v37, %v14144_v4  ;;  %v11475_v49 = vadd.f32 %v14148_v2, %v14147_v5  ;;  %v11483_v37 = vpop.permute.xlu1 %1482 }
 0x27a   : > { %7905 = vpow2.f32 %v6934_v34  ;;  %5531 = vadd.xlane.f32.xlu0 %v5530_v16  ;;  %v11463_v23 = vadd.f32 %v5164_v26, %v5163_v57  ;;  %v11481_v26 = vadd.f32 %v2456_v22, %v14144_v4  ;;  %14149 = vst [vmem:[#allocation146_spill] sm:$0xff] %v11483_v37  ;;  %v2460_v30 = vpop.f32.mrf.mxu0  ;;  %v14160_v37 = vld [vmem:[#allocation134_spill] sm:$0xff] }
 0x27b   : > { %7907 = vpow2.f32 %v6877_v13  ;;  %v5005_v13 = vmul.f32 %v7886_v25, %v11300_v53  ;;  %v11488_v53 = vpop.permute.xlu0 %1497  ;;  %v14151_v25 = vld [vmem:[#allocation28_spill] sm:$0xff] }
 0x27c   : > { %14143 = vst [vmem:[#allocation161_spill] sm:$0xff] %v11463_v23  ;;  %v7888_v43 = vpop.eup %7887  ;;  %7909 = vpow2.f32 %v6935_v44  ;;  %v6879_v44 = vmul.f32 -1.442695, %v11467_v38  ;;  %14150 = vst [vmem:[#allocation135_spill] sm:$0xff] %v11488_v53 }
 0x27d   : > { %v7890_v34 = vpop.eup %7889  ;;  %7911 = vpow2.f32 %v6936_v54  ;;  %v5006_v29 = vmul.f32 %v7888_v43, %v11322_v0  ;;  %v6939_v54 = vmul.f32 -1.442695, %v11471_v10  ;;  %v14152_v43 = vld [vmem:[#allocation32_spill] sm:$0xff] }
 0x27e   : > { %7913 = vrcp.f32 %v4049_v36  ;;  %v4050_v57 = vadd.f32 1.0, %v7890_v34  ;;  %v11485_v3 = vpop.eup %7891  ;;  %v11492_v36 = vadd.f32 %v14151_v25, %v14147_v5  ;;  %v11497_v22 = vadd.f32 %v14152_v43, %v14145_v40  ;;  %v14153_v5 = vld [vmem:[#allocation59_spill] sm:$0xff]  ;;  %v11522_v43 = vpop.permute.xlu1 %1492 }
 0x27f   : > { %7915 = vpow2.f32 %v6878_v1  ;;  %v5533_v16 = vadd.f32 %v5006_v29, %v5005_v13  ;;  %v7894_v0 = vpop.eup %7893  ;;  %v6937_v1 = vmul.f32 -1.442695, %v11475_v49  ;;  %v11504_v13 = vmul.f32 -1.442695, %v11481_v26  ;;  %14154 = vst [vmem:[#allocation31_spill] sm:$0xff] %v11522_v43 }
 0x280   : > { %7917 = vrcp.f32 %v4050_v57  ;;  %v7896_v4 = vpop.eup %7895  ;;  %v11499_v34 = vadd.f32 1.0, %v7894_v0  ;;  %v11507_v57 = vadd.f32 %v2460_v30, %v14153_v5  ;;  %v11514_v40 = vmul.f32 -1.442695, %v11492_v36 }
 0x281   : > { %5534 = vadd.xlane.f32.xlu1 %v5533_v16  ;;  %7919 = vpow2.f32 %v6879_v44  ;;  %v11509_v16 = vpop.f32.mrf.mxu0  ;;  %v11517_v0 = vmul.f32 %v7896_v4, %v11336_v59  ;;  %v6940_v30 = vmul.f32 -1.442695, %v11497_v22  ;;  %v11848_v4 = vpop.permute.xlu0 %1507 }
 0x282   : > { %v11501_v2 = vpop.eup %7897  ;;  %7921 = vpow2.f32 %v6939_v54  ;;  %v8512_v54 = vmov 0.0   ;;  %14155 = vst [vmem:[#allocation114_spill] sm:$0xff] %v11848_v4  ;;  %v6881_v23 = vmul.f32 -1.442695, %v11507_v57 }
 0x283   : > { %7923 = vpow2.f32 %v6937_v1  ;;  %229 = vst.msk [vmem:[#allocation2] sm:$0xff] %vm228_vm1, %v8512_v54  ;;  %230 = vst.msk [vmem:[#allocation2 + $0x8] sm:$0xff] %vm228_vm1, %v8512_v54  ;;  %v5167_v43 = vmul.f32 %v11501_v2, %v11343_v42 }
 0x284   : > { %v7900_v29 = vpop.eup %7899  ;;  %231 = vst.msk [vmem:[#allocation2 + $0x10] sm:$0xff] %vm228_vm1, %v8512_v54  ;;  %232 = vst.msk [vmem:[#allocation2 + $0x18] sm:$0xff] %vm228_vm1, %v8512_v54  ;;  %7925 = vrcp.f32 %v11499_v34  ;;  %v11859_v34 = vadd.f32 %v11509_v16, %v14153_v5  ;;  %v11868_v5 = vpop.permute.xlu1 %1502 }
 0x285   : > { %v11511_v25 = vpop.eup %7901  ;;  %v11520_v44 = vmul.f32 %v7900_v29, %v11355_v24  ;;  %233 = vst.msk [vmem:[#allocation2 + $0x20] sm:$0xff] %vm228_vm1, %v8512_v54  ;;  %234 = vst.msk [vmem:[#allocation2 + $0x28] sm:$0xff] %vm228_vm1, %v8512_v54  ;;  %v4109_v24 = vadd.f32 1.0, %v11485_v3  ;;  %7927 = vpow2.f32 %v11504_v13 }
 0x286   : > { %235 = vst.msk [vmem:[#allocation2 + $0x30] sm:$0xff] %vm228_vm1, %v8512_v54  ;;  %236 = vst.msk [vmem:[#allocation2 + $0x38] sm:$0xff] %vm228_vm1, %v8512_v54  ;;  %v7904_v59 = vpop.eup %7903  ;;  %v4052_v1 = vadd.f32 1.0, %v11511_v25  ;;  %v2464_v25 = vpop.f32.mrf.mxu0 }
 0x287   : > { %237 = vst.msk [vmem:[#allocation2 + $0x40] sm:$0xff] %vm228_vm1, %v8512_v54  ;;  %238 = vst.msk [vmem:[#allocation2 + $0x48] sm:$0xff] %vm228_vm1, %v8512_v54  ;;  %v7906_v29 = vpop.eup %7905  ;;  %v5168_v53 = vmul.f32 %v7904_v59, %v11363_v6  ;;  %v14157_v59 = vld [vmem:[#allocation126_spill] sm:$0xff] }
 0x288   : > { %239 = vst.msk [vmem:[#allocation2 + $0x50] sm:$0xff] %vm228_vm1, %v8512_v54  ;;  %240 = vst.msk [vmem:[#allocation2 + $0x58] sm:$0xff] %vm228_vm1, %v8512_v54  ;;  %v7908_v3 = vpop.eup %7907  ;;  %7929 = vrcp.f32 %v4052_v1  ;;  %v4110_v13 = vadd.f32 1.0, %v7906_v29  ;;  %v14158_v1 = vld [vmem:[#allocation37_spill] sm:$0xff] }
 0x289   : > { %241 = vst.msk [vmem:[#allocation2 + $0x60] sm:$0xff] %vm228_vm1, %v8512_v54  ;;  %242 = vst.msk [vmem:[#allocation2 + $0x68] sm:$0xff] %vm228_vm1, %v8512_v54  ;;  %v7910_v4 = vpop.eup %7909  ;;  %7931 = vpow2.f32 %v11514_v40  ;;  %v4053_v42 = vadd.f32 1.0, %v7908_v3  ;;  %v11862_v6 = vadd.f32 %v5168_v53, %v5167_v43  ;;  %v11866_v52 = vadd.f32 %v14158_v1, %v14157_v59  ;;  %v14162_v43 = vld [vmem:[#allocation51_spill] sm:$0xff] }
 0x28a   : > { %243 = vst.msk [vmem:[#allocation2 + $0x70] sm:$0xff] %vm228_vm1, %v8512_v54  ;;  %244 = vst.msk [vmem:[#allocation2 + $0x78] sm:$0xff] %vm228_vm1, %v8512_v54  ;;  %v7912_v2 = vpop.eup %7911  ;;  %7933 = vpow2.f32 %v6940_v30  ;;  %v11872_v40 = vadd.f32 %v14161_v55, %v14160_v37  ;;  %v6882_v53 = vmul.f32 -1.442695, %v11859_v34  ;;  %v11876_v29 = vadd.f32 %v2464_v25, %v14162_v43  ;;  %v2466_v30 = vpop.f32.mrf.mxu0 }
 0x28b   : > { %245 = vst.msk [vmem:[#allocation2 + $0x80] sm:$0xff] %vm228_vm1, %v8512_v54  ;;  %246 = vst.msk [vmem:[#allocation2 + $0x88] sm:$0xff] %vm228_vm1, %v8512_v54  ;;  %7935 = vrcp.f32 %v4109_v24  ;;  %v5229_v24 = vld [vmem:[#allocation2] sm:$0xff]  ;;  %v4111_v3 = vadd.f32 1.0, %v7910_v4  ;;  %v11885_v4 = vadd.f32 %v2466_v30, %v14162_v43  ;;  %v5231_v30 = vld [vmem:[#allocation2 + $0x10] sm:$0xff] }
 0x28c   : > { %247 = vst.msk [vmem:[#allocation2 + $0x90] sm:$0xff] %vm228_vm1, %v8512_v54  ;;  %248 = vst.msk [vmem:[#allocation2 + $0x98] sm:$0xff] %vm228_vm1, %v8512_v54  ;;  %7937 = vpow2.f32 %v6881_v23  ;;  %v6943_v23 = vmul.f32 -1.442695, %v11866_v52  ;;  %v6883_v8 = vmul.f32 -1.442695, %v11876_v29 }
 0x28d   : > { %249 = vst.msk [vmem:[#allocation2 + $0xa0] sm:$0xff] %vm228_vm1, %v8512_v54  ;;  %250 = vst.msk [vmem:[#allocation2 + $0xa8] sm:$0xff] %vm228_vm1, %v8512_v54  ;;  %7939 = vrcp.f32 %v4053_v42  ;;  %v2470_v42 = vpop.f32.mrf.mxu0  ;;  %v6941_v43 = vmul.f32 -1.442695, %v11872_v40 }
 0x28e   : > { %251 = vst.msk [vmem:[#allocation2 + $0xb0] sm:$0xff] %vm228_vm1, %v8512_v54  ;;  %252 = vst.msk [vmem:[#allocation2 + $0xb8] sm:$0xff] %vm228_vm1, %v8512_v54  ;;  %7941 = vrcp.f32 %v4110_v13 }
 0x28f   : > { %253 = vst.msk [vmem:[#allocation2 + $0xc0] sm:$0xff] %vm228_vm1, %v8512_v54  ;;  %254 = vst.msk [vmem:[#allocation2 + $0xc8] sm:$0xff] %vm228_vm1, %v8512_v54 }
 0x290   : > { %255 = vst.msk [vmem:[#allocation2 + $0xd0] sm:$0xff] %vm228_vm1, %v8512_v54  ;;  %256 = vst.msk [vmem:[#allocation2 + $0xd8] sm:$0xff] %vm228_vm1, %v8512_v54 }
 0x291   : > { %257 = vst.msk [vmem:[#allocation2 + $0xe0] sm:$0xff] %vm228_vm1, %v8512_v54  ;;  %258 = vst.msk [vmem:[#allocation2 + $0xe8] sm:$0xff] %vm228_vm1, %v8512_v54 }
 0x292   : > { %259 = vst.msk [vmem:[#allocation2 + $0xf0] sm:$0xff] %vm228_vm1, %v8512_v54  ;;  %260 = vst.msk [vmem:[#allocation2 + $0xf8] sm:$0xff] %vm228_vm1, %v8512_v54 }
 0x293   : > { %261 = vst.msk [vmem:[#allocation2 + $0x100] sm:$0xff] %vm228_vm1, %v8512_v54  ;;  %262 = vst.msk [vmem:[#allocation2 + $0x108] sm:$0xff] %vm228_vm1, %v8512_v54 }
 0x294   : > { %263 = vst.msk [vmem:[#allocation2 + $0x110] sm:$0xff] %vm228_vm1, %v8512_v54  ;;  %264 = vst.msk [vmem:[#allocation2 + $0x118] sm:$0xff] %vm228_vm1, %v8512_v54 }
 0x295   : > { %265 = vst.msk [vmem:[#allocation2 + $0x120] sm:$0xff] %vm228_vm1, %v8512_v54  ;;  %266 = vst.msk [vmem:[#allocation2 + $0x128] sm:$0xff] %vm228_vm1, %v8512_v54 }
 0x296   : > { %267 = vst.msk [vmem:[#allocation2 + $0x130] sm:$0xff] %vm228_vm1, %v8512_v54  ;;  %268 = vst.msk [vmem:[#allocation2 + $0x138] sm:$0xff] %vm228_vm1, %v8512_v54 }
 0x297   : > { %269 = vst.msk [vmem:[#allocation2 + $0x140] sm:$0xff] %vm228_vm1, %v8512_v54  ;;  %270 = vst.msk [vmem:[#allocation2 + $0x148] sm:$0xff] %vm228_vm1, %v8512_v54 }
 0x298   : > { %271 = vst.msk [vmem:[#allocation2 + $0x150] sm:$0xff] %vm228_vm1, %v8512_v54  ;;  %272 = vst.msk [vmem:[#allocation2 + $0x158] sm:$0xff] %vm228_vm1, %v8512_v54 }
 0x299   : > { %273 = vst.msk [vmem:[#allocation2 + $0x160] sm:$0xff] %vm228_vm1, %v8512_v54  ;;  %274 = vst.msk [vmem:[#allocation2 + $0x168] sm:$0xff] %vm228_vm1, %v8512_v54 }
 0x29a   : > { %275 = vst.msk [vmem:[#allocation2 + $0x170] sm:$0xff] %vm228_vm1, %v8512_v54  ;;  %276 = vst.msk [vmem:[#allocation2 + $0x178] sm:$0xff] %vm228_vm1, %v8512_v54 }
 0x29b   : > { %277 = vst.msk [vmem:[#allocation2 + $0x180] sm:$0xff] %vm228_vm1, %v8512_v54  ;;  %278 = vst.msk [vmem:[#allocation2 + $0x188] sm:$0xff] %vm228_vm1, %v8512_v54 }
 0x29c   : > { %279 = vst.msk [vmem:[#allocation2 + $0x190] sm:$0xff] %vm228_vm1, %v8512_v54  ;;  %280 = vst.msk [vmem:[#allocation2 + $0x198] sm:$0xff] %vm228_vm1, %v8512_v54 }
 0x29d   : > { %281 = vst.msk [vmem:[#allocation2 + $0x1a0] sm:$0xff] %vm228_vm1, %v8512_v54  ;;  %282 = vst.msk [vmem:[#allocation2 + $0x1a8] sm:$0xff] %vm228_vm1, %v8512_v54 }
 0x29e   : > { %283 = vst.msk [vmem:[#allocation2 + $0x1b0] sm:$0xff] %vm228_vm1, %v8512_v54  ;;  %284 = vst.msk [vmem:[#allocation2 + $0x1b8] sm:$0xff] %vm228_vm1, %v8512_v54 }
 0x29f   : > { %285 = vst.msk [vmem:[#allocation2 + $0x1c0] sm:$0xff] %vm228_vm1, %v8512_v54  ;;  %286 = vst.msk [vmem:[#allocation2 + $0x1c8] sm:$0xff] %vm228_vm1, %v8512_v54 }
 0x2a0   : > { %287 = vst.msk [vmem:[#allocation2 + $0x1d0] sm:$0xff] %vm228_vm1, %v8512_v54  ;;  %288 = vst.msk [vmem:[#allocation2 + $0x1d8] sm:$0xff] %vm228_vm1, %v8512_v54 }
 0x2a1   : > { %289 = vst.msk [vmem:[#allocation2 + $0x1e0] sm:$0xff] %vm228_vm1, %v8512_v54  ;;  %290 = vst.msk [vmem:[#allocation2 + $0x1e8] sm:$0xff] %vm228_vm1, %v8512_v54  ;;  %v5276_v31 = vld [vmem:[#allocation2 + $0x178] sm:$0xff] }
 0x2a2   : > { %291 = vst.msk [vmem:[#allocation2 + $0x1f0] sm:$0xff] %vm228_vm1, %v8512_v54  ;;  %292 = vst.msk [vmem:[#allocation2 + $0x1f8] sm:$0xff] %vm228_vm1, %v8512_v54 }
 0x2a3   : > { %293 = vst.msk [vmem:[#allocation2 + $0x200] sm:$0xff] %vm228_vm1, %v8512_v54  ;;  %294 = vst.msk [vmem:[#allocation2 + $0x208] sm:$0xff] %vm228_vm1, %v8512_v54 }
 0x2a4   : > { %295 = vst.msk [vmem:[#allocation2 + $0x210] sm:$0xff] %vm228_vm1, %v8512_v54  ;;  %296 = vst.msk [vmem:[#allocation2 + $0x218] sm:$0xff] %vm228_vm1, %v8512_v54 }
 0x2a5   : > { %297 = vst.msk [vmem:[#allocation2 + $0x220] sm:$0xff] %vm228_vm1, %v8512_v54  ;;  %298 = vst.msk [vmem:[#allocation2 + $0x228] sm:$0xff] %vm228_vm1, %v8512_v54 }
 0x2a6   : > { %299 = vst.msk [vmem:[#allocation2 + $0x230] sm:$0xff] %vm228_vm1, %v8512_v54  ;;  %300 = vst.msk [vmem:[#allocation2 + $0x238] sm:$0xff] %vm228_vm1, %v8512_v54 }
 0x2a7   : > { %301 = vst.msk [vmem:[#allocation2 + $0x240] sm:$0xff] %vm228_vm1, %v8512_v54  ;;  %302 = vst.msk [vmem:[#allocation2 + $0x248] sm:$0xff] %vm228_vm1, %v8512_v54 }
 0x2a8   : > { %303 = vst.msk [vmem:[#allocation2 + $0x250] sm:$0xff] %vm228_vm1, %v8512_v54  ;;  %304 = vst.msk [vmem:[#allocation2 + $0x258] sm:$0xff] %vm228_vm1, %v8512_v54 }
 0x2a9   : > { %305 = vst.msk [vmem:[#allocation2 + $0x260] sm:$0xff] %vm228_vm1, %v8512_v54  ;;  %306 = vst.msk [vmem:[#allocation2 + $0x268] sm:$0xff] %vm228_vm1, %v8512_v54 }
 0x2aa   : > { %307 = vst.msk [vmem:[#allocation2 + $0x270] sm:$0xff] %vm228_vm1, %v8512_v54  ;;  %308 = vst.msk [vmem:[#allocation2 + $0x278] sm:$0xff] %vm228_vm1, %v8512_v54 }
 0x2ab   : > { %309 = vst.msk [vmem:[#allocation2 + $0x280] sm:$0xff] %vm228_vm1, %v8512_v54  ;;  %310 = vst.msk [vmem:[#allocation2 + $0x288] sm:$0xff] %vm228_vm1, %v8512_v54 }
 0x2ac   : > { %311 = vst.msk [vmem:[#allocation2 + $0x290] sm:$0xff] %vm228_vm1, %v8512_v54  ;;  %312 = vst.msk [vmem:[#allocation2 + $0x298] sm:$0xff] %vm228_vm1, %v8512_v54 }
 0x2ad   : > { %313 = vst.msk [vmem:[#allocation2 + $0x2a0] sm:$0xff] %vm228_vm1, %v8512_v54  ;;  %314 = vst.msk [vmem:[#allocation2 + $0x2a8] sm:$0xff] %vm228_vm1, %v8512_v54 }
 0x2ae   : > { %315 = vst.msk [vmem:[#allocation2 + $0x2b0] sm:$0xff] %vm228_vm1, %v8512_v54  ;;  %316 = vst.msk [vmem:[#allocation2 + $0x2b8] sm:$0xff] %vm228_vm1, %v8512_v54 }
 0x2af   : > { %317 = vst.msk [vmem:[#allocation2 + $0x2c0] sm:$0xff] %vm228_vm1, %v8512_v54  ;;  %318 = vst.msk [vmem:[#allocation2 + $0x2c8] sm:$0xff] %vm228_vm1, %v8512_v54 }
 0x2b0   : > { %319 = vst.msk [vmem:[#allocation2 + $0x2d0] sm:$0xff] %vm228_vm1, %v8512_v54  ;;  %320 = vst.msk [vmem:[#allocation2 + $0x2d8] sm:$0xff] %vm228_vm1, %v8512_v54 }
 0x2b1   : > { %321 = vst.msk [vmem:[#allocation2 + $0x2e0] sm:$0xff] %vm228_vm1, %v8512_v54  ;;  %322 = vst.msk [vmem:[#allocation2 + $0x2e8] sm:$0xff] %vm228_vm1, %v8512_v54 }
 0x2b2   : > { %323 = vst.msk [vmem:[#allocation2 + $0x2f0] sm:$0xff] %vm228_vm1, %v8512_v54  ;;  %324 = vst.msk [vmem:[#allocation2 + $0x2f8] sm:$0xff] %vm228_vm1, %v8512_v54 }
 0x2b3   : > { %325 = vst.msk [vmem:[#allocation2 + $0x300] sm:$0xff] %vm228_vm1, %v8512_v54  ;;  %326 = vst.msk [vmem:[#allocation2 + $0x308] sm:$0xff] %vm228_vm1, %v8512_v54 }
 0x2b4   : > { %327 = vst.msk [vmem:[#allocation2 + $0x310] sm:$0xff] %vm228_vm1, %v8512_v54  ;;  %328 = vst.msk [vmem:[#allocation2 + $0x318] sm:$0xff] %vm228_vm1, %v8512_v54 }
 0x2b5   : > { %329 = vst.msk [vmem:[#allocation2 + $0x320] sm:$0xff] %vm228_vm1, %v8512_v54  ;;  %330 = vst.msk [vmem:[#allocation2 + $0x328] sm:$0xff] %vm228_vm1, %v8512_v54 }
 0x2b6   : > { %331 = vst.msk [vmem:[#allocation2 + $0x330] sm:$0xff] %vm228_vm1, %v8512_v54  ;;  %332 = vst.msk [vmem:[#allocation2 + $0x338] sm:$0xff] %vm228_vm1, %v8512_v54 }
 0x2b7   : > { %333 = vst.msk [vmem:[#allocation2 + $0x340] sm:$0xff] %vm228_vm1, %v8512_v54  ;;  %334 = vst.msk [vmem:[#allocation2 + $0x348] sm:$0xff] %vm228_vm1, %v8512_v54 }
 0x2b8   : > { %335 = vst.msk [vmem:[#allocation2 + $0x350] sm:$0xff] %vm228_vm1, %v8512_v54  ;;  %336 = vst.msk [vmem:[#allocation2 + $0x358] sm:$0xff] %vm228_vm1, %v8512_v54 }
 0x2b9   : > { %337 = vst.msk [vmem:[#allocation2 + $0x360] sm:$0xff] %vm228_vm1, %v8512_v54  ;;  %338 = vst.msk [vmem:[#allocation2 + $0x368] sm:$0xff] %vm228_vm1, %v8512_v54 }
 0x2ba   : > { %339 = vst.msk [vmem:[#allocation2 + $0x370] sm:$0xff] %vm228_vm1, %v8512_v54  ;;  %340 = vst.msk [vmem:[#allocation2 + $0x378] sm:$0xff] %vm228_vm1, %v8512_v54 }
 0x2bb   : > { %341 = vst.msk [vmem:[#allocation2 + $0x380] sm:$0xff] %vm228_vm1, %v8512_v54  ;;  %342 = vst.msk [vmem:[#allocation2 + $0x388] sm:$0xff] %vm228_vm1, %v8512_v54 }
 0x2bc   : > { %343 = vst.msk [vmem:[#allocation2 + $0x390] sm:$0xff] %vm228_vm1, %v8512_v54  ;;  %344 = vst.msk [vmem:[#allocation2 + $0x398] sm:$0xff] %vm228_vm1, %v8512_v54 }
 0x2bd   : > { %345 = vst.msk [vmem:[#allocation2 + $0x3a0] sm:$0xff] %vm228_vm1, %v8512_v54  ;;  %346 = vst.msk [vmem:[#allocation2 + $0x3a8] sm:$0xff] %vm228_vm1, %v8512_v54 }
 0x2be   : > { %347 = vst.msk [vmem:[#allocation2 + $0x3b0] sm:$0xff] %vm228_vm1, %v8512_v54  ;;  %348 = vst.msk [vmem:[#allocation2 + $0x3b8] sm:$0xff] %vm228_vm1, %v8512_v54 }
 0x2bf   : > { %349 = vst.msk [vmem:[#allocation2 + $0x3c0] sm:$0xff] %vm228_vm1, %v8512_v54  ;;  %350 = vst.msk [vmem:[#allocation2 + $0x3c8] sm:$0xff] %vm228_vm1, %v8512_v54 }
 0x2c0   : > { %351 = vst.msk [vmem:[#allocation2 + $0x3d0] sm:$0xff] %vm228_vm1, %v8512_v54  ;;  %352 = vst.msk [vmem:[#allocation2 + $0x3d8] sm:$0xff] %vm228_vm1, %v8512_v54 }
 0x2c1   : > { %353 = vst.msk [vmem:[#allocation2 + $0x3e0] sm:$0xff] %vm228_vm1, %v8512_v54  ;;  %354 = vst.msk [vmem:[#allocation2 + $0x3e8] sm:$0xff] %vm228_vm1, %v8512_v54 }
 0x2c2   : > { %355 = vst.msk [vmem:[#allocation2 + $0x3f0] sm:$0xff] %vm228_vm1, %v8512_v54  ;;  %356 = vst.msk [vmem:[#allocation2 + $0x3f8] sm:$0xff] %vm228_vm1, %v8512_v54 }
 0x2c3   : > { %357 = vst.msk [vmem:[#allocation2 + $0x400] sm:$0xff] %vm228_vm1, %v8512_v54  ;;  %358 = vst.msk [vmem:[#allocation2 + $0x408] sm:$0xff] %vm228_vm1, %v8512_v54 }
 0x2c4   : > { %359 = vst.msk [vmem:[#allocation2 + $0x410] sm:$0xff] %vm228_vm1, %v8512_v54  ;;  %360 = vst.msk [vmem:[#allocation2 + $0x418] sm:$0xff] %vm228_vm1, %v8512_v54 }
 0x2c5   : > { %361 = vst.msk [vmem:[#allocation2 + $0x420] sm:$0xff] %vm228_vm1, %v8512_v54  ;;  %362 = vst.msk [vmem:[#allocation2 + $0x428] sm:$0xff] %vm228_vm1, %v8512_v54 }
 0x2c6   : > { %363 = vst.msk [vmem:[#allocation2 + $0x430] sm:$0xff] %vm228_vm1, %v8512_v54  ;;  %364 = vst.msk [vmem:[#allocation2 + $0x438] sm:$0xff] %vm228_vm1, %v8512_v54 }
 0x2c7   : > { %365 = vst.msk [vmem:[#allocation2 + $0x440] sm:$0xff] %vm228_vm1, %v8512_v54  ;;  %366 = vst.msk [vmem:[#allocation2 + $0x448] sm:$0xff] %vm228_vm1, %v8512_v54 }
 0x2c8   : > { %367 = vst.msk [vmem:[#allocation2 + $0x450] sm:$0xff] %vm228_vm1, %v8512_v54  ;;  %368 = vst.msk [vmem:[#allocation2 + $0x458] sm:$0xff] %vm228_vm1, %v8512_v54 }
 0x2c9   : > { %369 = vst.msk [vmem:[#allocation2 + $0x460] sm:$0xff] %vm228_vm1, %v8512_v54  ;;  %370 = vst.msk [vmem:[#allocation2 + $0x468] sm:$0xff] %vm228_vm1, %v8512_v54 }
 0x2ca   : > { %371 = vst.msk [vmem:[#allocation2 + $0x470] sm:$0xff] %vm228_vm1, %v8512_v54  ;;  %372 = vst.msk [vmem:[#allocation2 + $0x478] sm:$0xff] %vm228_vm1, %v8512_v54 }
 0x2cb   : > { %373 = vst.msk [vmem:[#allocation2 + $0x480] sm:$0xff] %vm228_vm1, %v8512_v54  ;;  %374 = vst.msk [vmem:[#allocation2 + $0x488] sm:$0xff] %vm228_vm1, %v8512_v54 }
 0x2cc   : > { %375 = vst.msk [vmem:[#allocation2 + $0x490] sm:$0xff] %vm228_vm1, %v8512_v54  ;;  %376 = vst.msk [vmem:[#allocation2 + $0x498] sm:$0xff] %vm228_vm1, %v8512_v54 }
 0x2cd   : > { %377 = vst.msk [vmem:[#allocation2 + $0x4a0] sm:$0xff] %vm228_vm1, %v8512_v54  ;;  %378 = vst.msk [vmem:[#allocation2 + $0x4a8] sm:$0xff] %vm228_vm1, %v8512_v54 }
 0x2ce   : > { %379 = vst.msk [vmem:[#allocation2 + $0x4b0] sm:$0xff] %vm228_vm1, %v8512_v54  ;;  %380 = vst.msk [vmem:[#allocation2 + $0x4b8] sm:$0xff] %vm228_vm1, %v8512_v54 }
 0x2cf   : > { %381 = vst.msk [vmem:[#allocation2 + $0x4c0] sm:$0xff] %vm228_vm1, %v8512_v54  ;;  %382 = vst.msk [vmem:[#allocation2 + $0x4c8] sm:$0xff] %vm228_vm1, %v8512_v54 }
 0x2d0   : > { %383 = vst.msk [vmem:[#allocation2 + $0x4d0] sm:$0xff] %vm228_vm1, %v8512_v54  ;;  %384 = vst.msk [vmem:[#allocation2 + $0x4d8] sm:$0xff] %vm228_vm1, %v8512_v54 }
 0x2d1   : > { %385 = vst.msk [vmem:[#allocation2 + $0x4e0] sm:$0xff] %vm228_vm1, %v8512_v54  ;;  %386 = vst.msk [vmem:[#allocation2 + $0x4e8] sm:$0xff] %vm228_vm1, %v8512_v54 }
 0x2d2   : > { %387 = vst.msk [vmem:[#allocation2 + $0x4f0] sm:$0xff] %vm228_vm1, %v8512_v54  ;;  %388 = vst.msk [vmem:[#allocation2 + $0x4f8] sm:$0xff] %vm228_vm1, %v8512_v54  ;;  %v5536_v54 = vadd.f32 %v11520_v44, %v11517_v0  ;;  %v5391_v0 = vpop.xlane.xlu0 %5390  ;;  %v7914_v44 = vpop.eup %7913 }
 0x2d3   : > { %14156 = vst [vmem:[#allocation12_spill] sm:$0xff] %v11862_v6  ;;  %14159 = vst [vmem:[#allocation123_spill] sm:$0xff] %v11868_v5  ;;  %v7916_v16 = vpop.eup %7915  ;;  %v5869_v6 = vadd.f32 %v5391_v0, %v5229_v24  ;;  %v4112_v5 = vadd.f32 1.0, %v7912_v2  ;;  %v5009_v51 = vmul.f32 %v7914_v44, %v11374_v12  ;;  %v14163_v12 = vld [vmem:[#allocation38_spill] sm:$0xff]  ;;  %v11891_v44 = vpop.permute.xlu1 %1512 }
 0x2d4   : > { %5537 = vadd.xlane.f32.xlu0 %v5536_v54  ;;  %v7918_v54 = vpop.eup %7917  ;;  %v4054_v1 = vadd.f32 1.0, %v7916_v16  ;;  %14164 = vst [vmem:[#allocation4_spill] sm:$0xff] %v11891_v44  ;;  %v14165_v16 = vld [vmem:[#allocation35_spill] sm:$0xff] }
 0x2d5   : > { %v5010_v55 = vmul.f32 %v7918_v54, %v11390_v14  ;;  %6030 = vst.msk [vmem:[#allocation2] sm:$0xff] %vm228_vm1, %v5869_v6  ;;  %v7920_v25 = vpop.eup %7919  ;;  %v11889_v14 = vadd.f32 %v14163_v12, %v14157_v59  ;;  %v14166_v54 = vld [vmem:[#allocation64_spill] sm:$0xff] }
 0x2d6   : > { %7943 = vrcp.f32 %v4054_v1  ;;  %v7922_v13 = vpop.eup %7921  ;;  %v4055_v0 = vadd.f32 1.0, %v7920_v25 }
 0x2d7   : > { %7945 = vpow2.f32 %v6882_v53  ;;  %v5539_v2 = vadd.f32 %v5010_v55, %v5009_v51  ;;  %v7924_v6 = vpop.eup %7923  ;;  %v11895_v53 = vadd.f32 %v14165_v16, %v14160_v37  ;;  %v5397_v51 = vpop.xlane.xlu0 %5396  ;;  %v6884_v37 = vmul.f32 -1.442695, %v11885_v4 }
 0x2d8   : > { %7947 = vrcp.f32 %v4111_v3  ;;  %v7926_v24 = vpop.eup %7925  ;;  %v11899_v3 = vadd.f32 %v2470_v42, %v14166_v54  ;;  %v5871_v59 = vadd.f32 %v5397_v51, %v5231_v30  ;;  %v6944_v25 = vmul.f32 -1.442695, %v11889_v14  ;;  %v5230_v42 = vld [vmem:[#allocation2 + $0x8] sm:$0xff] }
 0x2d9   : > { %7949 = vrcp.f32 %v4112_v5  ;;  %5540 = vadd.xlane.f32.xlu1 %v5539_v2  ;;  %v7928_v1 = vpop.eup %7927  ;;  %v2472_v5 = vpop.f32.mrf.mxu0  ;;  %v6942_v16 = vmul.f32 -1.442695, %v11895_v53  ;;  %v5011_v30 = vmul.f32 %v7926_v24, %v11402_v20  ;;  %v4113_v60 = vadd.f32 1.0, %v7924_v6 }
 0x2da   : > { %7951 = vpow2.f32 %v6943_v23  ;;  %v7930_v55 = vpop.eup %7929  ;;  %v4056_v23 = vadd.f32 1.0, %v7928_v1  ;;  %6032 = vst.msk [vmem:[#allocation2 + $0x10] sm:$0xff] %vm228_vm1, %v5871_v59  ;;  %v5394_v2 = vpop.xlane.xlu1 %5393  ;;  %v6885_v56 = vmul.f32 -1.442695, %v11899_v3 }
 0x2db   : > { %7953 = vpow2.f32 %v6883_v8  ;;  %v7932_v12 = vpop.eup %7931  ;;  %v5012_v8 = vmul.f32 %v7930_v55, %v11424_v7  ;;  %v5870_v59 = vadd.f32 %v5394_v2, %v5230_v42  ;;  %v5232_v7 = vld [vmem:[#allocation2 + $0x18] sm:$0xff]  ;;  %v5400_v24 = vpop.xlane.xlu0 %5399  ;;  %v14168_v42 = vld [vmem:[#allocation43_spill] sm:$0xff] }
 0x2dc   : > { %7955 = vrcp.f32 %v4055_v0  ;;  %v6193_v51 = vld [vmem:[#allocation2] sm:$0xff]  ;;  %v7934_v44 = vpop.eup %7933  ;;  %v11914_v0 = vadd.f32 %v2472_v5, %v14166_v54  ;;  %v4114_v20 = vadd.f32 1.0, %v7932_v12  ;;  %v5872_v54 = vadd.f32 %v5400_v24, %v5232_v7 }
 0x2dd   : > { %7957 = vpow2.f32 %v6941_v43  ;;  %6353 = vst.msk [vmem:[%s11904_s19] sm:$0xff] %vm228_vm1, %v6193_v51  ;;  %v7936_v1 = vpop.eup %7935  ;;  %v2474_v43 = vpop.f32.mrf.mxu0  ;;  %v5542_v50 = vadd.f32 %v5012_v8, %v5011_v30  ;;  %6031 = vst.msk [vmem:[#allocation2 + $0x8] sm:$0xff] %vm228_vm1, %v5870_v59  ;;  %v14167_v51 = vld [vmem:[#allocation131_spill] sm:$0xff]  ;;  %v4115_v30 = vadd.f32 1.0, %v7922_v13  ;;  %v4116_v8 = vadd.f32 1.0, %v7934_v44 }
 0x2de   : > { %7959 = vrcp.f32 %v4056_v23  ;;  %v7938_v41 = vpop.eup %7937  ;;  %v11921_v2 = vadd.f32 %v14168_v42, %v14167_v51  ;;  %v6886_v6 = vmul.f32 -1.442695, %v11914_v0  ;;  %6033 = vst.msk [vmem:[#allocation2 + $0x18] sm:$0xff] %vm228_vm1, %v5872_v54  ;;  %v5233_v24 = vld [vmem:[#allocation2 + $0x20] sm:$0xff]  ;;  %v5069_v44 = vmul.f32 %v7936_v1, %v11398_v11 }
 0x2df   : > { %7961 = vpow2.f32 %v6884_v37  ;;  %v7940_v55 = vpop.eup %7939  ;;  %v4057_v23 = vadd.f32 1.0, %v7938_v41  ;;  %5543 = vadd.xlane.f32.xlu0 %v5542_v50  ;;  %v14169_v37 = vld [vmem:[#allocation56_spill] sm:$0xff]  ;;  %v2476_v59 = vpop.f32.mrf.mxu0 }
 0x2e0   : > { %7963 = vpow2.f32 %v6944_v25  ;;  %v7942_v5 = vpop.eup %7941  ;;  %v11925_v25 = vadd.f32 %v2474_v43, %v14169_v37  ;;  %v14171_v41 = vld [vmem:[#allocation40_spill] sm:$0xff]  ;;  %v5013_v17 = vmul.f32 %v7940_v55, %v11431_v61  ;;  %v14172_v55 = vld [vmem:[#allocation45_spill] sm:$0xff] }
 0x2e1   : > { %7965 = vpow2.f32 %v6942_v16  ;;  %v14170_v16 = vld [vmem:[#allocation139_spill] sm:$0xff]  ;;  %v6195_v7 = vld [vmem:[#allocation2 + $0x10] sm:$0xff]  ;;  %v11947_v11 = vadd.f32 %v14172_v55, %v14167_v51  ;;  %v2480_v1 = vpop.f32.mrf.mxu0  ;;  %v5406_v51 = vpop.xlane.xlu0 %5405 }
 0x2e2   : > { %7967 = vpow2.f32 %v6885_v56  ;;  %v11929_v50 = vadd.f32 %v14171_v41, %v14170_v16  ;;  %v5403_v56 = vpop.xlane.xlu1 %5402  ;;  %6355 = vst.msk [vmem:[%s11904_s19 + $0x10] sm:$0xff] %vm228_vm1, %v6195_v7  ;;  %v5070_v41 = vmul.f32 %v7942_v5, %v11428_v35  ;;  %v6887_v54 = vmul.f32 -1.442695, %v11925_v25 }
 0x2e3   : > { %v7944_v12 = vpop.eup %7943  ;;  %7969 = vrcp.f32 %v4113_v60  ;;  %v5873_v13 = vadd.f32 %v5403_v56, %v5233_v24  ;;  %v6947_v35 = vmul.f32 -1.442695, %v11921_v2  ;;  %v2482_v55 = vpop.f32.mrf.mxu0 }
 0x2e4   : > { %v7946_v42 = vpop.eup %7945  ;;  %7971 = vrcp.f32 %v4114_v20  ;;  %v5014_v43 = vmul.f32 %v7944_v12, %v11452_v62  ;;  %v11940_v20 = vadd.f32 %v2476_v59, %v14169_v37  ;;  %v5234_v12 = vld [vmem:[#allocation2 + $0x28] sm:$0xff]  ;;  %v5629_v56 = vadd.f32 %v5070_v41, %v5069_v44 }
 0x2e5   : > { %v7948_v60 = vpop.eup %7947  ;;  %7973 = vrcp.f32 %v4057_v23  ;;  %v4058_v58 = vadd.f32 1.0, %v7946_v42  ;;  %6034 = vst.msk [vmem:[#allocation2 + $0x20] sm:$0xff] %vm228_vm1, %v5873_v13  ;;  %v6194_v23 = vld [vmem:[#allocation2 + $0x8] sm:$0xff]  ;;  %v6196_v42 = vld [vmem:[#allocation2 + $0x18] sm:$0xff]  ;;  %v14174_v13 = vld [vmem:[#allocation69_spill] sm:$0xff] }
 0x2e6   : > { %v7950_v19 = vpop.eup %7949  ;;  %7975 = vpow2.f32 %v6886_v6  ;;  %v5545_v61 = vadd.f32 %v5014_v43, %v5013_v17  ;;  %v14173_v6 = vld [vmem:[#allocation42_spill] sm:$0xff]  ;;  %v6945_v17 = vmul.f32 -1.442695, %v11929_v50  ;;  %6354 = vst.msk [vmem:[%s11904_s19 + $0x8] sm:$0xff] %vm228_vm1, %v6194_v23  ;;  %v6948_v43 = vmul.f32 -1.442695, %v11947_v11  ;;  %v5409_v23 = vpop.xlane.xlu1 %5408 }
 0x2e7   : > { %v11943_v62 = vpop.eup %7951  ;;  %7977 = vrcp.f32 %v4058_v58  ;;  %v11952_v37 = vadd.f32 %v14173_v6, %v14170_v16  ;;  %v5874_v58 = vadd.f32 %v5406_v51, %v5234_v12  ;;  %6356 = vst.msk [vmem:[%s11904_s19 + $0x18] sm:$0xff] %vm228_vm1, %v6196_v42  ;;  %v5072_v42 = vmul.f32 %v7950_v19, %v11440_v15 }
 0x2e8   : > { %v7954_v5 = vpop.eup %7953  ;;  %7979 = vrcp.f32 %v4115_v30  ;;  %5546 = vadd.xlane.f32.xlu1 %v5545_v61  ;;  %v6888_v30 = vmul.f32 -1.442695, %v11940_v20  ;;  %v11960_v61 = vadd.f32 %v2480_v1, %v14174_v13  ;;  %v5071_v1 = vmul.f32 %v7948_v60, %v11411_v27  ;;  %v2484_v27 = vpop.f32.mrf.mxu0 }
 0x2e9   : > { %v7956_v59 = vpop.eup %7955  ;;  %7981 = vrcp.f32 %v4116_v8  ;;  %v4059_v7 = vadd.f32 1.0, %v7954_v5  ;;  %6035 = vst.msk [vmem:[#allocation2 + $0x28] sm:$0xff] %vm228_vm1, %v5874_v58  ;;  %v5235_v8 = vld [vmem:[#allocation2 + $0x30] sm:$0xff]  ;;  %v6946_v44 = vmul.f32 -1.442695, %v11952_v37 }
 0x2ea   : > { %v7958_v24 = vpop.eup %7957  ;;  %7983 = vpow2.f32 %v6887_v54  ;;  %v5015_v41 = vmul.f32 %v7956_v59, %v11467_v38  ;;  %v5875_v51 = vadd.f32 %v5409_v23, %v5235_v8  ;;  %v6889_v38 = vmul.f32 -1.442695, %v11960_v61  ;;  %v14175_v59 = vld [vmem:[#allocation136_spill] sm:$0xff] }
 0x2eb   : > { %v7960_v16 = vpop.eup %7959  ;;  %7985 = vpow2.f32 %v6947_v35  ;;  %v4117_v39 = vadd.f32 1.0, %v7958_v24 }
 0x2ec   : > { %v7962_v5 = vpop.eup %7961  ;;  %7987 = vpow2.f32 %v6945_v17  ;;  %v5016_v54 = vmul.f32 %v7960_v16, %v11481_v26  ;;  %5630 = vadd.xlane.f32.xlu1 %v5629_v56  ;;  %v6197_v12 = vld [vmem:[#allocation2 + $0x20] sm:$0xff]  ;;  %v11974_v26 = vadd.f32 %v2482_v55, %v14174_v13  ;;  %6036 = vst.msk [vmem:[#allocation2 + $0x30] sm:$0xff] %vm228_vm1, %v5875_v51  ;;  %v5236_v56 = vld [vmem:[#allocation2 + $0x38] sm:$0xff]  ;;  %v5412_v16 = vpop.xlane.xlu0 %5411  ;;  %v5632_v13 = vadd.f32 %v5072_v42, %v5071_v1 }
 0x2ed   : > { %v7964_v35 = vpop.eup %7963  ;;  %7989 = vrcp.f32 %v4059_v7  ;;  %v4060_v6 = vadd.f32 1.0, %v7962_v5  ;;  %6357 = vst.msk [vmem:[%s11904_s19 + $0x20] sm:$0xff] %vm228_vm1, %v6197_v12  ;;  %v14176_v7 = vld [vmem:[#allocation50_spill] sm:$0xff]  ;;  %v5876_v23 = vadd.f32 %v5412_v16, %v5236_v56  ;;  %v2486_v51 = vpop.f32.mrf.mxu0  ;;  %v5237_v42 = vld [vmem:[#allocation2 + $0x40] sm:$0xff] }
 0x2ee   : > { %v7966_v58 = vpop.eup %7965  ;;  %7991 = vpow2.f32 %v6888_v30  ;;  %v5548_v17 = vadd.f32 %v5016_v54, %v5015_v41  ;;  %v11979_v19 = vadd.f32 %v14176_v7, %v14175_v59  ;;  %v14177_v41 = vld [vmem:[#allocation57_spill] sm:$0xff]  ;;  %v4120_v7 = vadd.f32 1.0, %v7964_v35 }
 0x2ef   : > { %v7968_v18 = vpop.eup %7967  ;;  %7993 = vrcp.f32 %v4060_v6  ;;  %v4118_v30 = vadd.f32 1.0, %v7966_v58  ;;  %v14179_v6 = vld [vmem:[#allocation61_spill] sm:$0xff]  ;;  %6037 = vst.msk [vmem:[#allocation2 + $0x38] sm:$0xff] %vm228_vm1, %v5876_v23 }
 0x2f0   : > { %v7970_v60 = vpop.eup %7969  ;;  %7995 = vpow2.f32 %v6946_v44  ;;  %v4061_v15 = vadd.f32 1.0, %v7968_v18  ;;  %5549 = vadd.xlane.f32.xlu0 %v5548_v17  ;;  %v6198_v55 = vld [vmem:[#allocation2 + $0x28] sm:$0xff]  ;;  %v14178_v44 = vld [vmem:[#allocation47_spill] sm:$0xff]  ;;  %v6890_v18 = vmul.f32 -1.442695, %v11974_v26  ;;  %v11987_v12 = vadd.f32 %v2484_v27, %v14179_v6  ;;  %v5415_v17 = vpop.xlane.xlu1 %5414 }
 0x2f1   : > { %v7972_v24 = vpop.eup %7971  ;;  %7997 = vpow2.f32 %v6948_v43  ;;  %v11983_v54 = vadd.f32 %v14178_v44, %v14177_v41  ;;  %6358 = vst.msk [vmem:[%s11904_s19 + $0x28] sm:$0xff] %vm228_vm1, %v6198_v55  ;;  %v6951_v1 = vmul.f32 -1.442695, %v11979_v19  ;;  %v12000_v35 = vadd.f32 %v2486_v51, %v14179_v6  ;;  %v5238_v6 = vld [vmem:[#allocation2 + $0x48] sm:$0xff]  ;;  %v5418_v51 = vpop.xlane.xlu0 %5417 }
 0x2f2   : > { %v7974_v8 = vpop.eup %7973  ;;  %7999 = vrcp.f32 %v4117_v39  ;;  %v4119_v39 = vadd.f32 1.0, %v11943_v62  ;;  %v5073_v62 = vmul.f32 %v7970_v60, %v11475_v49  ;;  %v5074_v55 = vmul.f32 %v7972_v24, %v11492_v36  ;;  %v14180_v49 = vld [vmem:[#allocation52_spill] sm:$0xff] }
 0x2f3   : > { %v7976_v5 = vpop.eup %7975  ;;  %8001 = vpow2.f32 %v6889_v38  ;;  %v5017_v27 = vmul.f32 %v7974_v8, %v11507_v57  ;;  %v6891_v23 = vmul.f32 -1.442695, %v11987_v12  ;;  %v12008_v36 = vadd.f32 %v14180_v49, %v14175_v59 }
 0x2f4   : > { %v7978_v43 = vpop.eup %7977  ;;  %8003 = vrcp.f32 %v4061_v15  ;;  %v4062_v58 = vadd.f32 1.0, %v7976_v5  ;;  %5633 = vadd.xlane.f32.xlu0 %v5632_v13  ;;  %v6199_v15 = vld [vmem:[#allocation2 + $0x30] sm:$0xff]  ;;  %v5877_v13 = vadd.f32 %v5415_v17, %v5237_v42 }
 0x2f5   : > { %v7980_v38 = vpop.eup %7979  ;;  %8005 = vrcp.f32 %v4118_v30  ;;  %v5018_v56 = vmul.f32 %v7978_v43, %v11859_v34  ;;  %v2490_v30 = vpop.f32.mrf.mxu0  ;;  %6359 = vst.msk [vmem:[%s11904_s19 + $0x30] sm:$0xff] %vm228_vm1, %v6199_v15  ;;  %v14181_v34 = vld [vmem:[#allocation48_spill] sm:$0xff]  ;;  %v6952_v15 = vmul.f32 -1.442695, %v12008_v36 }
 0x2f6   : > { %v7982_v16 = vpop.eup %7981  ;;  %8007 = vrcp.f32 %v4062_v58  ;;  %v12012_v60 = vadd.f32 %v14181_v34, %v14177_v41  ;;  %6038 = vst.msk [vmem:[#allocation2 + $0x40] sm:$0xff] %vm228_vm1, %v5877_v13  ;;  %v5878_v58 = vadd.f32 %v5418_v51, %v5238_v6  ;;  %v6892_v41 = vmul.f32 -1.442695, %v12000_v35 }
 0x2f7   : > { %v7984_v5 = vpop.eup %7983  ;;  %8009 = vpow2.f32 %v6890_v18  ;;  %v5551_v44 = vadd.f32 %v5018_v56, %v5017_v27  ;;  %v6949_v18 = vmul.f32 -1.442695, %v11983_v54  ;;  %v2492_v17 = vpop.f32.mrf.mxu0  ;;  %v5635_v27 = vadd.f32 %v5074_v55, %v5073_v62  ;;  %v6200_v56 = vld [vmem:[#allocation2 + $0x38] sm:$0xff] }
 0x2f8   : > { %v12004_v57 = vpop.eup %7985  ;;  %8011 = vrcp.f32 %v4119_v39  ;;  %v4063_v24 = vadd.f32 1.0, %v7984_v5  ;;  %v14182_v39 = vld [vmem:[#allocation75_spill] sm:$0xff]  ;;  %v6950_v13 = vmul.f32 -1.442695, %v12012_v60  ;;  %6360 = vst.msk [vmem:[%s11904_s19 + $0x38] sm:$0xff] %vm228_vm1, %v6200_v56  ;;  %6039 = vst.msk [vmem:[#allocation2 + $0x48] sm:$0xff] %vm228_vm1, %v5878_v58  ;;  %v5076_v58 = vmul.f32 %v7982_v16, %v11497_v22 }
 0x2f9   : > { %v7988_v8 = vpop.eup %7987  ;;  %8013 = vrcp.f32 %v4120_v7  ;;  %5552 = vadd.xlane.f32.xlu1 %v5551_v44  ;;  %v12017_v59 = vadd.f32 %v2490_v30, %v14182_v39  ;;  %v5421_v30 = vpop.xlane.xlu1 %5420 }
 0x2fa   : > { %v7990_v43 = vpop.eup %7989  ;;  %8015 = vpow2.f32 %v6951_v1  ;;  %v5239_v1 = vld [vmem:[#allocation2 + $0x50] sm:$0xff] }
 0x2fb   : > { %v7992_v42 = vpop.eup %7991  ;;  %8017 = vpow2.f32 %v6891_v23  ;;  %v5075_v23 = vmul.f32 %v7980_v38, %v11471_v10  ;;  %v5019_v62 = vmul.f32 %v7990_v43, %v11876_v29  ;;  %v6893_v34 = vmul.f32 -1.442695, %v12017_v59  ;;  %v2494_v10 = vpop.f32.mrf.mxu0  ;;  %v5240_v43 = vld [vmem:[#allocation2 + $0x58] sm:$0xff] }
 0x2fc   : > { %v7994_v7 = vpop.eup %7993  ;;  %8019 = vrcp.f32 %v4063_v24  ;;  %v4064_v5 = vadd.f32 1.0, %v7992_v42  ;;  %v12030_v24 = vadd.f32 %v2492_v17, %v14182_v39  ;;  %v5879_v6 = vadd.f32 %v5421_v30, %v5239_v1  ;;  %v14185_v1 = vld [vmem:[#allocation53_spill] sm:$0xff] }
 0x2fd   : > { %v7996_v44 = vpop.eup %7995  ;;  %8021 = vpow2.f32 %v6949_v18  ;;  %v5020_v55 = vmul.f32 %v7994_v7, %v11885_v4  ;;  %5636 = vadd.xlane.f32.xlu1 %v5635_v27  ;;  %v4121_v42 = vadd.f32 1.0, %v7988_v8  ;;  %v6201_v29 = vld [vmem:[#allocation2 + $0x40] sm:$0xff]  ;;  %v5424_v27 = vpop.xlane.xlu0 %5423  ;;  %v14183_v8 = vld [vmem:[#allocation66_spill] sm:$0xff] }
 0x2fe   : > { %v7998_v49 = vpop.eup %7997  ;;  %8023 = vrcp.f32 %v4064_v5  ;;  %v4122_v4 = vadd.f32 1.0, %v7996_v44  ;;  %6361 = vst.msk [vmem:[%s11904_s19 + $0x40] sm:$0xff] %vm228_vm1, %v6201_v29  ;;  %6040 = vst.msk [vmem:[#allocation2 + $0x50] sm:$0xff] %vm228_vm1, %v5879_v6  ;;  %v5880_v56 = vadd.f32 %v5424_v27, %v5240_v43  ;;  %v6894_v16 = vmul.f32 -1.442695, %v12030_v24  ;;  %v14184_v5 = vld [vmem:[#allocation143_spill] sm:$0xff] }
 0x2ff   : > { %v8000_v51 = vpop.eup %7999  ;;  %8025 = vpow2.f32 %v6892_v41  ;;  %v5554_v38 = vadd.f32 %v5020_v55, %v5019_v62  ;;  %v12038_v41 = vadd.f32 %v2494_v10, %v14183_v8  ;;  %v12043_v30 = vadd.f32 %v14185_v1, %v14184_v5  ;;  %v6202_v62 = vld [vmem:[#allocation2 + $0x48] sm:$0xff]  ;;  %v5241_v55 = vld [vmem:[#allocation2 + $0x60] sm:$0xff] }
 0x300   : > { %v8002_v18 = vpop.eup %8001  ;;  %8027 = vpow2.f32 %v6952_v15  ;;  %v4123_v15 = vadd.f32 1.0, %v12004_v57  ;;  %v5638_v44 = vadd.f32 %v5076_v58, %v5075_v23  ;;  %6041 = vst.msk [vmem:[#allocation2 + $0x58] sm:$0xff] %vm228_vm1, %v5880_v56  ;;  %6362 = vst.msk [vmem:[%s11904_s19 + $0x48] sm:$0xff] %vm228_vm1, %v6202_v62  ;;  %v5077_v29 = vmul.f32 %v8000_v51, %v11872_v40 }
 0x301   : > { %v8004_v39 = vpop.eup %8003  ;;  %8029 = vpow2.f32 %v6950_v13  ;;  %v4065_v17 = vadd.f32 1.0, %v8002_v18  ;;  %5555 = vadd.xlane.f32.xlu0 %v5554_v38  ;;  %v2496_v13 = vpop.f32.mrf.mxu0  ;;  %v4124_v27 = vadd.f32 1.0, %v7998_v49  ;;  %v6953_v56 = vmul.f32 -1.442695, %v12043_v30 }
 0x302   : > { %v8006_v22 = vpop.eup %8005  ;;  %8031 = vpow2.f32 %v6893_v34  ;;  %v5427_v34 = vpop.xlane.xlu1 %5426  ;;  %v5021_v10 = vmul.f32 %v8004_v39, %v11899_v3  ;;  %v12054_v3 = vadd.f32 %v2496_v13, %v14183_v8  ;;  %v14186_v39 = vld [vmem:[#allocation55_spill] sm:$0xff] }
 0x303   : > { %v8008_v7 = vpop.eup %8007  ;;  %8033 = vrcp.f32 %v4121_v42  ;;  %v5881_v57 = vadd.f32 %v5427_v34, %v5241_v55  ;;  %v5078_v18 = vmul.f32 %v8006_v22, %v11895_v53  ;;  %v2500_v40 = vpop.f32.mrf.mxu0  ;;  %v5242_v22 = vld [vmem:[#allocation2 + $0x68] sm:$0xff] }
 0x304   : > { %v8010_v6 = vpop.eup %8009  ;;  %8035 = vrcp.f32 %v4122_v4  ;;  %v5022_v38 = vmul.f32 %v8008_v7, %v11914_v0  ;;  %v6895_v4 = vmul.f32 -1.442695, %v12038_v41  ;;  %v6896_v13 = vmul.f32 -1.442695, %v12054_v3  ;;  %v14187_v55 = vld [vmem:[#allocation80_spill] sm:$0xff] }
 0x305   : > { %v8012_v42 = vpop.eup %8011  ;;  %8037 = vrcp.f32 %v4065_v17  ;;  %v4066_v23 = vadd.f32 1.0, %v8010_v6  ;;  %5639 = vadd.xlane.f32.xlu0 %v5638_v44  ;;  %6042 = vst.msk [vmem:[#allocation2 + $0x60] sm:$0xff] %vm228_vm1, %v5881_v57  ;;  %v6203_v53 = vld [vmem:[#allocation2 + $0x50] sm:$0xff]  ;;  %v12061_v17 = vadd.f32 %v14186_v39, %v14184_v5  ;;  %v5641_v44 = vadd.f32 %v5078_v18, %v5077_v29  ;;  %v2502_v6 = vpop.f32.mrf.mxu0 }
 0x306   : > { %v8014_v58 = vpop.eup %8013  ;;  %8039 = vpow2.f32 %v6894_v16  ;;  %v5557_v0 = vadd.f32 %v5022_v38, %v5021_v10  ;;  %6363 = vst.msk [vmem:[%s11904_s19 + $0x50] sm:$0xff] %vm228_vm1, %v6203_v53  ;;  %v5430_v16 = vpop.xlane.xlu0 %5429  ;;  %v12068_v34 = vadd.f32 %v2500_v40, %v14187_v55  ;;  %v5243_v10 = vld [vmem:[#allocation2 + $0x70] sm:$0xff] }
 0x307   : > { %v12057_v43 = vpop.eup %8015  ;;  %8041 = vrcp.f32 %v4066_v23  ;;  %v5882_v49 = vadd.f32 %v5430_v16, %v5242_v22  ;;  %v6204_v62 = vld [vmem:[#allocation2 + $0x58] sm:$0xff]  ;;  %v6954_v57 = vmul.f32 -1.442695, %v12061_v17  ;;  %v12074_v23 = vpop.f32.mrf.mxu1  ;;  %v5080_v39 = vmul.f32 %v8014_v58, %v11889_v14 }
 0x308   : > { %v8018_v51 = vpop.eup %8017  ;;  %5558 = vadd.xlane.f32.xlu1 %v5557_v0  ;;  %8043 = vrcp.f32 %v4123_v15  ;;  %6364 = vst.msk [vmem:[%s11904_s19 + $0x58] sm:$0xff] %vm228_vm1, %v6204_v62  ;;  %v5433_v15 = vpop.xlane.xlu1 %5432  ;;  %v5079_v0 = vmul.f32 %v8012_v42, %v11866_v52 }
 0x309   : > { %v8020_v8 = vpop.eup %8019  ;;  %v4067_v7 = vadd.f32 1.0, %v8018_v51  ;;  %8045 = vpow2.f32 %v6895_v4  ;;  %6043 = vst.msk [vmem:[#allocation2 + $0x68] sm:$0xff] %vm228_vm1, %v5882_v49  ;;  %v5883_v53 = vadd.f32 %v5433_v15, %v5243_v10  ;;  %v2504_v52 = vpop.f32.mrf.mxu0  ;;  %v5244_v49 = vld [vmem:[#allocation2 + $0x78] sm:$0xff]  ;;  %v14188_v10 = vld [vmem:[#allocation72_spill] sm:$0xff] }
 0x30a   : > { %v8022_v1 = vpop.eup %8021  ;;  %8047 = vrcp.f32 %v4124_v27  ;;  %v5023_v29 = vmul.f32 %v8020_v8, %v11925_v25  ;;  %v6897_v25 = vmul.f32 -1.442695, %v12068_v34  ;;  %v12087_v8 = vpop.f32.mrf.mxu1  ;;  %v12091_v15 = vadd.f32 %v2504_v52, %v14188_v10 }
 0x30b   : > { %v8024_v5 = vpop.eup %8023  ;;  %8049 = vpow2.f32 %v6953_v56  ;;  %v4125_v56 = vadd.f32 1.0, %v8022_v1  ;;  %6044 = vst.msk [vmem:[#allocation2 + $0x70] sm:$0xff] %vm228_vm1, %v5883_v53  ;;  %v5436_v1 = vpop.xlane.xlu0 %5435 }
 0x30c   : > { %v8026_v38 = vpop.eup %8025  ;;  %v5024_v18 = vmul.f32 %v8024_v5, %v11940_v20  ;;  %5642 = vadd.xlane.f32.xlu1 %v5641_v44  ;;  %8051 = vrcp.f32 %v4067_v7  ;;  %v6205_v40 = vld [vmem:[#allocation2 + $0x60] sm:$0xff]  ;;  %v12084_v20 = vadd.f32 %v2502_v6, %v14187_v55  ;;  %v5644_v44 = vadd.f32 %v5080_v39, %v5079_v0  ;;  %v12100_v0 = vpop.f32.mrf.mxu1 }
 0x30d   : > { %v8028_v4 = vpop.eup %8027  ;;  %v4068_v27 = vadd.f32 1.0, %v8026_v38  ;;  %8053 = vpow2.f32 %v6896_v13  ;;  %6365 = vst.msk [vmem:[%s11904_s19 + $0x60] sm:$0xff] %vm228_vm1, %v6205_v40  ;;  %v5884_v5 = vadd.f32 %v5436_v1, %v5244_v49  ;;  %v2506_v38 = vpop.f32.mrf.mxu0 }
 0x30e   : > { %v8030_v51 = vpop.eup %8029  ;;  %v5560_v22 = vadd.f32 %v5024_v18, %v5023_v29  ;;  %v6898_v6 = vmul.f32 -1.442695, %v12084_v20  ;;  %v4127_v29 = vadd.f32 1.0, %v12057_v43  ;;  %v14189_v18 = vld [vmem:[#allocation147_spill] sm:$0xff]  ;;  %v5439_v39 = vpop.xlane.xlu1 %5438 }
 0x30f   : > { %v8032_v16 = vpop.eup %8031  ;;  %8055 = vrcp.f32 %v4068_v27  ;;  %v4126_v7 = vadd.f32 1.0, %v8030_v51  ;;  %v14190_v27 = vld [vmem:[#allocation60_spill] sm:$0xff]  ;;  %6045 = vst.msk [vmem:[#allocation2 + $0x78] sm:$0xff] %vm228_vm1, %v5884_v5  ;;  %v5245_v51 = vld [vmem:[#allocation2 + $0x80] sm:$0xff] }
 0x310   : > { %v8034_v42 = vpop.eup %8033  ;;  %8057 = vpow2.f32 %v6954_v57  ;;  %v4069_v14 = vadd.f32 1.0, %v8032_v16  ;;  %5561 = vadd.xlane.f32.xlu0 %v5560_v22  ;;  %v6206_v62 = vld [vmem:[#allocation2 + $0x68] sm:$0xff]  ;;  %v12098_v40 = vadd.f32 %v14190_v27, %v14189_v18  ;;  %v5885_v49 = vadd.f32 %v5439_v39, %v5245_v51 }
 0x311   : > { %v8036_v58 = vpop.eup %8035  ;;  %8059 = vrcp.f32 %v4125_v56  ;;  %6366 = vst.msk [vmem:[%s11904_s19 + $0x68] sm:$0xff] %vm228_vm1, %v6206_v62  ;;  %v4128_v56 = vadd.f32 1.0, %v8028_v4  ;;  %v12109_v4 = vadd.f32 %v2506_v38, %v14188_v10  ;;  %v5246_v5 = vld [vmem:[#allocation2 + $0x88] sm:$0xff] }
 0x312   : > { %v8038_v13 = vpop.eup %8037  ;;  %8061 = vpow2.f32 %v6897_v25  ;;  %v5081_v25 = vmul.f32 %v8034_v42, %v11929_v50  ;;  %v5082_v52 = vmul.f32 %v8036_v58, %v11952_v37  ;;  %v12117_v37 = vpop.f32.mrf.mxu1  ;;  %6046 = vst.msk [vmem:[#allocation2 + $0x80] sm:$0xff] %vm228_vm1, %v5885_v49  ;;  %v14192_v10 = vld [vmem:[#allocation84_spill] sm:$0xff] }
 0x313   : > { %v8040_v55 = vpop.eup %8039  ;;  %8063 = vrcp.f32 %v4069_v14  ;;  %v5025_v22 = vmul.f32 %v8038_v13, %v11960_v61  ;;  %v6207_v14 = vld [vmem:[#allocation2 + $0x70] sm:$0xff]  ;;  %v6957_v13 = vmul.f32 -1.442695, %v12098_v40  ;;  %v6900_v27 = vmul.f32 -1.442695, %v12109_v4  ;;  %v5445_v49 = vpop.xlane.xlu1 %5444 }
 0x314   : > { %v8042_v57 = vpop.eup %8041  ;;  %v4070_v53 = vadd.f32 1.0, %v8040_v55  ;;  %5645 = vadd.xlane.f32.xlu0 %v5644_v44  ;;  %8065 = vrcp.f32 %v4126_v7  ;;  %v6899_v44 = vmul.f32 -1.442695, %v12091_v15  ;;  %v2510_v7 = vpop.f32.mrf.mxu0  ;;  %6367 = vst.msk [vmem:[%s11904_s19 + $0x70] sm:$0xff] %vm228_vm1, %v6207_v14  ;;  %v5647_v51 = vadd.f32 %v5082_v52, %v5081_v25 }
 0x315   : > { %v5026_v43 = vmul.f32 %v8042_v57, %v11974_v26  ;;  %v8044_v16 = vpop.eup %8043  ;;  %v14191_v26 = vld [vmem:[#allocation62_spill] sm:$0xff]  ;;  %v5442_v55 = vpop.xlane.xlu0 %5441  ;;  %v12122_v38 = vadd.f32 %v2510_v7, %v14192_v10 }
 0x316   : > { %8067 = vrcp.f32 %v4070_v53  ;;  %v8046_v1 = vpop.eup %8045  ;;  %v12115_v50 = vadd.f32 %v14191_v26, %v14189_v18  ;;  %v5886_v57 = vadd.f32 %v5442_v55, %v5246_v5  ;;  %v2512_v53 = vpop.f32.mrf.mxu0  ;;  %v6208_v39 = vld [vmem:[#allocation2 + $0x78] sm:$0xff] }
 0x317   : > { %8069 = vpow2.f32 %v6898_v6  ;;  %v5563_v62 = vadd.f32 %v5026_v43, %v5025_v22  ;;  %v8048_v61 = vpop.eup %8047  ;;  %v4071_v42 = vadd.f32 1.0, %v8046_v1  ;;  %v12126_v43 = vpop.f32.mrf.mxu1  ;;  %6368 = vst.msk [vmem:[%s11904_s19 + $0x78] sm:$0xff] %vm228_vm1, %v6208_v39  ;;  %v6901_v7 = vmul.f32 -1.442695, %v12122_v38 }
 0x318   : > { %v8050_v58 = vpop.eup %8049  ;;  %8071 = vrcp.f32 %v4127_v29  ;;  %v6958_v22 = vmul.f32 -1.442695, %v12115_v50  ;;  %6047 = vst.msk [vmem:[#allocation2 + $0x88] sm:$0xff] %vm228_vm1, %v5886_v57  ;;  %v5084_v5 = vmul.f32 %v8048_v61, %v11947_v11 }
 0x319   : > { %5564 = vadd.xlane.f32.xlu1 %v5563_v62  ;;  %v8052_v6 = vpop.eup %8051  ;;  %8073 = vrcp.f32 %v4128_v56  ;;  %v5247_v56 = vld [vmem:[#allocation2 + $0x90] sm:$0xff]  ;;  %v12136_v62 = vadd.f32 %v2512_v53, %v14192_v10  ;;  %v4129_v55 = vadd.f32 1.0, %v8050_v58  ;;  %v5249_v53 = vld [vmem:[#allocation2 + $0xa0] sm:$0xff] }
 0x31a   : > { %v8054_v18 = vpop.eup %8053  ;;  %8075 = vpow2.f32 %v6899_v44  ;;  %v5083_v44 = vmul.f32 %v8044_v16, %v11921_v2  ;;  %v5027_v25 = vmul.f32 %v8052_v6, %v11987_v12  ;;  %v5887_v26 = vadd.f32 %v5445_v49, %v5247_v56  ;;  %v2514_v2 = vpop.f32.mrf.mxu0  ;;  %v5248_v12 = vld [vmem:[#allocation2 + $0x98] sm:$0xff] }
 0x31b   : > { %8077 = vrcp.f32 %v4071_v42  ;;  %v4072_v14 = vadd.f32 1.0, %v8054_v18  ;;  %v5448_v6 = vpop.xlane.xlu0 %5447  ;;  %v12139_v18 = vpop.f32.mrf.mxu1  ;;  %v6902_v56 = vmul.f32 -1.442695, %v12136_v62  ;;  %v14195_v49 = vld [vmem:[#allocation78_spill] sm:$0xff] }
 0x31c   : > { %v8056_v29 = vpop.eup %8055  ;;  %8079 = vpow2.f32 %v6957_v13  ;;  %v6209_v13 = vld [vmem:[#allocation2 + $0x80] sm:$0xff]  ;;  %6048 = vst.msk [vmem:[#allocation2 + $0x90] sm:$0xff] %vm228_vm1, %v5887_v26  ;;  %v5888_v10 = vadd.f32 %v5448_v6, %v5248_v12 }
 0x31d   : > { %v8058_v1 = vpop.eup %8057  ;;  %v5028_v52 = vmul.f32 %v8056_v29, %v12000_v35  ;;  %5648 = vadd.xlane.f32.xlu1 %v5647_v51  ;;  %8081 = vrcp.f32 %v4072_v14  ;;  %6369 = vst.msk [vmem:[%s11904_s19 + $0x80] sm:$0xff] %vm228_vm1, %v6209_v13  ;;  %v5451_v51 = vpop.xlane.xlu1 %5450  ;;  %v14194_v29 = vld [vmem:[#allocation67_spill] sm:$0xff]  ;;  %v5650_v13 = vadd.f32 %v5084_v5, %v5083_v44 }
 0x31e   : > { %v8060_v42 = vpop.eup %8059  ;;  %8083 = vpow2.f32 %v6900_v27  ;;  %v4130_v57 = vadd.f32 1.0, %v8058_v1  ;;  %v5889_v61 = vadd.f32 %v5451_v51, %v5249_v53  ;;  %v14193_v27 = vld [vmem:[#allocation151_spill] sm:$0xff]  ;;  %v12150_v1 = vadd.f32 %v2514_v2, %v14195_v49  ;;  %6049 = vst.msk [vmem:[#allocation2 + $0x98] sm:$0xff] %vm228_vm1, %v5888_v10 }
 0x31f   : > { %v5566_v16 = vadd.f32 %v5028_v52, %v5027_v25  ;;  %v8062_v35 = vpop.eup %8061  ;;  %8085 = vpow2.f32 %v6958_v22  ;;  %v12146_v14 = vadd.f32 %v14194_v29, %v14193_v27  ;;  %v5085_v22 = vmul.f32 %v8060_v42, %v11983_v54  ;;  %v14196_v52 = vld [vmem:[#allocation68_spill] sm:$0xff]  ;;  %v5454_v6 = vpop.xlane.xlu0 %5453 }
 0x320   : > { %v8064_v39 = vpop.eup %8063  ;;  %v4073_v11 = vadd.f32 1.0, %v8062_v35  ;;  %8087 = vpow2.f32 %v6901_v7  ;;  %v12156_v26 = vadd.f32 %v14196_v52, %v14193_v27  ;;  %v6210_v12 = vld [vmem:[#allocation2 + $0x88] sm:$0xff]  ;;  %6050 = vst.msk [vmem:[#allocation2 + $0xa0] sm:$0xff] %vm228_vm1, %v5889_v61  ;;  %v12159_v35 = vpop.f32.mrf.mxu1 }
 0x321   : > { %5567 = vadd.xlane.f32.xlu0 %v5566_v16  ;;  %v8066_v58 = vpop.eup %8065  ;;  %8089 = vrcp.f32 %v4129_v55  ;;  %v2516_v16 = vpop.f32.mrf.mxu0  ;;  %v5250_v7 = vld [vmem:[#allocation2 + $0xa8] sm:$0xff]  ;;  %v5029_v10 = vmul.f32 %v8064_v39, %v12017_v59  ;;  %6370 = vst.msk [vmem:[%s11904_s19 + $0x88] sm:$0xff] %vm228_vm1, %v6210_v12  ;;  %v5251_v55 = vld [vmem:[#allocation2 + $0xb0] sm:$0xff]  ;;  %v6961_v27 = vmul.f32 -1.442695, %v12146_v14 }
 0x322   : > { %8091 = vrcp.f32 %v4130_v57  ;;  %v5890_v42 = vadd.f32 %v5454_v6, %v5250_v7  ;;  %v5457_v53 = vpop.xlane.xlu1 %5456  ;;  %v5086_v44 = vmul.f32 %v8066_v58, %v12012_v60  ;;  %v6903_v57 = vmul.f32 -1.442695, %v12150_v1  ;;  %v5252_v58 = vld [vmem:[#allocation2 + $0xb8] sm:$0xff]  ;;  %v12174_v52 = vpop.f32.mrf.mxu1 }
 0x323   : > { %v8068_v25 = vpop.eup %8067  ;;  %8093 = vrcp.f32 %v4073_v11  ;;  %v5891_v51 = vadd.f32 %v5457_v53, %v5251_v55  ;;  %v12168_v59 = vadd.f32 %v2516_v16, %v14195_v49  ;;  %v2520_v60 = vpop.f32.mrf.mxu0  ;;  %v6211_v11 = vld [vmem:[#allocation2 + $0x90] sm:$0xff]  ;;  %v5253_v16 = vld [vmem:[#allocation2 + $0xc0] sm:$0xff] }
 0x324   : > { %v8070_v2 = vpop.eup %8069  ;;  %v5030_v54 = vmul.f32 %v8068_v25, %v12030_v24  ;;  %8095 = vpow2.f32 %v6902_v56  ;;  %6051 = vst.msk [vmem:[#allocation2 + $0xa8] sm:$0xff] %vm228_vm1, %v5890_v42  ;;  %v5460_v29 = vpop.xlane.xlu0 %5459  ;;  %v6962_v25 = vmul.f32 -1.442695, %v12156_v26  ;;  %6371 = vst.msk [vmem:[%s11904_s19 + $0x90] sm:$0xff] %vm228_vm1, %v6211_v11  ;;  %v5653_v42 = vadd.f32 %v5086_v44, %v5085_v22  ;;  %v5254_v11 = vld [vmem:[#allocation2 + $0xc8] sm:$0xff] }
 0x325   : > { %v4074_v5 = vadd.f32 1.0, %v8070_v2  ;;  %5651 = vadd.xlane.f32.xlu0 %v5650_v13  ;;  %v8072_v61 = vpop.eup %8071  ;;  %6052 = vst.msk [vmem:[#allocation2 + $0xb0] sm:$0xff] %vm228_vm1, %v5891_v51  ;;  %v5892_v49 = vadd.f32 %v5460_v29, %v5252_v58  ;;  %v6212_v6 = vld [vmem:[#allocation2 + $0x98] sm:$0xff]  ;;  %v12188_v22 = vpop.f32.mrf.mxu1 }
 0x326   : > { %v5569_v24 = vadd.f32 %v5030_v54, %v5029_v10  ;;  %v8074_v39 = vpop.eup %8073  ;;  %v5463_v13 = vpop.xlane.xlu1 %5462  ;;  %v6904_v54 = vmul.f32 -1.442695, %v12168_v59  ;;  %6372 = vst.msk [vmem:[%s11904_s19 + $0x98] sm:$0xff] %vm228_vm1, %v6212_v6 }
 0x327   : > { %8097 = vrcp.f32 %v4074_v5  ;;  %v8076_v56 = vpop.eup %8075  ;;  %v5893_v2 = vadd.f32 %v5463_v13, %v5253_v16  ;;  %v6213_v55 = vld [vmem:[#allocation2 + $0xa0] sm:$0xff]  ;;  %6053 = vst.msk [vmem:[#allocation2 + $0xb8] sm:$0xff] %vm228_vm1, %v5892_v49  ;;  %v14197_v5 = vld [vmem:[#allocation90_spill] sm:$0xff]  ;;  %v5087_v49 = vmul.f32 %v8072_v61, %v11979_v19 }
 0x328   : > { %5570 = vadd.xlane.f32.xlu1 %v5569_v24  ;;  %v8078_v12 = vpop.eup %8077  ;;  %v4075_v7 = vadd.f32 1.0, %v8076_v56  ;;  %8099 = vpow2.f32 %v6903_v57  ;;  %v12183_v51 = vadd.f32 %v2520_v60, %v14197_v5  ;;  %v2522_v24 = vpop.f32.mrf.mxu0  ;;  %6373 = vst.msk [vmem:[%s11904_s19 + $0xa0] sm:$0xff] %vm228_vm1, %v6213_v55  ;;  %v5255_v60 = vld [vmem:[#allocation2 + $0xd0] sm:$0xff] }
 0x329   : > { %v8080_v10 = vpop.eup %8079  ;;  %8101 = vpow2.f32 %v6961_v27  ;;  %6054 = vst.msk [vmem:[#allocation2 + $0xc0] sm:$0xff] %vm228_vm1, %v5893_v2  ;;  %v5466_v57 = vpop.xlane.xlu0 %5465  ;;  %v5031_v44 = vmul.f32 %v8078_v12, %v12038_v41  ;;  %v12199_v61 = vadd.f32 %v2522_v24, %v14197_v5 }
 0x32a   : > { %v8082_v53 = vpop.eup %8081  ;;  %8103 = vpow2.f32 %v6962_v25  ;;  %v5894_v27 = vadd.f32 %v5466_v57, %v5254_v11  ;;  %v5469_v56 = vpop.xlane.xlu1 %5468  ;;  %v5088_v25 = vmul.f32 %v8074_v39, %v12008_v36  ;;  %v4133_v55 = vadd.f32 1.0, %v8080_v10  ;;  %v5256_v36 = vld [vmem:[#allocation2 + $0xd8] sm:$0xff]  ;;  %v5257_v11 = vld [vmem:[#allocation2 + $0xe0] sm:$0xff] }
 0x32b   : > { %v8084_v58 = vpop.eup %8083  ;;  %v5032_v29 = vmul.f32 %v8082_v53, %v12054_v3  ;;  %8105 = vrcp.f32 %v4075_v7  ;;  %v6214_v13 = vld [vmem:[#allocation2 + $0xa8] sm:$0xff]  ;;  %v5895_v6 = vadd.f32 %v5469_v56, %v5255_v60  ;;  %v6905_v19 = vmul.f32 -1.442695, %v12183_v51  ;;  %v2524_v7 = vpop.f32.mrf.mxu0 }
 0x32c   : > { %5654 = vadd.xlane.f32.xlu1 %v5653_v42  ;;  %v4076_v16 = vadd.f32 1.0, %v8084_v58  ;;  %v8086_v2 = vpop.eup %8085  ;;  %8107 = vpow2.f32 %v6904_v54  ;;  %6374 = vst.msk [vmem:[%s11904_s19 + $0xa8] sm:$0xff] %vm228_vm1, %v6214_v13  ;;  %v6215_v3 = vld [vmem:[#allocation2 + $0xb0] sm:$0xff]  ;;  %6055 = vst.msk [vmem:[#allocation2 + $0xc8] sm:$0xff] %vm228_vm1, %v5894_v27  ;;  %v12204_v54 = vpop.f32.mrf.mxu1  ;;  %v5656_v27 = vadd.f32 %v5088_v25, %v5087_v49 }
 0x32d   : > { %v5572_v41 = vadd.f32 %v5032_v29, %v5031_v44  ;;  %v8088_v12 = vpop.eup %8087  ;;  %6375 = vst.msk [vmem:[%s11904_s19 + $0xb0] sm:$0xff] %vm228_vm1, %v6215_v3  ;;  %6056 = vst.msk [vmem:[#allocation2 + $0xd0] sm:$0xff] %vm228_vm1, %v5895_v6  ;;  %v5472_v39 = vpop.xlane.xlu0 %5471  ;;  %v4134_v5 = vadd.f32 1.0, %v8086_v2  ;;  %v14198_v13 = vld [vmem:[#allocation81_spill] sm:$0xff]  ;;  %v5258_v2 = vld [vmem:[#allocation2 + $0xe8] sm:$0xff] }
 0x32e   : > { %8109 = vrcp.f32 %v4076_v16  ;;  %v8090_v10 = vpop.eup %8089  ;;  %v4077_v42 = vadd.f32 1.0, %v8088_v12  ;;  %v5896_v53 = vadd.f32 %v5472_v39, %v5256_v36  ;;  %v5475_v57 = vpop.xlane.xlu1 %5474  ;;  %v6216_v24 = vld [vmem:[#allocation2 + $0xb8] sm:$0xff]  ;;  %v6906_v16 = vmul.f32 -1.442695, %v12199_v61 }
 0x32f   : > { %5573 = vadd.xlane.f32.xlu0 %v5572_v41  ;;  %v8092_v58 = vpop.eup %8091  ;;  %v5897_v44 = vadd.f32 %v5475_v57, %v5257_v11  ;;  %8111 = vrcp.f32 %v4133_v55  ;;  %6376 = vst.msk [vmem:[%s11904_s19 + $0xb8] sm:$0xff] %vm228_vm1, %v6216_v24  ;;  %v12211_v6 = vadd.f32 %v2524_v7, %v14198_v13  ;;  %v2526_v41 = vpop.f32.mrf.mxu0  ;;  %v5089_v57 = vmul.f32 %v8090_v10, %v12043_v30  ;;  %v5260_v30 = vld [vmem:[#allocation2 + $0xf8] sm:$0xff] }
 0x330   : > { %v8094_v29 = vpop.eup %8093  ;;  %v6217_v60 = vld [vmem:[#allocation2 + $0xc0] sm:$0xff]  ;;  %6057 = vst.msk [vmem:[#allocation2 + $0xd8] sm:$0xff] %vm228_vm1, %v5896_v53  ;;  %8113 = vpow2.f32 %v6905_v19  ;;  %v12216_v25 = vpop.f32.mrf.mxu1  ;;  %v5259_v19 = vld [vmem:[#allocation2 + $0xf0] sm:$0xff]  ;;  %v5090_v24 = vmul.f32 %v8092_v58, %v12061_v17 }
 0x331   : > { %v8096_v56 = vpop.eup %8095  ;;  %6377 = vst.msk [vmem:[%s11904_s19 + $0xc0] sm:$0xff] %vm228_vm1, %v6217_v60  ;;  %6058 = vst.msk [vmem:[#allocation2 + $0xe0] sm:$0xff] %vm228_vm1, %v5897_v44  ;;  %v5478_v55 = vpop.xlane.xlu0 %5477  ;;  %8115 = vrcp.f32 %v4077_v42  ;;  %v5033_v7 = vmul.f32 %v8094_v29, %v12068_v34  ;;  %v12227_v34 = vadd.f32 %v2526_v41, %v14198_v13 }
 0x332   : > { %v4078_v3 = vadd.f32 1.0, %v8096_v56  ;;  %v5898_v12 = vadd.f32 %v5478_v55, %v5258_v2  ;;  %v5481_v36 = vpop.xlane.xlu1 %5480  ;;  %8117 = vrcp.f32 %v4134_v5  ;;  %v6907_v5 = vmul.f32 -1.442695, %v12211_v6  ;;  %v12232_v58 = vpop.f32.mrf.mxu1  ;;  %v5261_v56 = vld [vmem:[#allocation2 + $0x100] sm:$0xff] }
 0x333   : > { %5657 = vadd.xlane.f32.xlu0 %v5656_v27  ;;  %v6218_v53 = vld [vmem:[#allocation2 + $0xc8] sm:$0xff]  ;;  %v5899_v11 = vadd.f32 %v5481_v36, %v5259_v19  ;;  %v6908_v36 = vmul.f32 -1.442695, %v12227_v34 }
 0x334   : > { %v8098_v49 = vpop.eup %8097  ;;  %8119 = vrcp.f32 %v4078_v3  ;;  %6378 = vst.msk [vmem:[%s11904_s19 + $0xc8] sm:$0xff] %vm228_vm1, %v6218_v53  ;;  %v6219_v42 = vld [vmem:[#allocation2 + $0xd0] sm:$0xff]  ;;  %6059 = vst.msk [vmem:[#allocation2 + $0xe8] sm:$0xff] %vm228_vm1, %v5898_v12  ;;  %v5262_v53 = vld [vmem:[#allocation2 + $0x108] sm:$0xff] }
 0x335   : > { %v5034_v39 = vmul.f32 %v8098_v49, %v12084_v20  ;;  %v8100_v44 = vpop.eup %8099  ;;  %8121 = vpow2.f32 %v6906_v16  ;;  %v2530_v20 = vpop.f32.mrf.mxu0  ;;  %6379 = vst.msk [vmem:[%s11904_s19 + $0xd0] sm:$0xff] %vm228_vm1, %v6219_v42  ;;  %6060 = vst.msk [vmem:[#allocation2 + $0xf0] sm:$0xff] %vm228_vm1, %v5899_v11  ;;  %v14199_v49 = vld [vmem:[#allocation94_spill] sm:$0xff] }
 0x336   : > { %v5484_v17 = vpop.xlane.xlu0 %5483  ;;  %v8102_v10 = vpop.eup %8101  ;;  %v4079_v27 = vadd.f32 1.0, %v8100_v44  ;;  %v12235_v3 = vadd.f32 %v2530_v20, %v14199_v49  ;;  %8123 = vpow2.f32 %v6907_v5 }
 0x337   : > { %v5575_v29 = vadd.f32 %v5034_v39, %v5033_v7  ;;  %v5900_v60 = vadd.f32 %v5484_v17, %v5260_v30  ;;  %v5487_v16 = vpop.xlane.xlu1 %5486  ;;  %v8104_v2 = vpop.eup %8103  ;;  %v6220_v13 = vld [vmem:[#allocation2 + $0xd8] sm:$0xff]  ;;  %v5659_v39 = vadd.f32 %v5090_v24, %v5089_v57  ;;  %v5263_v30 = vld [vmem:[#allocation2 + $0x110] sm:$0xff]  ;;  %v4137_v5 = vadd.f32 1.0, %v8102_v10 }
 0x338   : > { %v5901_v41 = vadd.f32 %v5487_v16, %v5261_v56  ;;  %v8106_v55 = vpop.eup %8105  ;;  %6380 = vst.msk [vmem:[%s11904_s19 + $0xd8] sm:$0xff] %vm228_vm1, %v6220_v13  ;;  %v6221_v12 = vld [vmem:[#allocation2 + $0xe0] sm:$0xff]  ;;  %v2532_v7 = vpop.f32.mrf.mxu0  ;;  %8125 = vrcp.f32 %v4079_v27  ;;  %v6909_v16 = vmul.f32 -1.442695, %v12235_v3 }
 0x339   : > { %5576 = vadd.xlane.f32.xlu1 %v5575_v29  ;;  %6061 = vst.msk [vmem:[#allocation2 + $0xf8] sm:$0xff] %vm228_vm1, %v5900_v60  ;;  %v8108_v19 = vpop.eup %8107  ;;  %6381 = vst.msk [vmem:[%s11904_s19 + $0xe0] sm:$0xff] %vm228_vm1, %v6221_v12  ;;  %v12244_v44 = vpop.f32.mrf.mxu1  ;;  %v5035_v60 = vmul.f32 %v8106_v55, %v12091_v15  ;;  %v12250_v13 = vadd.f32 %v2532_v7, %v14199_v49 }
 0x33a   : > { %6062 = vst.msk [vmem:[#allocation2 + $0x100] sm:$0xff] %vm228_vm1, %v5901_v41  ;;  %v5490_v11 = vpop.xlane.xlu0 %5489  ;;  %v4080_v20 = vadd.f32 1.0, %v8108_v19  ;;  %v4138_v41 = vadd.f32 1.0, %v8104_v2  ;;  %v2534_v15 = vpop.f32.mrf.mxu0  ;;  %v5265_v19 = vld [vmem:[#allocation2 + $0x120] sm:$0xff] }
 0x33b   : > { %v8110_v42 = vpop.eup %8109  ;;  %v5902_v29 = vadd.f32 %v5490_v11, %v5262_v53  ;;  %v5493_v17 = vpop.xlane.xlu1 %5492  ;;  %v6222_v24 = vld [vmem:[#allocation2 + $0xe8] sm:$0xff] }
 0x33c   : > { %v5036_v57 = vmul.f32 %v8110_v42, %v12109_v4  ;;  %v5903_v56 = vadd.f32 %v5493_v17, %v5263_v30  ;;  %8127 = vrcp.f32 %v4080_v20  ;;  %6382 = vst.msk [vmem:[%s11904_s19 + $0xe8] sm:$0xff] %vm228_vm1, %v6222_v24  ;;  %v6223_v27 = vld [vmem:[#allocation2 + $0xf0] sm:$0xff]  ;;  %v8112_v10 = vpop.eup %8111  ;;  %v5264_v4 = vld [vmem:[#allocation2 + $0x118] sm:$0xff]  ;;  %v12258_v7 = vpop.f32.mrf.mxu1  ;;  %v5266_v20 = vld [vmem:[#allocation2 + $0x128] sm:$0xff]  ;;  %v6910_v30 = vmul.f32 -1.442695, %v12250_v13 }
 0x33d   : > { %5660 = vadd.xlane.f32.xlu1 %v5659_v39  ;;  %6063 = vst.msk [vmem:[#allocation2 + $0x108] sm:$0xff] %vm228_vm1, %v5902_v29  ;;  %8129 = vpow2.f32 %v6908_v36  ;;  %6383 = vst.msk [vmem:[%s11904_s19 + $0xf0] sm:$0xff] %vm228_vm1, %v6223_v27  ;;  %v8114_v49 = vpop.eup %8113  ;;  %v14200_v17 = vld [vmem:[#allocation87_spill] sm:$0xff]  ;;  %v5267_v24 = vld [vmem:[#allocation2 + $0x130] sm:$0xff] }
 0x33e   : > { %v5578_v55 = vadd.f32 %v5036_v57, %v5035_v60  ;;  %6064 = vst.msk [vmem:[#allocation2 + $0x110] sm:$0xff] %vm228_vm1, %v5903_v56  ;;  %v5496_v12 = vpop.xlane.xlu0 %5495  ;;  %v8116_v11 = vpop.eup %8115  ;;  %8131 = vrcp.f32 %v4137_v5  ;;  %v4081_v42 = vadd.f32 1.0, %v8114_v49  ;;  %v12262_v60 = vadd.f32 %v2534_v15, %v14200_v17 }
 0x33f   : > { %v5904_v39 = vadd.f32 %v5496_v12, %v5264_v4  ;;  %v5499_v53 = vpop.xlane.xlu1 %5498  ;;  %v8118_v29 = vpop.eup %8117  ;;  %8133 = vpow2.f32 %v6909_v16  ;;  %v5037_v15 = vmul.f32 %v8116_v11, %v12122_v38 }
 0x340   : > { %5579 = vadd.xlane.f32.xlu0 %v5578_v55  ;;  %v6224_v2 = vld [vmem:[#allocation2 + $0xf8] sm:$0xff]  ;;  %v5905_v36 = vadd.f32 %v5499_v53, %v5265_v19  ;;  %8135 = vrcp.f32 %v4138_v41  ;;  %v2536_v56 = vpop.f32.mrf.mxu0  ;;  %v5093_v55 = vmul.f32 %v8112_v10, %v12098_v40  ;;  %v12271_v4 = vpop.f32.mrf.mxu1  ;;  %v5094_v41 = vmul.f32 %v8118_v29, %v12115_v50  ;;  %v14201_v53 = vld [vmem:[#allocation156_spill] sm:$0xff]  ;;  %v5269_v50 = vld [vmem:[#allocation2 + $0x140] sm:$0xff] }
 0x341   : > { %6384 = vst.msk [vmem:[%s11904_s19 + $0xf8] sm:$0xff] %vm228_vm1, %v6224_v2  ;;  %v6225_v57 = vld [vmem:[#allocation2 + $0x100] sm:$0xff]  ;;  %6065 = vst.msk [vmem:[#allocation2 + $0x118] sm:$0xff] %vm228_vm1, %v5904_v39  ;;  %v8120_v5 = vpop.eup %8119  ;;  %8137 = vrcp.f32 %v4081_v42  ;;  %v6911_v40 = vmul.f32 -1.442695, %v12262_v60  ;;  %v12279_v10 = vadd.f32 %v2536_v56, %v14200_v17 }
 0x342   : > { %6385 = vst.msk [vmem:[%s11904_s19 + $0x100] sm:$0xff] %vm228_vm1, %v6225_v57  ;;  %6066 = vst.msk [vmem:[#allocation2 + $0x120] sm:$0xff] %vm228_vm1, %v5905_v36  ;;  %v5502_v27 = vpop.xlane.xlu0 %5501  ;;  %v8122_v16 = vpop.eup %8121  ;;  %v5038_v12 = vmul.f32 %v8120_v5, %v12136_v62  ;;  %v5268_v57 = vld [vmem:[#allocation2 + $0x138] sm:$0xff]  ;;  %8139 = vpow2.f32 %v6910_v30 }
 0x343   : > { %v5906_v19 = vadd.f32 %v5502_v27, %v5266_v20  ;;  %v5505_v49 = vpop.xlane.xlu1 %5504  ;;  %v4082_v39 = vadd.f32 1.0, %v8122_v16  ;;  %v2540_v11 = vpop.f32.mrf.mxu0  ;;  %v5270_v16 = vld [vmem:[#allocation2 + $0x148] sm:$0xff] }
 0x344   : > { %5663 = vadd.xlane.f32.xlu0 %v14201_v53  ;;  %v6226_v2 = vld [vmem:[#allocation2 + $0x108] sm:$0xff]  ;;  %v5907_v36 = vadd.f32 %v5505_v49, %v5267_v24  ;;  %v5581_v38 = vadd.f32 %v5038_v12, %v5037_v15  ;;  %v8124_v20 = vpop.eup %8123  ;;  %v12287_v29 = vpop.f32.mrf.mxu1  ;;  %v6912_v15 = vmul.f32 -1.442695, %v12279_v10  ;;  %v5665_v12 = vadd.f32 %v5094_v41, %v5093_v55  ;;  %v5271_v49 = vld [vmem:[#allocation2 + $0x150] sm:$0xff]  ;;  %v14202_v53 = vld [vmem:[#allocation98_spill] sm:$0xff] }
 0x345   : > { %6386 = vst.msk [vmem:[%s11904_s19 + $0x108] sm:$0xff] %vm228_vm1, %v6226_v2  ;;  %v6227_v62 = vld [vmem:[#allocation2 + $0x110] sm:$0xff]  ;;  %6067 = vst.msk [vmem:[#allocation2 + $0x128] sm:$0xff] %vm228_vm1, %v5906_v19  ;;  %8141 = vrcp.f32 %v4082_v39  ;;  %v8126_v24 = vpop.eup %8125  ;;  %v4083_v5 = vadd.f32 1.0, %v8124_v20  ;;  %v12294_v2 = vadd.f32 %v2540_v11, %v14202_v53 }
 0x346   : > { %6387 = vst.msk [vmem:[%s11904_s19 + $0x110] sm:$0xff] %vm228_vm1, %v6227_v62  ;;  %6068 = vst.msk [vmem:[#allocation2 + $0x130] sm:$0xff] %vm228_vm1, %v5907_v36  ;;  %v5508_v42 = vpop.xlane.xlu0 %5507  ;;  %5582 = vadd.xlane.f32.xlu1 %v5581_v38  ;;  %8143 = vpow2.f32 %v6911_v40  ;;  %v2542_v36 = vpop.f32.mrf.mxu0  ;;  %v5039_v55 = vmul.f32 %v8126_v24, %v12150_v1  ;;  %v5273_v1 = vld [vmem:[#allocation2 + $0x160] sm:$0xff] }
 0x347   : > { %v5908_v30 = vadd.f32 %v5508_v42, %v5268_v57  ;;  %v5511_v17 = vpop.xlane.xlu1 %5510  ;;  %v12299_v38 = vpop.f32.mrf.mxu1  ;;  %8145 = vrcp.f32 %v4083_v5  ;;  %v12308_v5 = vadd.f32 %v2542_v36, %v14202_v53  ;;  %v5275_v36 = vld [vmem:[#allocation2 + $0x170] sm:$0xff] }
 0x348   : > { %v6228_v56 = vld [vmem:[#allocation2 + $0x118] sm:$0xff]  ;;  %v5909_v27 = vadd.f32 %v5511_v17, %v5269_v50  ;;  %8147 = vpow2.f32 %v6912_v15 }
 0x349   : > { %6388 = vst.msk [vmem:[%s11904_s19 + $0x118] sm:$0xff] %vm228_vm1, %v6228_v56  ;;  %v6229_v19 = vld [vmem:[#allocation2 + $0x120] sm:$0xff]  ;;  %6069 = vst.msk [vmem:[#allocation2 + $0x138] sm:$0xff] %vm228_vm1, %v5908_v30  ;;  %v8128_v39 = vpop.eup %8127  ;;  %v5272_v30 = vld [vmem:[#allocation2 + $0x158] sm:$0xff] }
 0x34a   : > { %6389 = vst.msk [vmem:[%s11904_s19 + $0x120] sm:$0xff] %vm228_vm1, %v6229_v19  ;;  %6070 = vst.msk [vmem:[#allocation2 + $0x140] sm:$0xff] %vm228_vm1, %v5909_v27  ;;  %v5514_v57 = vpop.xlane.xlu0 %5513  ;;  %v8130_v40 = vpop.eup %8129  ;;  %v5040_v41 = vmul.f32 %v8128_v39, %v12168_v59  ;;  %5666 = vadd.xlane.f32.xlu1 %v5665_v12  ;;  %v6913_v59 = vmul.f32 -1.442695, %v12294_v2 }
 0x34b   : > { %v5910_v62 = vadd.f32 %v5514_v57, %v5270_v16  ;;  %v5517_v50 = vpop.xlane.xlu1 %5516  ;;  %v4084_v11 = vadd.f32 1.0, %v8130_v40  ;;  %v8132_v17 = vpop.eup %8131 }
 0x34c   : > { %v6230_v42 = vld [vmem:[#allocation2 + $0x128] sm:$0xff]  ;;  %v5911_v20 = vadd.f32 %v5517_v50, %v5271_v49  ;;  %v5584_v56 = vadd.f32 %v5040_v41, %v5039_v55  ;;  %v8134_v24 = vpop.eup %8133  ;;  %v2544_v16 = vpop.f32.mrf.mxu0 }
 0x34d   : > { %6390 = vst.msk [vmem:[%s11904_s19 + $0x128] sm:$0xff] %vm228_vm1, %v6230_v42  ;;  %v6231_v27 = vld [vmem:[#allocation2 + $0x130] sm:$0xff]  ;;  %6071 = vst.msk [vmem:[#allocation2 + $0x148] sm:$0xff] %vm228_vm1, %v5910_v62  ;;  %8149 = vrcp.f32 %v4084_v11  ;;  %v8136_v12 = vpop.eup %8135  ;;  %v12313_v19 = vpop.f32.mrf.mxu1  ;;  %v4085_v49 = vadd.f32 1.0, %v8134_v24  ;;  %v5274_v41 = vld [vmem:[#allocation2 + $0x168] sm:$0xff] }
 0x34e   : > { %6391 = vst.msk [vmem:[%s11904_s19 + $0x130] sm:$0xff] %vm228_vm1, %v6231_v27  ;;  %6072 = vst.msk [vmem:[#allocation2 + $0x150] sm:$0xff] %vm228_vm1, %v5911_v20  ;;  %v5520_v15 = vpop.xlane.xlu0 %5519  ;;  %5585 = vadd.xlane.f32.xlu0 %v5584_v56  ;;  %v8138_v62 = vpop.eup %8137  ;;  %8151 = vpow2.f32 %v6913_v59  ;;  %v6914_v11 = vmul.f32 -1.442695, %v12308_v5  ;;  %v14203_v42 = vld [vmem:[#allocation92_spill] sm:$0xff]  ;;  %v5098_v9 = vmul.f32 %v8136_v12, %v12156_v26 }
 0x34f   : > { %v5912_v39 = vadd.f32 %v5520_v15, %v5272_v30  ;;  %v5523_v57 = vpop.xlane.xlu1 %5522  ;;  %v8140_v50 = vpop.eup %8139  ;;  %v12320_v20 = vadd.f32 %v2544_v16, %v14203_v42  ;;  %8153 = vrcp.f32 %v4085_v49  ;;  %v14204_v15 = vld [vmem:[#allocation153_spill] sm:$0xff] }
 0x350   : > { %v6232_v40 = vld [vmem:[#allocation2 + $0x138] sm:$0xff]  ;;  %v5913_v55 = vadd.f32 %v5523_v57, %v5273_v1  ;;  %v2546_v56 = vpop.f32.mrf.mxu0  ;;  %v12325_v1 = vpop.f32.mrf.mxu1  ;;  %v4086_v24 = vadd.f32 1.0, %v8140_v50  ;;  %v5041_v57 = vmul.f32 %v8138_v62, %v12183_v51 }
 0x351   : > { %6392 = vst.msk [vmem:[%s11904_s19 + $0x138] sm:$0xff] %vm228_vm1, %v6232_v40  ;;  %v6233_v53 = vld [vmem:[#allocation2 + $0x140] sm:$0xff]  ;;  %6073 = vst.msk [vmem:[#allocation2 + $0x158] sm:$0xff] %vm228_vm1, %v5912_v39  ;;  %v6915_v51 = vmul.f32 -1.442695, %v12320_v20 }
 0x352   : > { %6393 = vst.msk [vmem:[%s11904_s19 + $0x140] sm:$0xff] %vm228_vm1, %v6233_v53  ;;  %6074 = vst.msk [vmem:[#allocation2 + $0x160] sm:$0xff] %vm228_vm1, %v5913_v55  ;;  %v5526_v30 = vpop.xlane.xlu0 %5525  ;;  %v8142_v27 = vpop.eup %8141  ;;  %5669 = vadd.xlane.f32.xlu0 %v14204_v15  ;;  %v5097_v55 = vmul.f32 %v8132_v17, %v12146_v14  ;;  %8155 = vrcp.f32 %v4086_v24  ;;  %v5278_v24 = vld [vmem:[#allocation2 + $0x188] sm:$0xff] }
 0x353   : > { %v5914_v59 = vadd.f32 %v5526_v30, %v5274_v41  ;;  %v5529_v39 = vpop.xlane.xlu1 %5528  ;;  %v5042_v16 = vmul.f32 %v8142_v27, %v12199_v61  ;;  %v5277_v41 = vld [vmem:[#allocation2 + $0x180] sm:$0xff]  ;;  %v8144_v50 = vpop.eup %8143  ;;  %8157 = vpow2.f32 %v6914_v11  ;;  %v12337_v61 = vadd.f32 %v2546_v56, %v14203_v42  ;;  %v14205_v56 = vld [vmem:[#allocation102_spill] sm:$0xff] }
 0x354   : > { %v6234_v40 = vld [vmem:[#allocation2 + $0x148] sm:$0xff]  ;;  %v5915_v53 = vadd.f32 %v5529_v39, %v5275_v36  ;;  %v2550_v62 = vpop.f32.mrf.mxu0  ;;  %v12342_v26 = vpop.f32.mrf.mxu1  ;;  %v4087_v17 = vadd.f32 1.0, %v8144_v50  ;;  %8159 = vpow2.f32 %v6915_v51 }
 0x355   : > { %6394 = vst.msk [vmem:[%s11904_s19 + $0x148] sm:$0xff] %vm228_vm1, %v6234_v40  ;;  %v6235_v49 = vld [vmem:[#allocation2 + $0x150] sm:$0xff]  ;;  %6075 = vst.msk [vmem:[#allocation2 + $0x168] sm:$0xff] %vm228_vm1, %v5914_v59  ;;  %v5587_v36 = vadd.f32 %v5042_v16, %v5041_v57  ;;  %v8146_v42 = vpop.eup %8145  ;;  %v12345_v15 = vadd.f32 %v2550_v62, %v14205_v56  ;;  %v6916_v57 = vmul.f32 -1.442695, %v12337_v61  ;;  %v5671_v16 = vadd.f32 %v5098_v9, %v5097_v55 }
 0x356   : > { %6395 = vst.msk [vmem:[%s11904_s19 + $0x150] sm:$0xff] %vm228_vm1, %v6235_v49  ;;  %6076 = vst.msk [vmem:[#allocation2 + $0x170] sm:$0xff] %vm228_vm1, %v5915_v53  ;;  %v5532_v14 = vpop.xlane.xlu0 %5531  ;;  %v8148_v39 = vpop.eup %8147  ;;  %8161 = vrcp.f32 %v4087_v17  ;;  %v5043_v62 = vmul.f32 %v8146_v42, %v12211_v6 }
 0x357   : > { %v5916_v12 = vadd.f32 %v5532_v14, %v5276_v31  ;;  %v5535_v30 = vpop.xlane.xlu1 %5534  ;;  %5588 = vadd.xlane.f32.xlu1 %v5587_v36  ;;  %v2552_v31 = vpop.f32.mrf.mxu0  ;;  %v6917_v9 = vmul.f32 -1.442695, %v12345_v15 }
 0x358   : > { %v6236_v11 = vld [vmem:[#allocation2 + $0x158] sm:$0xff]  ;;  %v5917_v27 = vadd.f32 %v5535_v30, %v5277_v41  ;;  %v12354_v49 = vpop.f32.mrf.mxu1  ;;  %v4088_v41 = vadd.f32 1.0, %v8148_v39  ;;  %v12360_v55 = vadd.f32 %v2552_v31, %v14205_v56  ;;  %v5279_v30 = vld [vmem:[#allocation2 + $0x190] sm:$0xff]  ;;  %v14206_v56 = vld [vmem:[#allocation96_spill] sm:$0xff] }
 0x359   : > { %6396 = vst.msk [vmem:[%s11904_s19 + $0x158] sm:$0xff] %vm228_vm1, %v6236_v11  ;;  %v6237_v59 = vld [vmem:[#allocation2 + $0x160] sm:$0xff]  ;;  %6077 = vst.msk [vmem:[#allocation2 + $0x178] sm:$0xff] %vm228_vm1, %v5916_v12  ;;  %v2554_v17 = vpop.f32.mrf.mxu0 }
 0x35a   : > { %6397 = vst.msk [vmem:[%s11904_s19 + $0x160] sm:$0xff] %vm228_vm1, %v6237_v59  ;;  %6078 = vst.msk [vmem:[#allocation2 + $0x180] sm:$0xff] %vm228_vm1, %v5917_v27  ;;  %v8150_v53 = vpop.eup %8149  ;;  %8163 = vrcp.f32 %v4088_v41  ;;  %v6918_v42 = vmul.f32 -1.442695, %v12360_v55  ;;  %v12371_v59 = vadd.f32 %v2554_v17, %v14206_v56 }
 0x35b   : > { %v5044_v51 = vmul.f32 %v8150_v53, %v12227_v34  ;;  %5672 = vadd.xlane.f32.xlu1 %v5671_v16  ;;  %8165 = vpow2.f32 %v6916_v57  ;;  %v8152_v6 = vpop.eup %8151  ;;  %v12367_v34 = vpop.f32.mrf.mxu1 }
 0x35c   : > { %v6238_v36 = vld [vmem:[#allocation2 + $0x168] sm:$0xff]  ;;  %v8154_v11 = vpop.eup %8153  ;;  %v4089_v27 = vadd.f32 1.0, %v8152_v6  ;;  %8167 = vpow2.f32 %v6917_v9  ;;  %v2556_v16 = vpop.f32.mrf.mxu0 }
 0x35d   : > { %v5538_v40 = vpop.xlane.xlu0 %5537  ;;  %6398 = vst.msk [vmem:[%s11904_s19 + $0x168] sm:$0xff] %vm228_vm1, %v6238_v36  ;;  %v6239_v14 = vld [vmem:[#allocation2 + $0x170] sm:$0xff]  ;;  %v5590_v12 = vadd.f32 %v5044_v51, %v5043_v62  ;;  %v12377_v41 = vpop.f32.mrf.mxu1  ;;  %v12385_v17 = vadd.f32 %v2556_v16, %v14206_v56  ;;  %v14208_v56 = vld [vmem:[#allocation107_spill] sm:$0xff] }
 0x35e   : > { %v5918_v50 = vadd.f32 %v5538_v40, %v5278_v24  ;;  %6399 = vst.msk [vmem:[%s11904_s19 + $0x170] sm:$0xff] %vm228_vm1, %v6239_v14  ;;  %8169 = vrcp.f32 %v4089_v27  ;;  %v14207_v36 = vld [vmem:[#allocation65_spill] sm:$0xff]  ;;  %v6919_v14 = vmul.f32 -1.442695, %v12371_v59 }
 0x35f   : > { %5591 = vadd.xlane.f32.xlu0 %v5590_v12  ;;  %v8156_v31 = vpop.eup %8155  ;;  %8171 = vpow2.f32 %v6918_v42 }
 0x360   : > { %6079 = vst.msk [vmem:[#allocation2 + $0x188] sm:$0xff] %vm228_vm1, %v5918_v50  ;;  %v6240_v24 = vld [vmem:[#allocation2 + $0x178] sm:$0xff]  ;;  %v8158_v53 = vpop.eup %8157  ;;  %v5045_v50 = vmul.f32 %v8154_v11, %v12235_v3  ;;  %v5046_v62 = vmul.f32 %v8156_v31, %v12250_v13  ;;  %v2560_v3 = vpop.f32.mrf.mxu0 }
 0x361   : > { %6400 = vst.msk [vmem:[%s11904_s19 + $0x178] sm:$0xff] %vm228_vm1, %v6240_v24  ;;  %v6241_v39 = vld [vmem:[#allocation2 + $0x180] sm:$0xff]  ;;  %v4090_v51 = vadd.f32 1.0, %v8158_v53  ;;  %v8160_v6 = vpop.eup %8159  ;;  %v12389_v13 = vpop.f32.mrf.mxu1  ;;  %v6920_v24 = vmul.f32 -1.442695, %v12385_v17 }
 0x362   : > { %v5541_v57 = vpop.xlane.xlu1 %5540  ;;  %6401 = vst.msk [vmem:[%s11904_s19 + $0x180] sm:$0xff] %vm228_vm1, %v6241_v39  ;;  %v5593_v12 = vadd.f32 %v5046_v62, %v5045_v50  ;;  %v4091_v27 = vadd.f32 1.0, %v8160_v6  ;;  %v2562_v31 = vpop.f32.mrf.mxu0 }
 0x363   : > { %v5919_v40 = vadd.f32 %v5541_v57, %v5279_v30  ;;  %5675 = vadd.xlane.f32.xlu0 %v14207_v36  ;;  %8173 = vrcp.f32 %v4090_v51  ;;  %v5280_v30 = vld [vmem:[#allocation2 + $0x198] sm:$0xff]  ;;  %v8162_v11 = vpop.eup %8161  ;;  %v12393_v57 = vadd.f32 %v2560_v3, %v14208_v56  ;;  %v12395_v53 = vpop.f32.mrf.mxu1  ;;  %v12405_v6 = vadd.f32 %v2562_v31, %v14208_v56  ;;  %v14213_v56 = vld [vmem:[#allocation100_spill] sm:$0xff] }
 0x364   : > { %5594 = vadd.xlane.f32.xlu1 %v5593_v12  ;;  %8175 = vpow2.f32 %v6919_v14  ;;  %v5047_v50 = vmul.f32 %v8162_v11, %v12262_v60  ;;  %v14209_v51 = vld [vmem:[#allocation70_spill] sm:$0xff]  ;;  %v2564_v60 = vpop.f32.mrf.mxu0 }
 0x365   : > { %6080 = vst.msk [vmem:[#allocation2 + $0x190] sm:$0xff] %vm228_vm1, %v5919_v40  ;;  %8177 = vrcp.f32 %v4091_v27  ;;  %v6921_v3 = vmul.f32 -1.442695, %v12393_v57  ;;  %v12415_v31 = vadd.f32 %v2564_v60, %v14213_v56 }
 0x366   : > { %8179 = vpow2.f32 %v6920_v24 }
 0x367   : > { %v6242_v9 = vld [vmem:[#allocation2 + $0x188] sm:$0xff]  ;;  %v8164_v39 = vpop.eup %8163 }
 0x368   : > { %6402 = vst.msk [vmem:[%s11904_s19 + $0x188] sm:$0xff] %vm228_vm1, %v6242_v9  ;;  %v5544_v42 = vpop.xlane.xlu0 %5543  ;;  %v8166_v40 = vpop.eup %8165  ;;  %v5048_v62 = vmul.f32 %v8164_v39, %v12279_v10  ;;  %5678 = vadd.xlane.f32.xlu1 %v14209_v51  ;;  %v5281_v10 = vld [vmem:[#allocation2 + $0x1a0] sm:$0xff]  ;;  %v14211_v39 = vld [vmem:[#allocation93_spill] sm:$0xff] }
 0x369   : > { %v5920_v16 = vadd.f32 %v5544_v42, %v5280_v30  ;;  %v4092_v9 = vadd.f32 1.0, %v8166_v40  ;;  %v8168_v12 = vpop.eup %8167  ;;  %v12407_v30 = vpop.f32.mrf.mxu1  ;;  %v5309_v51 = vld [vmem:[#allocation2 + $0x280] sm:$0xff] }
 0x36a   : > { %v5596_v14 = vadd.f32 %v5048_v62, %v5047_v50  ;;  %14210 = vst [vmem:[#allocation150_spill] sm:$0xff] %v12407_v30  ;;  %v4093_v11 = vadd.f32 1.0, %v8168_v12  ;;  %v6922_v50 = vmul.f32 -1.442695, %v12405_v6  ;;  %v2566_v62 = vpop.f32.mrf.mxu0  ;;  %v14215_v12 = vld [vmem:[#allocation73_spill] sm:$0xff]  ;;  %v5282_v30 = vld [vmem:[#allocation2 + $0x1a8] sm:$0xff] }
 0x36b   : > { %6081 = vst.msk [vmem:[#allocation2 + $0x198] sm:$0xff] %vm228_vm1, %v5920_v16  ;;  %8181 = vrcp.f32 %v4092_v9  ;;  %v8170_v42 = vpop.eup %8169  ;;  %v12411_v16 = vadd.f32 %v11290_v32, %v14211_v39  ;;  %v12417_v9 = vpop.f32.mrf.mxu1 }
 0x36c   : > { %v6243_v36 = vld [vmem:[#allocation2 + $0x190] sm:$0xff]  ;;  %5597 = vadd.xlane.f32.xlu0 %v5596_v14  ;;  %v8172_v40 = vpop.eup %8171  ;;  %8183 = vpow2.f32 %v6921_v3  ;;  %14214 = vst [vmem:[#allocation124_spill] sm:$0xff] %v12417_v9  ;;  %v12423_v3 = vadd.f32 %v11306_v48, %v14211_v39  ;;  %v2570_v48 = vpop.f32.mrf.mxu0 }
 0x36d   : > { %6403 = vst.msk [vmem:[%s11904_s19 + $0x190] sm:$0xff] %vm228_vm1, %v6243_v36  ;;  %14212 = vst [vmem:[#allocation3_spill] sm:$0xff] %v12411_v16  ;;  %8185 = vrcp.f32 %v4093_v11  ;;  %v4094_v14 = vadd.f32 1.0, %v8172_v40  ;;  %v7029_v9 = vmul.f32 -1.442695, %v12411_v16 }
 0x36e   : > { %14216 = vst [vmem:[#allocation11_spill] sm:$0xff] %v12423_v3 }
 0x36f   : > { %8187 = vrcp.f32 %v4094_v14 }
 0x370   : > { %v8174_v36 = vpop.eup %8173  ;;  %5681 = vadd.xlane.f32.xlu0 %v14215_v12  ;;  %8189 = vpow2.f32 %v6922_v50  ;;  %v6923_v12 = vmul.f32 -1.442695, %v12415_v31  ;;  %v14217_v50 = vld [vmem:[#allocation112_spill] sm:$0xff] }
 0x371   : > { %v5547_v27 = vpop.xlane.xlu1 %5546  ;;  %v5050_v60 = vmul.f32 %v8174_v36, %v12308_v5  ;;  %v8176_v40 = vpop.eup %8175  ;;  %8191 = vpow2.f32 %v7029_v9  ;;  %v12439_v14 = vadd.f32 %v2570_v48, %v14217_v50 }
 0x372   : > { %v5921_v24 = vadd.f32 %v5547_v27, %v5281_v10  ;;  %v6244_v32 = vld [vmem:[#allocation2 + $0x198] sm:$0xff]  ;;  %v5049_v10 = vmul.f32 %v8170_v42, %v12294_v2  ;;  %v12434_v2 = vpop.f32.mrf.mxu1  ;;  %v4095_v5 = vadd.f32 1.0, %v8176_v40  ;;  %v7030_v42 = vmul.f32 -1.442695, %v12423_v3  ;;  %v8178_v36 = vpop.eup %8177 }
 0x373   : > { %6404 = vst.msk [vmem:[%s11904_s19 + $0x198] sm:$0xff] %vm228_vm1, %v6244_v32  ;;  %8193 = vpow2.f32 %v6923_v12  ;;  %v6925_v48 = vmul.f32 -1.442695, %v12439_v14 }
 0x374   : > { %6082 = vst.msk [vmem:[#allocation2 + $0x1a0] sm:$0xff] %vm228_vm1, %v5921_v24  ;;  %v12432_v24 = vadd.f32 %v2566_v62, %v14213_v56  ;;  %v5599_v39 = vadd.f32 %v5050_v60, %v5049_v10  ;;  %v8180_v62 = vpop.eup %8179  ;;  %v2572_v10 = vpop.f32.mrf.mxu0  ;;  %8195 = vrcp.f32 %v4095_v5 }
 0x375   : > { %v5631_v27 = vpop.xlane.xlu1 %5630  ;;  %8197 = vpow2.f32 %v7030_v42 }
 0x376   : > { %v5949_v11 = vadd.f32 %v5631_v27, %v5309_v51  ;;  %5600 = vadd.xlane.f32.xlu1 %v5599_v39  ;;  %v6924_v32 = vmul.f32 -1.442695, %v12432_v24  ;;  %v5310_v27 = vld [vmem:[#allocation2 + $0x288] sm:$0xff]  ;;  %v4096_v39 = vadd.f32 1.0, %v8180_v62  ;;  %v2574_v62 = vpop.f32.mrf.mxu0 }
 0x378   : > { %6110 = vst.msk [vmem:[#allocation2 + $0x280] sm:$0xff] %vm228_vm1, %v5949_v11  ;;  %v8182_v40 = vpop.eup %8181  ;;  %v12442_v11 = vpop.f32.mrf.mxu1  ;;  %8199 = vrcp.f32 %v4096_v39 }
 0x379   : > { %v5550_v51 = vpop.xlane.xlu0 %5549  ;;  %v5052_v9 = vmul.f32 %v8182_v40, %v12337_v61  ;;  %8201 = vpow2.f32 %v6924_v32  ;;  %v8184_v16 = vpop.eup %8183  ;;  %v12461_v61 = vadd.f32 %v12074_v23, %v11086_v47  ;;  %v14219_v32 = vld [vmem:[#allocation104_spill] sm:$0xff] }
 0x37a   : > { %v5922_v56 = vadd.f32 %v5550_v51, %v5282_v30  ;;  %v5051_v30 = vmul.f32 %v8178_v36, %v12320_v20  ;;  %5684 = vadd.xlane.f32.xlu1 %v11073_v63  ;;  %v12452_v51 = vadd.f32 %v2572_v10, %v14217_v50  ;;  %v12454_v42 = vpop.f32.mrf.mxu1  ;;  %v5283_v20 = vld [vmem:[#allocation2 + $0x1b0] sm:$0xff]  ;;  %v8186_v63 = vpop.eup %8185  ;;  %v4097_v36 = vadd.f32 1.0, %v8184_v16 }
 0x37b   : > { %v6245_v60 = vld [vmem:[#allocation2 + $0x1a0] sm:$0xff]  ;;  %14218 = vst [vmem:[#allocation127_spill] sm:$0xff] %v12461_v61  ;;  %8203 = vpow2.f32 %v6925_v48  ;;  %v12465_v10 = vadd.f32 %v2574_v62, %v14219_v32  ;;  %v2576_v39 = vpop.f32.mrf.mxu0  ;;  %v5311_v16 = vld [vmem:[#allocation2 + $0x290] sm:$0xff]  ;;  %v7033_v48 = vmul.f32 -1.442695, %v12461_v61 }
 0x37c   : > { %6405 = vst.msk [vmem:[%s11904_s19 + $0x1a0] sm:$0xff] %vm228_vm1, %v6245_v60  ;;  %6083 = vst.msk [vmem:[#allocation2 + $0x1a8] sm:$0xff] %vm228_vm1, %v5922_v56  ;;  %v5602_v60 = vadd.f32 %v5052_v9, %v5051_v30  ;;  %v6926_v50 = vmul.f32 -1.442695, %v12452_v51  ;;  %v8188_v40 = vpop.eup %8187  ;;  %8205 = vrcp.f32 %v4097_v36 }
 0x37d   : > { %v5634_v12 = vpop.xlane.xlu0 %5633  ;;  %v5054_v23 = vmul.f32 %v8188_v40, %v12360_v55 }
 0x37e   : > { %v5950_v5 = vadd.f32 %v5634_v12, %v5310_v27  ;;  %5603 = vadd.xlane.f32.xlu0 %v5602_v60  ;;  %v8190_v12 = vpop.eup %8189  ;;  %8207 = vpow2.f32 %v6926_v50  ;;  %v6927_v60 = vmul.f32 -1.442695, %v12465_v10 }
 0x37f   : > { %v6273_v56 = vld [vmem:[#allocation2 + $0x280] sm:$0xff]  ;;  %v4098_v62 = vadd.f32 1.0, %v8190_v12  ;;  %v2580_v12 = vpop.f32.mrf.mxu0 }
 0x380   : > { %6433 = vst.msk [vmem:[%s11904_s19 + $0x280] sm:$0xff] %vm228_vm1, %v6273_v56  ;;  %6111 = vst.msk [vmem:[#allocation2 + $0x288] sm:$0xff] %vm228_vm1, %v5950_v5  ;;  %v12467_v5 = vpop.f32.mrf.mxu1  ;;  %v5053_v56 = vmul.f32 %v8186_v63, %v12345_v15  ;;  %v8192_v63 = vpop.eup %8191 }
 0x381   : > { %8209 = vrcp.f32 %v4098_v62  ;;  %v4205_v3 = vadd.f32 1.0, %v8192_v63 }
 0x382   : > { %v5553_v27 = vpop.xlane.xlu1 %5552  ;;  %5687 = vadd.xlane.f32.xlu0 %v11075_v45  ;;  %v5605_v15 = vadd.f32 %v5054_v23, %v5053_v56  ;;  %v12480_v36 = vpop.f32.mrf.mxu1  ;;  %v5284_v45 = vld [vmem:[#allocation2 + $0x1b8] sm:$0xff]  ;;  %8211 = vpow2.f32 %v7033_v48 }
 0x383   : > { %v6246_v30 = vld [vmem:[#allocation2 + $0x1a8] sm:$0xff]  ;;  %v5923_v9 = vadd.f32 %v5553_v27, %v5283_v20  ;;  %v12478_v20 = vadd.f32 %v2576_v39, %v14219_v32  ;;  %14220 = vst [vmem:[#allocation5_spill] sm:$0xff] %v12480_v36  ;;  %8213 = vpow2.f32 %v6927_v60  ;;  %v12496_v36 = vadd.f32 %v12087_v8, %v11086_v47  ;;  %v5285_v47 = vld [vmem:[#allocation2 + $0x1c0] sm:$0xff] }
 0x384   : > { %6406 = vst.msk [vmem:[%s11904_s19 + $0x1a8] sm:$0xff] %vm228_vm1, %v6246_v30  ;;  %v8194_v30 = vpop.eup %8193  ;;  %5606 = vadd.xlane.f32.xlu1 %v5605_v15  ;;  %v12489_v61 = vpop.f32.mrf.mxu1 }
 0x385   : > { %6084 = vst.msk [vmem:[#allocation2 + $0x1b0] sm:$0xff] %vm228_vm1, %v5923_v9  ;;  %v8196_v50 = vpop.eup %8195  ;;  %v4099_v9 = vadd.f32 1.0, %v8194_v30  ;;  %v6928_v39 = vmul.f32 -1.442695, %v12478_v20  ;;  %v2582_v30 = vpop.f32.mrf.mxu0 }
 0x386   : > { %v5637_v55 = vpop.xlane.xlu1 %5636  ;;  %v8198_v32 = vpop.eup %8197 }
 0x387   : > { %v6274_v27 = vld [vmem:[#allocation2 + $0x288] sm:$0xff]  ;;  %v5951_v40 = vadd.f32 %v5637_v55, %v5311_v16  ;;  %v8200_v23 = vpop.eup %8199  ;;  %8215 = vrcp.f32 %v4099_v9  ;;  %v12507_v9 = vadd.f32 %v12100_v0, %v11161_v21 }
 0x388   : > { %6434 = vst.msk [vmem:[%s11904_s19 + $0x288] sm:$0xff] %vm228_vm1, %v6274_v27  ;;  %v14221_v16 = vld [vmem:[#allocation120_spill] sm:$0xff]  ;;  %v8202_v15 = vpop.eup %8201  ;;  %v5055_v27 = vmul.f32 %v8196_v50, %v12371_v59  ;;  %v5056_v48 = vmul.f32 %v8200_v23, %v12385_v17  ;;  %5690 = vadd.xlane.f32.xlu1 %v11107_v28  ;;  %8217 = vpow2.f32 %v6928_v39  ;;  %v2584_v39 = vpop.f32.mrf.mxu0 }
 0x389   : > { %6112 = vst.msk [vmem:[#allocation2 + $0x290] sm:$0xff] %vm228_vm1, %v5951_v40  ;;  %v12487_v62 = vadd.f32 %v2580_v12, %v14221_v16  ;;  %v5312_v40 = vld [vmem:[#allocation2 + $0x298] sm:$0xff]  ;;  %v4100_v12 = vadd.f32 1.0, %v8202_v15  ;;  %v8204_v50 = vpop.eup %8203  ;;  %v12503_v63 = vadd.f32 %v2582_v30, %v14221_v16  ;;  %v12514_v15 = vadd.f32 %v12117_v37, %v11161_v21  ;;  %v5313_v37 = vld [vmem:[#allocation2 + $0x2a0] sm:$0xff] }
 0x38a   : > { %v5556_v56 = vpop.xlane.xlu0 %5555  ;;  %v5608_v59 = vadd.f32 %v5056_v48, %v5055_v27  ;;  %v8206_v0 = vpop.eup %8205  ;;  %v12521_v27 = vadd.f32 %v12126_v43, %v11134_v46  ;;  %v14223_v43 = vld [vmem:[#allocation99_spill] sm:$0xff] }
 0x38b   : > { %v5924_v55 = vadd.f32 %v5556_v56, %v5284_v45  ;;  %v4206_v45 = vadd.f32 1.0, %v8198_v32  ;;  %8219 = vrcp.f32 %v4100_v12  ;;  %v6929_v28 = vmul.f32 -1.442695, %v12487_v62  ;;  %v12509_v56 = vpop.f32.mrf.mxu1  ;;  %v8208_v30 = vpop.eup %8207 }
 0x38c   : > { %v6247_v60 = vld [vmem:[#allocation2 + $0x1b0] sm:$0xff]  ;;  %v4101_v32 = vadd.f32 1.0, %v8204_v50  ;;  %5609 = vadd.xlane.f32.xlu0 %v5608_v59  ;;  %8221 = vrcp.f32 %v4205_v3  ;;  %v6930_v3 = vmul.f32 -1.442695, %v12503_v63  ;;  %v7035_v12 = vmul.f32 -1.442695, %v12507_v9 }
 0x38d   : > { %6407 = vst.msk [vmem:[%s11904_s19 + $0x1b0] sm:$0xff] %vm228_vm1, %v6247_v60  ;;  %6085 = vst.msk [vmem:[#allocation2 + $0x1b8] sm:$0xff] %vm228_vm1, %v5924_v55  ;;  %v7034_v55 = vmul.f32 -1.442695, %v12496_v36  ;;  %8223 = vrcp.f32 %v4206_v45  ;;  %v14222_v60 = vld [vmem:[#allocation109_spill] sm:$0xff]  ;;  %v12528_v59 = vpop.f32.mrf.mxu1  ;;  %v4102_v45 = vadd.f32 1.0, %v8208_v30 }
 0x38e   : > { %v5640_v17 = vpop.xlane.xlu0 %5639  ;;  %8225 = vpow2.f32 %v6929_v28  ;;  %v12525_v21 = vadd.f32 %v2584_v39, %v14222_v60  ;;  %v7036_v28 = vmul.f32 -1.442695, %v12514_v15 }
 0x38f   : > { %v5952_v8 = vadd.f32 %v5640_v17, %v5312_v40  ;;  %v8210_v40 = vpop.eup %8209  ;;  %8227 = vrcp.f32 %v4101_v32  ;;  %v2586_v17 = vpop.f32.mrf.mxu0  ;;  %v7037_v32 = vmul.f32 -1.442695, %v12521_v27 }
 0x390   : > { %v6275_v23 = vld [vmem:[#allocation2 + $0x290] sm:$0xff]  ;;  %5693 = vadd.xlane.f32.xlu0 %v14223_v43  ;;  %8229 = vpow2.f32 %v7034_v55  ;;  %v12540_v55 = vadd.f32 %v2586_v17, %v14222_v60 }
 0x391   : > { %6435 = vst.msk [vmem:[%s11904_s19 + $0x290] sm:$0xff] %vm228_vm1, %v6275_v23  ;;  %v5559_v16 = vpop.xlane.xlu1 %5558  ;;  %6113 = vst.msk [vmem:[#allocation2 + $0x298] sm:$0xff] %vm228_vm1, %v5952_v8  ;;  %v5058_v8 = vmul.f32 %v8210_v40, %v12405_v6  ;;  %v8212_v23 = vpop.eup %8211  ;;  %8231 = vrcp.f32 %v4102_v45  ;;  %v12544_v6 = vadd.f32 %v12139_v18, %v11134_v46 }
 0x392   : > { %v5925_v48 = vadd.f32 %v5559_v16, %v5285_v47  ;;  %v5057_v47 = vmul.f32 %v8206_v0, %v12393_v57  ;;  %v8214_v30 = vpop.eup %8213  ;;  %8233 = vpow2.f32 %v6930_v3  ;;  %v5286_v57 = vld [vmem:[#allocation2 + $0x1c8] sm:$0xff]  ;;  %v12546_v0 = vpop.f32.mrf.mxu1  ;;  %v14224_v3 = vld [vmem:[#allocation34_spill] sm:$0xff] }
 0x393   : > { %8235 = vpow2.f32 %v7035_v12  ;;  %v4103_v40 = vadd.f32 1.0, %v8214_v30  ;;  %v12557_v46 = vadd.f32 %v12174_v52, %v14224_v3 }
 0x394   : > { %v6248_v50 = vld [vmem:[#allocation2 + $0x1b8] sm:$0xff]  ;;  %6086 = vst.msk [vmem:[#allocation2 + $0x1c0] sm:$0xff] %vm228_vm1, %v5925_v48  ;;  %v6931_v48 = vmul.f32 -1.442695, %v12525_v21  ;;  %v5611_v43 = vadd.f32 %v5058_v8, %v5057_v47  ;;  %8237 = vpow2.f32 %v7036_v28  ;;  %v8216_v12 = vpop.eup %8215  ;;  %v12569_v52 = vpop.f32.mrf.mxu1 }
 0x395   : > { %6408 = vst.msk [vmem:[%s11904_s19 + $0x1b8] sm:$0xff] %vm228_vm1, %v6248_v50  ;;  %v5643_v39 = vpop.xlane.xlu1 %5642  ;;  %v12551_v50 = vadd.f32 %v12159_v35, %v14224_v3  ;;  %8239 = vpow2.f32 %v7037_v32  ;;  %v8218_v17 = vpop.eup %8217  ;;  %v14225_v47 = vld [vmem:[#allocation74_spill] sm:$0xff]  ;;  %v6932_v35 = vmul.f32 -1.442695, %v12540_v55 }
 0x396   : > { %v5953_v16 = vadd.f32 %v5643_v39, %v5313_v37  ;;  %v4209_v37 = vadd.f32 1.0, %v8212_v23  ;;  %5612 = vadd.xlane.f32.xlu1 %v5611_v43  ;;  %v12561_v28 = vadd.f32 %v12188_v22, %v14225_v47  ;;  %8241 = vpow2.f32 %v6931_v48  ;;  %v5314_v39 = vld [vmem:[#allocation2 + $0x2a8] sm:$0xff]  ;;  %v14227_v3 = vld [vmem:[#allocation26_spill] sm:$0xff] }
 0x397   : > { %v12567_v32 = vadd.f32 %v12204_v54, %v14225_v47  ;;  %8243 = vrcp.f32 %v4103_v40  ;;  %v4104_v30 = vadd.f32 1.0, %v8218_v17  ;;  %v7039_v22 = vmul.f32 -1.442695, %v12551_v50 }
 0x398   : > { %v6276_v45 = vld [vmem:[#allocation2 + $0x298] sm:$0xff]  ;;  %6114 = vst.msk [vmem:[#allocation2 + $0x2a0] sm:$0xff] %vm228_vm1, %v5953_v16  ;;  %v8220_v23 = vpop.eup %8219  ;;  %v7038_v16 = vmul.f32 -1.442695, %v12544_v6  ;;  %8245 = vrcp.f32 %v4209_v37  ;;  %v5059_v48 = vmul.f32 %v8216_v12, %v12415_v31  ;;  %v7040_v40 = vmul.f32 -1.442695, %v12557_v46 }
 0x399   : > { %6436 = vst.msk [vmem:[%s11904_s19 + $0x298] sm:$0xff] %vm228_vm1, %v6276_v45  ;;  %v5562_v60 = vpop.xlane.xlu0 %5561  ;;  %v5060_v43 = vmul.f32 %v8220_v23, %v12432_v24  ;;  %v12578_v54 = vpop.eup %8221  ;;  %8247 = vrcp.f32 %v4104_v30  ;;  %v7041_v31 = vmul.f32 -1.442695, %v12561_v28  ;;  %v12590_v24 = vadd.f32 %v12232_v58, %v14227_v3  ;;  %v14229_v30 = vld [vmem:[#allocation76_spill] sm:$0xff] }
 0x39a   : > { %v5926_v18 = vadd.f32 %v5562_v60, %v5286_v57  ;;  %v14226_v57 = vld [vmem:[#allocation19_spill] sm:$0xff]  ;;  %v12583_v60 = vadd.f32 %v12216_v25, %v14227_v3  ;;  %8249 = vpow2.f32 %v6932_v35  ;;  %v12593_v23 = vpop.f32.mrf.mxu1  ;;  %v5287_v25 = vld [vmem:[#allocation2 + $0x1d0] sm:$0xff]  ;;  %v12600_v58 = vadd.f32 %v12244_v44, %v14229_v30 }
 0x39b   : > { %v6249_v8 = vld [vmem:[#allocation2 + $0x1c0] sm:$0xff]  ;;  %5696 = vadd.xlane.f32.xlu1 %v14226_v57  ;;  %14228 = vst [vmem:[#allocation130_spill] sm:$0xff] %v12590_v24  ;;  %v5614_v12 = vadd.f32 %v5060_v43, %v5059_v48  ;;  %8251 = vpow2.f32 %v7038_v16  ;;  %v12605_v43 = vadd.f32 %v12258_v7, %v14229_v30  ;;  %v12610_v44 = vadd.f32 %v12271_v4, %v11280_v33 }
 0x39c   : > { %6409 = vst.msk [vmem:[%s11904_s19 + $0x1c0] sm:$0xff] %vm228_vm1, %v6249_v8  ;;  %6087 = vst.msk [vmem:[#allocation2 + $0x1c8] sm:$0xff] %vm228_vm1, %v5926_v18  ;;  %v12585_v18 = vpop.eup %8223  ;;  %v7042_v8 = vmul.f32 -1.442695, %v12567_v32  ;;  %8253 = vpow2.f32 %v7039_v22  ;;  %v7043_v16 = vmul.f32 -1.442695, %v12583_v60 }
 0x39d   : > { %v5646_v45 = vpop.xlane.xlu0 %5645  ;;  %v8226_v47 = vpop.eup %8225  ;;  %14230 = vst [vmem:[#allocation155_spill] sm:$0xff] %v12600_v58  ;;  %5615 = vadd.xlane.f32.xlu0 %v5614_v12  ;;  %8255 = vpow2.f32 %v7040_v40  ;;  %v7044_v22 = vmul.f32 -1.442695, %v12590_v24  ;;  %14231 = vst [vmem:[#allocation165_spill] sm:$0xff] %v12610_v44  ;;  %v12614_v40 = vadd.f32 %v12287_v29, %v11280_v33  ;;  %v7045_v4 = vmul.f32 -1.442695, %v12600_v58 }
 0x39e   : > { %v5954_v37 = vadd.f32 %v5646_v45, %v5314_v39  ;;  %v8228_v39 = vpop.eup %8227  ;;  %v4105_v35 = vadd.f32 1.0, %v8226_v47  ;;  %8257 = vpow2.f32 %v7041_v31  ;;  %v5315_v47 = vld [vmem:[#allocation2 + $0x2b0] sm:$0xff]  ;;  %v7046_v29 = vmul.f32 -1.442695, %v12605_v43 }
 0x39f   : > { %v6277_v17 = vld [vmem:[#allocation2 + $0x2a0] sm:$0xff]  ;;  %v8230_v48 = vpop.eup %8229  ;;  %8259 = vpow2.f32 %v7042_v8  ;;  %14232 = vst [vmem:[#allocation128_spill] sm:$0xff] %v12614_v40  ;;  %v5061_v7 = vmul.f32 %v8228_v39, %v12439_v14  ;;  %v14234_v14 = vld [vmem:[#allocation88_spill] sm:$0xff] }
 0x3a0   : > { %6437 = vst.msk [vmem:[%s11904_s19 + $0x2a0] sm:$0xff] %vm228_vm1, %v6277_v17  ;;  %6115 = vst.msk [vmem:[#allocation2 + $0x2a8] sm:$0xff] %vm228_vm1, %v5954_v37  ;;  %v8232_v45 = vpop.eup %8231  ;;  %v12616_v17 = vpop.f32.mrf.mxu1  ;;  %8261 = vrcp.f32 %v4105_v35 }
 0x3a1   : > { %v8234_v12 = vpop.eup %8233  ;;  %v5062_v31 = vmul.f32 %v8232_v45, %v12452_v51  ;;  %8263 = vpow2.f32 %v7043_v16  ;;  %v12628_v51 = vadd.f32 %v12299_v38, %v14234_v14  ;;  %v5288_v16 = vld [vmem:[#allocation2 + $0x1d8] sm:$0xff] }
 0x3a2   : > { %v5565_v57 = vpop.xlane.xlu1 %5564  ;;  %v8236_v30 = vpop.eup %8235 }
 0x3a3   : > { %v6250_v3 = vld [vmem:[#allocation2 + $0x1c8] sm:$0xff]  ;;  %v5927_v37 = vadd.f32 %v5565_v57, %v5287_v25  ;;  %v4106_v25 = vadd.f32 1.0, %v8234_v12  ;;  %v14233_v57 = vld [vmem:[#allocation29_spill] sm:$0xff]  ;;  %v8238_v33 = vpop.eup %8237  ;;  %14235 = vst [vmem:[#allocation13_spill] sm:$0xff] %v12628_v51  ;;  %v5617_v8 = vadd.f32 %v5062_v31, %v5061_v7  ;;  %v12632_v58 = vpop.f32.mrf.mxu1  ;;  %v12638_v7 = vadd.f32 %v12313_v19, %v14234_v14 }
 0x3a4   : > { %6410 = vst.msk [vmem:[%s11904_s19 + $0x1c8] sm:$0xff] %vm228_vm1, %v6250_v3  ;;  %5699 = vadd.xlane.f32.xlu0 %v14233_v57  ;;  %v8240_v45 = vpop.eup %8239  ;;  %v7047_v3 = vmul.f32 -1.442695, %v12610_v44  ;;  %v4210_v19 = vadd.f32 1.0, %v8230_v48  ;;  %v5316_v44 = vld [vmem:[#allocation2 + $0x2b8] sm:$0xff] }
 0x3a5   : > { %6088 = vst.msk [vmem:[#allocation2 + $0x1d0] sm:$0xff] %vm228_vm1, %v5927_v37  ;;  %8265 = vrcp.f32 %v4106_v25  ;;  %v8242_v57 = vpop.eup %8241  ;;  %v7048_v37 = vmul.f32 -1.442695, %v12614_v40  ;;  %5618 = vadd.xlane.f32.xlu1 %v5617_v8  ;;  %v14236_v8 = vld [vmem:[#allocation95_spill] sm:$0xff]  ;;  %v12648_v14 = vpop.f32.mrf.mxu1  ;;  %v7050_v24 = vmul.f32 -1.442695, %v12638_v7 }
 0x3a6   : > { %v5649_v39 = vpop.xlane.xlu1 %5648  ;;  %8267 = vpow2.f32 %v7044_v22  ;;  %v8244_v38 = vpop.eup %8243  ;;  %v4107_v31 = vadd.f32 1.0, %v8242_v57  ;;  %v7049_v22 = vmul.f32 -1.442695, %v12628_v51  ;;  %v14238_v57 = vld [vmem:[#allocation79_spill] sm:$0xff] }
 0x3a7   : > { %v6278_v35 = vld [vmem:[#allocation2 + $0x2a8] sm:$0xff]  ;;  %v5955_v12 = vadd.f32 %v5649_v39, %v5315_v47  ;;  %8269 = vpow2.f32 %v7045_v4  ;;  %v12641_v47 = vpop.eup %8245 }
 0x3a8   : > { %6438 = vst.msk [vmem:[%s11904_s19 + $0x2a8] sm:$0xff] %vm228_vm1, %v6278_v35  ;;  %8271 = vpow2.f32 %v7046_v29  ;;  %v8248_v39 = vpop.eup %8247  ;;  %v12646_v35 = vadd.f32 %v12325_v1, %v14236_v8 }
 0x3a9   : > { %6116 = vst.msk [vmem:[#allocation2 + $0x2b0] sm:$0xff] %vm228_vm1, %v5955_v12  ;;  %8273 = vpow2.f32 %v7047_v3  ;;  %v8250_v40 = vpop.eup %8249  ;;  %v5063_v12 = vmul.f32 %v8244_v38, %v12465_v10  ;;  %v5064_v29 = vmul.f32 %v8248_v39, %v12478_v20  ;;  %5702 = vadd.xlane.f32.xlu1 %v14238_v57 }
 0x3aa   : > { %v5568_v25 = vpop.xlane.xlu0 %5567  ;;  %14237 = vst [vmem:[#allocation18_spill] sm:$0xff] %v12646_v35  ;;  %8275 = vpow2.f32 %v7048_v37  ;;  %v8252_v3 = vpop.eup %8251  ;;  %v4108_v1 = vadd.f32 1.0, %v8250_v40  ;;  %v4211_v37 = vadd.f32 1.0, %v8236_v30  ;;  %v7051_v38 = vmul.f32 -1.442695, %v12646_v35 }
 0x3ab   : > { %v5928_v4 = vadd.f32 %v5568_v25, %v5288_v16  ;;  %8277 = vrcp.f32 %v4107_v31  ;;  %v8254_v48 = vpop.eup %8253  ;;  %v5620_v16 = vadd.f32 %v5064_v29, %v5063_v12  ;;  %v5289_v25 = vld [vmem:[#allocation2 + $0x1e0] sm:$0xff]  ;;  %v4212_v31 = vadd.f32 1.0, %v8238_v33 }
 0x3ac   : > { %v6251_v51 = vld [vmem:[#allocation2 + $0x1d0] sm:$0xff]  ;;  %8279 = vpow2.f32 %v7049_v22  ;;  %v8256_v20 = vpop.eup %8255  ;;  %v12660_v40 = vadd.f32 %v12342_v26, %v14236_v8  ;;  %v4215_v26 = vadd.f32 1.0, %v8254_v48  ;;  %v5317_v8 = vld [vmem:[#allocation2 + $0x2c0] sm:$0xff] }
 0x3ad   : > { %6411 = vst.msk [vmem:[%s11904_s19 + $0x1d0] sm:$0xff] %vm228_vm1, %v6251_v51  ;;  %6089 = vst.msk [vmem:[#allocation2 + $0x1d8] sm:$0xff] %vm228_vm1, %v5928_v4  ;;  %8281 = vrcp.f32 %v4108_v1  ;;  %v8258_v57 = vpop.eup %8257  ;;  %v12662_v51 = vpop.f32.mrf.mxu1  ;;  %5621 = vadd.xlane.f32.xlu0 %v5620_v16  ;;  %v4213_v4 = vadd.f32 1.0, %v8240_v45 }
 0x3ae   : > { %v5652_v10 = vpop.xlane.xlu0 %5651  ;;  %8283 = vrcp.f32 %v4210_v19  ;;  %14239 = vst [vmem:[#allocation158_spill] sm:$0xff] %v12660_v40  ;;  %v8260_v22 = vpop.eup %8259  ;;  %v4214_v19 = vadd.f32 1.0, %v8252_v3  ;;  %v7052_v16 = vmul.f32 -1.442695, %v12660_v40  ;;  %v4216_v3 = vadd.f32 1.0, %v8256_v20 }
 0x3af   : > { %v5956_v39 = vadd.f32 %v5652_v10, %v5316_v44  ;;  %8285 = vpow2.f32 %v7050_v24  ;;  %v8262_v44 = vpop.eup %8261  ;;  %v12668_v45 = vpop.f32.mrf.mxu1  ;;  %v14240_v24 = vld [vmem:[#allocation157_spill] sm:$0xff] }
 0x3b0   : > { %v6279_v30 = vld [vmem:[#allocation2 + $0x2b0] sm:$0xff]  ;;  %8287 = vrcp.f32 %v4211_v37  ;;  %v8264_v29 = vpop.eup %8263  ;;  %v5065_v37 = vmul.f32 %v8262_v44, %v12487_v62 }
 0x3b1   : > { %6439 = vst.msk [vmem:[%s11904_s19 + $0x2b0] sm:$0xff] %vm228_vm1, %v6279_v30  ;;  %v5571_v12 = vpop.xlane.xlu1 %5570  ;;  %6117 = vst.msk [vmem:[#allocation2 + $0x2b8] sm:$0xff] %vm228_vm1, %v5956_v39  ;;  %8289 = vpow2.f32 %v7051_v38  ;;  %5705 = vadd.xlane.f32.xlu0 %v14240_v24  ;;  %v4218_v24 = vadd.f32 1.0, %v8260_v22  ;;  %v12676_v20 = vpop.f32.mrf.mxu1 }
 0x3b2   : > { %v5929_v33 = vadd.f32 %v5571_v12, %v5289_v25  ;;  %v8266_v1 = vpop.eup %8265  ;;  %8291 = vrcp.f32 %v4212_v31  ;;  %v4217_v31 = vadd.f32 1.0, %v8258_v57 }
 0x3b3   : > { %v8268_v39 = vpop.eup %8267  ;;  %8293 = vrcp.f32 %v4213_v4  ;;  %v5066_v48 = vmul.f32 %v8266_v1, %v12503_v63  ;;  %v4219_v4 = vadd.f32 1.0, %v8264_v29 }
 0x3b4   : > { %v6252_v10 = vld [vmem:[#allocation2 + $0x1d8] sm:$0xff]  ;;  %6090 = vst.msk [vmem:[#allocation2 + $0x1e0] sm:$0xff] %vm228_vm1, %v5929_v33  ;;  %v8270_v25 = vpop.eup %8269  ;;  %8295 = vrcp.f32 %v4214_v19  ;;  %v5290_v33 = vld [vmem:[#allocation2 + $0x1e8] sm:$0xff]  ;;  %v4220_v44 = vadd.f32 1.0, %v8268_v39 }
 0x3b5   : > { %6412 = vst.msk [vmem:[%s11904_s19 + $0x1d8] sm:$0xff] %vm228_vm1, %v6252_v10  ;;  %v5655_v38 = vpop.xlane.xlu1 %5654  ;;  %v8272_v12 = vpop.eup %8271  ;;  %8297 = vrcp.f32 %v4215_v26  ;;  %v5623_v35 = vadd.f32 %v5066_v48, %v5065_v37  ;;  %v4221_v22 = vadd.f32 1.0, %v8270_v25  ;;  %v14241_v26 = vld [vmem:[#allocation101_spill] sm:$0xff]  ;;  %v5318_v37 = vld [vmem:[#allocation2 + $0x2c8] sm:$0xff] }
 0x3b6   : > { %v5957_v30 = vadd.f32 %v5655_v38, %v5317_v8  ;;  %v8274_v40 = vpop.eup %8273  ;;  %8299 = vpow2.f32 %v7052_v16  ;;  %v12683_v29 = vadd.f32 %v12354_v49, %v14241_v26  ;;  %v4222_v16 = vadd.f32 1.0, %v8272_v12  ;;  %v12689_v48 = vpop.f32.mrf.mxu1 }
 0x3b7   : > { %v8276_v63 = vpop.eup %8275  ;;  %8301 = vrcp.f32 %v4216_v3  ;;  %5624 = vadd.xlane.f32.xlu1 %v5623_v35  ;;  %v4223_v35 = vadd.f32 1.0, %v8274_v40  ;;  %v12687_v39 = vadd.f32 %v12367_v34, %v14241_v26 }
 0x3b8   : > { %v6280_v62 = vld [vmem:[#allocation2 + $0x2b8] sm:$0xff]  ;;  %6118 = vst.msk [vmem:[#allocation2 + $0x2c0] sm:$0xff] %vm228_vm1, %v5957_v30  ;;  %v5574_v57 = vpop.xlane.xlu0 %5573  ;;  %v8278_v19 = vpop.eup %8277  ;;  %8303 = vrcp.f32 %v4217_v31  ;;  %14242 = vst [vmem:[#allocation17_spill] sm:$0xff] %v12683_v29  ;;  %v4224_v38 = vadd.f32 1.0, %v8276_v63  ;;  %v7053_v12 = vmul.f32 -1.442695, %v12683_v29 }
 0x3b9   : > { %6440 = vst.msk [vmem:[%s11904_s19 + $0x2b8] sm:$0xff] %vm228_vm1, %v6280_v62  ;;  %v5930_v8 = vadd.f32 %v5574_v57, %v5290_v33  ;;  %v8280_v1 = vpop.eup %8279  ;;  %8305 = vrcp.f32 %v4218_v24  ;;  %14243 = vst [vmem:[#allocation9_spill] sm:$0xff] %v12687_v39  ;;  %v5067_v25 = vmul.f32 %v8278_v19, %v12525_v21  ;;  %v14244_v30 = vld [vmem:[#allocation22_spill] sm:$0xff]  ;;  %v7054_v57 = vmul.f32 -1.442695, %v12687_v39  ;;  %v14283_v39 = vld [vmem:[#allocation97_spill] sm:$0xff] }
 0x3ba   : > { %v8282_v3 = vpop.eup %8281  ;;  %8307 = vrcp.f32 %v4219_v4  ;;  %v14245_v24 = vld [vmem:[#allocation142_spill] sm:$0xff]  ;;  %v4225_v63 = vadd.f32 1.0, %v8280_v1 }
 0x3bb   : > { %v6253_v10 = vld [vmem:[#allocation2 + $0x1e0] sm:$0xff]  ;;  %6091 = vst.msk [vmem:[#allocation2 + $0x1e8] sm:$0xff] %vm228_vm1, %v5930_v8  ;;  %v12694_v49 = vpop.eup %8283  ;;  %8309 = vrcp.f32 %v4220_v44  ;;  %v5068_v31 = vmul.f32 %v8282_v3, %v12540_v55  ;;  %5708 = vadd.xlane.f32.xlu1 %v14244_v30  ;;  %v12702_v33 = vadd.f32 %v12377_v41, %v14245_v24  ;;  %v12709_v19 = vadd.f32 %v12389_v13, %v14245_v24  ;;  %v5291_v41 = vld [vmem:[#allocation2 + $0x1f0] sm:$0xff]  ;;  %v14248_v1 = vld [vmem:[#allocation110_spill] sm:$0xff] }
 0x3bc   : > { %6413 = vst.msk [vmem:[%s11904_s19 + $0x1e0] sm:$0xff] %vm228_vm1, %v6253_v10  ;;  %v5658_v40 = vpop.xlane.xlu0 %5657  ;;  %v8286_v34 = vpop.eup %8285  ;;  %8311 = vrcp.f32 %v4221_v22  ;;  %v14250_v10 = vld [vmem:[#allocation163_spill] sm:$0xff]  ;;  %v14251_v3 = vld [vmem:[#allocation150_spill] sm:$0xff]  ;;  %v14254_v30 = vld [vmem:[#allocation124_spill] sm:$0xff] }
 0x3bd   : > { %14246 = vst [vmem:[#allocation24_spill] sm:$0xff] %v12702_v33  ;;  %v5958_v4 = vadd.f32 %v5658_v40, %v5318_v37  ;;  %v12704_v62 = vpop.eup %8287  ;;  %8313 = vrcp.f32 %v4222_v16  ;;  %v5626_v21 = vadd.f32 %v5068_v31, %v5067_v25  ;;  %14247 = vst [vmem:[#allocation159_spill] sm:$0xff] %v12709_v19  ;;  %v12711_v22 = vpop.f32.mrf.mxu1  ;;  %v4226_v8 = vadd.f32 1.0, %v8286_v34 }
 0x3be   : > { %v8290_v55 = vpop.eup %8289  ;;  %8315 = vrcp.f32 %v4223_v35  ;;  %v12720_v16 = vadd.f32 %v12395_v53, %v14248_v1  ;;  %v7055_v37 = vmul.f32 -1.442695, %v12702_v33  ;;  %v12728_v35 = vadd.f32 %v14251_v3, %v14248_v1  ;;  %v14253_v53 = vld [vmem:[#allocation118_spill] sm:$0xff] }
 0x3bf   : > { %v6281_v44 = vld [vmem:[#allocation2 + $0x2c0] sm:$0xff]  ;;  %6119 = vst.msk [vmem:[#allocation2 + $0x2c8] sm:$0xff] %vm228_vm1, %v5958_v4  ;;  %v12716_v26 = vpop.eup %8291  ;;  %8317 = vrcp.f32 %v4224_v38  ;;  %5627 = vadd.xlane.f32.xlu0 %v5626_v21  ;;  %5714 = vadd.xlane.f32.xlu1 %v14250_v10  ;;  %v4227_v31 = vadd.f32 1.0, %v8290_v55  ;;  %v12734_v40 = vadd.f32 %v14254_v30, %v14253_v53  ;;  %v12739_v21 = vpop.f32.mrf.mxu1  ;;  %v12746_v55 = vadd.f32 %v12434_v2, %v14253_v53  ;;  %v14257_v10 = vld [vmem:[#allocation77_spill] sm:$0xff]  ;;  %v14262_v33 = vld [vmem:[#allocation154_spill] sm:$0xff] }
 0x3c0   : > { %6441 = vst.msk [vmem:[%s11904_s19 + $0x2c0] sm:$0xff] %vm228_vm1, %v6281_v44  ;;  %14249 = vst [vmem:[#allocation162_spill] sm:$0xff] %v12720_v16  ;;  %v12723_v13 = vpop.eup %8293  ;;  %8319 = vpow2.f32 %v7053_v12  ;;  %v7056_v12 = vmul.f32 -1.442695, %v12709_v19  ;;  %v5319_v44 = vld [vmem:[#allocation2 + $0x2d0] sm:$0xff] }
 0x3c1   : > { %14252 = vst [vmem:[#allocation44_spill] sm:$0xff] %v12728_v35  ;;  %v12730_v38 = vpop.eup %8295  ;;  %8321 = vrcp.f32 %v4225_v63  ;;  %14255 = vst [vmem:[#allocation137_spill] sm:$0xff] %v12734_v40  ;;  %v7057_v63 = vmul.f32 -1.442695, %v12720_v16  ;;  %v7058_v3 = vmul.f32 -1.442695, %v12728_v35  ;;  %v12771_v16 = vpop.f32.mrf.mxu1 }
 0x3c2   : > { %v5577_v25 = vpop.xlane.xlu1 %5576  ;;  %v6254_v34 = vld [vmem:[#allocation2 + $0x1e8] sm:$0xff]  ;;  %v12736_v4 = vpop.eup %8297  ;;  %8323 = vpow2.f32 %v7054_v57  ;;  %14256 = vst [vmem:[#allocation160_spill] sm:$0xff] %v12746_v55  ;;  %v7059_v2 = vmul.f32 -1.442695, %v12734_v40  ;;  %v5320_v35 = vld [vmem:[#allocation2 + $0x2d8] sm:$0xff] }
 0x3c3   : > { %v5931_v24 = vadd.f32 %v5577_v25, %v5291_v41  ;;  %6414 = vst.msk [vmem:[%s11904_s19 + $0x1e8] sm:$0xff] %vm228_vm1, %v6254_v34  ;;  %v8300_v1 = vpop.eup %8299  ;;  %8325 = vrcp.f32 %v4226_v8  ;;  %5711 = vadd.xlane.f32.xlu0 %v14257_v10  ;;  %v14258_v41 = vld [vmem:[#allocation82_spill] sm:$0xff]  ;;  %v14259_v25 = vld [vmem:[#allocation152_spill] sm:$0xff] }
 0x3c4   : > { %5720 = vadd.xlane.f32.xlu1 %v14258_v41  ;;  %v12751_v57 = vpop.eup %8301  ;;  %8327 = vpow2.f32 %v7055_v37  ;;  %v12756_v8 = vadd.f32 %v12442_v11, %v14259_v25  ;;  %v12763_v53 = vadd.f32 %v12454_v42, %v14259_v25  ;;  %v4228_v37 = vadd.f32 1.0, %v8300_v1  ;;  %v14266_v1 = vld [vmem:[#allocation164_spill] sm:$0xff] }
 0x3c5   : > { %6092 = vst.msk [vmem:[#allocation2 + $0x1f0] sm:$0xff] %vm228_vm1, %v5931_v24  ;;  %v12758_v34 = vpop.eup %8303  ;;  %8329 = vrcp.f32 %v4227_v31  ;;  %v12769_v11 = vadd.f32 %v12467_v5, %v14262_v33  ;;  %v5292_v31 = vld [vmem:[#allocation2 + $0x1f8] sm:$0xff]  ;;  %v7060_v42 = vmul.f32 -1.442695, %v12746_v55 }
 0x3c6   : > { %14260 = vst [vmem:[#allocation141_spill] sm:$0xff] %v12756_v8  ;;  %v5661_v30 = vpop.xlane.xlu1 %5660  ;;  %14261 = vst [vmem:[#allocation83_spill] sm:$0xff] %v12763_v53  ;;  %v6282_v24 = vld [vmem:[#allocation2 + $0x2c8] sm:$0xff]  ;;  %v12765_v41 = vpop.eup %8305  ;;  %8331 = vpow2.f32 %v7056_v12  ;;  %v14267_v12 = vld [vmem:[#allocation7_spill] sm:$0xff] }
 0x3c7   : > { %v5959_v10 = vadd.f32 %v5661_v30, %v5319_v44  ;;  %14263 = vst [vmem:[#allocation86_spill] sm:$0xff] %v12769_v11  ;;  %6442 = vst.msk [vmem:[%s11904_s19 + $0x2c8] sm:$0xff] %vm228_vm1, %v6282_v24  ;;  %v12775_v40 = vpop.eup %8307  ;;  %8333 = vpow2.f32 %v7057_v63  ;;  %v14264_v44 = vld [vmem:[#allocation5_spill] sm:$0xff]  ;;  %5717 = vadd.xlane.f32.xlu0 %v14266_v1  ;;  %v7061_v30 = vmul.f32 -1.442695, %v12756_v8  ;;  %v14268_v24 = vld [vmem:[#allocation148_spill] sm:$0xff]  ;;  %v12806_v8 = vpop.f32.mrf.mxu1 }
 0x3c8   : > { %v12780_v25 = vadd.f32 %v14264_v44, %v14262_v33  ;;  %5726 = vadd.xlane.f32.xlu1 %v14267_v12  ;;  %v12785_v5 = vpop.eup %8309  ;;  %8335 = vpow2.f32 %v7058_v3  ;;  %v12790_v63 = vadd.f32 %v12489_v61, %v14268_v24  ;;  %v7062_v33 = vmul.f32 -1.442695, %v12763_v53  ;;  %v14271_v12 = vld [vmem:[#allocation117_spill] sm:$0xff] }
 0x3c9   : > { %6120 = vst.msk [vmem:[#allocation2 + $0x2d0] sm:$0xff] %vm228_vm1, %v5959_v10  ;;  %v5580_v55 = vpop.xlane.xlu0 %5579  ;;  %v12792_v19 = vpop.eup %8311  ;;  %8337 = vpow2.f32 %v7059_v2  ;;  %v12797_v44 = vadd.f32 %v12509_v56, %v14268_v24  ;;  %v7063_v3 = vmul.f32 -1.442695, %v12769_v11  ;;  %v12804_v61 = vadd.f32 %v12528_v59, %v14271_v12 }
 0x3ca   : > { %14265 = vst [vmem:[#allocation140_spill] sm:$0xff] %v12780_v25  ;;  %14269 = vst [vmem:[#allocation14_spill] sm:$0xff] %v12790_v63  ;;  %v5932_v10 = vadd.f32 %v5580_v55, %v5292_v31  ;;  %v12799_v1 = vpop.eup %8313  ;;  %8339 = vrcp.f32 %v4228_v37  ;;  %v7064_v56 = vmul.f32 -1.442695, %v12780_v25  ;;  %v12813_v55 = vadd.f32 %v12546_v0, %v14271_v12  ;;  %v14275_v37 = vld [vmem:[#allocation85_spill] sm:$0xff]  ;;  %v14276_v31 = vld [vmem:[#allocation103_spill] sm:$0xff] }
 0x3cb   : > { %14270 = vst [vmem:[#allocation36_spill] sm:$0xff] %v12797_v44  ;;  %14272 = vst [vmem:[#allocation6_spill] sm:$0xff] %v12804_v61  ;;  %v12808_v53 = vpop.eup %8315  ;;  %8341 = vpow2.f32 %v7060_v42  ;;  %5723 = vadd.xlane.f32.xlu0 %v14275_v37  ;;  %v7065_v24 = vmul.f32 -1.442695, %v12790_v63  ;;  %v7066_v0 = vmul.f32 -1.442695, %v12797_v44 }
 0x3cc   : > { %v6255_v2 = vld [vmem:[#allocation2 + $0x1f0] sm:$0xff]  ;;  %14273 = vst [vmem:[#allocation15_spill] sm:$0xff] %v12808_v53  ;;  %14274 = vst [vmem:[#allocation16_spill] sm:$0xff] %v12813_v55  ;;  %5732 = vadd.xlane.f32.xlu1 %v14276_v31  ;;  %v12820_v59 = vpop.eup %8317  ;;  %8343 = vpow2.f32 %v7061_v30  ;;  %v14278_v12 = vld [vmem:[#allocation144_spill] sm:$0xff]  ;;  %v12831_v30 = vpop.f32.mrf.mxu1 }
 0x3cd   : > { %6415 = vst.msk [vmem:[%s11904_s19 + $0x1f0] sm:$0xff] %vm228_vm1, %v6255_v2  ;;  %6093 = vst.msk [vmem:[#allocation2 + $0x1f8] sm:$0xff] %vm228_vm1, %v5932_v10  ;;  %v5664_v42 = vpop.xlane.xlu0 %5663  ;;  %v8320_v11 = vpop.eup %8319  ;;  %8345 = vpow2.f32 %v7062_v33  ;;  %v12826_v37 = vadd.f32 %v12569_v52, %v14278_v12  ;;  %v5293_v31 = vld [vmem:[#allocation2 + $0x200] sm:$0xff]  ;;  %v7067_v10 = vmul.f32 -1.442695, %v12804_v61  ;;  %v12836_v44 = vadd.f32 %v12593_v23, %v14278_v12 }
 0x3ce   : > { %14277 = vst [vmem:[#allocation58_spill] sm:$0xff] %v12820_v59  ;;  %v5960_v25 = vadd.f32 %v5664_v42, %v5320_v35  ;;  %v12828_v2 = vpop.eup %8321  ;;  %8347 = vpow2.f32 %v7063_v3  ;;  %v7068_v33 = vmul.f32 -1.442695, %v12813_v55  ;;  %v14282_v52 = vld [vmem:[#allocation91_spill] sm:$0xff]  ;;  %v4229_v42 = vadd.f32 1.0, %v8320_v11  ;;  %v5322_v59 = vld [vmem:[#allocation2 + $0x2e8] sm:$0xff] }
 0x3cf   : > { %14279 = vst [vmem:[#allocation49_spill] sm:$0xff] %v12826_v37  ;;  %14280 = vst [vmem:[#allocation71_spill] sm:$0xff] %v12828_v2  ;;  %v8324_v29 = vpop.eup %8323  ;;  %8349 = vpow2.f32 %v7064_v56  ;;  %5729 = vadd.xlane.f32.xlu0 %v14282_v52  ;;  %v5583_v35 = vpop.xlane.xlu1 %5582  ;;  %v7069_v23 = vmul.f32 -1.442695, %v12826_v37  ;;  %v14285_v12 = vld [vmem:[#allocation119_spill] sm:$0xff] }
 0x3d0   : > { %v6283_v63 = vld [vmem:[#allocation2 + $0x2d0] sm:$0xff]  ;;  %14281 = vst [vmem:[#allocation89_spill] sm:$0xff] %v12836_v44  ;;  %5738 = vadd.xlane.f32.xlu1 %v14283_v39  ;;  %6121 = vst.msk [vmem:[#allocation2 + $0x2d8] sm:$0xff] %vm228_vm1, %v5960_v25  ;;  %v12843_v3 = vpop.eup %8325  ;;  %8351 = vpow2.f32 %v7065_v24  ;;  %v5933_v56 = vadd.f32 %v5583_v35, %v5293_v31  ;;  %v12848_v52 = vadd.f32 %v12616_v17, %v14285_v12  ;;  %v5321_v39 = vld [vmem:[#allocation2 + $0x2e0] sm:$0xff]  ;;  %v12852_v25 = vpop.f32.mrf.mxu1  ;;  %v7070_v24 = vmul.f32 -1.442695, %v12836_v44 }
 0x3d1   : > { %6443 = vst.msk [vmem:[%s11904_s19 + $0x2d0] sm:$0xff] %vm228_vm1, %v6283_v63  ;;  %14284 = vst [vmem:[#allocation63_spill] sm:$0xff] %v12843_v3  ;;  %v8328_v61 = vpop.eup %8327  ;;  %8353 = vpow2.f32 %v7066_v0  ;;  %v4230_v63 = vadd.f32 1.0, %v8324_v29  ;;  %v14288_v0 = vld [vmem:[#allocation106_spill] sm:$0xff]  ;;  %v14289_v31 = vld [vmem:[#allocation39_spill] sm:$0xff] }
 0x3d2   : > { %14286 = vst [vmem:[#allocation125_spill] sm:$0xff] %v12848_v52  ;;  %v12850_v55 = vpop.eup %8329  ;;  %8355 = vpow2.f32 %v7067_v10  ;;  %6094 = vst.msk [vmem:[#allocation2 + $0x200] sm:$0xff] %vm228_vm1, %v5933_v56  ;;  %v4231_v29 = vadd.f32 1.0, %v8328_v61  ;;  %v7071_v56 = vmul.f32 -1.442695, %v12848_v52 }
 0x3d3   : > { %14287 = vst [vmem:[#allocation20_spill] sm:$0xff] %v12850_v55  ;;  %v8332_v11 = vpop.eup %8331  ;;  %8357 = vpow2.f32 %v7068_v33  ;;  %5735 = vadd.xlane.f32.xlu0 %v14288_v0  ;;  %v5667_v17 = vpop.xlane.xlu1 %5666  ;;  %v5294_v55 = vld [vmem:[#allocation2 + $0x208] sm:$0xff]  ;;  %v12863_v0 = vadd.f32 %v12632_v58, %v14285_v12 }
 0x3d4   : > { %v6256_v2 = vld [vmem:[#allocation2 + $0x1f8] sm:$0xff]  ;;  %5744 = vadd.xlane.f32.xlu1 %v14289_v31  ;;  %v8334_v35 = vpop.eup %8333  ;;  %8359 = vrcp.f32 %v4229_v42  ;;  %v5961_v10 = vadd.f32 %v5667_v17, %v5321_v39  ;;  %v4232_v44 = vadd.f32 1.0, %v8332_v11  ;;  %v12865_v31 = vpop.f32.mrf.mxu1 }
 0x3d5   : > { %6416 = vst.msk [vmem:[%s11904_s19 + $0x1f8] sm:$0xff] %vm228_vm1, %v6256_v2  ;;  %v8336_v37 = vpop.eup %8335  ;;  %8361 = vpow2.f32 %v7069_v23  ;;  %14290 = vst [vmem:[#allocation41_spill] sm:$0xff] %v12863_v0  ;;  %v4233_v42 = vadd.f32 1.0, %v8334_v35  ;;  %v14292_v23 = vld [vmem:[#allocation108_spill] sm:$0xff]  ;;  %v14293_v39 = vld [vmem:[#allocation10_spill] sm:$0xff] }
 0x3d6   : > { %v8338_v33 = vpop.eup %8337  ;;  %8363 = vrcp.f32 %v4230_v63  ;;  %6122 = vst.msk [vmem:[#allocation2 + $0x2e0] sm:$0xff] %vm228_vm1, %v5961_v10  ;;  %v4234_v58 = vadd.f32 1.0, %v8336_v37  ;;  %v12875_v35 = vpop.f32.mrf.mxu1  ;;  %v14294_v37 = vld [vmem:[#allocation113_spill] sm:$0xff] }
 0x3d7   : > { %v6284_v2 = vld [vmem:[#allocation2 + $0x2d8] sm:$0xff]  ;;  %v12868_v61 = vpop.eup %8339  ;;  %8365 = vpow2.f32 %v7070_v24  ;;  %5741 = vadd.xlane.f32.xlu0 %v14292_v23  ;;  %v5586_v63 = vpop.xlane.xlu0 %5585  ;;  %v4235_v52 = vadd.f32 1.0, %v8338_v33  ;;  %v7072_v24 = vmul.f32 -1.442695, %v12863_v0 }
 0x3d8   : > { %14291 = vst [vmem:[#allocation115_spill] sm:$0xff] %v12868_v61  ;;  %5750 = vadd.xlane.f32.xlu1 %v14293_v39  ;;  %6444 = vst.msk [vmem:[%s11904_s19 + $0x2d8] sm:$0xff] %vm228_vm1, %v6284_v2  ;;  %v8342_v11 = vpop.eup %8341  ;;  %8367 = vrcp.f32 %v4231_v29  ;;  %v5934_v12 = vadd.f32 %v5586_v63, %v5294_v55  ;;  %v14295_v55 = vld [vmem:[#allocation116_spill] sm:$0xff]  ;;  %v14296_v63 = vld [vmem:[#allocation11_spill] sm:$0xff] }
 0x3d9   : > { %v8344_v17 = vpop.eup %8343  ;;  %8369 = vpow2.f32 %v7071_v56  ;;  %v6257_v10 = vld [vmem:[#allocation2 + $0x200] sm:$0xff]  ;;  %v4236_v29 = vadd.f32 1.0, %v8342_v11  ;;  %v5166_v0 = vmul.f32 %v12585_v18, %v14296_v63  ;;  %v14297_v11 = vld [vmem:[#allocation105_spill] sm:$0xff]  ;;  %v14301_v63 = vld [vmem:[#allocation138_spill] sm:$0xff] }
 0x3da   : > { %v8346_v61 = vpop.eup %8345  ;;  %8371 = vrcp.f32 %v4232_v44  ;;  %6417 = vst.msk [vmem:[%s11904_s19 + $0x200] sm:$0xff] %vm228_vm1, %v6257_v10  ;;  %6095 = vst.msk [vmem:[#allocation2 + $0x208] sm:$0xff] %vm228_vm1, %v5934_v12  ;;  %v4237_v44 = vadd.f32 1.0, %v8344_v17  ;;  %v14298_v17 = vld [vmem:[#allocation3_spill] sm:$0xff] }
 0x3db   : > { %v8348_v2 = vpop.eup %8347  ;;  %8373 = vrcp.f32 %v4233_v42  ;;  %5747 = vadd.xlane.f32.xlu0 %v14294_v37  ;;  %v5670_v56 = vpop.xlane.xlu0 %5669  ;;  %v4238_v10 = vadd.f32 1.0, %v8346_v61  ;;  %v12886_v37 = vadd.f32 %v12648_v14, %v14297_v11  ;;  %v5165_v18 = vmul.f32 %v12578_v54, %v14298_v17  ;;  %v14300_v14 = vld [vmem:[#allocation145_spill] sm:$0xff] }
 0x3dc   : > { %5756 = vadd.xlane.f32.xlu1 %v14295_v55  ;;  %v8350_v33 = vpop.eup %8349  ;;  %8375 = vrcp.f32 %v4234_v58  ;;  %v5962_v23 = vadd.f32 %v5670_v56, %v5322_v59  ;;  %v4239_v42 = vadd.f32 1.0, %v8348_v2  ;;  %v12888_v55 = vpop.f32.mrf.mxu1  ;;  %v5295_v58 = vld [vmem:[#allocation2 + $0x210] sm:$0xff]  ;;  %v12897_v61 = vadd.f32 %v12662_v51, %v14297_v11 }
 0x3dd   : > { %v8352_v39 = vpop.eup %8351  ;;  %8377 = vrcp.f32 %v4235_v52  ;;  %v6285_v12 = vld [vmem:[#allocation2 + $0x2e0] sm:$0xff]  ;;  %v4240_v52 = vadd.f32 1.0, %v8350_v33  ;;  %v5170_v56 = vmul.f32 %v12694_v49, %v12496_v36  ;;  %v12905_v54 = vadd.f32 %v12668_v45, %v14301_v63  ;;  %v5323_v45 = vld [vmem:[#allocation2 + $0x2f0] sm:$0xff] }
 0x3de   : > { %v8354_v53 = vpop.eup %8353  ;;  %8379 = vpow2.f32 %v7072_v24  ;;  %6445 = vst.msk [vmem:[%s11904_s19 + $0x2e0] sm:$0xff] %vm228_vm1, %v6285_v12  ;;  %6123 = vst.msk [vmem:[#allocation2 + $0x2e8] sm:$0xff] %vm228_vm1, %v5962_v23  ;;  %v14299_v24 = vld [vmem:[#allocation8_spill] sm:$0xff]  ;;  %v4241_v23 = vadd.f32 1.0, %v8352_v39  ;;  %v5773_v12 = vadd.f32 %v5166_v0, %v5165_v18  ;;  %v7073_v49 = vmul.f32 -1.442695, %v12886_v37 }
 0x3df   : > { %v8356_v59 = vpop.eup %8355  ;;  %8381 = vrcp.f32 %v4236_v29  ;;  %5753 = vadd.xlane.f32.xlu0 %v14299_v24  ;;  %v4242_v51 = vadd.f32 1.0, %v8354_v53  ;;  %v7074_v0 = vmul.f32 -1.442695, %v12897_v61  ;;  %v14305_v18 = vld [vmem:[#allocation133_spill] sm:$0xff] }
 0x3e0   : > { %5762 = vadd.xlane.f32.xlu1 %v14300_v14  ;;  %v8358_v2 = vpop.eup %8357  ;;  %8383 = vrcp.f32 %v4237_v44  ;;  %v5589_v29 = vpop.xlane.xlu1 %5588  ;;  %v14302_v14 = vld [vmem:[#allocation127_spill] sm:$0xff]  ;;  %v4243_v36 = vadd.f32 1.0, %v8356_v59  ;;  %v12927_v59 = vmul.f32 -1.442695, %v12905_v54 }
 0x3e1   : > { %v12907_v33 = vpop.eup %8359  ;;  %8385 = vrcp.f32 %v4238_v10  ;;  %v6258_v11 = vld [vmem:[#allocation2 + $0x208] sm:$0xff]  ;;  %v5935_v17 = vadd.f32 %v5589_v29, %v5295_v58  ;;  %v5169_v3 = vmul.f32 %v12641_v47, %v14302_v14  ;;  %v12912_v44 = vpop.f32.mrf.mxu1  ;;  %v4244_v53 = vadd.f32 1.0, %v8358_v2 }
 0x3e2   : > { %v8362_v24 = vpop.eup %8361  ;;  %8387 = vrcp.f32 %v4239_v42  ;;  %6418 = vst.msk [vmem:[%s11904_s19 + $0x208] sm:$0xff] %vm228_vm1, %v6258_v11  ;;  %v12921_v10 = vadd.f32 %v12676_v20, %v14301_v63  ;;  %v14303_v47 = vld [vmem:[#allocation132_spill] sm:$0xff]  ;;  %v14304_v42 = vld [vmem:[#allocation122_spill] sm:$0xff]  ;;  %v5171_v63 = vmul.f32 %v12704_v62, %v12507_v9 }
 0x3e3   : > { %v12916_v39 = vpop.eup %8363  ;;  %8389 = vrcp.f32 %v4240_v52  ;;  %5759 = vadd.xlane.f32.xlu0 %v14303_v47  ;;  %6096 = vst.msk [vmem:[#allocation2 + $0x210] sm:$0xff] %vm228_vm1, %v5935_v17  ;;  %v12931_v52 = vadd.f32 %v12711_v22, %v14305_v18  ;;  %v5779_v2 = vadd.f32 %v5170_v56, %v5169_v3  ;;  %v4245_v11 = vadd.f32 1.0, %v8362_v24  ;;  %v12945_v3 = vpop.f32.mrf.mxu1  ;;  %v5296_v9 = vld [vmem:[#allocation2 + $0x218] sm:$0xff] }
 0x3e4   : > { %5768 = vadd.xlane.f32.xlu1 %v14304_v42  ;;  %v8366_v58 = vpop.eup %8365  ;;  %8391 = vrcp.f32 %v4241_v23  ;;  %v5673_v29 = vpop.xlane.xlu1 %5672  ;;  %v5172_v47 = vmul.f32 %v12716_v26, %v12514_v15  ;;  %v5174_v42 = vmul.f32 %v12730_v38, %v12544_v6  ;;  %v12943_v22 = vadd.f32 %v12689_v48, %v14305_v18  ;;  %v14306_v15 = vld [vmem:[#allocation146_spill] sm:$0xff]  ;;  %v14307_v6 = vld [vmem:[#allocation111_spill] sm:$0xff] }
 0x3e5   : > { %v12933_v20 = vpop.eup %8367  ;;  %8393 = vrcp.f32 %v4242_v51  ;;  %v6286_v17 = vld [vmem:[#allocation2 + $0x2e8] sm:$0xff]  ;;  %v5963_v14 = vadd.f32 %v5673_v29, %v5323_v45  ;;  %v4246_v56 = vadd.f32 1.0, %v8366_v58  ;;  %v7076_v51 = vmul.f32 -1.442695, %v12921_v10 }
 0x3e6   : > { %v8370_v23 = vpop.eup %8369  ;;  %8395 = vrcp.f32 %v4243_v36  ;;  %6446 = vst.msk [vmem:[%s11904_s19 + $0x2e8] sm:$0xff] %vm228_vm1, %v6286_v17  ;;  %v12954_v26 = vadd.f32 %v12739_v21, %v14306_v15  ;;  %v5173_v38 = vmul.f32 %v12723_v13, %v12521_v27  ;;  %v7078_v24 = vmul.f32 -1.442695, %v12931_v52  ;;  %v12976_v13 = vpop.f32.mrf.mxu1 }
 0x3e7   : > { %v12949_v62 = vpop.eup %8371  ;;  %8397 = vrcp.f32 %v4244_v53  ;;  %5765 = vadd.xlane.f32.xlu0 %v14307_v6  ;;  %6124 = vst.msk [vmem:[#allocation2 + $0x2f0] sm:$0xff] %vm228_vm1, %v5963_v14  ;;  %v12965_v36 = vadd.f32 %v12771_v16, %v14306_v15  ;;  %v4247_v53 = vadd.f32 1.0, %v8370_v23  ;;  %v7077_v27 = vmul.f32 -1.442695, %v12943_v22  ;;  %v5324_v14 = vld [vmem:[#allocation2 + $0x2f8] sm:$0xff]  ;;  %v5297_v6 = vld [vmem:[#allocation2 + $0x220] sm:$0xff] }
 0x3e8   : > { %5774 = vadd.xlane.f32.xlu1 %v5773_v12  ;;  %v12958_v48 = vpop.eup %8373  ;;  %8399 = vpow2.f32 %v7074_v0  ;;  %v5592_v45 = vpop.xlane.xlu0 %5591  ;;  %v14308_v12 = vld [vmem:[#allocation149_spill] sm:$0xff]  ;;  %v5785_v16 = vadd.f32 %v5174_v42, %v5173_v38  ;;  %v12978_v0 = vadd.f32 %v5172_v47, %v5171_v63  ;;  %v5176_v23 = vmul.f32 %v12751_v57, %v12557_v46 }
 0x3e9   : > { %v12967_v21 = vpop.eup %8375  ;;  %8401 = vrcp.f32 %v4245_v11  ;;  %v12971_v58 = vadd.f32 %v12831_v30, %v14308_v12  ;;  %v5936_v18 = vadd.f32 %v5592_v45, %v5296_v9  ;;  %v12983_v30 = vmul.f32 -1.442695, %v12954_v26  ;;  %v14309_v9 = vld [vmem:[#allocation161_spill] sm:$0xff]  ;;  %v2982_v45 = vpop.f32.mrf.mxu1 }
 0x3ea   : > { %v12973_v29 = vpop.eup %8377  ;;  %8403 = vpow2.f32 %v7073_v49  ;;  %v6259_v17 = vld [vmem:[#allocation2 + $0x210] sm:$0xff]  ;;  %v12987_v49 = vadd.f32 %v12806_v8, %v14308_v12  ;;  %v5175_v46 = vmul.f32 %v12736_v4, %v12551_v50  ;;  %v5178_v57 = vmul.f32 %v12765_v41, %v12567_v32  ;;  %v14311_v41 = vld [vmem:[#allocation31_spill] sm:$0xff] }
 0x3eb   : > { %v8380_v11 = vpop.eup %8379  ;;  %8405 = vrcp.f32 %v4246_v56  ;;  %5771 = vadd.xlane.f32.xlu0 %v14309_v9  ;;  %6419 = vst.msk [vmem:[%s11904_s19 + $0x210] sm:$0xff] %vm228_vm1, %v6259_v17  ;;  %6097 = vst.msk [vmem:[#allocation2 + $0x218] sm:$0xff] %vm228_vm1, %v5936_v18  ;;  %v7080_v47 = vmul.f32 -1.442695, %v12965_v36  ;;  %v14310_v56 = vld [vmem:[#allocation135_spill] sm:$0xff]  ;;  %v5177_v32 = vmul.f32 %v12758_v34, %v12561_v28  ;;  %v14312_v17 = vld [vmem:[#allocation12_spill] sm:$0xff] }
 0x3ec   : > { %5780 = vadd.xlane.f32.xlu1 %v5779_v2  ;;  %v12993_v63 = vpop.eup %8381  ;;  %8407 = vpow2.f32 %v7078_v24  ;;  %v5676_v8 = vpop.xlane.xlu0 %5675  ;;  %v7082_v2 = vmul.f32 -1.442695, %v12971_v58  ;;  %v13005_v15 = vadd.f32 %v12888_v55, %v14310_v56  ;;  %v4248_v4 = vadd.f32 1.0, %v8380_v11 }
 0x3ed   : > { %v13000_v42 = vpop.eup %8383  ;;  %8409 = vrcp.f32 %v4247_v53  ;;  %v5964_v38 = vadd.f32 %v5676_v8, %v5324_v14  ;;  %v13013_v24 = vadd.f32 %v12852_v25, %v14311_v41  ;;  %v7081_v55 = vmul.f32 -1.442695, %v12987_v49  ;;  %v5595_v34 = vpop.xlane.xlu1 %5594 }
 0x3ee   : > { %v13007_v50 = vpop.eup %8385  ;;  %8411 = vpow2.f32 %v7077_v27  ;;  %v6287_v53 = vld [vmem:[#allocation2 + $0x2f0] sm:$0xff]  ;;  %v13021_v18 = vadd.f32 %v12875_v35, %v14310_v56  ;;  %v5788_v28 = vadd.f32 %v5176_v23, %v5175_v46  ;;  %v5791_v27 = vadd.f32 %v5178_v57, %v5177_v32  ;;  %v14313_v23 = vld [vmem:[#allocation114_spill] sm:$0xff]  ;;  %v5325_v46 = vld [vmem:[#allocation2 + $0x300] sm:$0xff] }
 0x3ef   : > { %v13015_v12 = vpop.eup %8387  ;;  %8413 = vpow2.f32 %v12927_v59  ;;  %5777 = vadd.xlane.f32.xlu0 %v14312_v17  ;;  %6447 = vst.msk [vmem:[%s11904_s19 + $0x2f0] sm:$0xff] %vm228_vm1, %v6287_v53  ;;  %6125 = vst.msk [vmem:[#allocation2 + $0x2f8] sm:$0xff] %vm228_vm1, %v5964_v38  ;;  %v13031_v59 = vadd.f32 %v12865_v31, %v14311_v41  ;;  %v5937_v14 = vadd.f32 %v5595_v34, %v5297_v6  ;;  %v7086_v11 = vmul.f32 -1.442695, %v13005_v15  ;;  %v14314_v57 = vld [vmem:[#allocation130_spill] sm:$0xff]  ;;  %v14315_v6 = vld [vmem:[#allocation155_spill] sm:$0xff] }
 0x3f0   : > { %5786 = vadd.xlane.f32.xlu1 %v5785_v16  ;;  %v13027_v25 = vpop.eup %8389  ;;  %8415 = vpow2.f32 %v7076_v51  ;;  %v5182_v16 = vmul.f32 %v12799_v1, %v12605_v43  ;;  %v13039_v9 = vadd.f32 %v2982_v45, %v14313_v23  ;;  %v5179_v31 = vmul.f32 %v12775_v40, %v12583_v60  ;;  %v2984_v43 = vpop.f32.mrf.mxu1  ;;  %v14316_v41 = vld [vmem:[#allocation123_spill] sm:$0xff]  ;;  %v5298_v34 = vld [vmem:[#allocation2 + $0x228] sm:$0xff] }
 0x3f1   : > { %v13033_v35 = vpop.eup %8391  ;;  %8417 = vpow2.f32 %v7082_v2  ;;  %v5180_v8 = vmul.f32 %v12785_v5, %v14314_v57  ;;  %v7083_v56 = vmul.f32 -1.442695, %v13013_v24  ;;  %6098 = vst.msk [vmem:[#allocation2 + $0x220] sm:$0xff] %vm228_vm1, %v5937_v14  ;;  %v5181_v38 = vmul.f32 %v12792_v19, %v14315_v6  ;;  %v5679_v40 = vpop.xlane.xlu1 %5678  ;;  %v14320_v14 = vld [vmem:[#allocation15_spill] sm:$0xff] }
 0x3f2   : > { %v13041_v51 = vpop.eup %8393  ;;  %8419 = vrcp.f32 %v4248_v4  ;;  %v6260_v1 = vld [vmem:[#allocation2 + $0x218] sm:$0xff]  ;;  %v7085_v32 = vmul.f32 -1.442695, %v13021_v18  ;;  %v13056_v60 = vadd.f32 %v12976_v13, %v14313_v23  ;;  %v7084_v4 = vmul.f32 -1.442695, %v13031_v59  ;;  %v14318_v13 = vld [vmem:[#allocation63_spill] sm:$0xff] }
 0x3f3   : > { %v13049_v2 = vpop.eup %8395  ;;  %8421 = vpow2.f32 %v7081_v55  ;;  %5783 = vadd.xlane.f32.xlu0 %v12978_v0  ;;  %6420 = vst.msk [vmem:[%s11904_s19 + $0x218] sm:$0xff] %vm228_vm1, %v6260_v1  ;;  %v13066_v19 = vadd.f32 %v12945_v3, %v14316_v41  ;;  %v5965_v45 = vadd.f32 %v5679_v40, %v5325_v46  ;;  %v5186_v55 = vmul.f32 %v14318_v13, %v12638_v7  ;;  %v2986_v46 = vpop.f32.mrf.mxu1  ;;  %v14323_v1 = vld [vmem:[#allocation58_spill] sm:$0xff]  ;;  %v14325_v40 = vld [vmem:[#allocation71_spill] sm:$0xff] }
 0x3f4   : > { %5792 = vadd.xlane.f32.xlu1 %v5791_v27  ;;  %v13061_v5 = vpop.eup %8397  ;;  %8423 = vpow2.f32 %v7080_v47  ;;  %v7090_v0 = vmul.f32 -1.442695, %v13039_v9  ;;  %v5797_v17 = vadd.f32 %v5182_v16, %v5181_v38  ;;  %v14319_v47 = vld [vmem:[#allocation165_spill] sm:$0xff]  ;;  %v13078_v3 = vadd.f32 %v12912_v44, %v14316_v41  ;;  %v14322_v16 = vld [vmem:[#allocation128_spill] sm:$0xff] }
 0x3f5   : > { %14317 = vst [vmem:[#allocation23_spill] sm:$0xff] %v13066_v19  ;;  %v8400_v53 = vpop.eup %8399  ;;  %8425 = vpow2.f32 %v7086_v11  ;;  %v5183_v23 = vmul.f32 %v14320_v14, %v14319_v47  ;;  %v5794_v57 = vadd.f32 %v5180_v8, %v5179_v31  ;;  %6126 = vst.msk [vmem:[#allocation2 + $0x300] sm:$0xff] %vm228_vm1, %v5965_v45  ;;  %v5184_v6 = vmul.f32 %v14323_v1, %v14322_v16  ;;  %v14324_v38 = vld [vmem:[#allocation13_spill] sm:$0xff]  ;;  %v5598_v44 = vpop.xlane.xlu0 %5597 }
 0x3f6   : > { %v13071_v27 = vpop.eup %8401  ;;  %8427 = vpow2.f32 %v12983_v30  ;;  %14321 = vst [vmem:[#allocation21_spill] sm:$0xff] %v13078_v3  ;;  %v6288_v7 = vld [vmem:[#allocation2 + $0x2f8] sm:$0xff]  ;;  %v5185_v13 = vmul.f32 %v14325_v40, %v14324_v38  ;;  %v7089_v47 = vmul.f32 -1.442695, %v13056_v60  ;;  %v4250_v31 = vadd.f32 1.0, %v8400_v53  ;;  %v14326_v14 = vld [vmem:[#allocation9_spill] sm:$0xff] }
 0x3f7   : > { %v8404_v11 = vpop.eup %8403  ;;  %8429 = vpow2.f32 %v7085_v32  ;;  %5789 = vadd.xlane.f32.xlu0 %v5788_v28  ;;  %6448 = vst.msk [vmem:[%s11904_s19 + $0x2f8] sm:$0xff] %vm228_vm1, %v6288_v7  ;;  %v7088_v8 = vmul.f32 -1.442695, %v13066_v19  ;;  %v5938_v41 = vadd.f32 %v5598_v44, %v5298_v34  ;;  %v5190_v16 = vmul.f32 %v12916_v39, %v14326_v14  ;;  %v14327_v32 = vld [vmem:[#allocation4_spill] sm:$0xff]  ;;  %v14329_v34 = vld [vmem:[#allocation115_spill] sm:$0xff] }
 0x3f8   : > { %5798 = vadd.xlane.f32.xlu1 %v5797_v17  ;;  %v13088_v30 = vpop.eup %8405  ;;  %8431 = vpow2.f32 %v7084_v4  ;;  %v13094_v1 = vadd.f32 %v2986_v46, %v14327_v32  ;;  %v5803_v28 = vadd.f32 %v5186_v55, %v5185_v13  ;;  %v6261_v17 = vld [vmem:[#allocation2 + $0x220] sm:$0xff]  ;;  %v5326_v7 = vld [vmem:[#allocation2 + $0x308] sm:$0xff]  ;;  %v4249_v40 = vadd.f32 1.0, %v8404_v11  ;;  %v14330_v55 = vld [vmem:[#allocation17_spill] sm:$0xff] }
 0x3f9   : > { %v8408_v45 = vpop.eup %8407  ;;  %8433 = vpow2.f32 %v7090_v0  ;;  %v7087_v4 = vmul.f32 -1.442695, %v13078_v3  ;;  %v13100_v53 = vadd.f32 %v2984_v43, %v14327_v32  ;;  %6421 = vst.msk [vmem:[%s11904_s19 + $0x220] sm:$0xff] %vm228_vm1, %v6261_v17  ;;  %6099 = vst.msk [vmem:[#allocation2 + $0x228] sm:$0xff] %vm228_vm1, %v5938_v41  ;;  %v14328_v0 = vld [vmem:[#allocation158_spill] sm:$0xff]  ;;  %v5189_v13 = vmul.f32 %v12907_v33, %v14330_v55  ;;  %v5682_v11 = vpop.xlane.xlu0 %5681  ;;  %v14332_v14 = vld [vmem:[#allocation20_spill] sm:$0xff] }
 0x3fa   : > { %v13096_v38 = vpop.eup %8409  ;;  %8435 = vpow2.f32 %v7083_v56  ;;  %v5188_v46 = vmul.f32 %v14329_v34, %v14328_v0  ;;  %v5800_v56 = vadd.f32 %v5184_v6, %v5183_v23  ;;  %v14331_v43 = vld [vmem:[#allocation18_spill] sm:$0xff]  ;;  %v4254_v17 = vadd.f32 1.0, %v8408_v45  ;;  %v14333_v19 = vld [vmem:[#allocation44_spill] sm:$0xff]  ;;  %v5299_v34 = vld [vmem:[#allocation2 + $0x230] sm:$0xff] }
 0x3fb   : > { %v8412_v39 = vpop.eup %8411  ;;  %8437 = vpow2.f32 %v7089_v47  ;;  %5795 = vadd.xlane.f32.xlu0 %v5794_v57  ;;  %v5187_v32 = vmul.f32 %v14332_v14, %v14331_v43  ;;  %v5966_v41 = vadd.f32 %v5682_v11, %v5326_v7  ;;  %v5194_v0 = vmul.f32 %v12967_v21, %v14333_v19  ;;  %v14334_v45 = vld [vmem:[#allocation159_spill] sm:$0xff]  ;;  %v14335_v19 = vld [vmem:[#allocation162_spill] sm:$0xff] }
 0x3fc   : > { %5804 = vadd.xlane.f32.xlu1 %v5803_v28  ;;  %v8414_v44 = vpop.eup %8413  ;;  %8439 = vrcp.f32 %v4250_v31  ;;  %v7092_v33 = vmul.f32 -1.442695, %v13094_v1  ;;  %v5809_v47 = vadd.f32 %v5190_v16, %v5189_v13  ;;  %v6289_v57 = vld [vmem:[#allocation2 + $0x300] sm:$0xff]  ;;  %v4253_v23 = vadd.f32 1.0, %v8412_v39 }
 0x3fd   : > { %v8416_v3 = vpop.eup %8415  ;;  %8441 = vpow2.f32 %v7088_v8  ;;  %v7091_v6 = vmul.f32 -1.442695, %v13100_v53  ;;  %6449 = vst.msk [vmem:[%s11904_s19 + $0x300] sm:$0xff] %vm228_vm1, %v6289_v57  ;;  %6127 = vst.msk [vmem:[#allocation2 + $0x308] sm:$0xff] %vm228_vm1, %v5966_v41  ;;  %v5192_v21 = vmul.f32 %v12949_v62, %v14334_v45  ;;  %v5193_v8 = vmul.f32 %v12958_v48, %v14335_v19  ;;  %v14337_v55 = vld [vmem:[#allocation83_spill] sm:$0xff]  ;;  %v14341_v19 = vld [vmem:[#allocation36_spill] sm:$0xff] }
 0x3fe   : > { %v8418_v28 = vpop.eup %8417  ;;  %8443 = vrcp.f32 %v4249_v40  ;;  %v5806_v16 = vadd.f32 %v5188_v46, %v5187_v32  ;;  %v14336_v40 = vld [vmem:[#allocation24_spill] sm:$0xff]  ;;  %v5198_v13 = vmul.f32 %v13007_v50, %v14337_v55  ;;  %v4252_v11 = vadd.f32 1.0, %v8416_v3 }
 0x3ff   : > { %v13118_v31 = vpop.eup %8419  ;;  %8445 = vpow2.f32 %v7087_v4  ;;  %5801 = vadd.xlane.f32.xlu0 %v5800_v56  ;;  %v5191_v39 = vmul.f32 %v12933_v20, %v14336_v40  ;;  %v5601_v43 = vpop.xlane.xlu1 %5600  ;;  %v4258_v62 = vadd.f32 1.0, %v8418_v28  ;;  %v5815_v41 = vadd.f32 %v5194_v0, %v5193_v8  ;;  %v5327_v20 = vld [vmem:[#allocation2 + $0x310] sm:$0xff]  ;;  %v14339_v50 = vld [vmem:[#allocation160_spill] sm:$0xff]  ;;  %v5300_v40 = vld [vmem:[#allocation2 + $0x238] sm:$0xff] }
 0x400   : > { %5810 = vadd.xlane.f32.xlu1 %v5809_v47  ;;  %v8422_v7 = vpop.eup %8421  ;;  %8447 = vrcp.f32 %v4254_v17  ;;  %v6262_v48 = vld [vmem:[#allocation2 + $0x228] sm:$0xff]  ;;  %v5939_v4 = vadd.f32 %v5601_v43, %v5299_v34  ;;  %v14338_v47 = vld [vmem:[#allocation141_spill] sm:$0xff]  ;;  %v4251_v32 = vadd.f32 1.0, %v8414_v44  ;;  %v5196_v3 = vmul.f32 %v12993_v63, %v14339_v50 }
 0x401   : > { %v8424_v14 = vpop.eup %8423  ;;  %8449 = vpow2.f32 %v7092_v33  ;;  %v5197_v46 = vmul.f32 %v13000_v42, %v14338_v47  ;;  %6422 = vst.msk [vmem:[%s11904_s19 + $0x228] sm:$0xff] %vm228_vm1, %v6262_v48  ;;  %v4257_v17 = vadd.f32 1.0, %v8422_v7  ;;  %v5812_v0 = vadd.f32 %v5192_v21, %v5191_v39  ;;  %v14340_v28 = vld [vmem:[#allocation137_spill] sm:$0xff]  ;;  %v14343_v43 = vld [vmem:[#allocation140_spill] sm:$0xff] }
 0x402   : > { %v8426_v56 = vpop.eup %8425  ;;  %8451 = vrcp.f32 %v4253_v23  ;;  %6100 = vst.msk [vmem:[#allocation2 + $0x230] sm:$0xff] %vm228_vm1, %v5939_v4  ;;  %v5195_v42 = vmul.f32 %v12973_v29, %v14340_v28  ;;  %v4256_v44 = vadd.f32 1.0, %v8424_v14  ;;  %v5202_v63 = vmul.f32 %v13041_v51, %v14341_v19  ;;  %v14342_v29 = vld [vmem:[#allocation14_spill] sm:$0xff]  ;;  %v14346_v50 = vld [vmem:[#allocation49_spill] sm:$0xff] }
 0x403   : > { %v8428_v57 = vpop.eup %8427  ;;  %8453 = vpow2.f32 %v7091_v6  ;;  %5807 = vadd.xlane.f32.xlu0 %v5806_v16  ;;  %v5821_v23 = vadd.f32 %v5198_v13, %v5197_v46  ;;  %v5685_v34 = vpop.xlane.xlu1 %5684  ;;  %v4262_v6 = vadd.f32 1.0, %v8426_v56  ;;  %v5201_v55 = vmul.f32 %v13033_v35, %v14342_v29 }
 0x404   : > { %5816 = vadd.xlane.f32.xlu1 %v5815_v41  ;;  %v8430_v33 = vpop.eup %8429  ;;  %8455 = vrcp.f32 %v4252_v11  ;;  %v6290_v8 = vld [vmem:[#allocation2 + $0x308] sm:$0xff]  ;;  %v5967_v16 = vadd.f32 %v5685_v34, %v5327_v20  ;;  %v4255_v7 = vadd.f32 1.0, %v8428_v57  ;;  %v5818_v11 = vadd.f32 %v5196_v3, %v5195_v42  ;;  %v14345_v20 = vld [vmem:[#allocation86_spill] sm:$0xff] }
 0x405   : > { %v8432_v45 = vpop.eup %8431  ;;  %8457 = vrcp.f32 %v4258_v62  ;;  %6450 = vst.msk [vmem:[%s11904_s19 + $0x308] sm:$0xff] %vm228_vm1, %v6290_v8  ;;  %v4261_v13 = vadd.f32 1.0, %v8430_v33  ;;  %v5200_v14 = vmul.f32 %v13027_v25, %v14343_v43  ;;  %v14344_v62 = vld [vmem:[#allocation89_spill] sm:$0xff]  ;;  %v5827_v47 = vadd.f32 %v5202_v63, %v5201_v55  ;;  %v14347_v42 = vld [vmem:[#allocation16_spill] sm:$0xff]  ;;  %v5301_v63 = vld [vmem:[#allocation2 + $0x240] sm:$0xff] }
 0x406   : > { %v8434_v21 = vpop.eup %8433  ;;  %8459 = vrcp.f32 %v4251_v32  ;;  %6128 = vst.msk [vmem:[#allocation2 + $0x310] sm:$0xff] %vm228_vm1, %v5967_v16  ;;  %v5206_v41 = vmul.f32 %v13088_v30, %v14344_v62  ;;  %v4260_v48 = vadd.f32 1.0, %v8432_v45  ;;  %v5199_v57 = vmul.f32 %v13015_v12, %v14345_v20  ;;  %v5328_v30 = vld [vmem:[#allocation2 + $0x318] sm:$0xff]  ;;  %v14349_v55 = vld [vmem:[#allocation41_spill] sm:$0xff]  ;;  %v5329_v62 = vld [vmem:[#allocation2 + $0x320] sm:$0xff] }
 0x407   : > { %v8436_v39 = vpop.eup %8435  ;;  %8461 = vrcp.f32 %v4257_v17  ;;  %5813 = vadd.xlane.f32.xlu0 %v5812_v0  ;;  %v5604_v4 = vpop.xlane.xlu0 %5603  ;;  %v4266_v35 = vadd.f32 1.0, %v8434_v21  ;;  %v5205_v3 = vmul.f32 %v13071_v27, %v14346_v50  ;;  %v5204_v12 = vmul.f32 %v13061_v5, %v14347_v42  ;;  %v14348_v16 = vld [vmem:[#allocation6_spill] sm:$0xff] }
 0x408   : > { %5822 = vadd.xlane.f32.xlu1 %v5821_v23  ;;  %v8438_v51 = vpop.eup %8437  ;;  %8463 = vrcp.f32 %v4256_v44  ;;  %v5940_v46 = vadd.f32 %v5604_v4, %v5300_v40  ;;  %v4259_v25 = vadd.f32 1.0, %v8436_v39  ;;  %v5824_v44 = vadd.f32 %v5200_v14, %v5199_v57 }
 0x409   : > { %v8440_v56 = vpop.eup %8439  ;;  %8465 = vrcp.f32 %v4262_v6  ;;  %v6263_v17 = vld [vmem:[#allocation2 + $0x230] sm:$0xff]  ;;  %v4265_v33 = vadd.f32 1.0, %v8438_v51  ;;  %v5833_v27 = vadd.f32 %v5206_v41, %v5205_v3  ;;  %v5203_v21 = vmul.f32 %v13049_v2, %v14348_v16 }
 0x40a   : > { %v8442_v32 = vpop.eup %8441  ;;  %8467 = vrcp.f32 %v4255_v7  ;;  %6423 = vst.msk [vmem:[%s11904_s19 + $0x230] sm:$0xff] %vm228_vm1, %v6263_v17  ;;  %6101 = vst.msk [vmem:[#allocation2 + $0x238] sm:$0xff] %vm228_vm1, %v5940_v46  ;;  %v5210_v45 = vmul.f32 %v8440_v56, %v12897_v61 }
 0x40b   : > { %v8444_v0 = vpop.eup %8443  ;;  %8469 = vrcp.f32 %v4261_v13  ;;  %5819 = vadd.xlane.f32.xlu0 %v5818_v11  ;;  %v5688_v23 = vpop.xlane.xlu0 %5687  ;;  %v4264_v19 = vadd.f32 1.0, %v8442_v32  ;;  %v5208_v13 = vmul.f32 %v13118_v31, %v14349_v55  ;;  %v5830_v11 = vadd.f32 %v5204_v12, %v5203_v21 }
 0x40c   : > { %5828 = vadd.xlane.f32.xlu1 %v5827_v47  ;;  %v8446_v28 = vpop.eup %8445  ;;  %8471 = vrcp.f32 %v4260_v48  ;;  %v5968_v6 = vadd.f32 %v5688_v23, %v5328_v30  ;;  %v5209_v5 = vmul.f32 %v8444_v0, %v12886_v37  ;;  %v14350_v48 = vld [vmem:[#allocation125_spill] sm:$0xff] }
 0x40d   : > { %v8448_v34 = vpop.eup %8447  ;;  %8473 = vrcp.f32 %v4266_v35  ;;  %v6291_v7 = vld [vmem:[#allocation2 + $0x310] sm:$0xff]  ;;  %v4263_v39 = vadd.f32 1.0, %v8446_v28  ;;  %v5607_v61 = vpop.xlane.xlu1 %5606  ;;  %v5207_v4 = vmul.f32 %v13096_v38, %v14350_v48 }
 0x40e   : > { %v8450_v8 = vpop.eup %8449  ;;  %8475 = vrcp.f32 %v4259_v25  ;;  %6451 = vst.msk [vmem:[%s11904_s19 + $0x310] sm:$0xff] %vm228_vm1, %v6291_v7  ;;  %6129 = vst.msk [vmem:[#allocation2 + $0x318] sm:$0xff] %vm228_vm1, %v5968_v6  ;;  %v5941_v2 = vadd.f32 %v5607_v61, %v5301_v63  ;;  %v5214_v43 = vmul.f32 %v8448_v34, %v12931_v52  ;;  %v5839_v14 = vadd.f32 %v5210_v45, %v5209_v5  ;;  %v5302_v25 = vld [vmem:[#allocation2 + $0x248] sm:$0xff] }
 0x40f   : > { %v8452_v40 = vpop.eup %8451  ;;  %8477 = vrcp.f32 %v4265_v33  ;;  %5825 = vadd.xlane.f32.xlu0 %v5824_v44  ;;  %v4268_v37 = vadd.f32 1.0, %v8450_v8  ;;  %v5836_v32 = vadd.f32 %v5208_v13, %v5207_v4 }
 0x410   : > { %5834 = vadd.xlane.f32.xlu1 %v5833_v27  ;;  %v8454_v29 = vpop.eup %8453  ;;  %8479 = vrcp.f32 %v4264_v19  ;;  %6102 = vst.msk [vmem:[#allocation2 + $0x240] sm:$0xff] %vm228_vm1, %v5941_v2  ;;  %v5213_v31 = vmul.f32 %v8452_v40, %v12943_v22 }
 0x411   : > { %v8456_v51 = vpop.eup %8455  ;;  %v6264_v56 = vld [vmem:[#allocation2 + $0x238] sm:$0xff]  ;;  %8481 = vrcp.f32 %v4263_v39  ;;  %v4267_v47 = vadd.f32 1.0, %v8454_v29  ;;  %v5691_v52 = vpop.xlane.xlu1 %5690  ;;  %v5303_v39 = vld [vmem:[#allocation2 + $0x250] sm:$0xff]  ;;  %v14351_v29 = vld [vmem:[#allocation23_spill] sm:$0xff] }
 0x412   : > { %v8458_v41 = vpop.eup %8457  ;;  %6424 = vst.msk [vmem:[%s11904_s19 + $0x238] sm:$0xff] %vm228_vm1, %v6264_v56  ;;  %v5969_v20 = vadd.f32 %v5691_v52, %v5329_v62  ;;  %v5212_v38 = vmul.f32 %v8456_v51, %v12921_v10  ;;  %8483 = vrcp.f32 %v4268_v37  ;;  %v5845_v3 = vadd.f32 %v5214_v43, %v5213_v31  ;;  %v5331_v43 = vld [vmem:[#allocation2 + $0x330] sm:$0xff]  ;;  %v5304_v56 = vld [vmem:[#allocation2 + $0x258] sm:$0xff] }
 0x413   : > { %v8460_v35 = vpop.eup %8459  ;;  %5831 = vadd.xlane.f32.xlu0 %v5830_v11  ;;  %v5218_v50 = vmul.f32 %v8458_v41, %v12971_v58  ;;  %8485 = vrcp.f32 %v4267_v47  ;;  %v14352_v37 = vld [vmem:[#allocation21_spill] sm:$0xff] }
 0x414   : > { %5840 = vadd.xlane.f32.xlu1 %v5839_v14  ;;  %v8462_v46 = vpop.eup %8461  ;;  %6130 = vst.msk [vmem:[#allocation2 + $0x320] sm:$0xff] %vm228_vm1, %v5969_v20  ;;  %v5211_v0 = vmul.f32 %v8460_v35, %v12905_v54  ;;  %v5330_v54 = vld [vmem:[#allocation2 + $0x328] sm:$0xff]  ;;  %v5305_v20 = vld [vmem:[#allocation2 + $0x260] sm:$0xff] }
 0x415   : > { %v8464_v57 = vpop.eup %8463  ;;  %v6292_v17 = vld [vmem:[#allocation2 + $0x318] sm:$0xff]  ;;  %v5217_v33 = vmul.f32 %v8462_v46, %v12987_v49  ;;  %v5610_v10 = vpop.xlane.xlu0 %5609 }
 0x416   : > { %v8466_v22 = vpop.eup %8465  ;;  %6452 = vst.msk [vmem:[%s11904_s19 + $0x318] sm:$0xff] %vm228_vm1, %v6292_v17  ;;  %v5942_v28 = vadd.f32 %v5610_v10, %v5302_v25  ;;  %v5216_v12 = vmul.f32 %v8464_v57, %v12965_v36  ;;  %v5842_v27 = vadd.f32 %v5212_v38, %v5211_v0 }
 0x417   : > { %v8468_v30 = vpop.eup %8467  ;;  %5837 = vadd.xlane.f32.xlu0 %v5836_v32  ;;  %v5222_v44 = vmul.f32 %v8466_v22, %v13005_v15  ;;  %v5851_v23 = vadd.f32 %v5218_v50, %v5217_v33  ;;  %v6265_v34 = vld [vmem:[#allocation2 + $0x240] sm:$0xff]  ;;  %v5332_v32 = vld [vmem:[#allocation2 + $0x338] sm:$0xff] }
 0x418   : > { %5846 = vadd.xlane.f32.xlu1 %v5845_v3  ;;  %v8470_v58 = vpop.eup %8469  ;;  %6425 = vst.msk [vmem:[%s11904_s19 + $0x240] sm:$0xff] %vm228_vm1, %v6265_v34  ;;  %6103 = vst.msk [vmem:[#allocation2 + $0x248] sm:$0xff] %vm228_vm1, %v5942_v28  ;;  %v5215_v19 = vmul.f32 %v8468_v30, %v12954_v26  ;;  %v5333_v3 = vld [vmem:[#allocation2 + $0x340] sm:$0xff]  ;;  %v5306_v30 = vld [vmem:[#allocation2 + $0x268] sm:$0xff] }
 0x419   : > { %v8472_v42 = vpop.eup %8471  ;;  %v5221_v63 = vmul.f32 %v8470_v58, %v13021_v18  ;;  %v5694_v36 = vpop.xlane.xlu0 %5693  ;;  %v5334_v28 = vld [vmem:[#allocation2 + $0x348] sm:$0xff] }
 0x41a   : > { %v8474_v45 = vpop.eup %8473  ;;  %v5970_v15 = vadd.f32 %v5694_v36, %v5330_v54  ;;  %v5220_v8 = vmul.f32 %v8472_v42, %v13031_v59  ;;  %v5848_v21 = vadd.f32 %v5216_v12, %v5215_v19  ;;  %v5308_v36 = vld [vmem:[#allocation2 + $0x278] sm:$0xff] }
 0x41b   : > { %v8476_v49 = vpop.eup %8475  ;;  %5843 = vadd.xlane.f32.xlu0 %v5842_v27  ;;  %v5226_v16 = vmul.f32 %v8474_v45, %v13039_v9  ;;  %v5857_v7 = vadd.f32 %v5222_v44, %v5221_v63  ;;  %v6293_v40 = vld [vmem:[#allocation2 + $0x320] sm:$0xff]  ;;  %v5307_v27 = vld [vmem:[#allocation2 + $0x270] sm:$0xff] }
 0x41c   : > { %5852 = vadd.xlane.f32.xlu1 %v5851_v23  ;;  %v8478_v6 = vpop.eup %8477  ;;  %6453 = vst.msk [vmem:[%s11904_s19 + $0x320] sm:$0xff] %vm228_vm1, %v6293_v40  ;;  %6131 = vst.msk [vmem:[#allocation2 + $0x328] sm:$0xff] %vm228_vm1, %v5970_v15  ;;  %v5219_v26 = vmul.f32 %v8476_v49, %v13013_v24  ;;  %v5335_v45 = vld [vmem:[#allocation2 + $0x350] sm:$0xff]  ;;  %v5336_v40 = vld [vmem:[#allocation2 + $0x358] sm:$0xff] }
 0x41d   : > { %v8480_v5 = vpop.eup %8479  ;;  %v5225_v18 = vmul.f32 %v8478_v6, %v13056_v60  ;;  %v5337_v6 = vld [vmem:[#allocation2 + $0x360] sm:$0xff] }
 0x41e   : > { %v8482_v61 = vpop.eup %8481  ;;  %v5224_v9 = vmul.f32 %v8480_v5, %v14351_v29  ;;  %v5854_v55 = vadd.f32 %v5220_v8, %v5219_v26  ;;  %v5339_v5 = vld [vmem:[#allocation2 + $0x370] sm:$0xff]  ;;  %v5338_v29 = vld [vmem:[#allocation2 + $0x368] sm:$0xff] }
 0x41f   : > { %5849 = vadd.xlane.f32.xlu0 %v5848_v21  ;;  %v5613_v59 = vpop.xlane.xlu1 %5612  ;;  %v5863_v13 = vadd.f32 %v5226_v16, %v5225_v18  ;;  %v6266_v11 = vld [vmem:[#allocation2 + $0x248] sm:$0xff]  ;;  %v8484_v51 = vpop.eup %8483  ;;  %v5223_v14 = vmul.f32 %v8482_v61, %v14352_v37 }
 0x420   : > { %5858 = vadd.xlane.f32.xlu1 %v5857_v7  ;;  %v5943_v2 = vadd.f32 %v5613_v59, %v5303_v39  ;;  %6426 = vst.msk [vmem:[%s11904_s19 + $0x248] sm:$0xff] %vm228_vm1, %v6266_v11  ;;  %v8486_v24 = vpop.eup %8485  ;;  %v5228_v62 = vmul.f32 %v8484_v51, %v13094_v1  ;;  %v5340_v51 = vld [vmem:[#allocation2 + $0x378] sm:$0xff] }
 0x421   : > { %v5860_v41 = vadd.f32 %v5224_v9, %v5223_v14  ;;  %v5227_v35 = vmul.f32 %v8486_v24, %v13100_v53  ;;  %v5341_v9 = vld [vmem:[#allocation2 + $0x380] sm:$0xff]  ;;  %v5343_v14 = vld [vmem:[#allocation2 + $0x390] sm:$0xff] }
 0x422   : > { %6104 = vst.msk [vmem:[#allocation2 + $0x250] sm:$0xff] %vm228_vm1, %v5943_v2 }
 0x423   : > { %5855 = vadd.xlane.f32.xlu0 %v5854_v55  ;;  %v6294_v48 = vld [vmem:[#allocation2 + $0x328] sm:$0xff]  ;;  %v5866_v47 = vadd.f32 %v5228_v62, %v5227_v35  ;;  %v5345_v35 = vld [vmem:[#allocation2 + $0x3a0] sm:$0xff] }
 0x424   : > { %5864 = vadd.xlane.f32.xlu1 %v5863_v13  ;;  %v5697_v60 = vpop.xlane.xlu1 %5696  ;;  %6454 = vst.msk [vmem:[%s11904_s19 + $0x328] sm:$0xff] %vm228_vm1, %v6294_v48  ;;  %v5342_v48 = vld [vmem:[#allocation2 + $0x388] sm:$0xff] }
 0x425   : > { %v5971_v4 = vadd.f32 %v5697_v60, %v5331_v43 }
 0x426   : > { %v5616_v31 = vpop.xlane.xlu0 %5615 }
 0x427   : > { %5861 = vadd.xlane.f32.xlu0 %v5860_v41  ;;  %6132 = vst.msk [vmem:[#allocation2 + $0x330] sm:$0xff] %vm228_vm1, %v5971_v4  ;;  %v5944_v52 = vadd.f32 %v5616_v31, %v5304_v56 }
 0x429   : > { %v6267_v46 = vld [vmem:[#allocation2 + $0x250] sm:$0xff]  ;;  %6105 = vst.msk [vmem:[#allocation2 + $0x258] sm:$0xff] %vm228_vm1, %v5944_v52 }
 0x42a   : > { %6427 = vst.msk [vmem:[%s11904_s19 + $0x250] sm:$0xff] %vm228_vm1, %v6267_v46 }
 0x42b   : > { %5867 = vadd.xlane.f32.xlu0 %v5866_v47 }
 0x42d   : > { %v5700_v1 = vpop.xlane.xlu0 %5699 }
 0x42e   : > { %v5972_v57 = vadd.f32 %v5700_v1, %v5332_v32  ;;  %v6295_v38 = vld [vmem:[#allocation2 + $0x330] sm:$0xff]  ;;  %v5619_v53 = vpop.xlane.xlu1 %5618  ;;  %v5344_v32 = vld [vmem:[#allocation2 + $0x398] sm:$0xff] }
 0x42f   : > { %6455 = vst.msk [vmem:[%s11904_s19 + $0x330] sm:$0xff] %vm228_vm1, %v6295_v38  ;;  %v5945_v50 = vadd.f32 %v5619_v53, %v5305_v20 }
 0x430   : > { %6133 = vst.msk [vmem:[#allocation2 + $0x338] sm:$0xff] %vm228_vm1, %v5972_v57  ;;  %v6268_v25 = vld [vmem:[#allocation2 + $0x258] sm:$0xff]  ;;  %v5347_v57 = vld [vmem:[#allocation2 + $0x3b0] sm:$0xff] }
 0x431   : > { %6106 = vst.msk [vmem:[#allocation2 + $0x260] sm:$0xff] %vm228_vm1, %v5945_v50  ;;  %6428 = vst.msk [vmem:[%s11904_s19 + $0x258] sm:$0xff] %vm228_vm1, %v6268_v25  ;;  %v5346_v25 = vld [vmem:[#allocation2 + $0x3a8] sm:$0xff] }
 0x432   : > { %v5703_v22 = vpop.xlane.xlu1 %5702 }
 0x433   : > { %v5973_v17 = vadd.f32 %v5703_v22, %v5333_v3 }
 0x435   : > { %6134 = vst.msk [vmem:[#allocation2 + $0x340] sm:$0xff] %vm228_vm1, %v5973_v17 }
 0x436   : > { %v5622_v33 = vpop.xlane.xlu0 %5621 }
 0x437   : > { %v6296_v0 = vld [vmem:[#allocation2 + $0x338] sm:$0xff]  ;;  %v5946_v10 = vadd.f32 %v5622_v33, %v5306_v30  ;;  %v5349_v30 = vld [vmem:[#allocation2 + $0x3c0] sm:$0xff] }
 0x438   : > { %6456 = vst.msk [vmem:[%s11904_s19 + $0x338] sm:$0xff] %vm228_vm1, %v6296_v0  ;;  %v6269_v58 = vld [vmem:[#allocation2 + $0x260] sm:$0xff] }
 0x439   : > { %6429 = vst.msk [vmem:[%s11904_s19 + $0x260] sm:$0xff] %vm228_vm1, %v6269_v58  ;;  %6107 = vst.msk [vmem:[#allocation2 + $0x268] sm:$0xff] %vm228_vm1, %v5946_v10 }
 0x43a   : > { %v5706_v42 = vpop.xlane.xlu0 %5705 }
 0x43b   : > { %v5974_v12 = vadd.f32 %v5706_v42, %v5334_v28  ;;  %v5348_v28 = vld [vmem:[#allocation2 + $0x3b8] sm:$0xff] }
 0x43c   : > { %v6297_v44 = vld [vmem:[#allocation2 + $0x340] sm:$0xff] }
 0x43d   : > { %6457 = vst.msk [vmem:[%s11904_s19 + $0x340] sm:$0xff] %vm228_vm1, %v6297_v44  ;;  %6135 = vst.msk [vmem:[#allocation2 + $0x348] sm:$0xff] %vm228_vm1, %v5974_v12  ;;  %v5351_v44 = vld [vmem:[#allocation2 + $0x3d0] sm:$0xff] }
 0x440   : > { %v5625_v23 = vpop.xlane.xlu1 %5624  ;;  %v6270_v34 = vld [vmem:[#allocation2 + $0x268] sm:$0xff] }
 0x441   : > { %v5947_v54 = vadd.f32 %v5625_v23, %v5307_v27  ;;  %6430 = vst.msk [vmem:[%s11904_s19 + $0x268] sm:$0xff] %vm228_vm1, %v6270_v34 }
 0x443   : > { %6108 = vst.msk [vmem:[#allocation2 + $0x270] sm:$0xff] %vm228_vm1, %v5947_v54 }
 0x444   : > { %v5709_v49 = vpop.xlane.xlu1 %5708  ;;  %v6298_v19 = vld [vmem:[#allocation2 + $0x348] sm:$0xff] }
 0x445   : > { %v5975_v63 = vadd.f32 %v5709_v49, %v5335_v45  ;;  %6458 = vst.msk [vmem:[%s11904_s19 + $0x348] sm:$0xff] %vm228_vm1, %v6298_v19  ;;  %v5350_v45 = vld [vmem:[#allocation2 + $0x3c8] sm:$0xff] }
 0x447   : > { %6136 = vst.msk [vmem:[#allocation2 + $0x350] sm:$0xff] %vm228_vm1, %v5975_v63  ;;  %v5353_v63 = vld [vmem:[#allocation2 + $0x3e0] sm:$0xff] }
 0x448   : > { %v5628_v15 = vpop.xlane.xlu0 %5627  ;;  %v5715_v8 = vpop.xlane.xlu1 %5714 }
 0x449   : > { %v5948_v16 = vadd.f32 %v5628_v15, %v5308_v36  ;;  %v5977_v21 = vadd.f32 %v5715_v8, %v5337_v6 }
 0x44a   : > { %v6271_v7 = vld [vmem:[#allocation2 + $0x270] sm:$0xff] }
 0x44b   : > { %6431 = vst.msk [vmem:[%s11904_s19 + $0x270] sm:$0xff] %vm228_vm1, %v6271_v7  ;;  %6109 = vst.msk [vmem:[#allocation2 + $0x278] sm:$0xff] %vm228_vm1, %v5948_v16  ;;  %v5352_v16 = vld [vmem:[#allocation2 + $0x3d8] sm:$0xff] }
 0x44c   : > { %6138 = vst.msk [vmem:[#allocation2 + $0x360] sm:$0xff] %vm228_vm1, %v5977_v21  ;;  %v5712_v39 = vpop.xlane.xlu0 %5711 }
 0x44d   : > { %v5721_v26 = vpop.xlane.xlu1 %5720  ;;  %v5976_v18 = vadd.f32 %v5712_v39, %v5336_v40  ;;  %v5355_v40 = vld [vmem:[#allocation2 + $0x3f0] sm:$0xff] }
 0x44e   : > { %v5979_v61 = vadd.f32 %v5721_v26, %v5339_v5  ;;  %v6299_v59 = vld [vmem:[#allocation2 + $0x350] sm:$0xff] }
 0x44f   : > { %6459 = vst.msk [vmem:[%s11904_s19 + $0x350] sm:$0xff] %vm228_vm1, %v6299_v59  ;;  %6137 = vst.msk [vmem:[#allocation2 + $0x358] sm:$0xff] %vm228_vm1, %v5976_v18 }
 0x450   : > { %6140 = vst.msk [vmem:[#allocation2 + $0x370] sm:$0xff] %vm228_vm1, %v5979_v61  ;;  %v5718_v55 = vpop.xlane.xlu0 %5717  ;;  %v5354_v61 = vld [vmem:[#allocation2 + $0x3e8] sm:$0xff] }
 0x451   : > { %v5727_v13 = vpop.xlane.xlu1 %5726  ;;  %v5978_v11 = vadd.f32 %v5718_v55, %v5338_v29 }
 0x452   : > { %v5981_v2 = vadd.f32 %v5727_v13, %v5341_v9  ;;  %v6272_v43 = vld [vmem:[#allocation2 + $0x278] sm:$0xff]  ;;  %v5357_v9 = vld [vmem:[#allocation2 + $0x400] sm:$0xff] }
 0x453   : > { %v6301_v37 = vld [vmem:[#allocation2 + $0x360] sm:$0xff]  ;;  %6432 = vst.msk [vmem:[%s11904_s19 + $0x278] sm:$0xff] %vm228_vm1, %v6272_v43  ;;  %6139 = vst.msk [vmem:[#allocation2 + $0x368] sm:$0xff] %vm228_vm1, %v5978_v11 }
 0x454   : > { %6461 = vst.msk [vmem:[%s11904_s19 + $0x360] sm:$0xff] %vm228_vm1, %v6301_v37  ;;  %6142 = vst.msk [vmem:[#allocation2 + $0x380] sm:$0xff] %vm228_vm1, %v5981_v2  ;;  %v5724_v24 = vpop.xlane.xlu0 %5723 }
 0x455   : > { %v5733_v60 = vpop.xlane.xlu1 %5732  ;;  %v5980_v62 = vadd.f32 %v5724_v24, %v5340_v51  ;;  %v5356_v51 = vld [vmem:[#allocation2 + $0x3f8] sm:$0xff] }
 0x456   : > { %v5983_v41 = vadd.f32 %v5733_v60, %v5343_v14  ;;  %v6300_v4 = vld [vmem:[#allocation2 + $0x358] sm:$0xff]  ;;  %v5359_v14 = vld [vmem:[#allocation2 + $0x410] sm:$0xff] }
 0x457   : > { %v6303_v56 = vld [vmem:[#allocation2 + $0x370] sm:$0xff]  ;;  %6460 = vst.msk [vmem:[%s11904_s19 + $0x358] sm:$0xff] %vm228_vm1, %v6300_v4  ;;  %6141 = vst.msk [vmem:[#allocation2 + $0x378] sm:$0xff] %vm228_vm1, %v5980_v62 }
 0x458   : > { %6463 = vst.msk [vmem:[%s11904_s19 + $0x370] sm:$0xff] %vm228_vm1, %v6303_v56  ;;  %6144 = vst.msk [vmem:[#allocation2 + $0x390] sm:$0xff] %vm228_vm1, %v5983_v41  ;;  %v5730_v31 = vpop.xlane.xlu0 %5729 }
 0x459   : > { %v5739_v47 = vpop.xlane.xlu1 %5738  ;;  %v5982_v52 = vadd.f32 %v5730_v31, %v5342_v48  ;;  %v5358_v48 = vld [vmem:[#allocation2 + $0x408] sm:$0xff] }
 0x45a   : > { %v5985_v46 = vadd.f32 %v5739_v47, %v5345_v35  ;;  %v6302_v1 = vld [vmem:[#allocation2 + $0x368] sm:$0xff]  ;;  %v5361_v35 = vld [vmem:[#allocation2 + $0x420] sm:$0xff] }
 0x45b   : > { %v6305_v20 = vld [vmem:[#allocation2 + $0x380] sm:$0xff]  ;;  %6462 = vst.msk [vmem:[%s11904_s19 + $0x368] sm:$0xff] %vm228_vm1, %v6302_v1  ;;  %6143 = vst.msk [vmem:[#allocation2 + $0x388] sm:$0xff] %vm228_vm1, %v5982_v52 }
 0x45c   : > { %6465 = vst.msk [vmem:[%s11904_s19 + $0x380] sm:$0xff] %vm228_vm1, %v6305_v20  ;;  %6146 = vst.msk [vmem:[#allocation2 + $0x3a0] sm:$0xff] %vm228_vm1, %v5985_v46  ;;  %v5736_v38 = vpop.xlane.xlu0 %5735 }
 0x45d   : > { %v5745_v53 = vpop.xlane.xlu1 %5744  ;;  %v5984_v50 = vadd.f32 %v5736_v38, %v5344_v32  ;;  %v5360_v32 = vld [vmem:[#allocation2 + $0x418] sm:$0xff] }
 0x45e   : > { %v5987_v3 = vadd.f32 %v5745_v53, %v5347_v57  ;;  %v6304_v22 = vld [vmem:[#allocation2 + $0x378] sm:$0xff]  ;;  %v5363_v57 = vld [vmem:[#allocation2 + $0x430] sm:$0xff] }
 0x45f   : > { %v6307_v17 = vld [vmem:[#allocation2 + $0x390] sm:$0xff]  ;;  %6464 = vst.msk [vmem:[%s11904_s19 + $0x378] sm:$0xff] %vm228_vm1, %v6304_v22  ;;  %6145 = vst.msk [vmem:[#allocation2 + $0x398] sm:$0xff] %vm228_vm1, %v5984_v50 }
 0x460   : > { %6467 = vst.msk [vmem:[%s11904_s19 + $0x390] sm:$0xff] %vm228_vm1, %v6307_v17  ;;  %6148 = vst.msk [vmem:[#allocation2 + $0x3b0] sm:$0xff] %vm228_vm1, %v5987_v3  ;;  %v5742_v0 = vpop.xlane.xlu0 %5741 }
 0x461   : > { %v5751_v33 = vpop.xlane.xlu1 %5750  ;;  %v5986_v10 = vadd.f32 %v5742_v0, %v5346_v25  ;;  %v5362_v25 = vld [vmem:[#allocation2 + $0x428] sm:$0xff] }
 0x462   : > { %v5989_v58 = vadd.f32 %v5751_v33, %v5349_v30  ;;  %v6306_v42 = vld [vmem:[#allocation2 + $0x388] sm:$0xff]  ;;  %v5365_v30 = vld [vmem:[#allocation2 + $0x440] sm:$0xff] }
 0x463   : > { %v6309_v12 = vld [vmem:[#allocation2 + $0x3a0] sm:$0xff]  ;;  %6466 = vst.msk [vmem:[%s11904_s19 + $0x388] sm:$0xff] %vm228_vm1, %v6306_v42  ;;  %6147 = vst.msk [vmem:[#allocation2 + $0x3a8] sm:$0xff] %vm228_vm1, %v5986_v10 }
 0x464   : > { %6469 = vst.msk [vmem:[%s11904_s19 + $0x3a0] sm:$0xff] %vm228_vm1, %v6309_v12  ;;  %6150 = vst.msk [vmem:[#allocation2 + $0x3c0] sm:$0xff] %vm228_vm1, %v5989_v58  ;;  %v5748_v27 = vpop.xlane.xlu0 %5747 }
 0x465   : > { %v5757_v23 = vpop.xlane.xlu1 %5756  ;;  %v5988_v34 = vadd.f32 %v5748_v27, %v5348_v28  ;;  %v5364_v28 = vld [vmem:[#allocation2 + $0x438] sm:$0xff] }
 0x466   : > { %v5991_v54 = vadd.f32 %v5757_v23, %v5351_v44  ;;  %v6308_v49 = vld [vmem:[#allocation2 + $0x398] sm:$0xff]  ;;  %v5367_v44 = vld [vmem:[#allocation2 + $0x450] sm:$0xff] }
 0x467   : > { %v6311_v19 = vld [vmem:[#allocation2 + $0x3b0] sm:$0xff]  ;;  %6468 = vst.msk [vmem:[%s11904_s19 + $0x398] sm:$0xff] %vm228_vm1, %v6308_v49  ;;  %6149 = vst.msk [vmem:[#allocation2 + $0x3b8] sm:$0xff] %vm228_vm1, %v5988_v34 }
 0x468   : > { %6471 = vst.msk [vmem:[%s11904_s19 + $0x3b0] sm:$0xff] %vm228_vm1, %v6311_v19  ;;  %6152 = vst.msk [vmem:[#allocation2 + $0x3d0] sm:$0xff] %vm228_vm1, %v5991_v54  ;;  %v5754_v36 = vpop.xlane.xlu0 %5753 }
 0x469   : > { %v5763_v6 = vpop.xlane.xlu1 %5762  ;;  %v5990_v15 = vadd.f32 %v5754_v36, %v5350_v45  ;;  %v5366_v45 = vld [vmem:[#allocation2 + $0x448] sm:$0xff] }
 0x46a   : > { %v5993_v8 = vadd.f32 %v5763_v6, %v5353_v63  ;;  %v6310_v21 = vld [vmem:[#allocation2 + $0x3a8] sm:$0xff]  ;;  %v5369_v63 = vld [vmem:[#allocation2 + $0x460] sm:$0xff] }
 0x46b   : > { %v6313_v7 = vld [vmem:[#allocation2 + $0x3c0] sm:$0xff]  ;;  %6470 = vst.msk [vmem:[%s11904_s19 + $0x3a8] sm:$0xff] %vm228_vm1, %v6310_v21  ;;  %6151 = vst.msk [vmem:[#allocation2 + $0x3c8] sm:$0xff] %vm228_vm1, %v5990_v15 }
 0x46c   : > { %6473 = vst.msk [vmem:[%s11904_s19 + $0x3c0] sm:$0xff] %vm228_vm1, %v6313_v7  ;;  %6154 = vst.msk [vmem:[#allocation2 + $0x3e0] sm:$0xff] %vm228_vm1, %v5993_v8  ;;  %v5760_v5 = vpop.xlane.xlu0 %5759 }
 0x46d   : > { %v5769_v39 = vpop.xlane.xlu1 %5768  ;;  %v5992_v26 = vadd.f32 %v5760_v5, %v5352_v16  ;;  %v5368_v16 = vld [vmem:[#allocation2 + $0x458] sm:$0xff] }
 0x46e   : > { %v5995_v18 = vadd.f32 %v5769_v39, %v5355_v40  ;;  %v6312_v59 = vld [vmem:[#allocation2 + $0x3b8] sm:$0xff]  ;;  %v5371_v40 = vld [vmem:[#allocation2 + $0x470] sm:$0xff] }
 0x46f   : > { %v6315_v29 = vld [vmem:[#allocation2 + $0x3d0] sm:$0xff]  ;;  %6472 = vst.msk [vmem:[%s11904_s19 + $0x3b8] sm:$0xff] %vm228_vm1, %v6312_v59  ;;  %6153 = vst.msk [vmem:[#allocation2 + $0x3d8] sm:$0xff] %vm228_vm1, %v5992_v26 }
 0x470   : > { %6475 = vst.msk [vmem:[%s11904_s19 + $0x3d0] sm:$0xff] %vm228_vm1, %v6315_v29  ;;  %6156 = vst.msk [vmem:[#allocation2 + $0x3f0] sm:$0xff] %vm228_vm1, %v5995_v18  ;;  %v5766_v55 = vpop.xlane.xlu0 %5765 }
 0x471   : > { %v5775_v13 = vpop.xlane.xlu1 %5774  ;;  %v5994_v11 = vadd.f32 %v5766_v55, %v5354_v61  ;;  %v5370_v61 = vld [vmem:[#allocation2 + $0x468] sm:$0xff] }
 0x472   : > { %v5997_v2 = vadd.f32 %v5775_v13, %v5357_v9  ;;  %v6314_v43 = vld [vmem:[#allocation2 + $0x3c8] sm:$0xff]  ;;  %v5373_v9 = vld [vmem:[#allocation2 + $0x480] sm:$0xff] }
 0x473   : > { %v6317_v37 = vld [vmem:[#allocation2 + $0x3e0] sm:$0xff]  ;;  %6474 = vst.msk [vmem:[%s11904_s19 + $0x3c8] sm:$0xff] %vm228_vm1, %v6314_v43  ;;  %6155 = vst.msk [vmem:[#allocation2 + $0x3e8] sm:$0xff] %vm228_vm1, %v5994_v11 }
 0x474   : > { %6477 = vst.msk [vmem:[%s11904_s19 + $0x3e0] sm:$0xff] %vm228_vm1, %v6317_v37  ;;  %6158 = vst.msk [vmem:[#allocation2 + $0x400] sm:$0xff] %vm228_vm1, %v5997_v2  ;;  %v5772_v24 = vpop.xlane.xlu0 %5771 }
 0x475   : > { %v5781_v60 = vpop.xlane.xlu1 %5780  ;;  %v5996_v62 = vadd.f32 %v5772_v24, %v5356_v51  ;;  %v5372_v51 = vld [vmem:[#allocation2 + $0x478] sm:$0xff] }
 0x476   : > { %v5999_v41 = vadd.f32 %v5781_v60, %v5359_v14  ;;  %v6316_v4 = vld [vmem:[#allocation2 + $0x3d8] sm:$0xff]  ;;  %v5375_v14 = vld [vmem:[#allocation2 + $0x490] sm:$0xff] }
 0x477   : > { %v6319_v56 = vld [vmem:[#allocation2 + $0x3f0] sm:$0xff]  ;;  %6476 = vst.msk [vmem:[%s11904_s19 + $0x3d8] sm:$0xff] %vm228_vm1, %v6316_v4  ;;  %6157 = vst.msk [vmem:[#allocation2 + $0x3f8] sm:$0xff] %vm228_vm1, %v5996_v62 }
 0x478   : > { %6479 = vst.msk [vmem:[%s11904_s19 + $0x3f0] sm:$0xff] %vm228_vm1, %v6319_v56  ;;  %6160 = vst.msk [vmem:[#allocation2 + $0x410] sm:$0xff] %vm228_vm1, %v5999_v41  ;;  %v5778_v31 = vpop.xlane.xlu0 %5777 }
 0x479   : > { %v5787_v47 = vpop.xlane.xlu1 %5786  ;;  %v5998_v52 = vadd.f32 %v5778_v31, %v5358_v48  ;;  %v5374_v48 = vld [vmem:[#allocation2 + $0x488] sm:$0xff] }
 0x47a   : > { %v6001_v46 = vadd.f32 %v5787_v47, %v5361_v35  ;;  %v6318_v1 = vld [vmem:[#allocation2 + $0x3e8] sm:$0xff]  ;;  %v5377_v35 = vld [vmem:[#allocation2 + $0x4a0] sm:$0xff] }
 0x47b   : > { %v6321_v20 = vld [vmem:[#allocation2 + $0x400] sm:$0xff]  ;;  %6478 = vst.msk [vmem:[%s11904_s19 + $0x3e8] sm:$0xff] %vm228_vm1, %v6318_v1  ;;  %6159 = vst.msk [vmem:[#allocation2 + $0x408] sm:$0xff] %vm228_vm1, %v5998_v52 }
 0x47c   : > { %6481 = vst.msk [vmem:[%s11904_s19 + $0x400] sm:$0xff] %vm228_vm1, %v6321_v20  ;;  %6162 = vst.msk [vmem:[#allocation2 + $0x420] sm:$0xff] %vm228_vm1, %v6001_v46  ;;  %v5784_v38 = vpop.xlane.xlu0 %5783 }
 0x47d   : > { %v5793_v53 = vpop.xlane.xlu1 %5792  ;;  %v6000_v50 = vadd.f32 %v5784_v38, %v5360_v32  ;;  %v5376_v32 = vld [vmem:[#allocation2 + $0x498] sm:$0xff] }
 0x47e   : > { %v6003_v3 = vadd.f32 %v5793_v53, %v5363_v57  ;;  %v6320_v22 = vld [vmem:[#allocation2 + $0x3f8] sm:$0xff]  ;;  %v5379_v57 = vld [vmem:[#allocation2 + $0x4b0] sm:$0xff] }
 0x47f   : > { %v6323_v17 = vld [vmem:[#allocation2 + $0x410] sm:$0xff]  ;;  %6480 = vst.msk [vmem:[%s11904_s19 + $0x3f8] sm:$0xff] %vm228_vm1, %v6320_v22  ;;  %6161 = vst.msk [vmem:[#allocation2 + $0x418] sm:$0xff] %vm228_vm1, %v6000_v50 }
 0x480   : > { %6483 = vst.msk [vmem:[%s11904_s19 + $0x410] sm:$0xff] %vm228_vm1, %v6323_v17  ;;  %6164 = vst.msk [vmem:[#allocation2 + $0x430] sm:$0xff] %vm228_vm1, %v6003_v3  ;;  %v5790_v0 = vpop.xlane.xlu0 %5789 }
 0x481   : > { %v5799_v33 = vpop.xlane.xlu1 %5798  ;;  %v6002_v10 = vadd.f32 %v5790_v0, %v5362_v25  ;;  %v5378_v25 = vld [vmem:[#allocation2 + $0x4a8] sm:$0xff] }
 0x482   : > { %v6005_v58 = vadd.f32 %v5799_v33, %v5365_v30  ;;  %v6322_v42 = vld [vmem:[#allocation2 + $0x408] sm:$0xff]  ;;  %v5381_v30 = vld [vmem:[#allocation2 + $0x4c0] sm:$0xff] }
 0x483   : > { %v6325_v12 = vld [vmem:[#allocation2 + $0x420] sm:$0xff]  ;;  %6482 = vst.msk [vmem:[%s11904_s19 + $0x408] sm:$0xff] %vm228_vm1, %v6322_v42  ;;  %6163 = vst.msk [vmem:[#allocation2 + $0x428] sm:$0xff] %vm228_vm1, %v6002_v10 }
 0x484   : > { %6485 = vst.msk [vmem:[%s11904_s19 + $0x420] sm:$0xff] %vm228_vm1, %v6325_v12  ;;  %6166 = vst.msk [vmem:[#allocation2 + $0x440] sm:$0xff] %vm228_vm1, %v6005_v58  ;;  %v5796_v27 = vpop.xlane.xlu0 %5795 }
 0x485   : > { %v5805_v23 = vpop.xlane.xlu1 %5804  ;;  %v6004_v34 = vadd.f32 %v5796_v27, %v5364_v28  ;;  %v5380_v28 = vld [vmem:[#allocation2 + $0x4b8] sm:$0xff] }
 0x486   : > { %v6007_v54 = vadd.f32 %v5805_v23, %v5367_v44  ;;  %v6324_v49 = vld [vmem:[#allocation2 + $0x418] sm:$0xff]  ;;  %v5383_v44 = vld [vmem:[#allocation2 + $0x4d0] sm:$0xff] }
 0x487   : > { %v6327_v19 = vld [vmem:[#allocation2 + $0x430] sm:$0xff]  ;;  %6484 = vst.msk [vmem:[%s11904_s19 + $0x418] sm:$0xff] %vm228_vm1, %v6324_v49  ;;  %6165 = vst.msk [vmem:[#allocation2 + $0x438] sm:$0xff] %vm228_vm1, %v6004_v34 }
 0x488   : > { %6487 = vst.msk [vmem:[%s11904_s19 + $0x430] sm:$0xff] %vm228_vm1, %v6327_v19  ;;  %6168 = vst.msk [vmem:[#allocation2 + $0x450] sm:$0xff] %vm228_vm1, %v6007_v54  ;;  %v5802_v36 = vpop.xlane.xlu0 %5801 }
 0x489   : > { %v5811_v6 = vpop.xlane.xlu1 %5810  ;;  %v6006_v15 = vadd.f32 %v5802_v36, %v5366_v45  ;;  %v5382_v45 = vld [vmem:[#allocation2 + $0x4c8] sm:$0xff] }
 0x48a   : > { %v6009_v8 = vadd.f32 %v5811_v6, %v5369_v63  ;;  %v6326_v21 = vld [vmem:[#allocation2 + $0x428] sm:$0xff]  ;;  %v5385_v63 = vld [vmem:[#allocation2 + $0x4e0] sm:$0xff] }
 0x48b   : > { %v6329_v7 = vld [vmem:[#allocation2 + $0x440] sm:$0xff]  ;;  %6486 = vst.msk [vmem:[%s11904_s19 + $0x428] sm:$0xff] %vm228_vm1, %v6326_v21  ;;  %6167 = vst.msk [vmem:[#allocation2 + $0x448] sm:$0xff] %vm228_vm1, %v6006_v15 }
 0x48c   : > { %6489 = vst.msk [vmem:[%s11904_s19 + $0x440] sm:$0xff] %vm228_vm1, %v6329_v7  ;;  %6170 = vst.msk [vmem:[#allocation2 + $0x460] sm:$0xff] %vm228_vm1, %v6009_v8  ;;  %v5808_v5 = vpop.xlane.xlu0 %5807 }
 0x48d   : > { %v5817_v39 = vpop.xlane.xlu1 %5816  ;;  %v6008_v26 = vadd.f32 %v5808_v5, %v5368_v16  ;;  %v5384_v16 = vld [vmem:[#allocation2 + $0x4d8] sm:$0xff] }
 0x48e   : > { %v6011_v18 = vadd.f32 %v5817_v39, %v5371_v40  ;;  %v6328_v59 = vld [vmem:[#allocation2 + $0x438] sm:$0xff]  ;;  %v5387_v40 = vld [vmem:[#allocation2 + $0x4f0] sm:$0xff] }
 0x48f   : > { %v6331_v29 = vld [vmem:[#allocation2 + $0x450] sm:$0xff]  ;;  %6488 = vst.msk [vmem:[%s11904_s19 + $0x438] sm:$0xff] %vm228_vm1, %v6328_v59  ;;  %6169 = vst.msk [vmem:[#allocation2 + $0x458] sm:$0xff] %vm228_vm1, %v6008_v26 }
 0x490   : > { %6491 = vst.msk [vmem:[%s11904_s19 + $0x450] sm:$0xff] %vm228_vm1, %v6331_v29  ;;  %6172 = vst.msk [vmem:[#allocation2 + $0x470] sm:$0xff] %vm228_vm1, %v6011_v18  ;;  %v5814_v55 = vpop.xlane.xlu0 %5813  ;;  %v5386_v29 = vld [vmem:[#allocation2 + $0x4e8] sm:$0xff] }
 0x491   : > { %v5823_v13 = vpop.xlane.xlu1 %5822  ;;  %v6010_v11 = vadd.f32 %v5814_v55, %v5370_v61 }
 0x492   : > { %v6013_v2 = vadd.f32 %v5823_v13, %v5373_v9  ;;  %v6330_v43 = vld [vmem:[#allocation2 + $0x448] sm:$0xff] }
 0x493   : > { %v6333_v37 = vld [vmem:[#allocation2 + $0x460] sm:$0xff]  ;;  %6490 = vst.msk [vmem:[%s11904_s19 + $0x448] sm:$0xff] %vm228_vm1, %v6330_v43  ;;  %6171 = vst.msk [vmem:[#allocation2 + $0x468] sm:$0xff] %vm228_vm1, %v6010_v11 }
 0x494   : > { %6493 = vst.msk [vmem:[%s11904_s19 + $0x460] sm:$0xff] %vm228_vm1, %v6333_v37  ;;  %6174 = vst.msk [vmem:[#allocation2 + $0x480] sm:$0xff] %vm228_vm1, %v6013_v2  ;;  %v5820_v24 = vpop.xlane.xlu0 %5819  ;;  %v5388_v2 = vld [vmem:[#allocation2 + $0x4f8] sm:$0xff] }
 0x495   : > { %v5829_v60 = vpop.xlane.xlu1 %5828  ;;  %v6012_v62 = vadd.f32 %v5820_v24, %v5372_v51 }
 0x496   : > { %v6015_v41 = vadd.f32 %v5829_v60, %v5375_v14  ;;  %v6332_v4 = vld [vmem:[#allocation2 + $0x458] sm:$0xff] }
 0x497   : > { %v6335_v56 = vld [vmem:[#allocation2 + $0x470] sm:$0xff]  ;;  %6492 = vst.msk [vmem:[%s11904_s19 + $0x458] sm:$0xff] %vm228_vm1, %v6332_v4  ;;  %6173 = vst.msk [vmem:[#allocation2 + $0x478] sm:$0xff] %vm228_vm1, %v6012_v62 }
 0x498   : > { %6495 = vst.msk [vmem:[%s11904_s19 + $0x470] sm:$0xff] %vm228_vm1, %v6335_v56  ;;  %6176 = vst.msk [vmem:[#allocation2 + $0x490] sm:$0xff] %vm228_vm1, %v6015_v41  ;;  %v5826_v31 = vpop.xlane.xlu0 %5825 }
 0x499   : > { %v5835_v47 = vpop.xlane.xlu1 %5834  ;;  %v6014_v52 = vadd.f32 %v5826_v31, %v5374_v48 }
 0x49a   : > { %v6017_v46 = vadd.f32 %v5835_v47, %v5377_v35  ;;  %v6334_v1 = vld [vmem:[#allocation2 + $0x468] sm:$0xff] }
 0x49b   : > { %v6337_v20 = vld [vmem:[#allocation2 + $0x480] sm:$0xff]  ;;  %6494 = vst.msk [vmem:[%s11904_s19 + $0x468] sm:$0xff] %vm228_vm1, %v6334_v1  ;;  %6175 = vst.msk [vmem:[#allocation2 + $0x488] sm:$0xff] %vm228_vm1, %v6014_v52 }
 0x49c   : > { %6497 = vst.msk [vmem:[%s11904_s19 + $0x480] sm:$0xff] %vm228_vm1, %v6337_v20  ;;  %6178 = vst.msk [vmem:[#allocation2 + $0x4a0] sm:$0xff] %vm228_vm1, %v6017_v46  ;;  %v5832_v38 = vpop.xlane.xlu0 %5831 }
 0x49d   : > { %v5841_v53 = vpop.xlane.xlu1 %5840  ;;  %v6016_v50 = vadd.f32 %v5832_v38, %v5376_v32 }
 0x49e   : > { %v6019_v3 = vadd.f32 %v5841_v53, %v5379_v57  ;;  %v6336_v22 = vld [vmem:[#allocation2 + $0x478] sm:$0xff] }
 0x49f   : > { %v6339_v17 = vld [vmem:[#allocation2 + $0x490] sm:$0xff]  ;;  %6496 = vst.msk [vmem:[%s11904_s19 + $0x478] sm:$0xff] %vm228_vm1, %v6336_v22  ;;  %6177 = vst.msk [vmem:[#allocation2 + $0x498] sm:$0xff] %vm228_vm1, %v6016_v50 }
 0x4a0   : > { %6499 = vst.msk [vmem:[%s11904_s19 + $0x490] sm:$0xff] %vm228_vm1, %v6339_v17  ;;  %6180 = vst.msk [vmem:[#allocation2 + $0x4b0] sm:$0xff] %vm228_vm1, %v6019_v3  ;;  %v5838_v0 = vpop.xlane.xlu0 %5837 }
 0x4a1   : > { %v5847_v33 = vpop.xlane.xlu1 %5846  ;;  %v6018_v10 = vadd.f32 %v5838_v0, %v5378_v25 }
 0x4a2   : > { %v6021_v58 = vadd.f32 %v5847_v33, %v5381_v30  ;;  %v6338_v42 = vld [vmem:[#allocation2 + $0x488] sm:$0xff] }
 0x4a3   : > { %v6341_v12 = vld [vmem:[#allocation2 + $0x4a0] sm:$0xff]  ;;  %6498 = vst.msk [vmem:[%s11904_s19 + $0x488] sm:$0xff] %vm228_vm1, %v6338_v42  ;;  %6179 = vst.msk [vmem:[#allocation2 + $0x4a8] sm:$0xff] %vm228_vm1, %v6018_v10 }
 0x4a4   : > { %6501 = vst.msk [vmem:[%s11904_s19 + $0x4a0] sm:$0xff] %vm228_vm1, %v6341_v12  ;;  %6182 = vst.msk [vmem:[#allocation2 + $0x4c0] sm:$0xff] %vm228_vm1, %v6021_v58  ;;  %v5844_v27 = vpop.xlane.xlu0 %5843 }
 0x4a5   : > { %v5853_v23 = vpop.xlane.xlu1 %5852  ;;  %v6020_v34 = vadd.f32 %v5844_v27, %v5380_v28 }
 0x4a6   : > { %v6023_v54 = vadd.f32 %v5853_v23, %v5383_v44  ;;  %v6340_v49 = vld [vmem:[#allocation2 + $0x498] sm:$0xff] }
 0x4a7   : > { %v6343_v19 = vld [vmem:[#allocation2 + $0x4b0] sm:$0xff]  ;;  %6500 = vst.msk [vmem:[%s11904_s19 + $0x498] sm:$0xff] %vm228_vm1, %v6340_v49  ;;  %6181 = vst.msk [vmem:[#allocation2 + $0x4b8] sm:$0xff] %vm228_vm1, %v6020_v34 }
 0x4a8   : > { %6503 = vst.msk [vmem:[%s11904_s19 + $0x4b0] sm:$0xff] %vm228_vm1, %v6343_v19  ;;  %6184 = vst.msk [vmem:[#allocation2 + $0x4d0] sm:$0xff] %vm228_vm1, %v6023_v54  ;;  %v5850_v36 = vpop.xlane.xlu0 %5849 }
 0x4a9   : > { %v5859_v6 = vpop.xlane.xlu1 %5858  ;;  %v6022_v15 = vadd.f32 %v5850_v36, %v5382_v45 }
 0x4aa   : > { %v6025_v8 = vadd.f32 %v5859_v6, %v5385_v63  ;;  %v6342_v21 = vld [vmem:[#allocation2 + $0x4a8] sm:$0xff] }
 0x4ab   : > { %v6345_v7 = vld [vmem:[#allocation2 + $0x4c0] sm:$0xff]  ;;  %6502 = vst.msk [vmem:[%s11904_s19 + $0x4a8] sm:$0xff] %vm228_vm1, %v6342_v21  ;;  %6183 = vst.msk [vmem:[#allocation2 + $0x4c8] sm:$0xff] %vm228_vm1, %v6022_v15 }
 0x4ac   : > { %6505 = vst.msk [vmem:[%s11904_s19 + $0x4c0] sm:$0xff] %vm228_vm1, %v6345_v7  ;;  %6186 = vst.msk [vmem:[#allocation2 + $0x4e0] sm:$0xff] %vm228_vm1, %v6025_v8  ;;  %v5856_v5 = vpop.xlane.xlu0 %5855 }
 0x4ad   : > { %v5865_v39 = vpop.xlane.xlu1 %5864  ;;  %v6024_v26 = vadd.f32 %v5856_v5, %v5384_v16 }
 0x4ae   : > { %v6027_v18 = vadd.f32 %v5865_v39, %v5387_v40  ;;  %v6344_v61 = vld [vmem:[#allocation2 + $0x4b8] sm:$0xff] }
 0x4af   : > { %v6347_v59 = vld [vmem:[#allocation2 + $0x4d0] sm:$0xff]  ;;  %6504 = vst.msk [vmem:[%s11904_s19 + $0x4b8] sm:$0xff] %vm228_vm1, %v6344_v61  ;;  %6185 = vst.msk [vmem:[#allocation2 + $0x4d8] sm:$0xff] %vm228_vm1, %v6024_v26 }
 0x4b0   : > { %6507 = vst.msk [vmem:[%s11904_s19 + $0x4d0] sm:$0xff] %vm228_vm1, %v6347_v59  ;;  %6188 = vst.msk [vmem:[#allocation2 + $0x4f0] sm:$0xff] %vm228_vm1, %v6027_v18  ;;  %v5862_v9 = vpop.xlane.xlu0 %5861 }
 0x4b1   : > { %v6026_v55 = vadd.f32 %v5862_v9, %v5386_v29 }
 0x4b2   : > { %v6346_v13 = vld [vmem:[#allocation2 + $0x4c8] sm:$0xff] }
 0x4b3   : > { %v6349_v11 = vld [vmem:[#allocation2 + $0x4e0] sm:$0xff]  ;;  %6506 = vst.msk [vmem:[%s11904_s19 + $0x4c8] sm:$0xff] %vm228_vm1, %v6346_v13  ;;  %6187 = vst.msk [vmem:[#allocation2 + $0x4e8] sm:$0xff] %vm228_vm1, %v6026_v55 }
 0x4b4   : > { %6509 = vst.msk [vmem:[%s11904_s19 + $0x4e0] sm:$0xff] %vm228_vm1, %v6349_v11  ;;  %v5868_v51 = vpop.xlane.xlu0 %5867 }
 0x4b5   : > { %v6028_v43 = vadd.f32 %v5868_v51, %v5388_v2 }
 0x4b6   : > { %v6348_v37 = vld [vmem:[#allocation2 + $0x4d8] sm:$0xff] }
 0x4b7   : > { %v6351_v14 = vld [vmem:[#allocation2 + $0x4f0] sm:$0xff]  ;;  %6508 = vst.msk [vmem:[%s11904_s19 + $0x4d8] sm:$0xff] %vm228_vm1, %v6348_v37  ;;  %6189 = vst.msk [vmem:[#allocation2 + $0x4f8] sm:$0xff] %vm228_vm1, %v6028_v43 }
 0x4b8   : > { %6511 = vst.msk [vmem:[%s11904_s19 + $0x4f0] sm:$0xff] %vm228_vm1, %v6351_v14 }
 0x4ba   : > { %v6350_v24 = vld [vmem:[#allocation2 + $0x4e8] sm:$0xff] }
 0x4bb   : > { %6510 = vst.msk [vmem:[%s11904_s19 + $0x4e8] sm:$0xff] %vm228_vm1, %v6350_v24 }
 0x4be   : > { %v6352_v60 = vld [vmem:[#allocation2 + $0x4f8] sm:$0xff] }
 0x4bf   : > { %6512 = vst.msk [vmem:[%s11904_s19 + $0x4f8] sm:$0xff] %vm228_vm1, %v6352_v60 }
 0x4c0 PF: > { %s13_s14 = sadd.s32 1, %s8509_s14   ;;  %s14353_s12 = smov %s8505_s13 }
 0x4c1   : > { %p10_p5 = scmp.ge.s32.totalorder %s13_s14, 4   ;;  %s14354_s13 = smov %s14356_s15 }
 0x4c3   :  { %12 = sbr.rel (!%p10_p5) target bundleno = 2 (0x2), region = 70 }

</bundles_post_ra>
